<compile_context>
chip_gen: v5e
topology: v5e:2x2
jax: 0.10.0
libtpu: 0.0.40
codegen_flags: <defaults>
</compile_context>

<pallas_src>
import functools
import math

import jax
import jax.numpy as jnp
from jax import lax
from jax.experimental import pallas as pl
from jax.experimental.pallas import tpu as pltpu


# ----------------------------------------------------------------------------
# Shared helper (works on in-kernel values and plain jnp arrays)
# ----------------------------------------------------------------------------
def _layernorm(x, gamma, beta, eps=1e-5):
    mean = jnp.mean(x, axis=-1, keepdims=True)
    xc = x - mean
    var = jnp.mean(xc * xc, axis=-1, keepdims=True)
    return xc * lax.rsqrt(var + eps) * gamma + beta


# ----------------------------------------------------------------------------
# Fused Pallas kernel: embedding + n_layer post-norm transformer layers
# ----------------------------------------------------------------------------
def _time_encoder_kernel(num_cls, nhead, n_layer,
                         data_ref, wproj_ref, bproj_ref, clspos_ref, posbot_ref,
                         wqkv_ref, bqkv_ref, wo_ref, bo_ref,
                         g1_ref, be1_ref, w1_ref, b1_ref, w2_ref, b2_ref,
                         g2_ref, be2_ref, out_ref):
    NB, S, seg = data_ref.shape
    _, T, D = out_ref.shape
    dh = D // nhead
    M = NB * T
    f32 = jnp.float32

    # ---- input embedding: one (NB*S, seg) @ (seg, D) matmul for the whole block ----
    proj = jnp.dot(data_ref[...].reshape(NB * S, seg), wproj_ref[...],
                   preferred_element_type=f32) + bproj_ref[...]
    cls_rows = jnp.broadcast_to(clspos_ref[...][None], (NB, num_cls, D))
    emb_rows = proj.reshape(NB, S, D) + posbot_ref[...][None]
    # Build the token slab in registers; single store to out_ref at the end.
    x = jnp.concatenate([cls_rows, emb_rows], axis=1).reshape(M, D)

    for l in range(n_layer):                # static unroll over layers
        # Fused QKV projection: one (M, D) @ (D, 3D) matmul.  1/sqrt(dh) already folded
        # into the Q columns of wqkv / bqkv.
        qkv = jnp.dot(x, wqkv_ref[l], preferred_element_type=f32) + bqkv_ref[l]
        qkv3 = qkv.reshape(NB, T, 3 * D)

        heads = []
        for h in range(nhead):              # static unroll; each einsum batched over NB
            qh = qkv3[:, :, h * dh:(h + 1) * dh]
            kh = qkv3[:, :, D + h * dh:D + (h + 1) * dh]
            vh = qkv3[:, :, 2 * D + h * dh:2 * D + (h + 1) * dh]
            s = jnp.einsum('bqd,bkd->bqk', qh, kh, preferred_element_type=f32)
            s = s - jnp.max(s, axis=-1, keepdims=True)
            p = jnp.exp(s)
            p = p * pl.reciprocal(jnp.sum(p, axis=-1, keepdims=True), approx=True)
            heads.append(jnp.einsum('bqk,bkd->bqd', p, vh, preferred_element_type=f32))
        attn = jnp.concatenate(heads, axis=-1).reshape(M, D)
        attn = jnp.dot(attn, wo_ref[l], preferred_element_type=f32) + bo_ref[l]

        # residual + LayerNorm1, FFN (Linear -> ReLU -> Linear), residual + LayerNorm2
        y = _layernorm(x + attn, g1_ref[l], be1_ref[l])
        h1 = jnp.maximum(
            jnp.dot(y, w1_ref[l], preferred_element_type=f32) + b1_ref[l], 0.0)
        ff = jnp.dot(h1, w2_ref[l], preferred_element_type=f32) + b2_ref[l]
        x = _layernorm(y + ff, g2_ref[l], be2_ref[l])

    out_ref[...] = x.reshape(NB, T, D)


# ----------------------------------------------------------------------------
# Wrappers (plain-JAX glue + pallas_call)
# ----------------------------------------------------------------------------
def sinusoidal_pos_enc(t_len, dim):
    """Matches the module's RotaryPositionalEncoding (additive sin|cos)."""
    inv_freq = 1.0 / (10000.0 ** (jnp.arange(0, dim, 2, dtype=jnp.float32) / dim))
    t = jnp.arange(t_len, dtype=jnp.float32)
    freqs = jnp.einsum("i,j->ij", t, inv_freq)
    return jnp.concatenate([jnp.sin(freqs), jnp.cos(freqs)], axis=-1)      # (T, dim)


def _full_spec(arr):
    shape = arr.shape
    return pl.BlockSpec(shape, lambda i, _n=len(shape): (0,) * _n)


@functools.partial(jax.jit, static_argnames=("num_cls", "nhead"))
def time_encoder_forward(params, data, *, num_cls, nhead):
    B, S, seg, C = data.shape
    N = B * C
    x = data.reshape(N, S, seg)   # same reinterpretation as torch .view on contiguous data
    D = params["w_proj"].shape[1]
    T = S + num_cls

    pos = sinusoidal_pos_enc(T, D)
    clspos = params["cls"] + pos[:num_cls]     # input-independent; hoisted out of kernel
    posbot = pos[num_cls:]

    layers = params["layers"]
    L = len(layers)
    dh = D // nhead
    scale = 1.0 / math.sqrt(dh)

    def stack(name):
        return jnp.stack([lp[name] for lp in layers])

    # Fused QKV weights with the attention scale folded into the Q projection.
    wqkv = jnp.stack([jnp.concatenate([lp["wq"] * scale, lp["wk"], lp["wv"]], axis=1)
                      for lp in layers])       # (L, D, 3D)
    bqkv = jnp.stack([jnp.concatenate([lp["bq"] * scale, lp["bk"], lp["bv"]], axis=1)
                      for lp in layers])       # (L, 1, 3D)

    args = [x, params["w_proj"], params["b_proj"], clspos, posbot,
            wqkv, bqkv, stack("wo"), stack("bo"),
            stack("g1"), stack("be1"), stack("w1"), stack("b1"),
            stack("w2"), stack("b2"), stack("g2"), stack("be2")]

    # 2-way 'parallel' grid: both TensorCores busy on v7x; harmless on v5e/v6e.
    G = 2 if N % 2 == 0 else 1
    NB = N // G

    kernel = functools.partial(_time_encoder_kernel, num_cls, nhead, L)
    in_specs = [pl.BlockSpec((NB, S, seg), lambda i: (i, 0, 0))]
    in_specs += [_full_spec(a) for a in args[1:]]

    out = pl.pallas_call(
        kernel,
        out_shape=jax.ShapeDtypeStruct((N, T, D), jnp.float32),
        grid=(G,),
        in_specs=in_specs,
        out_specs=pl.BlockSpec((NB, T, D), lambda i: (i, 0, 0)),
        compiler_params=pltpu.CompilerParams(dimension_semantics=("parallel",)),
    )(*args)

    # split cls-token outputs vs sequence outputs (same as torch slicing)
    return out[:, :num_cls, :], out[:, num_cls:, :]


# ----------------------------------------------------------------------------
# Pure-JAX reference (mirrors the torch module; used for a loose sanity check)
# ----------------------------------------------------------------------------
def reference_forward(params, data, *, num_cls, nhead):
    B, S, seg, C = data.shape
    N = B * C
    x = data.reshape(N, S, seg)
    D = params["w_proj"].shape[1]
    T = S + num_cls
    dh = D // nhead

    emb = x @ params["w_proj"] + params["b_proj"]                 # (N, S, D)
    cls = jnp.broadcast_to(params["cls"][None], (N, num_cls, D))
    h = jnp.concatenate([cls, emb], axis=1) + sinusoidal_pos_enc(T, D)[None]

    for lp in params["layers"]:
        q = h @ lp["wq"] + lp["bq"]
        k = h @ lp["wk"] + lp["bk"]
        v = h @ lp["wv"] + lp["bv"]

        def split(z):
            return z.reshape(N, T, nhead, dh).transpose(0, 2, 1, 3)

        qh, kh, vh = split(q), split(k), split(v)
        s = jnp.einsum('bhqd,bhkd->bhqk', qh, kh) / math.sqrt(dh)
        p = jax.nn.softmax(s, axis=-1)
        a = jnp.einsum('bhqk,bhkd->bhqd', p, vh).transpose(0, 2, 1, 3).reshape(N, T, D)
        a = a @ lp["wo"] + lp["bo"]
        h = _layernorm(h + a, lp["g1"], lp["be1"])
        f = jnp.maximum(h @ lp["w1"] + lp["b1"], 0.0) @ lp["w2"] + lp["b2"]
        h = _layernorm(h + f, lp["g2"], lp["be2"])

    return h[:, :num_cls, :], h[:, num_cls:, :]


# ----------------------------------------------------------------------------
# Deterministic parameter init (shapes from the module __init__)
# ----------------------------------------------------------------------------
def init_params(key, in_dim, d_model, dim_ff, n_layer, num_cls):
    keys = jax.random.split(key, 2 + n_layer)

    def nrm(k, shape, std):
        return jax.random.normal(k, shape, jnp.float32) * std

    # proj: Linear(in_dim -> d_model), kaiming fan_out/relu style std; stored as (in, out)
    w_proj = nrm(keys[0], (in_dim, d_model), math.sqrt(2.0 / d_model))
    b_proj = jnp.zeros((1, d_model), jnp.float32)
    cls = jax.random.normal(keys[1], (num_cls, d_model), jnp.float32)  # cls_tokens (nc,1,D) squeezed

    layers = []
    for l in range(n_layer):
        lk = jax.random.split(keys[2 + l], 6)
        D, FF = d_model, dim_ff
        layers.append(dict(
            wq=nrm(lk[0], (D, D), 1.0 / math.sqrt(D)),
            wk=nrm(lk[1], (D, D), 1.0 / math.sqrt(D)),
            wv=nrm(lk[2], (D, D), 1.0 / math.sqrt(D)),
            bq=jnp.zeros((1, D), jnp.float32),
            bk=jnp.zeros((1, D), jnp.float32),
            bv=jnp.zeros((1, D), jnp.float32),
            wo=nrm(lk[3], (D, D), math.sqrt(2.0 / D)),
            bo=jnp.zeros((1, D), jnp.float32),
            g1=jnp.ones((1, D), jnp.float32),
            be1=jnp.zeros((1, D), jnp.float32),
            w1=nrm(lk[4], (D, FF), math.sqrt(2.0 / FF)),
            b1=jnp.zeros((1, FF), jnp.float32),
            w2=nrm(lk[5], (FF, D), math.sqrt(2.0 / D)),
            b2=jnp.zeros((1, D), jnp.float32),
            g2=jnp.ones((1, D), jnp.float32),
            be2=jnp.zeros((1, D), jnp.float32),
        ))
    return dict(w_proj=w_proj, b_proj=b_proj, cls=cls, layers=layers)


# ----------------------------------------------------------------------------
# Main
# ----------------------------------------------------------------------------
if __name__ == "__main__":
    # Module hyper-params (small, consistent with the forward pass):
    B, S, seg_len, C = 2, 8, 16, 4          # data: (batch, seq_len, seg_len, ch_num)
    in_dim = seg_len                        # proj = Linear(in_dim=seg_len -> d_model)
    d_model, dim_ff, n_layer, nhead, num_cls = 32, 64, 2, 4, 1

    key = jax.random.PRNGKey(0)
    pkey, dkey = jax.random.split(key)
    params = init_params(pkey, in_dim, d_model, dim_ff, n_layer, num_cls)
    data = jax.random.normal(dkey, (B, S, seg_len, C), jnp.float32)

    cls_out, seq_out = time_encoder_forward(params, data, num_cls=num_cls, nhead=nhead)
    cls_out, seq_out = jax.block_until_ready((cls_out, seq_out))

    assert cls_out.shape == (B * C, num_cls, d_model), cls_out.shape
    assert seq_out.shape == (B * C, S, d_model), seq_out.shape
    assert bool(jnp.all(jnp.isfinite(cls_out))) and bool(jnp.all(jnp.isfinite(seq_out)))

    # Loose numerical sanity check against a pure-JAX reference (catches structural
    # bugs; tolerance is generous for MXU precision + approx reciprocal differences).
    ref_cls, ref_seq = reference_forward(params, data, num_cls=num_cls, nhead=nhead)
    max_diff = float(jnp.maximum(jnp.max(jnp.abs(cls_out - ref_cls)),
                                 jnp.max(jnp.abs(seq_out - ref_seq))))
    assert max_diff < 1e-1, f"kernel vs reference max abs diff = {max_diff}"

    print("KERNEL_OK")
</pallas_src>

<mosaic_0001>
module attributes {stable_mosaic.version = 11 : i64} {
  func.func @_time_encoder_kernel(%arg0: i32, %arg1: memref<4x8x16xf32, #tpu.memory_space<vmem>>, %arg2: memref<16x32xf32, #tpu.memory_space<vmem>>, %arg3: memref<1x32xf32, #tpu.memory_space<vmem>>, %arg4: memref<1x32xf32, #tpu.memory_space<vmem>>, %arg5: memref<8x32xf32, #tpu.memory_space<vmem>>, %arg6: memref<2x32x96xf32, #tpu.memory_space<vmem>>, %arg7: memref<2x1x96xf32, #tpu.memory_space<vmem>>, %arg8: memref<2x32x32xf32, #tpu.memory_space<vmem>>, %arg9: memref<2x1x32xf32, #tpu.memory_space<vmem>>, %arg10: memref<2x1x32xf32, #tpu.memory_space<vmem>>, %arg11: memref<2x1x32xf32, #tpu.memory_space<vmem>>, %arg12: memref<2x32x64xf32, #tpu.memory_space<vmem>>, %arg13: memref<2x1x64xf32, #tpu.memory_space<vmem>>, %arg14: memref<2x64x32xf32, #tpu.memory_space<vmem>>, %arg15: memref<2x1x32xf32, #tpu.memory_space<vmem>>, %arg16: memref<2x1x32xf32, #tpu.memory_space<vmem>>, %arg17: memref<2x1x32xf32, #tpu.memory_space<vmem>>, %arg18: memref<4x9x32xf32, #tpu.memory_space<vmem>>) attributes {dimension_semantics = [#tpu.dimension_semantics<parallel>], iteration_bounds = array<i64: 2>, scalar_prefetch = 0 : i64, scratch_operands = 0 : i64, tpu.core_type = #tpu.core_type<tc>, window_params = [{transform_indices = @transform_0, window_bounds = array<i64: 4, 8, 16>}, {pipeline_mode = #tpu.pipeline_mode<synchronous>, transform_indices = @transform_1, window_bounds = array<i64: 16, 32>}, {pipeline_mode = #tpu.pipeline_mode<synchronous>, transform_indices = @transform_2, window_bounds = array<i64: 1, 32>}, {pipeline_mode = #tpu.pipeline_mode<synchronous>, transform_indices = @transform_3, window_bounds = array<i64: 1, 32>}, {pipeline_mode = #tpu.pipeline_mode<synchronous>, transform_indices = @transform_4, window_bounds = array<i64: 8, 32>}, {pipeline_mode = #tpu.pipeline_mode<synchronous>, transform_indices = @transform_5, window_bounds = array<i64: 2, 32, 96>}, {pipeline_mode = #tpu.pipeline_mode<synchronous>, transform_indices = @transform_6, window_bounds = array<i64: 2, 1, 96>}, {pipeline_mode = #tpu.pipeline_mode<synchronous>, transform_indices = @transform_7, window_bounds = array<i64: 2, 32, 32>}, {pipeline_mode = #tpu.pipeline_mode<synchronous>, transform_indices = @transform_8, window_bounds = array<i64: 2, 1, 32>}, {pipeline_mode = #tpu.pipeline_mode<synchronous>, transform_indices = @transform_9, window_bounds = array<i64: 2, 1, 32>}, {pipeline_mode = #tpu.pipeline_mode<synchronous>, transform_indices = @transform_10, window_bounds = array<i64: 2, 1, 32>}, {pipeline_mode = #tpu.pipeline_mode<synchronous>, transform_indices = @transform_11, window_bounds = array<i64: 2, 32, 64>}, {pipeline_mode = #tpu.pipeline_mode<synchronous>, transform_indices = @transform_12, window_bounds = array<i64: 2, 1, 64>}, {pipeline_mode = #tpu.pipeline_mode<synchronous>, transform_indices = @transform_13, window_bounds = array<i64: 2, 64, 32>}, {pipeline_mode = #tpu.pipeline_mode<synchronous>, transform_indices = @transform_14, window_bounds = array<i64: 2, 1, 32>}, {pipeline_mode = #tpu.pipeline_mode<synchronous>, transform_indices = @transform_15, window_bounds = array<i64: 2, 1, 32>}, {pipeline_mode = #tpu.pipeline_mode<synchronous>, transform_indices = @transform_16, window_bounds = array<i64: 2, 1, 32>}, {transform_indices = @transform_17, window_bounds = array<i64: 4, 9, 32>}]} {
    %c0 = arith.constant 0 : index
    %c0_0 = arith.constant 0 : index
    %c0_1 = arith.constant 0 : index
    %0 = vector.load %arg1[%c0, %c0_0, %c0_1] : memref<4x8x16xf32, #tpu.memory_space<vmem>>, vector<4x8x16xf32>
    %1 = vector.shape_cast %0 : vector<4x8x16xf32> to vector<32x16xf32>
    %c0_2 = arith.constant 0 : index
    %c0_3 = arith.constant 0 : index
    %2 = vector.load %arg2[%c0_2, %c0_3] : memref<16x32xf32, #tpu.memory_space<vmem>>, vector<16x32xf32>
    %cst = arith.constant dense<0.000000e+00> : vector<32x32xf32>
    %3 = tpu.matmul %1, %2, %cst {dimension_numbers = #tpu.dot_dimension_numbers<[1], [0], [0], [1], [0, 0, 1, 1], [], []>} : vector<32x16xf32>, vector<16x32xf32>, vector<32x32xf32> -> vector<32x32xf32>
    %c0_4 = arith.constant 0 : index
    %c0_5 = arith.constant 0 : index
    %4 = vector.load %arg3[%c0_4, %c0_5] : memref<1x32xf32, #tpu.memory_space<vmem>>, vector<1x32xf32>
    %5 = vector.broadcast %4 : vector<1x32xf32> to vector<32x32xf32>
    %6 = arith.addf %3, %5 : vector<32x32xf32>
    %c0_6 = arith.constant 0 : index
    %c0_7 = arith.constant 0 : index
    %7 = vector.load %arg4[%c0_6, %c0_7] : memref<1x32xf32, #tpu.memory_space<vmem>>, vector<1x32xf32>
    %8 = vector.shape_cast %7 : vector<1x32xf32> to vector<1x1x32xf32>
    %9 = vector.shape_cast %8 : vector<1x1x32xf32> to vector<1x1x32xf32>
    %10 = vector.broadcast %9 : vector<1x1x32xf32> to vector<4x1x32xf32>
    %11 = vector.shape_cast %6 : vector<32x32xf32> to vector<4x8x32xf32>
    %c0_8 = arith.constant 0 : index
    %c0_9 = arith.constant 0 : index
    %12 = vector.load %arg5[%c0_8, %c0_9] : memref<8x32xf32, #tpu.memory_space<vmem>>, vector<8x32xf32>
    %13 = vector.shape_cast %12 : vector<8x32xf32> to vector<1x8x32xf32>
    %14 = vector.broadcast %13 : vector<1x8x32xf32> to vector<4x8x32xf32>
    %15 = arith.addf %11, %14 : vector<4x8x32xf32>
    %16 = tpu.concatenate %10, %15 in 1 : vector<4x1x32xf32>, vector<4x8x32xf32> -> vector<4x9x32xf32>
    %17 = vector.shape_cast %16 : vector<4x9x32xf32> to vector<36x32xf32>
    %c0_10 = arith.constant 0 : index
    %c0_11 = arith.constant 0 : index
    %c0_12 = arith.constant 0 : index
    %18 = vector.load %arg6[%c0_10, %c0_11, %c0_12] : memref<2x32x96xf32, #tpu.memory_space<vmem>>, vector<1x32x96xf32>
    %19 = vector.shape_cast %18 : vector<1x32x96xf32> to vector<32x96xf32>
    %cst_13 = arith.constant dense<0.000000e+00> : vector<36x96xf32>
    %20 = tpu.matmul %17, %19, %cst_13 {dimension_numbers = #tpu.dot_dimension_numbers<[1], [0], [0], [1], [0, 0, 1, 1], [], []>} : vector<36x32xf32>, vector<32x96xf32>, vector<36x96xf32> -> vector<36x96xf32>
    %c0_14 = arith.constant 0 : index
    %c0_15 = arith.constant 0 : index
    %c0_16 = arith.constant 0 : index
    %21 = vector.load %arg7[%c0_14, %c0_15, %c0_16] : memref<2x1x96xf32, #tpu.memory_space<vmem>>, vector<1x1x96xf32>
    %22 = vector.shape_cast %21 : vector<1x1x96xf32> to vector<1x96xf32>
    %23 = vector.broadcast %22 : vector<1x96xf32> to vector<36x96xf32>
    %24 = arith.addf %20, %23 : vector<36x96xf32>
    %25 = vector.shape_cast %24 : vector<36x96xf32> to vector<4x9x96xf32>
    %26 = vector.extract_strided_slice %25 {offsets = [0, 0, 0], sizes = [4, 9, 8], strides = [1, 1, 1]} : vector<4x9x96xf32> to vector<4x9x8xf32>
    %27 = vector.extract_strided_slice %25 {offsets = [0, 0, 32], sizes = [4, 9, 8], strides = [1, 1, 1]} : vector<4x9x96xf32> to vector<4x9x8xf32>
    %28 = vector.extract_strided_slice %25 {offsets = [0, 0, 64], sizes = [4, 9, 8], strides = [1, 1, 1]} : vector<4x9x96xf32> to vector<4x9x8xf32>
    "tpu.trace_start"() <{level = 10 : i32, message = "bqd,bkd->bqk"}> : () -> ()
    %cst_17 = arith.constant dense<0.000000e+00> : vector<4x9x9xf32>
    %29 = tpu.matmul %26, %27, %cst_17 {dimension_numbers = #tpu.dot_dimension_numbers<[2], [2], [1], [1], [0, 0, 0, 1, 1, 1], [0], [0]>} : vector<4x9x8xf32>, vector<4x9x8xf32>, vector<4x9x9xf32> -> vector<4x9x9xf32>
    "tpu.trace_stop"() : () -> ()
    %cst_18 = arith.constant dense<0xFF800000> : vector<4x9xf32>
    %30 = vector.multi_reduction <maximumf>, %29, %cst_18 [2] : vector<4x9x9xf32> to vector<4x9xf32>
    %31 = vector.shape_cast %30 : vector<4x9xf32> to vector<4x9x1xf32>
    %32 = vector.broadcast %31 : vector<4x9x1xf32> to vector<4x9x9xf32>
    %33 = arith.subf %29, %32 : vector<4x9x9xf32>
    %34 = math.exp %33 : vector<4x9x9xf32>
    %cst_19 = arith.constant dense<0.000000e+00> : vector<4x9xf32>
    %35 = vector.multi_reduction <add>, %34, %cst_19 [2] : vector<4x9x9xf32> to vector<4x9xf32>
    %36 = vector.shape_cast %35 : vector<4x9xf32> to vector<4x9x1xf32>
    %37 = tpu.reciprocal %36 {approx = true} : vector<4x9x1xf32> -> vector<4x9x1xf32>
    %38 = vector.broadcast %37 : vector<4x9x1xf32> to vector<4x9x9xf32>
    %39 = arith.mulf %34, %38 : vector<4x9x9xf32>
    "tpu.trace_start"() <{level = 10 : i32, message = "bqk,bkd->bqd"}> : () -> ()
    %cst_20 = arith.constant dense<0.000000e+00> : vector<4x9x8xf32>
    %40 = tpu.matmul %39, %28, %cst_20 {dimension_numbers = #tpu.dot_dimension_numbers<[2], [1], [1], [2], [0, 0, 0, 1, 1, 2], [0], [0]>} : vector<4x9x9xf32>, vector<4x9x8xf32>, vector<4x9x8xf32> -> vector<4x9x8xf32>
    "tpu.trace_stop"() : () -> ()
    %41 = vector.extract_strided_slice %25 {offsets = [0, 0, 8], sizes = [4, 9, 8], strides = [1, 1, 1]} : vector<4x9x96xf32> to vector<4x9x8xf32>
    %42 = vector.extract_strided_slice %25 {offsets = [0, 0, 40], sizes = [4, 9, 8], strides = [1, 1, 1]} : vector<4x9x96xf32> to vector<4x9x8xf32>
    %43 = vector.extract_strided_slice %25 {offsets = [0, 0, 72], sizes = [4, 9, 8], strides = [1, 1, 1]} : vector<4x9x96xf32> to vector<4x9x8xf32>
    "tpu.trace_start"() <{level = 10 : i32, message = "bqd,bkd->bqk"}> : () -> ()
    %cst_21 = arith.constant dense<0.000000e+00> : vector<4x9x9xf32>
    %44 = tpu.matmul %41, %42, %cst_21 {dimension_numbers = #tpu.dot_dimension_numbers<[2], [2], [1], [1], [0, 0, 0, 1, 1, 1], [0], [0]>} : vector<4x9x8xf32>, vector<4x9x8xf32>, vector<4x9x9xf32> -> vector<4x9x9xf32>
    "tpu.trace_stop"() : () -> ()
    %cst_22 = arith.constant dense<0xFF800000> : vector<4x9xf32>
    %45 = vector.multi_reduction <maximumf>, %44, %cst_22 [2] : vector<4x9x9xf32> to vector<4x9xf32>
    %46 = vector.shape_cast %45 : vector<4x9xf32> to vector<4x9x1xf32>
    %47 = vector.broadcast %46 : vector<4x9x1xf32> to vector<4x9x9xf32>
    %48 = arith.subf %44, %47 : vector<4x9x9xf32>
    %49 = math.exp %48 : vector<4x9x9xf32>
    %cst_23 = arith.constant dense<0.000000e+00> : vector<4x9xf32>
    %50 = vector.multi_reduction <add>, %49, %cst_23 [2] : vector<4x9x9xf32> to vector<4x9xf32>
    %51 = vector.shape_cast %50 : vector<4x9xf32> to vector<4x9x1xf32>
    %52 = tpu.reciprocal %51 {approx = true} : vector<4x9x1xf32> -> vector<4x9x1xf32>
    %53 = vector.broadcast %52 : vector<4x9x1xf32> to vector<4x9x9xf32>
    %54 = arith.mulf %49, %53 : vector<4x9x9xf32>
    "tpu.trace_start"() <{level = 10 : i32, message = "bqk,bkd->bqd"}> : () -> ()
    %cst_24 = arith.constant dense<0.000000e+00> : vector<4x9x8xf32>
    %55 = tpu.matmul %54, %43, %cst_24 {dimension_numbers = #tpu.dot_dimension_numbers<[2], [1], [1], [2], [0, 0, 0, 1, 1, 2], [0], [0]>} : vector<4x9x9xf32>, vector<4x9x8xf32>, vector<4x9x8xf32> -> vector<4x9x8xf32>
    "tpu.trace_stop"() : () -> ()
    %56 = vector.extract_strided_slice %25 {offsets = [0, 0, 16], sizes = [4, 9, 8], strides = [1, 1, 1]} : vector<4x9x96xf32> to vector<4x9x8xf32>
    %57 = vector.extract_strided_slice %25 {offsets = [0, 0, 48], sizes = [4, 9, 8], strides = [1, 1, 1]} : vector<4x9x96xf32> to vector<4x9x8xf32>
    %58 = vector.extract_strided_slice %25 {offsets = [0, 0, 80], sizes = [4, 9, 8], strides = [1, 1, 1]} : vector<4x9x96xf32> to vector<4x9x8xf32>
    "tpu.trace_start"() <{level = 10 : i32, message = "bqd,bkd->bqk"}> : () -> ()
    %cst_25 = arith.constant dense<0.000000e+00> : vector<4x9x9xf32>
    %59 = tpu.matmul %56, %57, %cst_25 {dimension_numbers = #tpu.dot_dimension_numbers<[2], [2], [1], [1], [0, 0, 0, 1, 1, 1], [0], [0]>} : vector<4x9x8xf32>, vector<4x9x8xf32>, vector<4x9x9xf32> -> vector<4x9x9xf32>
    "tpu.trace_stop"() : () -> ()
    %cst_26 = arith.constant dense<0xFF800000> : vector<4x9xf32>
    %60 = vector.multi_reduction <maximumf>, %59, %cst_26 [2] : vector<4x9x9xf32> to vector<4x9xf32>
    %61 = vector.shape_cast %60 : vector<4x9xf32> to vector<4x9x1xf32>
    %62 = vector.broadcast %61 : vector<4x9x1xf32> to vector<4x9x9xf32>
    %63 = arith.subf %59, %62 : vector<4x9x9xf32>
    %64 = math.exp %63 : vector<4x9x9xf32>
    %cst_27 = arith.constant dense<0.000000e+00> : vector<4x9xf32>
    %65 = vector.multi_reduction <add>, %64, %cst_27 [2] : vector<4x9x9xf32> to vector<4x9xf32>
    %66 = vector.shape_cast %65 : vector<4x9xf32> to vector<4x9x1xf32>
    %67 = tpu.reciprocal %66 {approx = true} : vector<4x9x1xf32> -> vector<4x9x1xf32>
    %68 = vector.broadcast %67 : vector<4x9x1xf32> to vector<4x9x9xf32>
    %69 = arith.mulf %64, %68 : vector<4x9x9xf32>
    "tpu.trace_start"() <{level = 10 : i32, message = "bqk,bkd->bqd"}> : () -> ()
    %cst_28 = arith.constant dense<0.000000e+00> : vector<4x9x8xf32>
    %70 = tpu.matmul %69, %58, %cst_28 {dimension_numbers = #tpu.dot_dimension_numbers<[2], [1], [1], [2], [0, 0, 0, 1, 1, 2], [0], [0]>} : vector<4x9x9xf32>, vector<4x9x8xf32>, vector<4x9x8xf32> -> vector<4x9x8xf32>
    "tpu.trace_stop"() : () -> ()
    %71 = vector.extract_strided_slice %25 {offsets = [0, 0, 24], sizes = [4, 9, 8], strides = [1, 1, 1]} : vector<4x9x96xf32> to vector<4x9x8xf32>
    %72 = vector.extract_strided_slice %25 {offsets = [0, 0, 56], sizes = [4, 9, 8], strides = [1, 1, 1]} : vector<4x9x96xf32> to vector<4x9x8xf32>
    %73 = vector.extract_strided_slice %25 {offsets = [0, 0, 88], sizes = [4, 9, 8], strides = [1, 1, 1]} : vector<4x9x96xf32> to vector<4x9x8xf32>
    "tpu.trace_start"() <{level = 10 : i32, message = "bqd,bkd->bqk"}> : () -> ()
    %cst_29 = arith.constant dense<0.000000e+00> : vector<4x9x9xf32>
    %74 = tpu.matmul %71, %72, %cst_29 {dimension_numbers = #tpu.dot_dimension_numbers<[2], [2], [1], [1], [0, 0, 0, 1, 1, 1], [0], [0]>} : vector<4x9x8xf32>, vector<4x9x8xf32>, vector<4x9x9xf32> -> vector<4x9x9xf32>
    "tpu.trace_stop"() : () -> ()
    %cst_30 = arith.constant dense<0xFF800000> : vector<4x9xf32>
    %75 = vector.multi_reduction <maximumf>, %74, %cst_30 [2] : vector<4x9x9xf32> to vector<4x9xf32>
    %76 = vector.shape_cast %75 : vector<4x9xf32> to vector<4x9x1xf32>
    %77 = vector.broadcast %76 : vector<4x9x1xf32> to vector<4x9x9xf32>
    %78 = arith.subf %74, %77 : vector<4x9x9xf32>
    %79 = math.exp %78 : vector<4x9x9xf32>
    %cst_31 = arith.constant dense<0.000000e+00> : vector<4x9xf32>
    %80 = vector.multi_reduction <add>, %79, %cst_31 [2] : vector<4x9x9xf32> to vector<4x9xf32>
    %81 = vector.shape_cast %80 : vector<4x9xf32> to vector<4x9x1xf32>
    %82 = tpu.reciprocal %81 {approx = true} : vector<4x9x1xf32> -> vector<4x9x1xf32>
    %83 = vector.broadcast %82 : vector<4x9x1xf32> to vector<4x9x9xf32>
    %84 = arith.mulf %79, %83 : vector<4x9x9xf32>
    "tpu.trace_start"() <{level = 10 : i32, message = "bqk,bkd->bqd"}> : () -> ()
    %cst_32 = arith.constant dense<0.000000e+00> : vector<4x9x8xf32>
    %85 = tpu.matmul %84, %73, %cst_32 {dimension_numbers = #tpu.dot_dimension_numbers<[2], [1], [1], [2], [0, 0, 0, 1, 1, 2], [0], [0]>} : vector<4x9x9xf32>, vector<4x9x8xf32>, vector<4x9x8xf32> -> vector<4x9x8xf32>
    "tpu.trace_stop"() : () -> ()
    %86 = tpu.concatenate %40, %55, %70, %85 in 2 : vector<4x9x8xf32>, vector<4x9x8xf32>, vector<4x9x8xf32>, vector<4x9x8xf32> -> vector<4x9x32xf32>
    %87 = vector.shape_cast %86 : vector<4x9x32xf32> to vector<36x32xf32>
    %c0_33 = arith.constant 0 : index
    %c0_34 = arith.constant 0 : index
    %c0_35 = arith.constant 0 : index
    %88 = vector.load %arg8[%c0_33, %c0_34, %c0_35] : memref<2x32x32xf32, #tpu.memory_space<vmem>>, vector<1x32x32xf32>
    %89 = vector.shape_cast %88 : vector<1x32x32xf32> to vector<32x32xf32>
    %cst_36 = arith.constant dense<0.000000e+00> : vector<36x32xf32>
    %90 = tpu.matmul %87, %89, %cst_36 {dimension_numbers = #tpu.dot_dimension_numbers<[1], [0], [0], [1], [0, 0, 1, 1], [], []>} : vector<36x32xf32>, vector<32x32xf32>, vector<36x32xf32> -> vector<36x32xf32>
    %c0_37 = arith.constant 0 : index
    %c0_38 = arith.constant 0 : index
    %c0_39 = arith.constant 0 : index
    %91 = vector.load %arg9[%c0_37, %c0_38, %c0_39] : memref<2x1x32xf32, #tpu.memory_space<vmem>>, vector<1x1x32xf32>
    %92 = vector.shape_cast %91 : vector<1x1x32xf32> to vector<1x32xf32>
    %93 = vector.broadcast %92 : vector<1x32xf32> to vector<36x32xf32>
    %94 = arith.addf %90, %93 : vector<36x32xf32>
    %95 = arith.addf %17, %94 : vector<36x32xf32>
    %c0_40 = arith.constant 0 : index
    %c0_41 = arith.constant 0 : index
    %c0_42 = arith.constant 0 : index
    %96 = vector.load %arg10[%c0_40, %c0_41, %c0_42] : memref<2x1x32xf32, #tpu.memory_space<vmem>>, vector<1x1x32xf32>
    %97 = vector.shape_cast %96 : vector<1x1x32xf32> to vector<1x32xf32>
    %c0_43 = arith.constant 0 : index
    %c0_44 = arith.constant 0 : index
    %c0_45 = arith.constant 0 : index
    %98 = vector.load %arg11[%c0_43, %c0_44, %c0_45] : memref<2x1x32xf32, #tpu.memory_space<vmem>>, vector<1x1x32xf32>
    %99 = vector.shape_cast %98 : vector<1x1x32xf32> to vector<1x32xf32>
    %cst_46 = arith.constant dense<0.000000e+00> : vector<36xf32>
    %100 = vector.multi_reduction <add>, %95, %cst_46 [1] : vector<36x32xf32> to vector<36xf32>
    %101 = vector.shape_cast %100 : vector<36xf32> to vector<36x1xf32>
    %cst_47 = arith.constant 3.200000e+01 : f32
    %102 = vector.broadcast %cst_47 : f32 to vector<36x1xf32>
    %103 = arith.divf %101, %102 : vector<36x1xf32>
    %104 = vector.broadcast %103 : vector<36x1xf32> to vector<36x32xf32>
    %105 = arith.subf %95, %104 : vector<36x32xf32>
    %106 = arith.mulf %105, %105 : vector<36x32xf32>
    %cst_48 = arith.constant dense<0.000000e+00> : vector<36xf32>
    %107 = vector.multi_reduction <add>, %106, %cst_48 [1] : vector<36x32xf32> to vector<36xf32>
    %108 = vector.shape_cast %107 : vector<36xf32> to vector<36x1xf32>
    %cst_49 = arith.constant 3.200000e+01 : f32
    %109 = vector.broadcast %cst_49 : f32 to vector<36x1xf32>
    %110 = arith.divf %108, %109 : vector<36x1xf32>
    %cst_50 = arith.constant 9.99999974E-6 : f32
    %111 = vector.broadcast %cst_50 : f32 to vector<36x1xf32>
    %112 = arith.addf %110, %111 : vector<36x1xf32>
    %113 = math.rsqrt %112 : vector<36x1xf32>
    %114 = vector.broadcast %113 : vector<36x1xf32> to vector<36x32xf32>
    %115 = arith.mulf %105, %114 : vector<36x32xf32>
    %116 = vector.broadcast %97 : vector<1x32xf32> to vector<36x32xf32>
    %117 = arith.mulf %115, %116 : vector<36x32xf32>
    %118 = vector.broadcast %99 : vector<1x32xf32> to vector<36x32xf32>
    %119 = arith.addf %117, %118 : vector<36x32xf32>
    %c0_51 = arith.constant 0 : index
    %c0_52 = arith.constant 0 : index
    %c0_53 = arith.constant 0 : index
    %120 = vector.load %arg12[%c0_51, %c0_52, %c0_53] : memref<2x32x64xf32, #tpu.memory_space<vmem>>, vector<1x32x64xf32>
    %121 = vector.shape_cast %120 : vector<1x32x64xf32> to vector<32x64xf32>
    %cst_54 = arith.constant dense<0.000000e+00> : vector<36x64xf32>
    %122 = tpu.matmul %119, %121, %cst_54 {dimension_numbers = #tpu.dot_dimension_numbers<[1], [0], [0], [1], [0, 0, 1, 1], [], []>} : vector<36x32xf32>, vector<32x64xf32>, vector<36x64xf32> -> vector<36x64xf32>
    %c0_55 = arith.constant 0 : index
    %c0_56 = arith.constant 0 : index
    %c0_57 = arith.constant 0 : index
    %123 = vector.load %arg13[%c0_55, %c0_56, %c0_57] : memref<2x1x64xf32, #tpu.memory_space<vmem>>, vector<1x1x64xf32>
    %124 = vector.shape_cast %123 : vector<1x1x64xf32> to vector<1x64xf32>
    %125 = vector.broadcast %124 : vector<1x64xf32> to vector<36x64xf32>
    %126 = arith.addf %122, %125 : vector<36x64xf32>
    %cst_58 = arith.constant 0.000000e+00 : f32
    %127 = vector.broadcast %cst_58 : f32 to vector<36x64xf32>
    %128 = arith.maximumf %126, %127 : vector<36x64xf32>
    %c0_59 = arith.constant 0 : index
    %c0_60 = arith.constant 0 : index
    %c0_61 = arith.constant 0 : index
    %129 = vector.load %arg14[%c0_59, %c0_60, %c0_61] : memref<2x64x32xf32, #tpu.memory_space<vmem>>, vector<1x64x32xf32>
    %130 = vector.shape_cast %129 : vector<1x64x32xf32> to vector<64x32xf32>
    %cst_62 = arith.constant dense<0.000000e+00> : vector<36x32xf32>
    %131 = tpu.matmul %128, %130, %cst_62 {dimension_numbers = #tpu.dot_dimension_numbers<[1], [0], [0], [1], [0, 0, 1, 1], [], []>} : vector<36x64xf32>, vector<64x32xf32>, vector<36x32xf32> -> vector<36x32xf32>
    %c0_63 = arith.constant 0 : index
    %c0_64 = arith.constant 0 : index
    %c0_65 = arith.constant 0 : index
    %132 = vector.load %arg15[%c0_63, %c0_64, %c0_65] : memref<2x1x32xf32, #tpu.memory_space<vmem>>, vector<1x1x32xf32>
    %133 = vector.shape_cast %132 : vector<1x1x32xf32> to vector<1x32xf32>
    %134 = vector.broadcast %133 : vector<1x32xf32> to vector<36x32xf32>
    %135 = arith.addf %131, %134 : vector<36x32xf32>
    %136 = arith.addf %119, %135 : vector<36x32xf32>
    %c0_66 = arith.constant 0 : index
    %c0_67 = arith.constant 0 : index
    %c0_68 = arith.constant 0 : index
    %137 = vector.load %arg16[%c0_66, %c0_67, %c0_68] : memref<2x1x32xf32, #tpu.memory_space<vmem>>, vector<1x1x32xf32>
    %138 = vector.shape_cast %137 : vector<1x1x32xf32> to vector<1x32xf32>
    %c0_69 = arith.constant 0 : index
    %c0_70 = arith.constant 0 : index
    %c0_71 = arith.constant 0 : index
    %139 = vector.load %arg17[%c0_69, %c0_70, %c0_71] : memref<2x1x32xf32, #tpu.memory_space<vmem>>, vector<1x1x32xf32>
    %140 = vector.shape_cast %139 : vector<1x1x32xf32> to vector<1x32xf32>
    %cst_72 = arith.constant dense<0.000000e+00> : vector<36xf32>
    %141 = vector.multi_reduction <add>, %136, %cst_72 [1] : vector<36x32xf32> to vector<36xf32>
    %142 = vector.shape_cast %141 : vector<36xf32> to vector<36x1xf32>
    %cst_73 = arith.constant 3.200000e+01 : f32
    %143 = vector.broadcast %cst_73 : f32 to vector<36x1xf32>
    %144 = arith.divf %142, %143 : vector<36x1xf32>
    %145 = vector.broadcast %144 : vector<36x1xf32> to vector<36x32xf32>
    %146 = arith.subf %136, %145 : vector<36x32xf32>
    %147 = arith.mulf %146, %146 : vector<36x32xf32>
    %cst_74 = arith.constant dense<0.000000e+00> : vector<36xf32>
    %148 = vector.multi_reduction <add>, %147, %cst_74 [1] : vector<36x32xf32> to vector<36xf32>
    %149 = vector.shape_cast %148 : vector<36xf32> to vector<36x1xf32>
    %cst_75 = arith.constant 3.200000e+01 : f32
    %150 = vector.broadcast %cst_75 : f32 to vector<36x1xf32>
    %151 = arith.divf %149, %150 : vector<36x1xf32>
    %cst_76 = arith.constant 9.99999974E-6 : f32
    %152 = vector.broadcast %cst_76 : f32 to vector<36x1xf32>
    %153 = arith.addf %151, %152 : vector<36x1xf32>
    %154 = math.rsqrt %153 : vector<36x1xf32>
    %155 = vector.broadcast %154 : vector<36x1xf32> to vector<36x32xf32>
    %156 = arith.mulf %146, %155 : vector<36x32xf32>
    %157 = vector.broadcast %138 : vector<1x32xf32> to vector<36x32xf32>
    %158 = arith.mulf %156, %157 : vector<36x32xf32>
    %159 = vector.broadcast %140 : vector<1x32xf32> to vector<36x32xf32>
    %160 = arith.addf %158, %159 : vector<36x32xf32>
    %c1 = arith.constant 1 : index
    %c0_77 = arith.constant 0 : index
    %c0_78 = arith.constant 0 : index
    %161 = vector.load %arg6[%c1, %c0_77, %c0_78] : memref<2x32x96xf32, #tpu.memory_space<vmem>>, vector<1x32x96xf32>
    %162 = vector.shape_cast %161 : vector<1x32x96xf32> to vector<32x96xf32>
    %cst_79 = arith.constant dense<0.000000e+00> : vector<36x96xf32>
    %163 = tpu.matmul %160, %162, %cst_79 {dimension_numbers = #tpu.dot_dimension_numbers<[1], [0], [0], [1], [0, 0, 1, 1], [], []>} : vector<36x32xf32>, vector<32x96xf32>, vector<36x96xf32> -> vector<36x96xf32>
    %c1_80 = arith.constant 1 : index
    %c0_81 = arith.constant 0 : index
    %c0_82 = arith.constant 0 : index
    %164 = vector.load %arg7[%c1_80, %c0_81, %c0_82] : memref<2x1x96xf32, #tpu.memory_space<vmem>>, vector<1x1x96xf32>
    %165 = vector.shape_cast %164 : vector<1x1x96xf32> to vector<1x96xf32>
    %166 = vector.broadcast %165 : vector<1x96xf32> to vector<36x96xf32>
    %167 = arith.addf %163, %166 : vector<36x96xf32>
    %168 = vector.shape_cast %167 : vector<36x96xf32> to vector<4x9x96xf32>
    %169 = vector.extract_strided_slice %168 {offsets = [0, 0, 0], sizes = [4, 9, 8], strides = [1, 1, 1]} : vector<4x9x96xf32> to vector<4x9x8xf32>
    %170 = vector.extract_strided_slice %168 {offsets = [0, 0, 32], sizes = [4, 9, 8], strides = [1, 1, 1]} : vector<4x9x96xf32> to vector<4x9x8xf32>
    %171 = vector.extract_strided_slice %168 {offsets = [0, 0, 64], sizes = [4, 9, 8], strides = [1, 1, 1]} : vector<4x9x96xf32> to vector<4x9x8xf32>
    "tpu.trace_start"() <{level = 10 : i32, message = "bqd,bkd->bqk"}> : () -> ()
    %cst_83 = arith.constant dense<0.000000e+00> : vector<4x9x9xf32>
    %172 = tpu.matmul %169, %170, %cst_83 {dimension_numbers = #tpu.dot_dimension_numbers<[2], [2], [1], [1], [0, 0, 0, 1, 1, 1], [0], [0]>} : vector<4x9x8xf32>, vector<4x9x8xf32>, vector<4x9x9xf32> -> vector<4x9x9xf32>
    "tpu.trace_stop"() : () -> ()
    %cst_84 = arith.constant dense<0xFF800000> : vector<4x9xf32>
    %173 = vector.multi_reduction <maximumf>, %172, %cst_84 [2] : vector<4x9x9xf32> to vector<4x9xf32>
    %174 = vector.shape_cast %173 : vector<4x9xf32> to vector<4x9x1xf32>
    %175 = vector.broadcast %174 : vector<4x9x1xf32> to vector<4x9x9xf32>
    %176 = arith.subf %172, %175 : vector<4x9x9xf32>
    %177 = math.exp %176 : vector<4x9x9xf32>
    %cst_85 = arith.constant dense<0.000000e+00> : vector<4x9xf32>
    %178 = vector.multi_reduction <add>, %177, %cst_85 [2] : vector<4x9x9xf32> to vector<4x9xf32>
    %179 = vector.shape_cast %178 : vector<4x9xf32> to vector<4x9x1xf32>
    %180 = tpu.reciprocal %179 {approx = true} : vector<4x9x1xf32> -> vector<4x9x1xf32>
    %181 = vector.broadcast %180 : vector<4x9x1xf32> to vector<4x9x9xf32>
    %182 = arith.mulf %177, %181 : vector<4x9x9xf32>
    "tpu.trace_start"() <{level = 10 : i32, message = "bqk,bkd->bqd"}> : () -> ()
    %cst_86 = arith.constant dense<0.000000e+00> : vector<4x9x8xf32>
    %183 = tpu.matmul %182, %171, %cst_86 {dimension_numbers = #tpu.dot_dimension_numbers<[2], [1], [1], [2], [0, 0, 0, 1, 1, 2], [0], [0]>} : vector<4x9x9xf32>, vector<4x9x8xf32>, vector<4x9x8xf32> -> vector<4x9x8xf32>
    "tpu.trace_stop"() : () -> ()
    %184 = vector.extract_strided_slice %168 {offsets = [0, 0, 8], sizes = [4, 9, 8], strides = [1, 1, 1]} : vector<4x9x96xf32> to vector<4x9x8xf32>
    %185 = vector.extract_strided_slice %168 {offsets = [0, 0, 40], sizes = [4, 9, 8], strides = [1, 1, 1]} : vector<4x9x96xf32> to vector<4x9x8xf32>
    %186 = vector.extract_strided_slice %168 {offsets = [0, 0, 72], sizes = [4, 9, 8], strides = [1, 1, 1]} : vector<4x9x96xf32> to vector<4x9x8xf32>
    "tpu.trace_start"() <{level = 10 : i32, message = "bqd,bkd->bqk"}> : () -> ()
    %cst_87 = arith.constant dense<0.000000e+00> : vector<4x9x9xf32>
    %187 = tpu.matmul %184, %185, %cst_87 {dimension_numbers = #tpu.dot_dimension_numbers<[2], [2], [1], [1], [0, 0, 0, 1, 1, 1], [0], [0]>} : vector<4x9x8xf32>, vector<4x9x8xf32>, vector<4x9x9xf32> -> vector<4x9x9xf32>
    "tpu.trace_stop"() : () -> ()
    %cst_88 = arith.constant dense<0xFF800000> : vector<4x9xf32>
    %188 = vector.multi_reduction <maximumf>, %187, %cst_88 [2] : vector<4x9x9xf32> to vector<4x9xf32>
    %189 = vector.shape_cast %188 : vector<4x9xf32> to vector<4x9x1xf32>
    %190 = vector.broadcast %189 : vector<4x9x1xf32> to vector<4x9x9xf32>
    %191 = arith.subf %187, %190 : vector<4x9x9xf32>
    %192 = math.exp %191 : vector<4x9x9xf32>
    %cst_89 = arith.constant dense<0.000000e+00> : vector<4x9xf32>
    %193 = vector.multi_reduction <add>, %192, %cst_89 [2] : vector<4x9x9xf32> to vector<4x9xf32>
    %194 = vector.shape_cast %193 : vector<4x9xf32> to vector<4x9x1xf32>
    %195 = tpu.reciprocal %194 {approx = true} : vector<4x9x1xf32> -> vector<4x9x1xf32>
    %196 = vector.broadcast %195 : vector<4x9x1xf32> to vector<4x9x9xf32>
    %197 = arith.mulf %192, %196 : vector<4x9x9xf32>
    "tpu.trace_start"() <{level = 10 : i32, message = "bqk,bkd->bqd"}> : () -> ()
    %cst_90 = arith.constant dense<0.000000e+00> : vector<4x9x8xf32>
    %198 = tpu.matmul %197, %186, %cst_90 {dimension_numbers = #tpu.dot_dimension_numbers<[2], [1], [1], [2], [0, 0, 0, 1, 1, 2], [0], [0]>} : vector<4x9x9xf32>, vector<4x9x8xf32>, vector<4x9x8xf32> -> vector<4x9x8xf32>
    "tpu.trace_stop"() : () -> ()
    %199 = vector.extract_strided_slice %168 {offsets = [0, 0, 16], sizes = [4, 9, 8], strides = [1, 1, 1]} : vector<4x9x96xf32> to vector<4x9x8xf32>
    %200 = vector.extract_strided_slice %168 {offsets = [0, 0, 48], sizes = [4, 9, 8], strides = [1, 1, 1]} : vector<4x9x96xf32> to vector<4x9x8xf32>
    %201 = vector.extract_strided_slice %168 {offsets = [0, 0, 80], sizes = [4, 9, 8], strides = [1, 1, 1]} : vector<4x9x96xf32> to vector<4x9x8xf32>
    "tpu.trace_start"() <{level = 10 : i32, message = "bqd,bkd->bqk"}> : () -> ()
    %cst_91 = arith.constant dense<0.000000e+00> : vector<4x9x9xf32>
    %202 = tpu.matmul %199, %200, %cst_91 {dimension_numbers = #tpu.dot_dimension_numbers<[2], [2], [1], [1], [0, 0, 0, 1, 1, 1], [0], [0]>} : vector<4x9x8xf32>, vector<4x9x8xf32>, vector<4x9x9xf32> -> vector<4x9x9xf32>
    "tpu.trace_stop"() : () -> ()
    %cst_92 = arith.constant dense<0xFF800000> : vector<4x9xf32>
    %203 = vector.multi_reduction <maximumf>, %202, %cst_92 [2] : vector<4x9x9xf32> to vector<4x9xf32>
    %204 = vector.shape_cast %203 : vector<4x9xf32> to vector<4x9x1xf32>
    %205 = vector.broadcast %204 : vector<4x9x1xf32> to vector<4x9x9xf32>
    %206 = arith.subf %202, %205 : vector<4x9x9xf32>
    %207 = math.exp %206 : vector<4x9x9xf32>
    %cst_93 = arith.constant dense<0.000000e+00> : vector<4x9xf32>
    %208 = vector.multi_reduction <add>, %207, %cst_93 [2] : vector<4x9x9xf32> to vector<4x9xf32>
    %209 = vector.shape_cast %208 : vector<4x9xf32> to vector<4x9x1xf32>
    %210 = tpu.reciprocal %209 {approx = true} : vector<4x9x1xf32> -> vector<4x9x1xf32>
    %211 = vector.broadcast %210 : vector<4x9x1xf32> to vector<4x9x9xf32>
    %212 = arith.mulf %207, %211 : vector<4x9x9xf32>
    "tpu.trace_start"() <{level = 10 : i32, message = "bqk,bkd->bqd"}> : () -> ()
    %cst_94 = arith.constant dense<0.000000e+00> : vector<4x9x8xf32>
    %213 = tpu.matmul %212, %201, %cst_94 {dimension_numbers = #tpu.dot_dimension_numbers<[2], [1], [1], [2], [0, 0, 0, 1, 1, 2], [0], [0]>} : vector<4x9x9xf32>, vector<4x9x8xf32>, vector<4x9x8xf32> -> vector<4x9x8xf32>
    "tpu.trace_stop"() : () -> ()
    %214 = vector.extract_strided_slice %168 {offsets = [0, 0, 24], sizes = [4, 9, 8], strides = [1, 1, 1]} : vector<4x9x96xf32> to vector<4x9x8xf32>
    %215 = vector.extract_strided_slice %168 {offsets = [0, 0, 56], sizes = [4, 9, 8], strides = [1, 1, 1]} : vector<4x9x96xf32> to vector<4x9x8xf32>
    %216 = vector.extract_strided_slice %168 {offsets = [0, 0, 88], sizes = [4, 9, 8], strides = [1, 1, 1]} : vector<4x9x96xf32> to vector<4x9x8xf32>
    "tpu.trace_start"() <{level = 10 : i32, message = "bqd,bkd->bqk"}> : () -> ()
    %cst_95 = arith.constant dense<0.000000e+00> : vector<4x9x9xf32>
    %217 = tpu.matmul %214, %215, %cst_95 {dimension_numbers = #tpu.dot_dimension_numbers<[2], [2], [1], [1], [0, 0, 0, 1, 1, 1], [0], [0]>} : vector<4x9x8xf32>, vector<4x9x8xf32>, vector<4x9x9xf32> -> vector<4x9x9xf32>
    "tpu.trace_stop"() : () -> ()
    %cst_96 = arith.constant dense<0xFF800000> : vector<4x9xf32>
    %218 = vector.multi_reduction <maximumf>, %217, %cst_96 [2] : vector<4x9x9xf32> to vector<4x9xf32>
    %219 = vector.shape_cast %218 : vector<4x9xf32> to vector<4x9x1xf32>
    %220 = vector.broadcast %219 : vector<4x9x1xf32> to vector<4x9x9xf32>
    %221 = arith.subf %217, %220 : vector<4x9x9xf32>
    %222 = math.exp %221 : vector<4x9x9xf32>
    %cst_97 = arith.constant dense<0.000000e+00> : vector<4x9xf32>
    %223 = vector.multi_reduction <add>, %222, %cst_97 [2] : vector<4x9x9xf32> to vector<4x9xf32>
    %224 = vector.shape_cast %223 : vector<4x9xf32> to vector<4x9x1xf32>
    %225 = tpu.reciprocal %224 {approx = true} : vector<4x9x1xf32> -> vector<4x9x1xf32>
    %226 = vector.broadcast %225 : vector<4x9x1xf32> to vector<4x9x9xf32>
    %227 = arith.mulf %222, %226 : vector<4x9x9xf32>
    "tpu.trace_start"() <{level = 10 : i32, message = "bqk,bkd->bqd"}> : () -> ()
    %cst_98 = arith.constant dense<0.000000e+00> : vector<4x9x8xf32>
    %228 = tpu.matmul %227, %216, %cst_98 {dimension_numbers = #tpu.dot_dimension_numbers<[2], [1], [1], [2], [0, 0, 0, 1, 1, 2], [0], [0]>} : vector<4x9x9xf32>, vector<4x9x8xf32>, vector<4x9x8xf32> -> vector<4x9x8xf32>
    "tpu.trace_stop"() : () -> ()
    %229 = tpu.concatenate %183, %198, %213, %228 in 2 : vector<4x9x8xf32>, vector<4x9x8xf32>, vector<4x9x8xf32>, vector<4x9x8xf32> -> vector<4x9x32xf32>
    %230 = vector.shape_cast %229 : vector<4x9x32xf32> to vector<36x32xf32>
    %c1_99 = arith.constant 1 : index
    %c0_100 = arith.constant 0 : index
    %c0_101 = arith.constant 0 : index
    %231 = vector.load %arg8[%c1_99, %c0_100, %c0_101] : memref<2x32x32xf32, #tpu.memory_space<vmem>>, vector<1x32x32xf32>
    %232 = vector.shape_cast %231 : vector<1x32x32xf32> to vector<32x32xf32>
    %cst_102 = arith.constant dense<0.000000e+00> : vector<36x32xf32>
    %233 = tpu.matmul %230, %232, %cst_102 {dimension_numbers = #tpu.dot_dimension_numbers<[1], [0], [0], [1], [0, 0, 1, 1], [], []>} : vector<36x32xf32>, vector<32x32xf32>, vector<36x32xf32> -> vector<36x32xf32>
    %c1_103 = arith.constant 1 : index
    %c0_104 = arith.constant 0 : index
    %c0_105 = arith.constant 0 : index
    %234 = vector.load %arg9[%c1_103, %c0_104, %c0_105] : memref<2x1x32xf32, #tpu.memory_space<vmem>>, vector<1x1x32xf32>
    %235 = vector.shape_cast %234 : vector<1x1x32xf32> to vector<1x32xf32>
    %236 = vector.broadcast %235 : vector<1x32xf32> to vector<36x32xf32>
    %237 = arith.addf %233, %236 : vector<36x32xf32>
    %238 = arith.addf %160, %237 : vector<36x32xf32>
    %c1_106 = arith.constant 1 : index
    %c0_107 = arith.constant 0 : index
    %c0_108 = arith.constant 0 : index
    %239 = vector.load %arg10[%c1_106, %c0_107, %c0_108] : memref<2x1x32xf32, #tpu.memory_space<vmem>>, vector<1x1x32xf32>
    %240 = vector.shape_cast %239 : vector<1x1x32xf32> to vector<1x32xf32>
    %c1_109 = arith.constant 1 : index
    %c0_110 = arith.constant 0 : index
    %c0_111 = arith.constant 0 : index
    %241 = vector.load %arg11[%c1_109, %c0_110, %c0_111] : memref<2x1x32xf32, #tpu.memory_space<vmem>>, vector<1x1x32xf32>
    %242 = vector.shape_cast %241 : vector<1x1x32xf32> to vector<1x32xf32>
    %cst_112 = arith.constant dense<0.000000e+00> : vector<36xf32>
    %243 = vector.multi_reduction <add>, %238, %cst_112 [1] : vector<36x32xf32> to vector<36xf32>
    %244 = vector.shape_cast %243 : vector<36xf32> to vector<36x1xf32>
    %cst_113 = arith.constant 3.200000e+01 : f32
    %245 = vector.broadcast %cst_113 : f32 to vector<36x1xf32>
    %246 = arith.divf %244, %245 : vector<36x1xf32>
    %247 = vector.broadcast %246 : vector<36x1xf32> to vector<36x32xf32>
    %248 = arith.subf %238, %247 : vector<36x32xf32>
    %249 = arith.mulf %248, %248 : vector<36x32xf32>
    %cst_114 = arith.constant dense<0.000000e+00> : vector<36xf32>
    %250 = vector.multi_reduction <add>, %249, %cst_114 [1] : vector<36x32xf32> to vector<36xf32>
    %251 = vector.shape_cast %250 : vector<36xf32> to vector<36x1xf32>
    %cst_115 = arith.constant 3.200000e+01 : f32
    %252 = vector.broadcast %cst_115 : f32 to vector<36x1xf32>
    %253 = arith.divf %251, %252 : vector<36x1xf32>
    %cst_116 = arith.constant 9.99999974E-6 : f32
    %254 = vector.broadcast %cst_116 : f32 to vector<36x1xf32>
    %255 = arith.addf %253, %254 : vector<36x1xf32>
    %256 = math.rsqrt %255 : vector<36x1xf32>
    %257 = vector.broadcast %256 : vector<36x1xf32> to vector<36x32xf32>
    %258 = arith.mulf %248, %257 : vector<36x32xf32>
    %259 = vector.broadcast %240 : vector<1x32xf32> to vector<36x32xf32>
    %260 = arith.mulf %258, %259 : vector<36x32xf32>
    %261 = vector.broadcast %242 : vector<1x32xf32> to vector<36x32xf32>
    %262 = arith.addf %260, %261 : vector<36x32xf32>
    %c1_117 = arith.constant 1 : index
    %c0_118 = arith.constant 0 : index
    %c0_119 = arith.constant 0 : index
    %263 = vector.load %arg12[%c1_117, %c0_118, %c0_119] : memref<2x32x64xf32, #tpu.memory_space<vmem>>, vector<1x32x64xf32>
    %264 = vector.shape_cast %263 : vector<1x32x64xf32> to vector<32x64xf32>
    %cst_120 = arith.constant dense<0.000000e+00> : vector<36x64xf32>
    %265 = tpu.matmul %262, %264, %cst_120 {dimension_numbers = #tpu.dot_dimension_numbers<[1], [0], [0], [1], [0, 0, 1, 1], [], []>} : vector<36x32xf32>, vector<32x64xf32>, vector<36x64xf32> -> vector<36x64xf32>
    %c1_121 = arith.constant 1 : index
    %c0_122 = arith.constant 0 : index
    %c0_123 = arith.constant 0 : index
    %266 = vector.load %arg13[%c1_121, %c0_122, %c0_123] : memref<2x1x64xf32, #tpu.memory_space<vmem>>, vector<1x1x64xf32>
    %267 = vector.shape_cast %266 : vector<1x1x64xf32> to vector<1x64xf32>
    %268 = vector.broadcast %267 : vector<1x64xf32> to vector<36x64xf32>
    %269 = arith.addf %265, %268 : vector<36x64xf32>
    %cst_124 = arith.constant 0.000000e+00 : f32
    %270 = vector.broadcast %cst_124 : f32 to vector<36x64xf32>
    %271 = arith.maximumf %269, %270 : vector<36x64xf32>
    %c1_125 = arith.constant 1 : index
    %c0_126 = arith.constant 0 : index
    %c0_127 = arith.constant 0 : index
    %272 = vector.load %arg14[%c1_125, %c0_126, %c0_127] : memref<2x64x32xf32, #tpu.memory_space<vmem>>, vector<1x64x32xf32>
    %273 = vector.shape_cast %272 : vector<1x64x32xf32> to vector<64x32xf32>
    %cst_128 = arith.constant dense<0.000000e+00> : vector<36x32xf32>
    %274 = tpu.matmul %271, %273, %cst_128 {dimension_numbers = #tpu.dot_dimension_numbers<[1], [0], [0], [1], [0, 0, 1, 1], [], []>} : vector<36x64xf32>, vector<64x32xf32>, vector<36x32xf32> -> vector<36x32xf32>
    %c1_129 = arith.constant 1 : index
    %c0_130 = arith.constant 0 : index
    %c0_131 = arith.constant 0 : index
    %275 = vector.load %arg15[%c1_129, %c0_130, %c0_131] : memref<2x1x32xf32, #tpu.memory_space<vmem>>, vector<1x1x32xf32>
    %276 = vector.shape_cast %275 : vector<1x1x32xf32> to vector<1x32xf32>
    %277 = vector.broadcast %276 : vector<1x32xf32> to vector<36x32xf32>
    %278 = arith.addf %274, %277 : vector<36x32xf32>
    %279 = arith.addf %262, %278 : vector<36x32xf32>
    %c1_132 = arith.constant 1 : index
    %c0_133 = arith.constant 0 : index
    %c0_134 = arith.constant 0 : index
    %280 = vector.load %arg16[%c1_132, %c0_133, %c0_134] : memref<2x1x32xf32, #tpu.memory_space<vmem>>, vector<1x1x32xf32>
    %281 = vector.shape_cast %280 : vector<1x1x32xf32> to vector<1x32xf32>
    %c1_135 = arith.constant 1 : index
    %c0_136 = arith.constant 0 : index
    %c0_137 = arith.constant 0 : index
    %282 = vector.load %arg17[%c1_135, %c0_136, %c0_137] : memref<2x1x32xf32, #tpu.memory_space<vmem>>, vector<1x1x32xf32>
    %283 = vector.shape_cast %282 : vector<1x1x32xf32> to vector<1x32xf32>
    %cst_138 = arith.constant dense<0.000000e+00> : vector<36xf32>
    %284 = vector.multi_reduction <add>, %279, %cst_138 [1] : vector<36x32xf32> to vector<36xf32>
    %285 = vector.shape_cast %284 : vector<36xf32> to vector<36x1xf32>
    %cst_139 = arith.constant 3.200000e+01 : f32
    %286 = vector.broadcast %cst_139 : f32 to vector<36x1xf32>
    %287 = arith.divf %285, %286 : vector<36x1xf32>
    %288 = vector.broadcast %287 : vector<36x1xf32> to vector<36x32xf32>
    %289 = arith.subf %279, %288 : vector<36x32xf32>
    %290 = arith.mulf %289, %289 : vector<36x32xf32>
    %cst_140 = arith.constant dense<0.000000e+00> : vector<36xf32>
    %291 = vector.multi_reduction <add>, %290, %cst_140 [1] : vector<36x32xf32> to vector<36xf32>
    %292 = vector.shape_cast %291 : vector<36xf32> to vector<36x1xf32>
    %cst_141 = arith.constant 3.200000e+01 : f32
    %293 = vector.broadcast %cst_141 : f32 to vector<36x1xf32>
    %294 = arith.divf %292, %293 : vector<36x1xf32>
    %cst_142 = arith.constant 9.99999974E-6 : f32
    %295 = vector.broadcast %cst_142 : f32 to vector<36x1xf32>
    %296 = arith.addf %294, %295 : vector<36x1xf32>
    %297 = math.rsqrt %296 : vector<36x1xf32>
    %298 = vector.broadcast %297 : vector<36x1xf32> to vector<36x32xf32>
    %299 = arith.mulf %289, %298 : vector<36x32xf32>
    %300 = vector.broadcast %281 : vector<1x32xf32> to vector<36x32xf32>
    %301 = arith.mulf %299, %300 : vector<36x32xf32>
    %302 = vector.broadcast %283 : vector<1x32xf32> to vector<36x32xf32>
    %303 = arith.addf %301, %302 : vector<36x32xf32>
    %304 = vector.shape_cast %303 : vector<36x32xf32> to vector<4x9x32xf32>
    %c0_143 = arith.constant 0 : index
    %c0_144 = arith.constant 0 : index
    %c0_145 = arith.constant 0 : index
    %305 = vector.load %arg18[%c0_143, %c0_144, %c0_145] : memref<4x9x32xf32, #tpu.memory_space<vmem>>, vector<4x9x32xf32>
    tpu.vector_store %arg18[%c0_143, %c0_144, %c0_145], %304 {strides = array<i32>} : memref<4x9x32xf32, #tpu.memory_space<vmem>>, vector<4x9x32xf32>,
    return
  }
  func.func @transform_0(%arg0: i32) -> (i32, i32, i32) {
    %c0_i32 = arith.constant 0 : i32
    %c0_i32_0 = arith.constant 0 : i32
    %c0_i32_1 = arith.constant 0 : i32
    return %arg0, %c0_i32, %c0_i32_0 : i32, i32, i32
  }
  func.func @transform_1(%arg0: i32) -> (i32, i32) {
    %c0_i32 = arith.constant 0 : i32
    %c0_i32_0 = arith.constant 0 : i32
    %c0_i32_1 = arith.constant 0 : i32
    return %c0_i32, %c0_i32_0 : i32, i32
  }
  func.func @transform_2(%arg0: i32) -> (i32, i32) {
    %c0_i32 = arith.constant 0 : i32
    %c0_i32_0 = arith.constant 0 : i32
    %c0_i32_1 = arith.constant 0 : i32
    return %c0_i32, %c0_i32_0 : i32, i32
  }
  func.func @transform_3(%arg0: i32) -> (i32, i32) {
    %c0_i32 = arith.constant 0 : i32
    %c0_i32_0 = arith.constant 0 : i32
    %c0_i32_1 = arith.constant 0 : i32
    return %c0_i32, %c0_i32_0 : i32, i32
  }
  func.func @transform_4(%arg0: i32) -> (i32, i32) {
    %c0_i32 = arith.constant 0 : i32
    %c0_i32_0 = arith.constant 0 : i32
    %c0_i32_1 = arith.constant 0 : i32
    return %c0_i32, %c0_i32_0 : i32, i32
  }
  func.func @transform_5(%arg0: i32) -> (i32, i32, i32) {
    %c0_i32 = arith.constant 0 : i32
    %c0_i32_0 = arith.constant 0 : i32
    %c0_i32_1 = arith.constant 0 : i32
    %c0_i32_2 = arith.constant 0 : i32
    return %c0_i32, %c0_i32_0, %c0_i32_1 : i32, i32, i32
  }
  func.func @transform_6(%arg0: i32) -> (i32, i32, i32) {
    %c0_i32 = arith.constant 0 : i32
    %c0_i32_0 = arith.constant 0 : i32
    %c0_i32_1 = arith.constant 0 : i32
    %c0_i32_2 = arith.constant 0 : i32
    return %c0_i32, %c0_i32_0, %c0_i32_1 : i32, i32, i32
  }
  func.func @transform_7(%arg0: i32) -> (i32, i32, i32) {
    %c0_i32 = arith.constant 0 : i32
    %c0_i32_0 = arith.constant 0 : i32
    %c0_i32_1 = arith.constant 0 : i32
    %c0_i32_2 = arith.constant 0 : i32
    return %c0_i32, %c0_i32_0, %c0_i32_1 : i32, i32, i32
  }
  func.func @transform_8(%arg0: i32) -> (i32, i32, i32) {
    %c0_i32 = arith.constant 0 : i32
    %c0_i32_0 = arith.constant 0 : i32
    %c0_i32_1 = arith.constant 0 : i32
    %c0_i32_2 = arith.constant 0 : i32
    return %c0_i32, %c0_i32_0, %c0_i32_1 : i32, i32, i32
  }
  func.func @transform_9(%arg0: i32) -> (i32, i32, i32) {
    %c0_i32 = arith.constant 0 : i32
    %c0_i32_0 = arith.constant 0 : i32
    %c0_i32_1 = arith.constant 0 : i32
    %c0_i32_2 = arith.constant 0 : i32
    return %c0_i32, %c0_i32_0, %c0_i32_1 : i32, i32, i32
  }
  func.func @transform_10(%arg0: i32) -> (i32, i32, i32) {
    %c0_i32 = arith.constant 0 : i32
    %c0_i32_0 = arith.constant 0 : i32
    %c0_i32_1 = arith.constant 0 : i32
    %c0_i32_2 = arith.constant 0 : i32
    return %c0_i32, %c0_i32_0, %c0_i32_1 : i32, i32, i32
  }
  func.func @transform_11(%arg0: i32) -> (i32, i32, i32) {
    %c0_i32 = arith.constant 0 : i32
    %c0_i32_0 = arith.constant 0 : i32
    %c0_i32_1 = arith.constant 0 : i32
    %c0_i32_2 = arith.constant 0 : i32
    return %c0_i32, %c0_i32_0, %c0_i32_1 : i32, i32, i32
  }
  func.func @transform_12(%arg0: i32) -> (i32, i32, i32) {
    %c0_i32 = arith.constant 0 : i32
    %c0_i32_0 = arith.constant 0 : i32
    %c0_i32_1 = arith.constant 0 : i32
    %c0_i32_2 = arith.constant 0 : i32
    return %c0_i32, %c0_i32_0, %c0_i32_1 : i32, i32, i32
  }
  func.func @transform_13(%arg0: i32) -> (i32, i32, i32) {
    %c0_i32 = arith.constant 0 : i32
    %c0_i32_0 = arith.constant 0 : i32
    %c0_i32_1 = arith.constant 0 : i32
    %c0_i32_2 = arith.constant 0 : i32
    return %c0_i32, %c0_i32_0, %c0_i32_1 : i32, i32, i32
  }
  func.func @transform_14(%arg0: i32) -> (i32, i32, i32) {
    %c0_i32 = arith.constant 0 : i32
    %c0_i32_0 = arith.constant 0 : i32
    %c0_i32_1 = arith.constant 0 : i32
    %c0_i32_2 = arith.constant 0 : i32
    return %c0_i32, %c0_i32_0, %c0_i32_1 : i32, i32, i32
  }
  func.func @transform_15(%arg0: i32) -> (i32, i32, i32) {
    %c0_i32 = arith.constant 0 : i32
    %c0_i32_0 = arith.constant 0 : i32
    %c0_i32_1 = arith.constant 0 : i32
    %c0_i32_2 = arith.constant 0 : i32
    return %c0_i32, %c0_i32_0, %c0_i32_1 : i32, i32, i32
  }
  func.func @transform_16(%arg0: i32) -> (i32, i32, i32) {
    %c0_i32 = arith.constant 0 : i32
    %c0_i32_0 = arith.constant 0 : i32
    %c0_i32_1 = arith.constant 0 : i32
    %c0_i32_2 = arith.constant 0 : i32
    return %c0_i32, %c0_i32_0, %c0_i32_1 : i32, i32, i32
  }
  func.func @transform_17(%arg0: i32) -> (i32, i32, i32) {
    %c0_i32 = arith.constant 0 : i32
    %c0_i32_0 = arith.constant 0 : i32
    %c0_i32_1 = arith.constant 0 : i32
    return %arg0, %c0_i32, %c0_i32_0 : i32, i32, i32
  }
}

</mosaic_0001>

<bundles_post_ra>
// kernel: time_encoder_forward.1
= control target key start
LH: loop header
LB: loop body
LE: loop exit
PB: predicated region body
PF: predicated region fallthrough
CT: control target
= control target key end

     0   :  { %s10678_s24 = smov 0   ;;  %s16112_s0 = inlined_call_operand.vmem [shape: f32[8,8,16], index: 0, kind: input, shape index: {}]   ;;  %s16113_s1 = inlined_call_operand.vmem [shape: f32[16,32], index: 1, kind: input, shape index: {}]   ;;  %s16114_s2 = inlined_call_operand.vmem [shape: f32[1,32], index: 2, kind: input, shape index: {}]   ;;  %s16115_s3 = inlined_call_operand.vmem [shape: f32[1,32], index: 3, kind: input, shape index: {}]   ;;  %s16116_s4 = inlined_call_operand.vmem [shape: f32[8,32], index: 4, kind: input, shape index: {}]   ;;  %s16117_s5 = inlined_call_operand.vmem [shape: f32[2,32,96], index: 5, kind: input, shape index: {}]   ;;  %s16118_s6 = inlined_call_operand.vmem [shape: f32[2,1,96], index: 6, kind: input, shape index: {}]   ;;  %s16119_s7 = inlined_call_operand.vmem [shape: f32[2,32,32], index: 7, kind: input, shape index: {}]   ;;  %s16120_s8 = inlined_call_operand.vmem [shape: f32[2,1,32], index: 8, kind: input, shape index: {}]   ;;  %s16121_s9 = inlined_call_operand.vmem [shape: f32[2,1,32], index: 9, kind: input, shape index: {}]   ;;  %s16122_s10 = inlined_call_operand.vmem [shape: f32[2,1,32], index: 10, kind: input, shape index: {}]   ;;  %s16123_s11 = inlined_call_operand.vmem [shape: f32[2,32,64], index: 11, kind: input, shape index: {}]   ;;  %s16124_s12 = inlined_call_operand.vmem [shape: f32[2,1,64], index: 12, kind: input, shape index: {}]   ;;  %s16125_s13 = inlined_call_operand.vmem [shape: f32[2,64,32], index: 13, kind: input, shape index: {}]   ;;  %s16126_s14 = inlined_call_operand.vmem [shape: f32[2,1,32], index: 14, kind: input, shape index: {}]   ;;  %s16127_s15 = inlined_call_operand.vmem [shape: f32[2,1,32], index: 15, kind: input, shape index: {}]   ;;  %s16128_s16 = inlined_call_operand.vmem [shape: f32[2,1,32], index: 16, kind: input, shape index: {}]   ;;  %s16129_s17 = inlined_call_operand.vmem [shape: f32[8,9,32], index: 17, kind: output, shape index: {}]  }
   0x1   :  { %16263 = sst [smem:[#allocation62_spill]] %s16112_s0 }
   0x2   :  { %16264 = sst [smem:[#allocation63_spill]] %s16113_s1 }
   0x3 LB: > { %s9869_s25 = sadd.s32 4294967295, %s10571_s24   ;;  %p9873_p0 = scmp.ge.s32.totalorder %s10571_s24, 1  ;;  %s10571_s24 = sphi %s10678_s24, %s27_s24  }
   0x4   : > { %p488_p1 = scmp.lt.s32.totalorder %s10571_s24, 3 }
   0x6   : > { %p489_p2 = pnand %p9873_p0, %p488_p1 }
   0x8   : > { %492 = sbr.rel (%p489_p2) target bundleno = 7498 (0x1d4a), region = 88 }
   0xd   : > { %s16265_s28 = sld [smem:[#allocation63_spill]]  ;;  %s9874_s30 = sshll.u32 %s9869_s25, 2  ;;  %vm564_vm0 = vcmask 130048   ;;  %v692_v6 = vld [vmem:[%s16117_s5 + $0x18] sm:$0xff]  ;;  %v691_v7 = vld [vmem:[%s16117_s5 + $0x10] sm:$0xff]  ;;  %v690_v8 = vld [vmem:[%s16117_s5 + $0x8] sm:$0xff] }
   0xe   : > { %p542_p3 = scmp.lt.s32.totalorder %s9874_s30, 7  ;;  %s16266_s20 = sld [smem:[#allocation62_spill]]  ;;  %768 = vmatpush.msra.mxu1 %v692_v6  ;;  %v10250_v9 = vld [vmem:[%s16114_s2] ss:$0 sm:$0xff]  ;;  %vm624_vm1 = vcmask 1040384   ;;  %vm745_vm2 = vcmask 261120  }
   0xf   : > { %v10717_v11 = vld [vmem:[%s16116_s4] sm:$0xff]  ;;  %s10573_s27 = smov 96   ;;  %s16189_s29 = smov 64   ;;  %vm864_vm3 = vcmask 64512   ;;  %vm1109_vm4 = vcmask 72704   ;;  %vm1113_vm5 = vcmask 65536  }
  0x10   : > { %s16566_s30 = smov (!%p542_p3, %s9874_s30), 7  ;;  %769 = vmatpush.msra.mxu1 %v691_v7  ;;  %v10723_v14 = vld [vmem:[%s16115_s3] sm:$0x1]  ;;  %s16185_s0 = smov 88   ;;  %vm3339_vm6 = vcmask 195584   ;;  %vm3688_vm8 = vcmask 257024  }
  0x11   : > { %s9875_s18 = sshll.u32 %s16566_s30, 3  ;;  %v689_v15 = vld [vmem:[%s16117_s5] sm:$0xff]  ;;  %s16183_s19 = smov 56  }
  0x12   : > { %770 = vmatpush.msra.mxu1 %v690_v8  ;;  %s16181_s1 = smov 80   ;;  %s16175_s22 = smov 72  }
  0x13   : > { %v559_v0 = vld [vmem:[%s16265_s28 + $0x8] sm:$0xff]  ;;  %v558_v1 = vld [vmem:[%s16265_s28] sm:$0xff]  ;;  %s16171_s23 = smov 104   ;;  %s16173_s25 = smov 40  }
  0x14   : > { %591 = vmatpush.msra.mxu0 %v559_v0  ;;  %s545_s21 = scalar_lea.vmem %s16266_s20, %s9875_s18  ;;  %771 = vmatpush.msra.mxu1 %v689_v15  ;;  %s16187_s18 = smov 120  }
  0x15   : > { %v554_v2 = vld [vmem:[%s545_s21] sm:$0xff]  ;;  %v555_v3 = vld [vmem:[%s545_s21 + $0x8] sm:$0xff]  ;;  %v556_v4 = vld [vmem:[%s545_s21 + $0x10] sm:$0xff]  ;;  %s16179_s20 = smov 112   ;;  %s10584_s26 = smov 8  }
  0x16   : > { %592 = vmatpush.msra.mxu0 %v558_v1  ;;  %v557_v5 = vld [vmem:[%s545_s21 + $0x18] sm:$0xff]  ;;  %s16177_s21 = smov 48  }
  0x17   : > { %9879 = vmatmul.msk.f32.vlgmr.msra.gmra.mxu0 %vm564_vm0, %v554_v2  ;;  %v10859_v2 = vld [vmem:[%s16118_s6] ss:$0 sm:$0xff] }
  0x1f   : > { %9880 = vmatmul.msk.f32.gmra.mxu0 %vm564_vm0, %v555_v3 }
  0x27   : > { %9881 = vmatmul.msk.f32.gmra.mxu0 %vm564_vm0, %v556_v4 }
  0x2f   : > { %9882 = vmatmul.msk.f32.gmra.mxu0 %vm564_vm0, %v557_v5 }
  0x94   : > { %v594_v10 = vpop.f32.mrf.mxu0 }
  0x95   : > { %v595_v12 = vadd.f32 %v10250_v9, %v594_v10 }
  0x97   : > { %v608_v13 = vadd.f32 %v10717_v11, %v595_v12 }
  0x99   : > { %v10728_v16 = vrot.slane %v608_v13, 7 }
  0x9b   : > { %16267 = vst [vmem:[#allocation2_spill] sm:$0xff] %v10728_v16  ;;  %v10733_v17 = vsel %vm624_vm1, %v10723_v14, %v10728_v16 }
  0x9c   : > { %16268 = vst [vmem:[#allocation3_spill] sm:$0xff] %v10733_v17  ;;  %v16158_v18 = vrot.slane %v10733_v17, 1  ;;  %v16157_v19 = vrot.slane %v10733_v17, 2  ;;  %v16156_v20 = vrot.slane %v10733_v17, 3  ;;  %v597_v21 = vpop.f32.mrf.mxu0  ;;  %v16155_v22 = vrot.slane %v10733_v17, 4 }
  0x9d   : > { %697 = vst [vmem:[#allocation1] ss:$9 sm:$0xff] %v10733_v17  ;;  %v598_v23 = vadd.f32 %v10250_v9, %v597_v21  ;;  %v16154_v24 = vrot.slane %v10733_v17, 5  ;;  %v16153_v25 = vrot.slane %v10733_v17, 6  ;;  %v16152_v27 = vrot.slane %v10733_v17, 7 }
  0x9e   : > { %699 = vst [vmem:[#allocation1 + $0x1] ss:$9 sm:$0xff] %v16158_v18 }
  0x9f   : > { %701 = vst [vmem:[#allocation1 + $0x2] ss:$9 sm:$0xff] %v16157_v19  ;;  %v609_v26 = vadd.f32 %v10717_v11, %v598_v23 }
  0xa0   : > { %703 = vst [vmem:[#allocation1 + $0x3] ss:$9 sm:$0xff] %v16156_v20 }
  0xa1   : > { %705 = vst [vmem:[#allocation1 + $0x4] ss:$9 sm:$0xff] %v16155_v22  ;;  %v10756_v28 = vrot.slane %v609_v26, 7 }
  0xa2   : > { %707 = vst [vmem:[#allocation1 + $0x5] ss:$9 sm:$0xff] %v16154_v24 }
  0xa3   : > { %709 = vst [vmem:[#allocation1 + $0x6] ss:$9 sm:$0xff] %v16153_v25  ;;  %v10763_v29 = vsel %vm624_vm1, %v10723_v14, %v10756_v28 }
  0xa4   : > { %16269 = vst [vmem:[#allocation4_spill] sm:$0xff] %v10756_v28  ;;  %v600_v30 = vpop.f32.mrf.mxu0  ;;  %v16151_v31 = vrot.slane %v10763_v29, 1  ;;  %v16150_v33 = vrot.slane %v10763_v29, 2  ;;  %v16149_v35 = vrot.slane %v10763_v29, 3  ;;  %v16148_v36 = vrot.slane %v10763_v29, 4 }
  0xa5   : > { %711 = vst [vmem:[#allocation1 + $0x7] ss:$9 sm:$0xff] %v16152_v27  ;;  %v601_v34 = vadd.f32 %v10250_v9, %v600_v30  ;;  %v16147_v37 = vrot.slane %v10763_v29, 5  ;;  %v16146_v38 = vrot.slane %v10763_v29, 6  ;;  %v16145_v43 = vrot.slane %v10763_v29, 7 }
  0xa6   : > { %16270 = vst [vmem:[#allocation5_spill] sm:$0xff] %v10763_v29 }
  0xa7   : > { %v610_v39 = vadd.f32 %v10717_v11, %v601_v34 }
  0xa9   : > { %v10787_v40 = vrot.slane %v610_v39, 7 }
  0xab   : > { %16271 = vst [vmem:[#allocation6_spill] sm:$0xff] %v10787_v40  ;;  %v10792_v41 = vsel %vm624_vm1, %v10723_v14, %v10787_v40 }
  0xac   : > { %v712_v32 = vld [vmem:[#allocation1] sm:$0xff]  ;;  %16272 = vst [vmem:[#allocation7_spill] sm:$0xff] %v10792_v41  ;;  %v603_v42 = vpop.f32.mrf.mxu0  ;;  %v16144_v45 = vrot.slane %v10792_v41, 1  ;;  %v16143_v46 = vrot.slane %v10792_v41, 2  ;;  %v16142_v48 = vrot.slane %v10792_v41, 3  ;;  %v16141_v49 = vrot.slane %v10792_v41, 4 }
  0xad   : > { %713 = vst [vmem:[#allocation1] ss:$9 sm:$0xff] %v10728_v16  ;;  %9883 = vmatmul.msk.f32.vlgmr.msra.gmra.mxu1 %vm745_vm2, %v712_v32  ;;  %v604_v47 = vadd.f32 %v10250_v9, %v603_v42  ;;  %v16140_v50 = vrot.slane %v10792_v41, 5  ;;  %v16139_v53 = vrot.slane %v10792_v41, 6  ;;  %v16138_v54 = vrot.slane %v10792_v41, 7 }
  0xae   : > { %714 = vst [vmem:[#allocation1 + $0x1] ss:$9 sm:$0xff] %v10763_v29 }
  0xaf   : > { %715 = vst [vmem:[#allocation1 + $0x2] ss:$9 sm:$0xff] %v16151_v31  ;;  %v611_v51 = vadd.f32 %v10717_v11, %v604_v47 }
  0xb0   : > { %716 = vst [vmem:[#allocation1 + $0x3] ss:$9 sm:$0xff] %v16150_v33 }
  0xb1   : > { %717 = vst [vmem:[#allocation1 + $0x4] ss:$9 sm:$0xff] %v16149_v35  ;;  %v10816_v52 = vrot.slane %v611_v51, 7 }
  0xb2   : > { %718 = vst [vmem:[#allocation1 + $0x5] ss:$9 sm:$0xff] %v16148_v36 }
  0xb3   : > { %719 = vst [vmem:[#allocation1 + $0x6] ss:$9 sm:$0xff] %v16147_v37  ;;  %v10823_v55 = vsel %vm624_vm1, %v10723_v14, %v10816_v52 }
  0xb4   : > { %720 = vst [vmem:[#allocation1 + $0x7] ss:$9 sm:$0xff] %v16146_v38  ;;  %v16137_v57 = vrot.slane %v10823_v55, 1  ;;  %v16136_v58 = vrot.slane %v10823_v55, 2  ;;  %v16135_v59 = vrot.slane %v10823_v55, 3  ;;  %v16134_v60 = vrot.slane %v10823_v55, 4 }
  0xb5   : > { %16273 = vst [vmem:[#allocation8_spill] sm:$0xff] %v10816_v52  ;;  %v16133_v61 = vrot.slane %v10823_v55, 5  ;;  %v16132_v62 = vrot.slane %v10823_v55, 6  ;;  %v16131_v63 = vrot.slane %v10823_v55, 7 }
  0xb6   : > { %16274 = vst [vmem:[#allocation9_spill] sm:$0xff] %v10823_v55 }
  0xbb   : > { %v721_v44 = vld [vmem:[#allocation1] sm:$0xff] }
  0xbc   : > { %722 = vst [vmem:[#allocation1] ss:$9 sm:$0xff] %v16145_v43  ;;  %9884 = vmatmul.msk.f32.gmra.mxu1 %vm745_vm2, %v721_v44 }
  0xbd   : > { %723 = vst [vmem:[#allocation1 + $0x1] ss:$9 sm:$0xff] %v10756_v28 }
  0xbe   : > { %724 = vst [vmem:[#allocation1 + $0x2] ss:$9 sm:$0xff] %v10792_v41 }
  0xbf   : > { %725 = vst [vmem:[#allocation1 + $0x3] ss:$9 sm:$0xff] %v16144_v45 }
  0xc0   : > { %726 = vst [vmem:[#allocation1 + $0x4] ss:$9 sm:$0xff] %v16143_v46 }
  0xc1   : > { %727 = vst [vmem:[#allocation1 + $0x5] ss:$9 sm:$0xff] %v16142_v48 }
  0xc2   : > { %728 = vst [vmem:[#allocation1 + $0x6] ss:$9 sm:$0xff] %v16141_v49 }
  0xc3   : > { %729 = vst [vmem:[#allocation1 + $0x7] ss:$9 sm:$0xff] %v16140_v50 }
  0xca   : > { %v730_v56 = vld [vmem:[#allocation1] sm:$0xff] }
  0xcb   : > { %731 = vst [vmem:[#allocation1] ss:$9 sm:$0xff] %v16139_v53  ;;  %9885 = vmatmul.msk.f32.gmra.mxu1 %vm745_vm2, %v730_v56 }
  0xcc   : > { %732 = vst [vmem:[#allocation1 + $0x1] ss:$9 sm:$0xff] %v16138_v54 }
  0xcd   : > { %733 = vst [vmem:[#allocation1 + $0x2] ss:$9 sm:$0xff] %v10787_v40 }
  0xce   : > { %734 = vst [vmem:[#allocation1 + $0x3] ss:$9 sm:$0xff] %v10823_v55 }
  0xcf   : > { %735 = vst [vmem:[#allocation1 + $0x4] ss:$9 sm:$0xff] %v16137_v57 }
  0xd0   : > { %736 = vst [vmem:[#allocation1 + $0x5] ss:$9 sm:$0xff] %v16136_v58 }
  0xd1   : > { %737 = vst [vmem:[#allocation1 + $0x6] ss:$9 sm:$0xff] %v16135_v59 }
  0xd2   : > { %738 = vst [vmem:[#allocation1 + $0x7] ss:$9 sm:$0xff] %v16134_v60 }
  0xd9   : > { %v739_v0 = vld [vmem:[#allocation1] sm:$0xff] }
  0xda   : > { %740 = vst [vmem:[#allocation1] ss:$9 sm:$0xff] %v16133_v61  ;;  %9886 = vmatmul.msk.f32.gmra.mxu1 %vm745_vm2, %v739_v0 }
  0xdb   : > { %741 = vst [vmem:[#allocation1 + $0x1] ss:$9 sm:$0xff] %v16132_v62 }
  0xdc   : > { %742 = vst [vmem:[#allocation1 + $0x2] ss:$9 sm:$0xff] %v16131_v63 }
  0xdd   : > { %743 = vst [vmem:[#allocation1 + $0x3] ss:$9 sm:$0xff] %v10816_v52 }
  0xe4   : > { %v744_v1 = vld [vmem:[#allocation1] sm:$0xff] }
  0xe5   : > { %9887 = vmatmul.msk.f32.gmra.mxu1 %vm745_vm2, %v744_v1 }
 0x12a   : > { %v773_v3 = vpop.f32.mrf.mxu1 }
 0x12b   : > { %v10862_v4 = vadd.f32 %v10859_v2, %v773_v3 }
 0x12d   : > { %v10865_v5 = vrot.slane %v10862_v4, 1  ;;  %v10868_v6 = vrot.slane %v10862_v4, 2  ;;  %v10871_v7 = vrot.slane %v10862_v4, 3  ;;  %824 = vst [vmem:[#allocation1] ss:$9 sm:$0xff] %v10862_v4  ;;  %v10875_v8 = vrot.slane %v10862_v4, 4 }
 0x12e   : > { %v10878_v9 = vrot.slane %v10862_v4, 5  ;;  %v10882_v10 = vrot.slane %v10862_v4, 6  ;;  %v10886_v11 = vrot.slane %v10862_v4, 7 }
 0x12f   : > { %826 = vst [vmem:[#allocation1 + $0x1] ss:$9 sm:$0xff] %v10865_v5 }
 0x130   : > { %828 = vst [vmem:[#allocation1 + $0x2] ss:$9 sm:$0xff] %v10868_v6 }
 0x131   : > { %830 = vst [vmem:[#allocation1 + $0x3] ss:$9 sm:$0xff] %v10871_v7 }
 0x132   : > { %832 = vst [vmem:[#allocation1 + $0x4] ss:$9 sm:$0xff] %v10875_v8 }
 0x133   : > { %834 = vst [vmem:[#allocation1 + $0x5] ss:$9 sm:$0xff] %v10878_v9 }
 0x134   : > { %836 = vst [vmem:[#allocation1 + $0x6] ss:$9 sm:$0xff] %v10882_v10 }
 0x135   : > { %838 = vst [vmem:[#allocation1 + $0x7] ss:$9 sm:$0xff] %v10886_v11 }
 0x139   : > { %v776_v12 = vpop.f32.mrf.mxu1 }
 0x13a   : > { %v10894_v13 = vadd.f32 %v10859_v2, %v776_v12 }
 0x13c   : > { %v10896_v14 = vld [vmem:[#allocation1] sm:$0xff]  ;;  %v10911_v23 = vrot.slane %v10894_v13, 1  ;;  %v10914_v26 = vrot.slane %v10894_v13, 2  ;;  %v10917_v32 = vrot.slane %v10894_v13, 3  ;;  %v10922_v34 = vrot.slane %v10894_v13, 4 }
 0x13d   : > { %840 = vst [vmem:[#allocation1] ss:$9 sm:$0xff] %v10894_v13  ;;  %v10926_v39 = vrot.slane %v10894_v13, 5  ;;  %v10930_v44 = vrot.slane %v10894_v13, 6  ;;  %v10934_v47 = vrot.slane %v10894_v13, 7 }
 0x144   : > { %v10899_v15 = vld [vmem:[#allocation1] sm:$0xff] }
 0x145   : > { %842 = vst [vmem:[#allocation1] ss:$9 sm:$0xff] %v10862_v4 }
 0x146   : > { %844 = vst [vmem:[#allocation1 + $0x1] ss:$9 sm:$0xff] %v10865_v5 }
 0x147   : > { %846 = vst [vmem:[#allocation1 + $0x2] ss:$9 sm:$0xff] %v10868_v6 }
 0x148   : > { %848 = vst [vmem:[#allocation1 + $0x3] ss:$9 sm:$0xff] %v10871_v7  ;;  %v779_v42 = vpop.f32.mrf.mxu1 }
 0x149   : > { %850 = vst [vmem:[#allocation1 + $0x4] ss:$9 sm:$0xff] %v10875_v8  ;;  %v10939_v51 = vadd.f32 %v10859_v2, %v779_v42 }
 0x14a   : > { %852 = vst [vmem:[#allocation1 + $0x5] ss:$9 sm:$0xff] %v10878_v9 }
 0x14b   : > { %854 = vst [vmem:[#allocation1 + $0x6] ss:$9 sm:$0xff] %v10882_v10  ;;  %v10945_v56 = vrot.slane %v10939_v51, 1  ;;  %v10962_v12 = vrot.slane %v10939_v51, 2  ;;  %v10968_v63 = vrot.slane %v10939_v51, 4  ;;  %v10973_v62 = vrot.slane %v10939_v51, 5 }
 0x14c   : > { %856 = vst [vmem:[#allocation1 + $0x7] ss:$9 sm:$0xff] %v10886_v11  ;;  %v10980_v60 = vrot.slane %v10939_v51, 6  ;;  %v10984_v59 = vrot.slane %v10939_v51, 7 }
 0x153   : > { %v857_v21 = vld [vmem:[#allocation1] sm:$0xff] }
 0x154   : > { %858 = vst [vmem:[#allocation1] ss:$9 sm:$0xff] %v10894_v13 }
 0x15b   : > { %v859_v30 = vld [vmem:[#allocation1] sm:$0xff] }
 0x15c   : > { %896 = vst [vmem:[#allocation1] ss:$9 sm:$0xff] %v10911_v23  ;;  %862 = vrot.lane.b32.xlu0 %v859_v30, %s10573_s27  ;;  %v10965_v30 = vrot.slane %v10939_v51, 3 }
 0x15d   : > { %898 = vst [vmem:[#allocation1 + $0x1] ss:$9 sm:$0xff] %v10914_v26 }
 0x15e   : > { %900 = vst [vmem:[#allocation1 + $0x2] ss:$9 sm:$0xff] %v10917_v32 }
 0x15f   : > { %902 = vst [vmem:[#allocation1 + $0x3] ss:$9 sm:$0xff] %v10922_v34 }
 0x160   : > { %904 = vst [vmem:[#allocation1 + $0x4] ss:$9 sm:$0xff] %v10926_v39 }
 0x161   : > { %906 = vst [vmem:[#allocation1 + $0x5] ss:$9 sm:$0xff] %v10930_v44 }
 0x162   : > { %908 = vst [vmem:[#allocation1 + $0x6] ss:$9 sm:$0xff] %v10934_v47 }
 0x163   : > { %910 = vst [vmem:[#allocation1 + $0x7] ss:$9 sm:$0xff] %v10939_v51 }
 0x164   : > { %860 = vrot.lane.b32.xlu0 %v857_v21, %s10573_s27  ;;  %v782_v21 = vpop.f32.mrf.mxu1 }
 0x165   : > { %v10977_v61 = vadd.f32 %v10859_v2, %v782_v21 }
 0x167   : > { %v10996_v21 = vrot.slane %v10977_v61, 2  ;;  %v11013_v53 = vrot.slane %v10977_v61, 3  ;;  %v11016_v50 = vrot.slane %v10977_v61, 4  ;;  %v11019_v48 = vrot.slane %v10977_v61, 5 }
 0x168   : > { %v11027_v45 = vrot.slane %v10977_v61, 6  ;;  %v11031_v43 = vrot.slane %v10977_v61, 7 }
 0x16a   : > { %v10947_v0 = vld [vmem:[#allocation1] sm:$0xff] }
 0x16b   : > { %912 = vst [vmem:[#allocation1] ss:$9 sm:$0xff] %v10945_v56 }
 0x16c   : > { %v785_v54 = vpop.f32.mrf.mxu1 }
 0x16d   : > { %v11023_v46 = vadd.f32 %v10859_v2, %v785_v54 }
 0x16f   : > { %v11037_v38 = vrot.slane %v11023_v46, 1  ;;  %v11040_v54 = vrot.slane %v11023_v46, 2 }
 0x172   : > { %v10950_v1 = vld [vmem:[#allocation1] sm:$0xff] }
 0x173   : > { %914 = vst [vmem:[#allocation1] ss:$9 sm:$0xff] %v10911_v23 }
 0x174   : > { %916 = vst [vmem:[#allocation1 + $0x1] ss:$9 sm:$0xff] %v10914_v26 }
 0x175   : > { %918 = vst [vmem:[#allocation1 + $0x2] ss:$9 sm:$0xff] %v10917_v32 }
 0x176   : > { %920 = vst [vmem:[#allocation1 + $0x3] ss:$9 sm:$0xff] %v10922_v34 }
 0x177   : > { %922 = vst [vmem:[#allocation1 + $0x4] ss:$9 sm:$0xff] %v10926_v39 }
 0x178   : > { %924 = vst [vmem:[#allocation1 + $0x5] ss:$9 sm:$0xff] %v10930_v44 }
 0x179   : > { %926 = vst [vmem:[#allocation1 + $0x6] ss:$9 sm:$0xff] %v10934_v47 }
 0x17a   : > { %928 = vst [vmem:[#allocation1 + $0x7] ss:$9 sm:$0xff] %v10939_v51 }
 0x181   : > { %v929_v3 = vld [vmem:[#allocation1] sm:$0xff] }
 0x182   : > { %930 = vst [vmem:[#allocation1] ss:$9 sm:$0xff] %v10945_v56 }
 0x189   : > { %v931_v42 = vld [vmem:[#allocation1] sm:$0xff] }
 0x18a   : > { %967 = vst [vmem:[#allocation1] ss:$9 sm:$0xff] %v10962_v12  ;;  %934 = vrot.lane.b32.xlu1 %v931_v42, %s10573_s27  ;;  %v10990_v42 = vrot.slane %v10977_v61, 1 }
 0x18b   : > { %969 = vst [vmem:[#allocation1 + $0x1] ss:$9 sm:$0xff] %v10965_v30 }
 0x18c   : > { %971 = vst [vmem:[#allocation1 + $0x2] ss:$9 sm:$0xff] %v10968_v63 }
 0x18d   : > { %973 = vst [vmem:[#allocation1 + $0x3] ss:$9 sm:$0xff] %v10973_v62 }
 0x18e   : > { %975 = vst [vmem:[#allocation1 + $0x4] ss:$9 sm:$0xff] %v10980_v60 }
 0x18f   : > { %977 = vst [vmem:[#allocation1 + $0x5] ss:$9 sm:$0xff] %v10984_v59 }
 0x190   : > { %979 = vst [vmem:[#allocation1 + $0x6] ss:$9 sm:$0xff] %v10977_v61 }
 0x191   : > { %981 = vst [vmem:[#allocation1 + $0x7] ss:$9 sm:$0xff] %v10990_v42 }
 0x192   : > { %932 = vrot.lane.b32.xlu1 %v929_v3, %s10573_s27 }
 0x198   : > { %v10998_v58 = vld [vmem:[#allocation1] sm:$0xff] }
 0x199   : > { %983 = vst [vmem:[#allocation1] ss:$9 sm:$0xff] %v10996_v21 }
 0x1a0   : > { %v11001_v57 = vld [vmem:[#allocation1] sm:$0xff] }
 0x1a1   : > { %985 = vst [vmem:[#allocation1] ss:$9 sm:$0xff] %v10962_v12 }
 0x1a2   : > { %987 = vst [vmem:[#allocation1 + $0x1] ss:$9 sm:$0xff] %v10965_v30 }
 0x1a3   : > { %989 = vst [vmem:[#allocation1 + $0x2] ss:$9 sm:$0xff] %v10968_v63 }
 0x1a4   : > { %991 = vst [vmem:[#allocation1 + $0x3] ss:$9 sm:$0xff] %v10973_v62 }
 0x1a5   : > { %993 = vst [vmem:[#allocation1 + $0x4] ss:$9 sm:$0xff] %v10980_v60 }
 0x1a6   : > { %995 = vst [vmem:[#allocation1 + $0x5] ss:$9 sm:$0xff] %v10984_v59 }
 0x1a7   : > { %997 = vst [vmem:[#allocation1 + $0x6] ss:$9 sm:$0xff] %v10977_v61 }
 0x1a8   : > { %999 = vst [vmem:[#allocation1 + $0x7] ss:$9 sm:$0xff] %v10990_v42 }
 0x1af   : > { %v1000_v3 = vld [vmem:[#allocation1] sm:$0xff] }
 0x1b0   : > { %1001 = vst [vmem:[#allocation1] ss:$9 sm:$0xff] %v10996_v21 }
 0x1b7   : > { %v1002_v49 = vld [vmem:[#allocation1] sm:$0xff] }
 0x1b8   : > { %1038 = vst [vmem:[#allocation1] ss:$9 sm:$0xff] %v11013_v53  ;;  %1005 = vrot.lane.b32.xlu2 %v1002_v49, %s10573_s27  ;;  %v11047_v49 = vrot.slane %v11023_v46, 3 }
 0x1b9   : > { %1040 = vst [vmem:[#allocation1 + $0x1] ss:$9 sm:$0xff] %v11016_v50 }
 0x1ba   : > { %1042 = vst [vmem:[#allocation1 + $0x2] ss:$9 sm:$0xff] %v11019_v48 }
 0x1bb   : > { %1044 = vst [vmem:[#allocation1 + $0x3] ss:$9 sm:$0xff] %v11027_v45 }
 0x1bc   : > { %1046 = vst [vmem:[#allocation1 + $0x4] ss:$9 sm:$0xff] %v11031_v43 }
 0x1bd   : > { %1048 = vst [vmem:[#allocation1 + $0x5] ss:$9 sm:$0xff] %v11023_v46 }
 0x1be   : > { %1050 = vst [vmem:[#allocation1 + $0x6] ss:$9 sm:$0xff] %v11037_v38 }
 0x1bf   : > { %1052 = vst [vmem:[#allocation1 + $0x7] ss:$9 sm:$0xff] %v11040_v54 }
 0x1c0   : > { %1003 = vrot.lane.b32.xlu2 %v1000_v3, %s10573_s27 }
 0x1c6   : > { %v11049_v2 = vld [vmem:[#allocation1] sm:$0xff] }
 0x1c7   : > { %1054 = vst [vmem:[#allocation1] ss:$9 sm:$0xff] %v11047_v49 }
 0x1ce   : > { %v11052_v37 = vld [vmem:[#allocation1] sm:$0xff] }
 0x1cf   : > { %1056 = vst [vmem:[#allocation1] ss:$9 sm:$0xff] %v11013_v53 }
 0x1d0   : > { %1058 = vst [vmem:[#allocation1 + $0x1] ss:$9 sm:$0xff] %v11016_v50 }
 0x1d1   : > { %1060 = vst [vmem:[#allocation1 + $0x2] ss:$9 sm:$0xff] %v11019_v48 }
 0x1d2   : > { %1062 = vst [vmem:[#allocation1 + $0x3] ss:$9 sm:$0xff] %v11027_v45 }
 0x1d3   : > { %1064 = vst [vmem:[#allocation1 + $0x4] ss:$9 sm:$0xff] %v11031_v43 }
 0x1d4   : > { %1066 = vst [vmem:[#allocation1 + $0x5] ss:$9 sm:$0xff] %v11023_v46 }
 0x1d5   : > { %1068 = vst [vmem:[#allocation1 + $0x6] ss:$9 sm:$0xff] %v11037_v38 }
 0x1d6   : > { %1070 = vst [vmem:[#allocation1 + $0x7] ss:$9 sm:$0xff] %v11040_v54 }
 0x1dd   : > { %v1071_v3 = vld [vmem:[#allocation1] sm:$0xff] }
 0x1de   : > { %1072 = vst [vmem:[#allocation1] ss:$9 sm:$0xff] %v11047_v49  ;;  %1074 = vrot.lane.b32.xlu1 %v1071_v3, %s10573_s27 }
 0x1e5   : > { %v1073_v36 = vld [vmem:[#allocation1] sm:$0xff] }
 0x1e6   : > { %1199 = vst [vmem:[#allocation1] ss:$9 sm:$0xff] %v10862_v4  ;;  %1076 = vrot.lane.b32.xlu0 %v1073_v36, %s10573_s27 }
 0x1e7   : > { %1201 = vst [vmem:[#allocation1 + $0x1] ss:$9 sm:$0xff] %v10865_v5 }
 0x1e8   : > { %1203 = vst [vmem:[#allocation1 + $0x2] ss:$9 sm:$0xff] %v10868_v6 }
 0x1e9   : > { %1205 = vst [vmem:[#allocation1 + $0x3] ss:$9 sm:$0xff] %v10871_v7 }
 0x1ea   : > { %1207 = vst [vmem:[#allocation1 + $0x4] ss:$9 sm:$0xff] %v10875_v8 }
 0x1eb   : > { %1209 = vst [vmem:[#allocation1 + $0x5] ss:$9 sm:$0xff] %v10878_v9 }
 0x1ec   : > { %1211 = vst [vmem:[#allocation1 + $0x6] ss:$9 sm:$0xff] %v10882_v10 }
 0x1ed   : > { %1213 = vst [vmem:[#allocation1 + $0x7] ss:$9 sm:$0xff] %v10886_v11 }
 0x1f4   : > { %v11073_v3 = vld [vmem:[#allocation1] sm:$0xff] }
 0x1f5   : > { %1215 = vst [vmem:[#allocation1] ss:$9 sm:$0xff] %v10894_v13 }
 0x1fc   : > { %v11076_v35 = vld [vmem:[#allocation1] sm:$0xff] }
 0x1fd   : > { %1253 = vst [vmem:[#allocation1] ss:$9 sm:$0xff] %v10911_v23  ;;  %1219 = vrot.lane.b32.xlu2 %v11076_v35, %s16189_s29 }
 0x1fe   : > { %1255 = vst [vmem:[#allocation1 + $0x1] ss:$9 sm:$0xff] %v10914_v26 }
 0x1ff   : > { %1257 = vst [vmem:[#allocation1 + $0x2] ss:$9 sm:$0xff] %v10917_v32 }
 0x200   : > { %1259 = vst [vmem:[#allocation1 + $0x3] ss:$9 sm:$0xff] %v10922_v34 }
 0x201   : > { %1261 = vst [vmem:[#allocation1 + $0x4] ss:$9 sm:$0xff] %v10926_v39 }
 0x202   : > { %1263 = vst [vmem:[#allocation1 + $0x5] ss:$9 sm:$0xff] %v10930_v44 }
 0x203   : > { %1265 = vst [vmem:[#allocation1 + $0x6] ss:$9 sm:$0xff] %v10934_v47 }
 0x204   : > { %1267 = vst [vmem:[#allocation1 + $0x7] ss:$9 sm:$0xff] %v10939_v51 }
 0x20b   : > { %v11086_v36 = vld [vmem:[#allocation1] sm:$0xff] }
 0x20c   : > { %1269 = vst [vmem:[#allocation1] ss:$9 sm:$0xff] %v10945_v56 }
 0x213   : > { %v11089_v33 = vld [vmem:[#allocation1] sm:$0xff] }
 0x214   : > { %1307 = vst [vmem:[#allocation1] ss:$9 sm:$0xff] %v10962_v12  ;;  %1273 = vrot.lane.b32.xlu0 %v11089_v33, %s16189_s29 }
 0x215   : > { %1309 = vst [vmem:[#allocation1 + $0x1] ss:$9 sm:$0xff] %v10965_v30 }
 0x216   : > { %1311 = vst [vmem:[#allocation1 + $0x2] ss:$9 sm:$0xff] %v10968_v63 }
 0x217   : > { %1313 = vst [vmem:[#allocation1 + $0x3] ss:$9 sm:$0xff] %v10973_v62 }
 0x218   : > { %1315 = vst [vmem:[#allocation1 + $0x4] ss:$9 sm:$0xff] %v10980_v60 }
 0x219   : > { %1317 = vst [vmem:[#allocation1 + $0x5] ss:$9 sm:$0xff] %v10984_v59 }
 0x21a   : > { %1319 = vst [vmem:[#allocation1 + $0x6] ss:$9 sm:$0xff] %v10977_v61 }
 0x21b   : > { %1321 = vst [vmem:[#allocation1 + $0x7] ss:$9 sm:$0xff] %v10990_v42 }
 0x222   : > { %v11099_v31 = vld [vmem:[#allocation1] sm:$0xff] }
 0x223   : > { %1323 = vst [vmem:[#allocation1] ss:$9 sm:$0xff] %v10996_v21 }
 0x22a   : > { %v11102_v27 = vld [vmem:[#allocation1] sm:$0xff] }
 0x22b   : > { %1361 = vst [vmem:[#allocation1] ss:$9 sm:$0xff] %v11013_v53 }
 0x22c   : > { %1363 = vst [vmem:[#allocation1 + $0x1] ss:$9 sm:$0xff] %v11016_v50 }
 0x22d   : > { %1365 = vst [vmem:[#allocation1 + $0x2] ss:$9 sm:$0xff] %v11019_v48 }
 0x22e   : > { %1367 = vst [vmem:[#allocation1 + $0x3] ss:$9 sm:$0xff] %v11027_v45 }
 0x22f   : > { %1369 = vst [vmem:[#allocation1 + $0x4] ss:$9 sm:$0xff] %v11031_v43 }
 0x230   : > { %1371 = vst [vmem:[#allocation1 + $0x5] ss:$9 sm:$0xff] %v11023_v46 }
 0x231   : > { %1373 = vst [vmem:[#allocation1 + $0x6] ss:$9 sm:$0xff] %v11037_v38 }
 0x232   : > { %1375 = vst [vmem:[#allocation1 + $0x7] ss:$9 sm:$0xff] %v11040_v54 }
 0x239   : > { %v11112_v25 = vld [vmem:[#allocation1] sm:$0xff] }
 0x23a   : > { %16275 = vst [vmem:[#allocation10_spill] sm:$0xff] %v11112_v25 }
 0x23b   : > { %1377 = vst [vmem:[#allocation1] ss:$9 sm:$0xff] %v11047_v49 }
 0x242   : > { %v11115_v24 = vld [vmem:[#allocation1] sm:$0xff] }
 0x243   : > { %16276 = vst [vmem:[#allocation11_spill] sm:$0xff] %v11115_v24 }
 0x244   : > { %1415 = vst [vmem:[#allocation1] ss:$9 sm:$0xff] %v10862_v4 }
 0x245   : > { %1417 = vst [vmem:[#allocation1 + $0x1] ss:$9 sm:$0xff] %v10865_v5 }
 0x246   : > { %1419 = vst [vmem:[#allocation1 + $0x2] ss:$9 sm:$0xff] %v10868_v6 }
 0x247   : > { %1421 = vst [vmem:[#allocation1 + $0x3] ss:$9 sm:$0xff] %v10871_v7 }
 0x248   : > { %1423 = vst [vmem:[#allocation1 + $0x4] ss:$9 sm:$0xff] %v10875_v8 }
 0x249   : > { %1425 = vst [vmem:[#allocation1 + $0x5] ss:$9 sm:$0xff] %v10878_v9 }
 0x24a   : > { %1427 = vst [vmem:[#allocation1 + $0x6] ss:$9 sm:$0xff] %v10882_v10 }
 0x24b   : > { %1429 = vst [vmem:[#allocation1 + $0x7] ss:$9 sm:$0xff] %v10886_v11 }
 0x252   : > { %v11125_v22 = vld [vmem:[#allocation1] sm:$0xff] }
 0x253   : > { %1431 = vst [vmem:[#allocation1] ss:$9 sm:$0xff] %v10894_v13 }
 0x25a   : > { %v11128_v20 = vld [vmem:[#allocation1] sm:$0xff] }
 0x25b   : > { %1437 = vst [vmem:[#allocation1] ss:$9 sm:$0xff] %v10862_v4 }
 0x25c   : > { %1439 = vst [vmem:[#allocation1 + $0x1] ss:$9 sm:$0xff] %v10865_v5 }
 0x25d   : > { %1441 = vst [vmem:[#allocation1 + $0x2] ss:$9 sm:$0xff] %v10868_v6 }
 0x25e   : > { %1443 = vst [vmem:[#allocation1 + $0x3] ss:$9 sm:$0xff] %v10871_v7 }
 0x25f   : > { %1445 = vst [vmem:[#allocation1 + $0x4] ss:$9 sm:$0xff] %v10875_v8 }
 0x260   : > { %1447 = vst [vmem:[#allocation1 + $0x5] ss:$9 sm:$0xff] %v10878_v9 }
 0x261   : > { %1449 = vst [vmem:[#allocation1 + $0x6] ss:$9 sm:$0xff] %v10882_v10 }
 0x262   : > { %1451 = vst [vmem:[#allocation1 + $0x7] ss:$9 sm:$0xff] %v10886_v11 }
 0x269   : > { %v11138_v19 = vld [vmem:[#allocation1] sm:$0xff] }
 0x26a   : > { %1453 = vst [vmem:[#allocation1] ss:$9 sm:$0xff] %v10894_v13 }
 0x271   : > { %v11141_v18 = vld [vmem:[#allocation1] sm:$0xff] }
 0x272   : > { %1490 = vst [vmem:[#allocation1] ss:$9 sm:$0xff] %v10911_v23 }
 0x273   : > { %1492 = vst [vmem:[#allocation1 + $0x1] ss:$9 sm:$0xff] %v10914_v26 }
 0x274   : > { %1494 = vst [vmem:[#allocation1 + $0x2] ss:$9 sm:$0xff] %v10917_v32 }
 0x275   : > { %1496 = vst [vmem:[#allocation1 + $0x3] ss:$9 sm:$0xff] %v10922_v34 }
 0x276   : > { %1498 = vst [vmem:[#allocation1 + $0x4] ss:$9 sm:$0xff] %v10926_v39 }
 0x277   : > { %1500 = vst [vmem:[#allocation1 + $0x5] ss:$9 sm:$0xff] %v10930_v44 }
 0x278   : > { %1502 = vst [vmem:[#allocation1 + $0x6] ss:$9 sm:$0xff] %v10934_v47 }
 0x279   : > { %1504 = vst [vmem:[#allocation1 + $0x7] ss:$9 sm:$0xff] %v10939_v51 }
 0x280   : > { %v11151_v52 = vld [vmem:[#allocation1] sm:$0xff] }
 0x281   : > { %1506 = vst [vmem:[#allocation1] ss:$9 sm:$0xff] %v10945_v56 }
 0x288   : > { %v11154_v55 = vld [vmem:[#allocation1] sm:$0xff] }
 0x289   : > { %1512 = vst [vmem:[#allocation1] ss:$9 sm:$0xff] %v10911_v23 }
 0x28a   : > { %1514 = vst [vmem:[#allocation1 + $0x1] ss:$9 sm:$0xff] %v10914_v26 }
 0x28b   : > { %1516 = vst [vmem:[#allocation1 + $0x2] ss:$9 sm:$0xff] %v10917_v32 }
 0x28c   : > { %1518 = vst [vmem:[#allocation1 + $0x3] ss:$9 sm:$0xff] %v10922_v34 }
 0x28d   : > { %1520 = vst [vmem:[#allocation1 + $0x4] ss:$9 sm:$0xff] %v10926_v39 }
 0x28e   : > { %1522 = vst [vmem:[#allocation1 + $0x5] ss:$9 sm:$0xff] %v10930_v44 }
 0x28f   : > { %1524 = vst [vmem:[#allocation1 + $0x6] ss:$9 sm:$0xff] %v10934_v47 }
 0x290   : > { %1526 = vst [vmem:[#allocation1 + $0x7] ss:$9 sm:$0xff] %v10939_v51 }
 0x297   : > { %v11168_v40 = vld [vmem:[#allocation1] sm:$0xff] }
 0x298   : > { %1528 = vst [vmem:[#allocation1] ss:$9 sm:$0xff] %v10945_v56 }
 0x29f   : > { %v1529_v41 = vld [vmem:[#allocation1] sm:$0xff] }
 0x2a0   : > { %1565 = vst [vmem:[#allocation1] ss:$9 sm:$0xff] %v10962_v12  ;;  %1532 = vrot.lane.b32.xlu0 %v1529_v41, %s16185_s0 }
 0x2a1   : > { %1567 = vst [vmem:[#allocation1 + $0x1] ss:$9 sm:$0xff] %v10965_v30 }
 0x2a2   : > { %1569 = vst [vmem:[#allocation1 + $0x2] ss:$9 sm:$0xff] %v10968_v63 }
 0x2a3   : > { %1571 = vst [vmem:[#allocation1 + $0x3] ss:$9 sm:$0xff] %v10973_v62 }
 0x2a4   : > { %1573 = vst [vmem:[#allocation1 + $0x4] ss:$9 sm:$0xff] %v10980_v60 }
 0x2a5   : > { %1575 = vst [vmem:[#allocation1 + $0x5] ss:$9 sm:$0xff] %v10984_v59 }
 0x2a6   : > { %1577 = vst [vmem:[#allocation1 + $0x6] ss:$9 sm:$0xff] %v10977_v61 }
 0x2a7   : > { %1579 = vst [vmem:[#allocation1 + $0x7] ss:$9 sm:$0xff] %v10990_v42 }
 0x2ae   : > { %v11179_v33 = vld [vmem:[#allocation1] sm:$0xff] }
 0x2af   : > { %16277 = vst [vmem:[#allocation12_spill] sm:$0xff] %v11179_v33 }
 0x2b0   : > { %1581 = vst [vmem:[#allocation1] ss:$9 sm:$0xff] %v10996_v21 }
 0x2b7   : > { %v11182_v35 = vld [vmem:[#allocation1] sm:$0xff] }
 0x2b8   : > { %1587 = vst [vmem:[#allocation1] ss:$9 sm:$0xff] %v10962_v12 }
 0x2b9   : > { %1589 = vst [vmem:[#allocation1 + $0x1] ss:$9 sm:$0xff] %v10965_v30 }
 0x2ba   : > { %1591 = vst [vmem:[#allocation1 + $0x2] ss:$9 sm:$0xff] %v10968_v63 }
 0x2bb   : > { %1593 = vst [vmem:[#allocation1 + $0x3] ss:$9 sm:$0xff] %v10973_v62 }
 0x2bc   : > { %1595 = vst [vmem:[#allocation1 + $0x4] ss:$9 sm:$0xff] %v10980_v60 }
 0x2bd   : > { %1597 = vst [vmem:[#allocation1 + $0x5] ss:$9 sm:$0xff] %v10984_v59 }
 0x2be   : > { %1599 = vst [vmem:[#allocation1 + $0x6] ss:$9 sm:$0xff] %v10977_v61 }
 0x2bf   : > { %1601 = vst [vmem:[#allocation1 + $0x7] ss:$9 sm:$0xff] %v10990_v42 }
 0x2c6   : > { %v11192_v28 = vld [vmem:[#allocation1] sm:$0xff] }
 0x2c7   : > { %1603 = vst [vmem:[#allocation1] ss:$9 sm:$0xff] %v10996_v21 }
 0x2ce   : > { %v11195_v29 = vld [vmem:[#allocation1] sm:$0xff] }
 0x2cf   : > { %1640 = vst [vmem:[#allocation1] ss:$9 sm:$0xff] %v11013_v53 }
 0x2d0   : > { %1642 = vst [vmem:[#allocation1 + $0x1] ss:$9 sm:$0xff] %v11016_v50 }
 0x2d1   : > { %1644 = vst [vmem:[#allocation1 + $0x2] ss:$9 sm:$0xff] %v11019_v48 }
 0x2d2   : > { %1646 = vst [vmem:[#allocation1 + $0x3] ss:$9 sm:$0xff] %v11027_v45 }
 0x2d3   : > { %1648 = vst [vmem:[#allocation1 + $0x4] ss:$9 sm:$0xff] %v11031_v43 }
 0x2d4   : > { %1650 = vst [vmem:[#allocation1 + $0x5] ss:$9 sm:$0xff] %v11023_v46 }
 0x2d5   : > { %1652 = vst [vmem:[#allocation1 + $0x6] ss:$9 sm:$0xff] %v11037_v38 }
 0x2d6   : > { %1654 = vst [vmem:[#allocation1 + $0x7] ss:$9 sm:$0xff] %v11040_v54 }
 0x2dd   : > { %v11205_v16 = vld [vmem:[#allocation1] sm:$0xff] }
 0x2de   : > { %16278 = vst [vmem:[#allocation13_spill] sm:$0xff] %v11205_v16  ;;  %v863_v16 = vpop.permute.xlu0 %862 }
 0x2df   : > { %1656 = vst [vmem:[#allocation1] ss:$9 sm:$0xff] %v11047_v49  ;;  %9888 = vmatpush.xpose.msk.msrb.mxu1 %vm864_vm3, %v863_v16 }
 0x2e6   : > { %v11208_v17 = vld [vmem:[#allocation1] sm:$0xff]  ;;  %v861_v24 = vpop.permute.xlu0 %860 }
 0x2e7   : > { %16279 = vst [vmem:[#allocation14_spill] sm:$0xff] %v11208_v17  ;;  %v10205_v17 = vpack.i.bf16 %v11086_v36, %v11073_v3  ;;  %9889 = vmatpush.xpose.msk.msrb.mxu1 %vm864_vm3, %v861_v24  ;;  %v935_v24 = vpop.permute.xlu1 %934 }
 0x2e8   : > { %1662 = vst [vmem:[#allocation1] ss:$9 sm:$0xff] %v11013_v53  ;;  %10178 = vmatpush.xpose.msk.msra.mxu3 %vm864_vm3, %v935_v24 }
 0x2e9   : > { %1664 = vst [vmem:[#allocation1 + $0x1] ss:$9 sm:$0xff] %v11016_v50  ;;  %10206 = vrot.lane.b32.xlu1 %v10205_v17, %s16189_s29 }
 0x2ea   : > { %1666 = vst [vmem:[#allocation1 + $0x2] ss:$9 sm:$0xff] %v11019_v48  ;;  %9890 = vmatmul.msk.f32.vlgmr.msrb.gmra.mxu1 %vm864_vm3, %v10896_v14  ;;  %v1006_v14 = vpop.permute.xlu2 %1005 }
 0x2eb   : > { %1668 = vst [vmem:[#allocation1 + $0x3] ss:$9 sm:$0xff] %v11027_v45  ;;  %9892 = vmatpush.xpose.msk.msra.mxu1 %vm864_vm3, %v935_v24  ;;  %9896 = vmatpush.xpose.msk.msra.mxu2 %vm864_vm3, %v1006_v14 }
 0x2ec   : > { %1670 = vst [vmem:[#allocation1 + $0x4] ss:$9 sm:$0xff] %v11031_v43 }
 0x2ed   : > { %1672 = vst [vmem:[#allocation1 + $0x5] ss:$9 sm:$0xff] %v11023_v46 }
 0x2ee   : > { %1674 = vst [vmem:[#allocation1 + $0x6] ss:$9 sm:$0xff] %v11037_v38  ;;  %v1077_v24 = vpop.permute.xlu0 %1076 }
 0x2ef   : > { %1676 = vst [vmem:[#allocation1 + $0x7] ss:$9 sm:$0xff] %v11040_v54  ;;  %v933_v41 = vpop.permute.xlu1 %932 }
 0x2f0   : > { %9893 = vmatpush.xpose.msk.msra.mxu1 %vm864_vm3, %v933_v41  ;;  %10179 = vmatpush.xpose.msk.msra.mxu3 %vm864_vm3, %v933_v41 }
 0x2f2   : > { %9891 = vmatmul.msk.f32.gmra.mxu1 %vm864_vm3, %v10899_v15  ;;  %v1004_v3 = vpop.permute.xlu2 %1003 }
 0x2f3   : > { %9895 = vmatmul.msk.f32.vlgmr.msra.gmra.mxu3 %vm864_vm3, %v10950_v1  ;;  %9897 = vmatpush.xpose.msk.msra.mxu2 %vm864_vm3, %v1004_v3 }
 0x2f4   : > { %9900 = vmatpush.xpose.msk.msrb.mxu3 %vm864_vm3, %v1077_v24 }
 0x2f6   : > { %v11218_v25 = vld [vmem:[#allocation1] sm:$0xff]  ;;  %9898 = vmatmul.msk.f32.vlgmr.msra.gmra.mxu2 %vm864_vm3, %v10998_v58 }
 0x2f7   : > { %1678 = vst [vmem:[#allocation1] ss:$9 sm:$0xff] %v11047_v49  ;;  %v1075_v41 = vpop.permute.xlu1 %1074 }
 0x2f8   : > { %9901 = vmatpush.xpose.msk.msrb.mxu3 %vm864_vm3, %v1075_v41  ;;  %v1274_v41 = vpop.permute.xlu0 %1273 }
 0x2fa   : > { %9894 = vmatmul.msk.f32.vlgmr.msra.gmra.mxu1 %vm864_vm3, %v10947_v0 }
 0x2fb   : > { %9902 = vmatmul.msk.f32.vlgmr.msrb.gmra.mxu3 %vm864_vm3, %v11049_v2 }
 0x2fe   : > { %v11225_v33 = vld [vmem:[#allocation1] sm:$0xff]  ;;  %9899 = vmatmul.msk.f32.gmra.mxu2 %vm864_vm3, %v11001_v57  ;;  %v1220_v57 = vpop.permute.xlu2 %1219 }
 0x2ff   : > { %1803 = vst [vmem:[#allocation1] ss:$9 sm:$0xff] %v10862_v4  ;;  %9904 = vmatpush.msk.msrb.mxu0 %vm624_vm1, %v1220_v57  ;;  %10180 = vmatpush.msk.msrb.mxu2 %vm624_vm1, %v1220_v57 }
 0x300   : > { %1805 = vst [vmem:[#allocation1 + $0x1] ss:$9 sm:$0xff] %v10865_v5 }
 0x301   : > { %1807 = vst [vmem:[#allocation1 + $0x2] ss:$9 sm:$0xff] %v10868_v6 }
 0x302   : > { %1809 = vst [vmem:[#allocation1 + $0x3] ss:$9 sm:$0xff] %v10871_v7 }
 0x303   : > { %1811 = vst [vmem:[#allocation1 + $0x4] ss:$9 sm:$0xff] %v10875_v8  ;;  %9903 = vmatmul.msk.f32.gmra.mxu3 %vm864_vm3, %v11052_v37 }
 0x304   : > { %1813 = vst [vmem:[#allocation1 + $0x5] ss:$9 sm:$0xff] %v10878_v9 }
 0x305   : > { %1815 = vst [vmem:[#allocation1 + $0x6] ss:$9 sm:$0xff] %v10882_v10 }
 0x306   : > { %1817 = vst [vmem:[#allocation1 + $0x7] ss:$9 sm:$0xff] %v10886_v11 }
 0x30d   : > { %v11241_v16 = vld [vmem:[#allocation1] sm:$0xff] }
 0x30e   : > { %1819 = vst [vmem:[#allocation1] ss:$9 sm:$0xff] %v10894_v13 }
 0x315   : > { %v11244_v17 = vld [vmem:[#allocation1] sm:$0xff] }
 0x316   : > { %16280 = vst [vmem:[#allocation15_spill] sm:$0xff] %v11244_v17 }
 0x317   : > { %1857 = vst [vmem:[#allocation1] ss:$9 sm:$0xff] %v10911_v23 }
 0x318   : > { %1859 = vst [vmem:[#allocation1 + $0x1] ss:$9 sm:$0xff] %v10914_v26 }
 0x319   : > { %1861 = vst [vmem:[#allocation1 + $0x2] ss:$9 sm:$0xff] %v10917_v32 }
 0x31a   : > { %1863 = vst [vmem:[#allocation1 + $0x3] ss:$9 sm:$0xff] %v10922_v34 }
 0x31b   : > { %1865 = vst [vmem:[#allocation1 + $0x4] ss:$9 sm:$0xff] %v10926_v39 }
 0x31c   : > { %1867 = vst [vmem:[#allocation1 + $0x5] ss:$9 sm:$0xff] %v10930_v44 }
 0x31d   : > { %1869 = vst [vmem:[#allocation1 + $0x6] ss:$9 sm:$0xff] %v10934_v47 }
 0x31e   : > { %1871 = vst [vmem:[#allocation1 + $0x7] ss:$9 sm:$0xff] %v10939_v51 }
 0x325   : > { %v11263_v15 = vld [vmem:[#allocation1] sm:$0xff] }
 0x326   : > { %1873 = vst [vmem:[#allocation1] ss:$9 sm:$0xff] %v10945_v56 }
 0x32d   : > { %v11269_v36 = vld [vmem:[#allocation1] sm:$0xff] }
 0x32e   : > { %1911 = vst [vmem:[#allocation1] ss:$9 sm:$0xff] %v10962_v12 }
 0x32f   : > { %1913 = vst [vmem:[#allocation1 + $0x1] ss:$9 sm:$0xff] %v10965_v30 }
 0x330   : > { %1915 = vst [vmem:[#allocation1 + $0x2] ss:$9 sm:$0xff] %v10968_v63 }
 0x331   : > { %1917 = vst [vmem:[#allocation1 + $0x3] ss:$9 sm:$0xff] %v10973_v62 }
 0x332   : > { %1919 = vst [vmem:[#allocation1 + $0x4] ss:$9 sm:$0xff] %v10980_v60 }
 0x333   : > { %1921 = vst [vmem:[#allocation1 + $0x5] ss:$9 sm:$0xff] %v10984_v59 }
 0x334   : > { %1923 = vst [vmem:[#allocation1 + $0x6] ss:$9 sm:$0xff] %v10977_v61 }
 0x335   : > { %1925 = vst [vmem:[#allocation1 + $0x7] ss:$9 sm:$0xff] %v10990_v42 }
 0x33c   : > { %v11281_v58 = vld [vmem:[#allocation1] sm:$0xff] }
 0x33d   : > { %16281 = vst [vmem:[#allocation16_spill] sm:$0xff] %v11281_v58 }
 0x33e   : > { %1927 = vst [vmem:[#allocation1] ss:$9 sm:$0xff] %v10996_v21 }
 0x345   : > { %v11284_v0 = vld [vmem:[#allocation1] sm:$0xff] }
 0x346   : > { %16282 = vst [vmem:[#allocation17_spill] sm:$0xff] %v11284_v0 }
 0x347   : > { %1965 = vst [vmem:[#allocation1] ss:$9 sm:$0xff] %v11013_v53 }
 0x348   : > { %1967 = vst [vmem:[#allocation1 + $0x1] ss:$9 sm:$0xff] %v11016_v50 }
 0x349   : > { %1969 = vst [vmem:[#allocation1 + $0x2] ss:$9 sm:$0xff] %v11019_v48 }
 0x34a   : > { %1971 = vst [vmem:[#allocation1 + $0x3] ss:$9 sm:$0xff] %v11027_v45 }
 0x34b   : > { %1973 = vst [vmem:[#allocation1 + $0x4] ss:$9 sm:$0xff] %v11031_v43 }
 0x34c   : > { %1975 = vst [vmem:[#allocation1 + $0x5] ss:$9 sm:$0xff] %v11023_v46 }
 0x34d   : > { %1977 = vst [vmem:[#allocation1 + $0x6] ss:$9 sm:$0xff] %v11037_v38 }
 0x34e   : > { %1979 = vst [vmem:[#allocation1 + $0x7] ss:$9 sm:$0xff] %v11040_v54 }
 0x355   : > { %v11296_v1 = vld [vmem:[#allocation1] sm:$0xff] }
 0x356   : > { %16283 = vst [vmem:[#allocation18_spill] sm:$0xff] %v11296_v1 }
 0x357   : > { %1981 = vst [vmem:[#allocation1] ss:$9 sm:$0xff] %v11047_v49 }
 0x35b   : > { %v10207_v57 = vpop.permute.xlu1 %10206 }
 0x35c   : > { %v10208_v24 = vunpack.i.l.bf16 %v10207_v57  ;;  %v10209_v37 = vunpack.i.h.bf16 %v10207_v57 }
 0x35e   : > { %v11300_v14 = vld [vmem:[#allocation1] sm:$0xff]  ;;  %1245 = vmatpush.msrb.mxu0 %v10208_v24  ;;  %10181 = vmatpush.msrb.mxu2 %v10208_v24 }
 0x35f   : > { %16284 = vst [vmem:[#allocation19_spill] sm:$0xff] %v11300_v14 }
 0x360   : > { %2019 = vst [vmem:[#allocation1] ss:$9 sm:$0xff] %v10862_v4  ;;  %9907 = vmatpush.msk.msra.mxu2 %vm624_vm1, %v1274_v41 }
 0x361   : > { %2021 = vst [vmem:[#allocation1 + $0x1] ss:$9 sm:$0xff] %v10865_v5 }
 0x362   : > { %2023 = vst [vmem:[#allocation1 + $0x2] ss:$9 sm:$0xff] %v10868_v6  ;;  %1299 = vmatpush.msra.mxu2 %v10209_v37 }
 0x363   : > { %2025 = vst [vmem:[#allocation1 + $0x3] ss:$9 sm:$0xff] %v10871_v7 }
 0x364   : > { %2027 = vst [vmem:[#allocation1 + $0x4] ss:$9 sm:$0xff] %v10875_v8 }
 0x365   : > { %2029 = vst [vmem:[#allocation1 + $0x5] ss:$9 sm:$0xff] %v10878_v9 }
 0x366   : > { %2031 = vst [vmem:[#allocation1 + $0x6] ss:$9 sm:$0xff] %v10882_v10 }
 0x367   : > { %2033 = vst [vmem:[#allocation1 + $0x7] ss:$9 sm:$0xff] %v10886_v11  ;;  %v11329_v24 = vpop.f32.mrf.mxu1 }
 0x368   : > { %v1110_v1 = vsel %vm1109_vm4, %v11329_v24, -inf }
 0x369   : > { %1111 = vmax.xlane.f32.xlu2 %v1110_v1 }
 0x36e   : > { %v11315_v3 = vld [vmem:[#allocation1] sm:$0xff] }
 0x36f   : > { %16285 = vst [vmem:[#allocation20_spill] sm:$0xff] %v11315_v3  ;;  %v11336_v57 = vpop.f32.mrf.mxu1 }
 0x370   : > { %2035 = vst [vmem:[#allocation1] ss:$9 sm:$0xff] %v10894_v13  ;;  %v1114_v41 = vsel %vm1113_vm5, %v11336_v57, -inf }
 0x371   : > { %1115 = vmax.xlane.f32.xlu2 %v1114_v41 }
 0x377   : > { %v11318_v2 = vld [vmem:[#allocation1] sm:$0xff]  ;;  %v11353_v41 = vpop.f32.mrf.mxu1 }
 0x378   : > { %16286 = vst [vmem:[#allocation21_spill] sm:$0xff] %v11318_v2 }
 0x379   : > { %2041 = vst [vmem:[#allocation1] ss:$9 sm:$0xff] %v10862_v4 }
 0x37a   : > { %2043 = vst [vmem:[#allocation1 + $0x1] ss:$9 sm:$0xff] %v10865_v5 }
 0x37b   : > { %2045 = vst [vmem:[#allocation1 + $0x2] ss:$9 sm:$0xff] %v10868_v6 }
 0x37c   : > { %2047 = vst [vmem:[#allocation1 + $0x3] ss:$9 sm:$0xff] %v10871_v7 }
 0x37d   : > { %2049 = vst [vmem:[#allocation1 + $0x4] ss:$9 sm:$0xff] %v10875_v8 }
 0x37e   : > { %2051 = vst [vmem:[#allocation1 + $0x5] ss:$9 sm:$0xff] %v10878_v9 }
 0x37f   : > { %2053 = vst [vmem:[#allocation1 + $0x6] ss:$9 sm:$0xff] %v10882_v10 }
 0x380   : > { %2055 = vst [vmem:[#allocation1 + $0x7] ss:$9 sm:$0xff] %v10886_v11 }
 0x387   : > { %v11333_v2 = vld [vmem:[#allocation1] sm:$0xff] }
 0x388   : > { %16287 = vst [vmem:[#allocation22_spill] sm:$0xff] %v11333_v2 }
 0x389   : > { %2057 = vst [vmem:[#allocation1] ss:$9 sm:$0xff] %v10894_v13 }
 0x390   : > { %v11340_v37 = vld [vmem:[#allocation1] sm:$0xff] }
 0x391   : > { %16288 = vst [vmem:[#allocation23_spill] sm:$0xff] %v11340_v37  ;;  %v1117_v37 = vsel %vm1109_vm4, %v11353_v41, -inf }
 0x392   : > { %2094 = vst [vmem:[#allocation1] ss:$9 sm:$0xff] %v10911_v23  ;;  %1118 = vmax.xlane.f32.xlu0 %v1117_v37  ;;  %v11371_v37 = vpop.f32.mrf.mxu2 }
 0x393   : > { %2096 = vst [vmem:[#allocation1 + $0x1] ss:$9 sm:$0xff] %v10914_v26  ;;  %v1123_v3 = vsel %vm1109_vm4, %v11371_v37, -inf }
 0x394   : > { %2098 = vst [vmem:[#allocation1 + $0x2] ss:$9 sm:$0xff] %v10917_v32  ;;  %1124 = vmax.xlane.f32.xlu2 %v1123_v3 }
 0x395   : > { %2100 = vst [vmem:[#allocation1 + $0x3] ss:$9 sm:$0xff] %v10922_v34 }
 0x396   : > { %2102 = vst [vmem:[#allocation1 + $0x4] ss:$9 sm:$0xff] %v10926_v39 }
 0x397   : > { %2104 = vst [vmem:[#allocation1 + $0x5] ss:$9 sm:$0xff] %v10930_v44 }
 0x398   : > { %2106 = vst [vmem:[#allocation1 + $0x6] ss:$9 sm:$0xff] %v10934_v47 }
 0x399   : > { %2108 = vst [vmem:[#allocation1 + $0x7] ss:$9 sm:$0xff] %v10939_v51 }
 0x39a   : > { %v11378_v2 = vpop.f32.mrf.mxu2 }
 0x39b   : > { %v1126_v0 = vsel %vm1113_vm5, %v11378_v2, -inf }
 0x39c   : > { %1127 = vmax.xlane.f32.xlu0 %v1126_v0 }
 0x3a0   : > { %v11350_v1 = vld [vmem:[#allocation1] sm:$0xff] }
 0x3a1   : > { %16289 = vst [vmem:[#allocation24_spill] sm:$0xff] %v11350_v1  ;;  %v11364_v1 = vpop.f32.mrf.mxu3 }
 0x3a2   : > { %2110 = vst [vmem:[#allocation1] ss:$9 sm:$0xff] %v10945_v56 }
 0x3a9   : > { %v11355_v14 = vld [vmem:[#allocation1] sm:$0xff] }
 0x3aa   : > { %16290 = vst [vmem:[#allocation25_spill] sm:$0xff] %v11355_v14  ;;  %v1120_v14 = vsel %vm1113_vm5, %v11364_v1, -inf }
 0x3ab   : > { %2116 = vst [vmem:[#allocation1] ss:$9 sm:$0xff] %v10911_v23  ;;  %1121 = vmax.xlane.f32.xlu1 %v1120_v14 }
 0x3ac   : > { %2118 = vst [vmem:[#allocation1 + $0x1] ss:$9 sm:$0xff] %v10914_v26  ;;  %1508 = vrot.lane.b32.xlu2 %v11151_v52, %s16187_s18 }
 0x3ad   : > { %2120 = vst [vmem:[#allocation1 + $0x2] ss:$9 sm:$0xff] %v10917_v32 }
 0x3ae   : > { %2122 = vst [vmem:[#allocation1 + $0x3] ss:$9 sm:$0xff] %v10922_v34 }
 0x3af   : > { %2124 = vst [vmem:[#allocation1 + $0x4] ss:$9 sm:$0xff] %v10926_v39 }
 0x3b0   : > { %2126 = vst [vmem:[#allocation1 + $0x5] ss:$9 sm:$0xff] %v10930_v44 }
 0x3b1   : > { %2128 = vst [vmem:[#allocation1 + $0x6] ss:$9 sm:$0xff] %v10934_v47 }
 0x3b2   : > { %2130 = vst [vmem:[#allocation1 + $0x7] ss:$9 sm:$0xff] %v10939_v51 }
 0x3b4   : > { %1325 = vrot.lane.b32.xlu2 %v11099_v31, %s16189_s29  ;;  %v11416_v31 = vpop.f32.mrf.mxu3 }
 0x3b5   : > { %v1129_v3 = vsel %vm1109_vm4, %v11416_v31, -inf }
 0x3b6   : > { %1130 = vmax.xlane.f32.xlu0 %v1129_v3 }
 0x3b9   : > { %v11375_v58 = vld [vmem:[#allocation1] sm:$0xff] }
 0x3ba   : > { %16291 = vst [vmem:[#allocation26_spill] sm:$0xff] %v11375_v58 }
 0x3bb   : > { %2132 = vst [vmem:[#allocation1] ss:$9 sm:$0xff] %v10945_v56 }
 0x3bc   : > { %1457 = vrot.lane.b32.xlu2 %v11141_v18, %s16185_s0  ;;  %v11428_v18 = vpop.f32.mrf.mxu3 }
 0x3c2   : > { %v11382_v17 = vld [vmem:[#allocation1] sm:$0xff] }
 0x3c3   : > { %16292 = vst [vmem:[#allocation27_spill] sm:$0xff] %v11382_v17 }
 0x3c4   : > { %2169 = vst [vmem:[#allocation1] ss:$9 sm:$0xff] %v10962_v12  ;;  %1455 = vrot.lane.b32.xlu2 %v11138_v19, %s16185_s0  ;;  %v1132_v19 = vsel %vm1113_vm5, %v11428_v18, -inf }
 0x3c5   : > { %2171 = vst [vmem:[#allocation1 + $0x1] ss:$9 sm:$0xff] %v10965_v30  ;;  %1133 = vmax.xlane.f32.xlu1 %v1132_v19 }
 0x3c6   : > { %2173 = vst [vmem:[#allocation1 + $0x2] ss:$9 sm:$0xff] %v10968_v63 }
 0x3c7   : > { %2175 = vst [vmem:[#allocation1 + $0x3] ss:$9 sm:$0xff] %v10973_v62 }
 0x3c8   : > { %2177 = vst [vmem:[#allocation1 + $0x4] ss:$9 sm:$0xff] %v10980_v60 }
 0x3c9   : > { %2179 = vst [vmem:[#allocation1 + $0x5] ss:$9 sm:$0xff] %v10984_v59 }
 0x3ca   : > { %2181 = vst [vmem:[#allocation1 + $0x6] ss:$9 sm:$0xff] %v10977_v61 }
 0x3cb   : > { %2183 = vst [vmem:[#allocation1 + $0x7] ss:$9 sm:$0xff] %v10990_v42 }
 0x3cc   : > { %1607 = vrot.lane.b32.xlu2 %v11195_v29, %s16185_s0 }
 0x3d2   : > { %v11392_v14 = vld [vmem:[#allocation1] sm:$0xff] }
 0x3d3   : > { %16293 = vst [vmem:[#allocation28_spill] sm:$0xff] %v11392_v14 }
 0x3d4   : > { %2185 = vst [vmem:[#allocation1] ss:$9 sm:$0xff] %v10996_v21  ;;  %1435 = vrot.lane.b32.xlu2 %v11128_v20, %s16187_s18 }
 0x3db   : > { %v11397_v0 = vld [vmem:[#allocation1] sm:$0xff] }
 0x3dc   : > { %16294 = vst [vmem:[#allocation29_spill] sm:$0xff] %v11397_v0  ;;  %v1112_v3 = vpop.xlane.xlu2 %1111 }
 0x3dd   : > { %2191 = vst [vmem:[#allocation1] ss:$9 sm:$0xff] %v10962_v12  ;;  %v1135_v14 = vsub.f32 %v11329_v24, %v1112_v3 }
 0x3de   : > { %2193 = vst [vmem:[#allocation1 + $0x1] ss:$9 sm:$0xff] %v10965_v30 }
 0x3df   : > { %2195 = vst [vmem:[#allocation1 + $0x2] ss:$9 sm:$0xff] %v10968_v63 }
 0x3e0   : > { %2197 = vst [vmem:[#allocation1 + $0x3] ss:$9 sm:$0xff] %v10973_v62 }
 0x3e1   : > { %2199 = vst [vmem:[#allocation1 + $0x4] ss:$9 sm:$0xff] %v10980_v60 }
 0x3e2   : > { %2201 = vst [vmem:[#allocation1 + $0x5] ss:$9 sm:$0xff] %v10984_v59 }
 0x3e3   : > { %2203 = vst [vmem:[#allocation1 + $0x6] ss:$9 sm:$0xff] %v10977_v61 }
 0x3e4   : > { %2205 = vst [vmem:[#allocation1 + $0x7] ss:$9 sm:$0xff] %v10990_v42  ;;  %v1116_v58 = vpop.xlane.xlu2 %1115 }
 0x3e5   : > { %v1136_v19 = vsub.f32 %v11336_v57, %v1116_v58 }
 0x3e7   : > { %v1145_v20 = vmul.f32 1.442695, %v1136_v19 }
 0x3eb   : > { %v11411_v52 = vld [vmem:[#allocation1] sm:$0xff] }
 0x3ec   : > { %16295 = vst [vmem:[#allocation30_spill] sm:$0xff] %v11411_v52 }
 0x3ed   : > { %2207 = vst [vmem:[#allocation1] ss:$9 sm:$0xff] %v10996_v21 }
 0x3f4   : > { %v11420_v0 = vld [vmem:[#allocation1] sm:$0xff] }
 0x3f5   : > { %16296 = vst [vmem:[#allocation31_spill] sm:$0xff] %v11420_v0  ;;  %v1143_v0 = vmul.f32 1.442695, %v1135_v14 }
 0x3f6   : > { %2244 = vst [vmem:[#allocation1] ss:$9 sm:$0xff] %v11013_v53 }
 0x3f7   : > { %2246 = vst [vmem:[#allocation1 + $0x1] ss:$9 sm:$0xff] %v11016_v50  ;;  %10267 = vpow2.f32 %v1143_v0 }
 0x3f8   : > { %2248 = vst [vmem:[#allocation1 + $0x2] ss:$9 sm:$0xff] %v11019_v48  ;;  %10269 = vpow2.f32 %v1145_v20 }
 0x3f9   : > { %2250 = vst [vmem:[#allocation1 + $0x3] ss:$9 sm:$0xff] %v11027_v45 }
 0x3fa   : > { %2252 = vst [vmem:[#allocation1 + $0x4] ss:$9 sm:$0xff] %v11031_v43 }
 0x3fb   : > { %2254 = vst [vmem:[#allocation1 + $0x5] ss:$9 sm:$0xff] %v11023_v46 }
 0x3fc   : > { %2256 = vst [vmem:[#allocation1 + $0x6] ss:$9 sm:$0xff] %v11037_v38 }
 0x3fd   : > { %2258 = vst [vmem:[#allocation1 + $0x7] ss:$9 sm:$0xff] %v11040_v54  ;;  %v11447_v17 = vpop.eup %10267 }
 0x3fe   : > { %v1159_v24 = vsel %vm1109_vm4, %v11447_v17, 0.0  ;;  %v11457_v58 = vpop.eup %10269 }
 0x3ff   : > { %1160 = vadd.xlane.f32.xlu0 %v1159_v24  ;;  %v1162_v57 = vsel %vm1113_vm5, %v11457_v58, 0.0 }
 0x400   : > { %1163 = vadd.xlane.f32.xlu1 %v1162_v57 }
 0x404   : > { %v11438_v29 = vld [vmem:[#allocation1] sm:$0xff] }
 0x405   : > { %16297 = vst [vmem:[#allocation32_spill] sm:$0xff] %v11438_v29 }
 0x406   : > { %2260 = vst [vmem:[#allocation1] ss:$9 sm:$0xff] %v11047_v49 }
 0x407   : > { %v1125_v24 = vpop.xlane.xlu2 %1124 }
 0x40d   : > { %v11442_v52 = vld [vmem:[#allocation1] sm:$0xff] }
 0x40e   : > { %16298 = vst [vmem:[#allocation33_spill] sm:$0xff] %v11442_v52 }
 0x40f   : > { %2266 = vst [vmem:[#allocation1] ss:$9 sm:$0xff] %v11013_v53 }
 0x410   : > { %2268 = vst [vmem:[#allocation1 + $0x1] ss:$9 sm:$0xff] %v11016_v50 }
 0x411   : > { %2270 = vst [vmem:[#allocation1 + $0x2] ss:$9 sm:$0xff] %v11019_v48 }
 0x412   : > { %2272 = vst [vmem:[#allocation1 + $0x3] ss:$9 sm:$0xff] %v11027_v45 }
 0x413   : > { %2274 = vst [vmem:[#allocation1 + $0x4] ss:$9 sm:$0xff] %v11031_v43  ;;  %1327 = vrot.lane.b32.xlu0 %v11102_v27, %s16189_s29 }
 0x414   : > { %2276 = vst [vmem:[#allocation1 + $0x5] ss:$9 sm:$0xff] %v11023_v46 }
 0x415   : > { %2278 = vst [vmem:[#allocation1 + $0x6] ss:$9 sm:$0xff] %v11037_v38 }
 0x416   : > { %2280 = vst [vmem:[#allocation1 + $0x7] ss:$9 sm:$0xff] %v11040_v54 }
 0x419   : > { %1530 = vrot.lane.b32.xlu1 %v11168_v40, %s16185_s0 }
 0x41b   : > { %1510 = vrot.lane.b32.xlu0 %v11154_v55, %s16187_s18 }
 0x41d   : > { %v11461_v14 = vld [vmem:[#allocation1] sm:$0xff] }
 0x41e   : > { %16299 = vst [vmem:[#allocation34_spill] sm:$0xff] %v11461_v14  ;;  %v1122_v3 = vpop.xlane.xlu1 %1121 }
 0x41f   : > { %2282 = vst [vmem:[#allocation1] ss:$9 sm:$0xff] %v11047_v49  ;;  %v1138_v19 = vsub.f32 %v11364_v1, %v1122_v3  ;;  %v11490_v3 = vpop.permute.xlu0 %1532 }
 0x421   : > { %v1149_v20 = vmul.f32 1.442695, %v1138_v19  ;;  %v11494_v19 = vpop.permute.xlu2 %1508 }
 0x423   : > { %10271 = vpow2.f32 %v1149_v20  ;;  %1433 = vrot.lane.b32.xlu0 %v11125_v22, %s16187_s18 }
 0x426   : > { %v11464_v0 = vld [vmem:[#allocation1] sm:$0xff] }
 0x427   : > { %16300 = vst [vmem:[#allocation35_spill] sm:$0xff] %v11464_v0  ;;  %v1119_v22 = vpop.xlane.xlu0 %1118 }
 0x428   : > { %2407 = vst [vmem:[#allocation1] ss:$9 sm:$0xff] %v10862_v4  ;;  %v1137_v52 = vsub.f32 %v11353_v41, %v1119_v22 }
 0x429   : > { %2409 = vst [vmem:[#allocation1 + $0x1] ss:$9 sm:$0xff] %v10865_v5  ;;  %v11484_v57 = vpop.eup %10271  ;;  %v11504_v40 = vpop.permute.xlu2 %1325 }
 0x42a   : > { %2411 = vst [vmem:[#allocation1 + $0x2] ss:$9 sm:$0xff] %v10868_v6  ;;  %v1168_v1 = vsel %vm1113_vm5, %v11484_v57, 0.0 }
 0x42b   : > { %2413 = vst [vmem:[#allocation1 + $0x3] ss:$9 sm:$0xff] %v10871_v7  ;;  %1169 = vadd.xlane.f32.xlu2 %v1168_v1 }
 0x42c   : > { %2415 = vst [vmem:[#allocation1 + $0x4] ss:$9 sm:$0xff] %v10875_v8 }
 0x42d   : > { %2417 = vst [vmem:[#allocation1 + $0x5] ss:$9 sm:$0xff] %v10878_v9 }
 0x42e   : > { %2419 = vst [vmem:[#allocation1 + $0x6] ss:$9 sm:$0xff] %v10882_v10 }
 0x42f   : > { %2421 = vst [vmem:[#allocation1 + $0x7] ss:$9 sm:$0xff] %v10886_v11  ;;  %v1128_v20 = vpop.xlane.xlu0 %1127 }
 0x430   : > { %v1140_v14 = vsub.f32 %v11378_v2, %v1128_v20 }
 0x432   : > { %v1153_v29 = vmul.f32 1.442695, %v1140_v14  ;;  %v1139_v14 = vsub.f32 %v11371_v37, %v1125_v24 }
 0x434   : > { %10273 = vpow2.f32 %v1153_v29 }
 0x436   : > { %v11479_v27 = vld [vmem:[#allocation1] sm:$0xff] }
 0x437   : > { %16301 = vst [vmem:[#allocation36_spill] sm:$0xff] %v11479_v27  ;;  %v1458_v27 = vpop.permute.xlu2 %1457 }
 0x438   : > { %2423 = vst [vmem:[#allocation1] ss:$9 sm:$0xff] %v10894_v13  ;;  %9916 = vmatpush.xpose.msk.msra.mxu0 %vm864_vm3, %v1458_v27  ;;  %v1131_v27 = vpop.xlane.xlu0 %1130  ;;  %v1134_v37 = vpop.xlane.xlu1 %1133 }
 0x43f   : > { %v11492_v55 = vld [vmem:[#allocation1] sm:$0xff] }
 0x440   : > { %16302 = vst [vmem:[#allocation37_spill] sm:$0xff] %v11492_v55  ;;  %v1147_v55 = vmul.f32 1.442695, %v1137_v52 }
 0x441   : > { %2461 = vst [vmem:[#allocation1] ss:$9 sm:$0xff] %v10911_v23 }
 0x442   : > { %2463 = vst [vmem:[#allocation1 + $0x1] ss:$9 sm:$0xff] %v10914_v26  ;;  %10275 = vpow2.f32 %v1147_v55  ;;  %v1141_v55 = vsub.f32 %v11416_v31, %v1131_v27  ;;  %v1142_v31 = vsub.f32 %v11428_v18, %v1134_v37  ;;  %v16306_v37 = vld [vmem:[#allocation11_spill] sm:$0xff] }
 0x443   : > { %2465 = vst [vmem:[#allocation1 + $0x2] ss:$9 sm:$0xff] %v10917_v32  ;;  %1585 = vrot.lane.b32.xlu2 %v11182_v35, %s16187_s18  ;;  %v11523_v35 = vpop.eup %10273 }
 0x444   : > { %2467 = vst [vmem:[#allocation1 + $0x3] ss:$9 sm:$0xff] %v10922_v34  ;;  %v1174_v41 = vsel %vm1113_vm5, %v11523_v35, 0.0  ;;  %v1155_v20 = vmul.f32 1.442695, %v1141_v55 }
 0x445   : > { %2469 = vst [vmem:[#allocation1 + $0x4] ss:$9 sm:$0xff] %v10926_v39  ;;  %1175 = vadd.xlane.f32.xlu1 %v1174_v41  ;;  %v1157_v41 = vmul.f32 1.442695, %v1142_v31 }
 0x446   : > { %2471 = vst [vmem:[#allocation1 + $0x5] ss:$9 sm:$0xff] %v10930_v44  ;;  %10277 = vpow2.f32 %v1155_v20 }
 0x447   : > { %2473 = vst [vmem:[#allocation1 + $0x6] ss:$9 sm:$0xff] %v10934_v47 }
 0x448   : > { %2475 = vst [vmem:[#allocation1 + $0x7] ss:$9 sm:$0xff] %v10939_v51  ;;  %v11527_v2 = vpop.eup %10275 }
 0x449   : > { %v1165_v52 = vsel %vm1109_vm4, %v11527_v2, 0.0 }
 0x44c   : > { %v11549_v24 = vpop.eup %10277 }
 0x44d   : > { %1166 = vadd.xlane.f32.xlu0 %v1165_v52  ;;  %v1177_v52 = vsel %vm1109_vm4, %v11549_v24, 0.0 }
 0x44e   : > { %1178 = vadd.xlane.f32.xlu1 %v1177_v52 }
 0x44f   : > { %v11506_v1 = vld [vmem:[#allocation1] sm:$0xff] }
 0x450   : > { %16303 = vst [vmem:[#allocation38_spill] sm:$0xff] %v11506_v1  ;;  %v1456_v1 = vpop.permute.xlu2 %1455 }
 0x451   : > { %2477 = vst [vmem:[#allocation1] ss:$9 sm:$0xff] %v10945_v56  ;;  %9917 = vmatpush.xpose.msk.msra.mxu0 %vm864_vm3, %v1456_v1  ;;  %v1151_v1 = vmul.f32 1.442695, %v1139_v14 }
 0x453   : > { %10279 = vpow2.f32 %v1151_v1  ;;  %v16305_v1 = vld [vmem:[#allocation12_spill] sm:$0xff] }
 0x454   : > { %10281 = vpow2.f32 %v1157_v41 }
 0x458   : > { %v11514_v0 = vld [vmem:[#allocation1] sm:$0xff] }
 0x459   : > { %2515 = vst [vmem:[#allocation1] ss:$9 sm:$0xff] %v10962_v12  ;;  %v11555_v14 = vpop.eup %10279 }
 0x45a   : > { %2517 = vst [vmem:[#allocation1 + $0x1] ss:$9 sm:$0xff] %v10965_v30  ;;  %v1171_v18 = vsel %vm1109_vm4, %v11555_v14, 0.0  ;;  %v11562_v55 = vpop.eup %10281 }
 0x45b   : > { %2519 = vst [vmem:[#allocation1 + $0x2] ss:$9 sm:$0xff] %v10968_v63  ;;  %v1180_v20 = vsel %vm1113_vm5, %v11562_v55, 0.0 }
 0x45c   : > { %2521 = vst [vmem:[#allocation1 + $0x3] ss:$9 sm:$0xff] %v10973_v62  ;;  %1181 = vadd.xlane.f32.xlu1 %v1180_v20 }
 0x45d   : > { %2523 = vst [vmem:[#allocation1 + $0x4] ss:$9 sm:$0xff] %v10980_v60 }
 0x45e   : > { %2525 = vst [vmem:[#allocation1 + $0x5] ss:$9 sm:$0xff] %v10984_v59 }
 0x45f   : > { %2527 = vst [vmem:[#allocation1 + $0x6] ss:$9 sm:$0xff] %v10977_v61 }
 0x460   : > { %2529 = vst [vmem:[#allocation1 + $0x7] ss:$9 sm:$0xff] %v10990_v42 }
 0x461   : > { %1605 = vrot.lane.b32.xlu0 %v11192_v28, %s16185_s0 }
 0x467   : > { %v11533_v29 = vld [vmem:[#allocation1] sm:$0xff] }
 0x468   : > { %2531 = vst [vmem:[#allocation1] ss:$9 sm:$0xff] %v10996_v21 }
 0x469   : > { %1583 = vrot.lane.b32.xlu0 %v16305_v1, %s16187_s18  ;;  %v16307_v1 = vld [vmem:[#allocation10_spill] sm:$0xff] }
 0x46c   : > { %1172 = vadd.xlane.f32.xlu2 %v1171_v18 }
 0x46f   : > { %v11538_v22 = vld [vmem:[#allocation1] sm:$0xff] }
 0x470   : > { %2569 = vst [vmem:[#allocation1] ss:$9 sm:$0xff] %v11013_v53 }
 0x471   : > { %2571 = vst [vmem:[#allocation1 + $0x1] ss:$9 sm:$0xff] %v11016_v50  ;;  %1381 = vrot.lane.b32.xlu0 %v16306_v37, %s16189_s29 }
 0x472   : > { %2573 = vst [vmem:[#allocation1 + $0x2] ss:$9 sm:$0xff] %v11019_v48  ;;  %v1161_v31 = vpop.xlane.xlu0 %1160 }
 0x473   : > { %2575 = vst [vmem:[#allocation1 + $0x3] ss:$9 sm:$0xff] %v11027_v45  ;;  %10283 = vrcp.f32 %v1161_v31  ;;  %v1164_v52 = vpop.xlane.xlu1 %1163  ;;  %v16308_v31 = vld [vmem:[#allocation14_spill] sm:$0xff] }
 0x474   : > { %2577 = vst [vmem:[#allocation1 + $0x4] ss:$9 sm:$0xff] %v11031_v43  ;;  %10285 = vrcp.f32 %v1164_v52  ;;  %v16310_v52 = vld [vmem:[#allocation13_spill] sm:$0xff] }
 0x475   : > { %2579 = vst [vmem:[#allocation1 + $0x5] ss:$9 sm:$0xff] %v11023_v46  ;;  %1680 = vrot.lane.b32.xlu1 %v11218_v25, %s16185_s0  ;;  %v1608_v25 = vpop.permute.xlu2 %1607 }
 0x476   : > { %2581 = vst [vmem:[#allocation1 + $0x6] ss:$9 sm:$0xff] %v11037_v38 }
 0x477   : > { %2583 = vst [vmem:[#allocation1 + $0x7] ss:$9 sm:$0xff] %v11040_v54 }
 0x479   : > { %v10284_v41 = vpop.eup %10283  ;;  %1682 = vrot.lane.b32.xlu0 %v11225_v33, %s16185_s0  ;;  %s16443_s0 = smov 88  }
 0x47a   : > { %v1191_v18 = vmul.f32 %v10284_v41, %v11447_v17  ;;  %v10286_v37 = vpop.eup %10285 }
 0x47b   : > { %v1192_v33 = vmul.f32 %v10286_v37, %v11457_v58  ;;  %v10210_v58 = vpack.i.bf16 %v11241_v16, %v11263_v15  ;;  %v16311_v16 = vld [vmem:[#allocation15_spill] sm:$0xff]  ;;  %v16312_v15 = vld [vmem:[#allocation17_spill] sm:$0xff] }
 0x47c   : > { %9905 = vmatmul.msk.f32.vlgmr.msrb.gmra.mxu0 %vm1109_vm4, %v1191_v18  ;;  %v16314_v37 = vld [vmem:[#allocation27_spill] sm:$0xff] }
 0x47d   : > { %9906 = vmatmul.msk.f32.vlgmr.msrb.gmra.mxu2 %vm1109_vm4, %v1192_v33  ;;  %10211 = vrot.lane.b32.xlu1 %v10210_v58, %s16183_s19  ;;  %v16318_v58 = vld [vmem:[#allocation24_spill] sm:$0xff] }
 0x47e   : > { %v11557_v27 = vld [vmem:[#allocation1] sm:$0xff]  ;;  %9920 = vmatpush.xpose.msk.msrb.mxu2 %vm864_vm3, %v11490_v3 }
 0x47f   : > { %16304 = vst [vmem:[#allocation39_spill] sm:$0xff] %v11557_v27 }
 0x480   : > { %2585 = vst [vmem:[#allocation1] ss:$9 sm:$0xff] %v11047_v49 }
 0x481   : > { %1660 = vrot.lane.b32.xlu0 %v16308_v31, %s16187_s18  ;;  %v16315_v31 = vld [vmem:[#allocation16_spill] sm:$0xff] }
 0x484   : > { %1379 = vrot.lane.b32.xlu2 %v16307_v1, %s16189_s29  ;;  %s16440_s29 = smov 64  }
 0x485   : > { %v1328_v41 = vpop.permute.xlu0 %1327 }
 0x486   : > { %9910 = vmatpush.msk.msra.mxu3 %vm624_vm1, %v1328_v41  ;;  %v1436_v41 = vpop.permute.xlu2 %1435 }
 0x487   : > { %v11568_v28 = vld [vmem:[#allocation1] sm:$0xff] }
 0x488   : > { %2623 = vst [vmem:[#allocation1] ss:$9 sm:$0xff] %v10862_v4  ;;  %1353 = vmatpush.msra.mxu3 %v11504_v40 }
 0x489   : > { %2625 = vst [vmem:[#allocation1 + $0x1] ss:$9 sm:$0xff] %v10865_v5  ;;  %1877 = vrot.lane.b32.xlu0 %v11269_v36, %s16183_s19  ;;  %v16313_v36 = vld [vmem:[#allocation22_spill] sm:$0xff] }
 0x48a   : > { %2627 = vst [vmem:[#allocation1 + $0x2] ss:$9 sm:$0xff] %v10868_v6  ;;  %9924 = vmatpush.xpose.msk.msrb.mxu3 %vm864_vm3, %v1608_v25  ;;  %2059 = vrot.lane.b32.xlu1 %v16313_v36, %s16181_s1  ;;  %v16317_v25 = vld [vmem:[#allocation20_spill] sm:$0xff] }
 0x48b   : > { %2629 = vst [vmem:[#allocation1 + $0x3] ss:$9 sm:$0xff] %v10871_v7  ;;  %v1531_v40 = vpop.permute.xlu1 %1530 }
 0x48c   : > { %2631 = vst [vmem:[#allocation1 + $0x4] ss:$9 sm:$0xff] %v10875_v8  ;;  %1658 = vrot.lane.b32.xlu2 %v16310_v52, %s16187_s18  ;;  %9921 = vmatpush.xpose.msk.msrb.mxu2 %vm864_vm3, %v1531_v40  ;;  %v16316_v52 = vld [vmem:[#allocation26_spill] sm:$0xff]  ;;  %v16320_v40 = vld [vmem:[#allocation23_spill] sm:$0xff]  ;;  %s16460_s18 = smov 56  }
 0x48d   : > { %2633 = vst [vmem:[#allocation1 + $0x5] ss:$9 sm:$0xff] %v10878_v9  ;;  %v11617_v3 = vpop.permute.xlu0 %1510 }
 0x48e   : > { %2635 = vst [vmem:[#allocation1 + $0x6] ss:$9 sm:$0xff] %v10882_v10 }
 0x48f   : > { %2637 = vst [vmem:[#allocation1 + $0x7] ss:$9 sm:$0xff] %v10886_v11 }
 0x491   : > { %1931 = vrot.lane.b32.xlu0 %v16312_v15, %s16183_s19 }
 0x494   : > { %1823 = vrot.lane.b32.xlu2 %v16311_v16, %s16183_s19  ;;  %v16319_v16 = vld [vmem:[#allocation25_spill] sm:$0xff] }
 0x495   : > { %v1434_v1 = vpop.permute.xlu0 %1433 }
 0x496   : > { %v11583_v20 = vld [vmem:[#allocation1] sm:$0xff]  ;;  %9918 = vmatmul.msk.f32.vlgmr.msra.gmra.mxu0 %vm864_vm3, %v1434_v1 }
 0x497   : > { %2639 = vst [vmem:[#allocation1] ss:$9 sm:$0xff] %v10894_v13 }
 0x499   : > { %1929 = vrot.lane.b32.xlu0 %v16315_v31, %s16183_s19 }
 0x49c   : > { %2136 = vrot.lane.b32.xlu2 %v16314_v37, %s16181_s1 }
 0x49e   : > { %v11594_v17 = vld [vmem:[#allocation1] sm:$0xff]  ;;  %9919 = vmatmul.msk.f32.gmra.mxu0 %vm864_vm3, %v1436_v41  ;;  %v1170_v31 = vpop.xlane.xlu2 %1169 }
 0x49f   : > { %16309 = vst [vmem:[#allocation12_spill] sm:$0xff] %v11594_v17 }
 0x4a0   : > { %2645 = vst [vmem:[#allocation1] ss:$9 sm:$0xff] %v10862_v4 }
 0x4a1   : > { %2647 = vst [vmem:[#allocation1 + $0x1] ss:$9 sm:$0xff] %v10865_v5  ;;  %2037 = vrot.lane.b32.xlu0 %v16317_v25, %s16179_s20 }
 0x4a2   : > { %2649 = vst [vmem:[#allocation1 + $0x2] ss:$9 sm:$0xff] %v10868_v6 }
 0x4a3   : > { %2651 = vst [vmem:[#allocation1 + $0x3] ss:$9 sm:$0xff] %v10871_v7 }
 0x4a4   : > { %2653 = vst [vmem:[#allocation1 + $0x4] ss:$9 sm:$0xff] %v10875_v8  ;;  %2134 = vrot.lane.b32.xlu2 %v16316_v52, %s16181_s1 }
 0x4a5   : > { %2655 = vst [vmem:[#allocation1 + $0x5] ss:$9 sm:$0xff] %v10878_v9 }
 0x4a6   : > { %2657 = vst [vmem:[#allocation1 + $0x6] ss:$9 sm:$0xff] %v10882_v10 }
 0x4a7   : > { %2659 = vst [vmem:[#allocation1 + $0x7] ss:$9 sm:$0xff] %v10886_v11 }
 0x4a9   : > { %2114 = vrot.lane.b32.xlu0 %v16319_v16, %s16179_s20 }
 0x4ac   : > { %2112 = vrot.lane.b32.xlu2 %v16318_v58, %s16179_s20 }
 0x4ae   : > { %v11625_v18 = vld [vmem:[#allocation1] sm:$0xff] }
 0x4af   : > { %2661 = vst [vmem:[#allocation1] ss:$9 sm:$0xff] %v10894_v13 }
 0x4b4   : > { %2061 = vrot.lane.b32.xlu2 %v16320_v40, %s16181_s1  ;;  %v1586_v40 = vpop.permute.xlu2 %1585 }
 0x4b6   : > { %v11634_v33 = vld [vmem:[#allocation1] sm:$0xff] }
 0x4b7   : > { %2698 = vst [vmem:[#allocation1] ss:$9 sm:$0xff] %v10911_v23 }
 0x4b8   : > { %2700 = vst [vmem:[#allocation1 + $0x1] ss:$9 sm:$0xff] %v10914_v26  ;;  %v1176_v16 = vpop.xlane.xlu1 %1175 }
 0x4b9   : > { %2702 = vst [vmem:[#allocation1 + $0x2] ss:$9 sm:$0xff] %v10917_v32 }
 0x4ba   : > { %2704 = vst [vmem:[#allocation1 + $0x3] ss:$9 sm:$0xff] %v10922_v34 }
 0x4bb   : > { %2706 = vst [vmem:[#allocation1 + $0x4] ss:$9 sm:$0xff] %v10926_v39 }
 0x4bc   : > { %2708 = vst [vmem:[#allocation1 + $0x5] ss:$9 sm:$0xff] %v10930_v44 }
 0x4bd   : > { %2710 = vst [vmem:[#allocation1 + $0x6] ss:$9 sm:$0xff] %v10934_v47 }
 0x4be   : > { %2712 = vst [vmem:[#allocation1 + $0x7] ss:$9 sm:$0xff] %v10939_v51 }
 0x4c0   : > { %v1167_v1 = vpop.xlane.xlu0 %1166 }
 0x4c1   : > { %10287 = vrcp.f32 %v1167_v1 }
 0x4c2   : > { %10289 = vrcp.f32 %v1170_v31  ;;  %v1179_v31 = vpop.xlane.xlu1 %1178 }
 0x4c5   : > { %v11653_v15 = vld [vmem:[#allocation1] sm:$0xff] }
 0x4c6   : > { %2714 = vst [vmem:[#allocation1] ss:$9 sm:$0xff] %v10945_v56 }
 0x4c7   : > { %v10288_v41 = vpop.eup %10287 }
 0x4c8   : > { %v1193_v52 = vmul.f32 %v10288_v41, %v11527_v2  ;;  %v10290_v58 = vpop.eup %10289 }
 0x4c9   : > { %v1194_v2 = vmul.f32 %v10290_v58, %v11484_v57 }
 0x4ca   : > { %9908 = vmatmul.msk.f32.vlgmr.msra.gmra.mxu2 %vm1109_vm4, %v1193_v52 }
 0x4cd   : > { %v11658_v36 = vld [vmem:[#allocation1] sm:$0xff] }
 0x4ce   : > { %2720 = vst [vmem:[#allocation1] ss:$9 sm:$0xff] %v10911_v23 }
 0x4cf   : > { %2722 = vst [vmem:[#allocation1 + $0x1] ss:$9 sm:$0xff] %v10914_v26 }
 0x4d0   : > { %2724 = vst [vmem:[#allocation1 + $0x2] ss:$9 sm:$0xff] %v10917_v32 }
 0x4d1   : > { %2726 = vst [vmem:[#allocation1 + $0x3] ss:$9 sm:$0xff] %v10922_v34 }
 0x4d2   : > { %2728 = vst [vmem:[#allocation1 + $0x4] ss:$9 sm:$0xff] %v10926_v39  ;;  %9909 = vmatmul.msk.f32.gmra.mxu2 %vm1109_vm4, %v1194_v2 }
 0x4d3   : > { %2730 = vst [vmem:[#allocation1 + $0x5] ss:$9 sm:$0xff] %v10930_v44  ;;  %v1606_v1 = vpop.permute.xlu0 %1605 }
 0x4d4   : > { %2732 = vst [vmem:[#allocation1 + $0x6] ss:$9 sm:$0xff] %v10934_v47  ;;  %9925 = vmatpush.xpose.msk.msrb.mxu3 %vm864_vm3, %v1606_v1  ;;  %v1182_v1 = vpop.xlane.xlu1 %1181 }
 0x4d5   : > { %2734 = vst [vmem:[#allocation1 + $0x7] ss:$9 sm:$0xff] %v10939_v51 }
 0x4da   : > { %9922 = vmatmul.msk.f32.vlgmr.msrb.gmra.mxu2 %vm864_vm3, %v11494_v19 }
 0x4db   : > { %v1584_v27 = vpop.permute.xlu0 %1583 }
 0x4dc   : > { %v11668_v37 = vld [vmem:[#allocation1] sm:$0xff] }
 0x4dd   : > { %2736 = vst [vmem:[#allocation1] ss:$9 sm:$0xff] %v10945_v56 }
 0x4df   : > { %v1173_v52 = vpop.xlane.xlu2 %1172 }
 0x4e0   : > { %10291 = vrcp.f32 %v1173_v52 }
 0x4e1   : > { %10293 = vrcp.f32 %v1179_v31 }
 0x4e2   : > { %10295 = vrcp.f32 %v1176_v16  ;;  %9923 = vmatmul.msk.f32.gmra.mxu2 %vm864_vm3, %v11617_v3 }
 0x4e3   : > { %v1382_v19 = vpop.permute.xlu0 %1381  ;;  %10297 = vrcp.f32 %v1182_v1 }
 0x4e4   : > { %v11672_v25 = vld [vmem:[#allocation1] sm:$0xff]  ;;  %9913 = vmatpush.msk.msrb.mxu1 %vm624_vm1, %v1382_v19 }
 0x4e5   : > { %2773 = vst [vmem:[#allocation1] ss:$9 sm:$0xff] %v10962_v12 }
 0x4e6   : > { %2775 = vst [vmem:[#allocation1 + $0x1] ss:$9 sm:$0xff] %v10965_v30  ;;  %v10292_v57 = vpop.eup %10291 }
 0x4e7   : > { %2777 = vst [vmem:[#allocation1 + $0x2] ss:$9 sm:$0xff] %v10968_v63  ;;  %v1195_v2 = vmul.f32 %v10292_v57, %v11555_v14  ;;  %v1380_v17 = vpop.permute.xlu2 %1379 }
 0x4e8   : > { %2779 = vst [vmem:[#allocation1 + $0x3] ss:$9 sm:$0xff] %v10973_v62  ;;  %1407 = vmatpush.msrb.mxu1 %v1380_v17 }
 0x4e9   : > { %2781 = vst [vmem:[#allocation1 + $0x4] ss:$9 sm:$0xff] %v10980_v60  ;;  %9911 = vmatmul.msk.f32.vlgmr.msra.gmra.mxu3 %vm1109_vm4, %v1195_v2  ;;  %v1681_v2 = vpop.permute.xlu1 %1680 }
 0x4ea   : > { %2783 = vst [vmem:[#allocation1 + $0x5] ss:$9 sm:$0xff] %v10984_v59 }
 0x4eb   : > { %2785 = vst [vmem:[#allocation1 + $0x6] ss:$9 sm:$0xff] %v10977_v61  ;;  %v1683_v57 = vpop.permute.xlu0 %1682 }
 0x4ec   : > { %2787 = vst [vmem:[#allocation1 + $0x7] ss:$9 sm:$0xff] %v10990_v42  ;;  %9928 = vmatpush.xpose.msk.msra.mxu1 %vm864_vm3, %v1683_v57 }
 0x4ef   : > { %v1659_v3 = vpop.permute.xlu2 %1658 }
 0x4f0   : > { %9929 = vmatpush.xpose.msk.msra.mxu1 %vm864_vm3, %v1681_v2 }
 0x4f1   : > { %v10212_v19 = vpop.permute.xlu1 %10211 }
 0x4f3   : > { %v11686_v41 = vld [vmem:[#allocation1] sm:$0xff] }
 0x4f4   : > { %16321 = vst [vmem:[#allocation11_spill] sm:$0xff] %v11686_v41  ;;  %v10294_v41 = vpop.eup %10293 }
 0x4f5   : > { %2789 = vst [vmem:[#allocation1] ss:$9 sm:$0xff] %v10996_v21  ;;  %v1197_v14 = vmul.f32 %v10294_v41, %v11549_v24  ;;  %v10296_v16 = vpop.eup %10295 }
 0x4f6   : > { %v1196_v31 = vmul.f32 %v10296_v16, %v11523_v35  ;;  %v10298_v52 = vpop.eup %10297  ;;  %v1661_v35 = vpop.permute.xlu0 %1660  ;;  %v10213_v16 = vunpack.i.l.bf16 %v10212_v19 }
 0x4f7   : > { %9914 = vmatmul.msk.f32.vlgmr.msrb.gmra.mxu1 %vm1109_vm4, %v1197_v14  ;;  %v1198_v24 = vmul.f32 %v10298_v52, %v11562_v55  ;;  %v1824_v17 = vpop.permute.xlu2 %1823  ;;  %v10214_v14 = vunpack.i.h.bf16 %v10212_v19 }
 0x4f8   : > { %9912 = vmatmul.msk.f32.gmra.mxu3 %vm1109_vm4, %v1196_v31  ;;  %9932 = vmatpush.msk.msrb.mxu0 %vm624_vm1, %v1824_v17 }
 0x4f9   : > { %v11741_v57 = vpop.f32.mrf.mxu0 }
 0x4fa   : > { %1849 = vmatpush.msrb.mxu0 %v10214_v14 }
 0x4fc   : > { %v11691_v58 = vld [vmem:[#allocation1] sm:$0xff] }
 0x4fd   : > { %2795 = vst [vmem:[#allocation1] ss:$9 sm:$0xff] %v10962_v12 }
 0x4fe   : > { %2797 = vst [vmem:[#allocation1 + $0x1] ss:$9 sm:$0xff] %v10965_v30 }
 0x4ff   : > { %2799 = vst [vmem:[#allocation1 + $0x2] ss:$9 sm:$0xff] %v10968_v63  ;;  %9915 = vmatmul.msk.f32.gmra.mxu1 %vm1109_vm4, %v1198_v24  ;;  %v2137_v55 = vpop.permute.xlu2 %2136 }
 0x500   : > { %2801 = vst [vmem:[#allocation1 + $0x3] ss:$9 sm:$0xff] %v10973_v62  ;;  %9926 = vmatmul.msk.f32.vlgmr.msrb.gmra.mxu3 %vm864_vm3, %v1584_v27  ;;  %v1878_v27 = vpop.permute.xlu0 %1877 }
 0x501   : > { %2803 = vst [vmem:[#allocation1 + $0x4] ss:$9 sm:$0xff] %v10980_v60  ;;  %9935 = vmatpush.msk.msra.mxu2 %vm624_vm1, %v1878_v27  ;;  %v2060_v27 = vpop.permute.xlu1 %2059 }
 0x502   : > { %2805 = vst [vmem:[#allocation1 + $0x5] ss:$9 sm:$0xff] %v10984_v59 }
 0x503   : > { %2807 = vst [vmem:[#allocation1 + $0x6] ss:$9 sm:$0xff] %v10977_v61  ;;  %1903 = vmatpush.msra.mxu2 %v10213_v16 }
 0x504   : > { %2809 = vst [vmem:[#allocation1 + $0x7] ss:$9 sm:$0xff] %v10990_v42 }
 0x505   : > { %9948 = vmatpush.xpose.msk.msrb.mxu2 %vm864_vm3, %v2137_v55 }
 0x507   : > { %9930 = vmatmul.msk.f32.vlgmr.msra.gmra.mxu1 %vm864_vm3, %v1659_v3 }
 0x508   : > { %9927 = vmatmul.msk.f32.gmra.mxu3 %vm864_vm3, %v1586_v40  ;;  %v2135_v40 = vpop.permute.xlu2 %2134  ;;  %v1932_v3 = vpop.permute.xlu0 %1931 }
 0x509   : > { %9938 = vmatpush.msk.msra.mxu3 %vm624_vm1, %v1932_v3  ;;  %9949 = vmatpush.xpose.msk.msrb.mxu2 %vm864_vm3, %v2135_v40 }
 0x50b   : > { %v11712_v41 = vld [vmem:[#allocation1] sm:$0xff] }
 0x50c   : > { %2811 = vst [vmem:[#allocation1] ss:$9 sm:$0xff] %v10996_v21 }
 0x50f   : > { %9931 = vmatmul.msk.f32.gmra.mxu1 %vm864_vm3, %v1661_v35 }
 0x510   : > { %v11739_v52 = vpop.permute.xlu2 %2112  ;;  %v1930_v24 = vpop.permute.xlu0 %1929 }
 0x511   : > { %1957 = vmatpush.msra.mxu3 %v1930_v24 }
 0x513   : > { %v11719_v1 = vld [vmem:[#allocation1] sm:$0xff]  ;;  %v11751_v2 = vpop.f32.mrf.mxu0 }
 0x514   : > { %2848 = vst [vmem:[#allocation1] ss:$9 sm:$0xff] %v11013_v53  ;;  %v1715_v55 = vsel %vm1109_vm4, %v11751_v2, -inf }
 0x515   : > { %2850 = vst [vmem:[#allocation1 + $0x1] ss:$9 sm:$0xff] %v11016_v50  ;;  %1716 = vmax.xlane.f32.xlu0 %v1715_v55  ;;  %v16324_v55 = vld [vmem:[#allocation28_spill] sm:$0xff] }
 0x516   : > { %2852 = vst [vmem:[#allocation1 + $0x2] ss:$9 sm:$0xff] %v11019_v48 }
 0x517   : > { %2854 = vst [vmem:[#allocation1 + $0x3] ss:$9 sm:$0xff] %v11027_v45 }
 0x518   : > { %2856 = vst [vmem:[#allocation1 + $0x4] ss:$9 sm:$0xff] %v11031_v43  ;;  %v2062_v35 = vpop.permute.xlu2 %2061 }
 0x519   : > { %2858 = vst [vmem:[#allocation1 + $0x5] ss:$9 sm:$0xff] %v11023_v46  ;;  %9944 = vmatpush.xpose.msk.msra.mxu0 %vm864_vm3, %v2062_v35  ;;  %v16322_v35 = vld [vmem:[#allocation30_spill] sm:$0xff] }
 0x51a   : > { %2860 = vst [vmem:[#allocation1 + $0x6] ss:$9 sm:$0xff] %v11037_v38 }
 0x51b   : > { %2862 = vst [vmem:[#allocation1 + $0x7] ss:$9 sm:$0xff] %v11040_v54  ;;  %v11759_v19 = vpop.f32.mrf.mxu0 }
 0x51c   : > { %v1718_v14 = vsel %vm1113_vm5, %v11759_v19, -inf }
 0x51d   : > { %9945 = vmatpush.xpose.msk.msra.mxu0 %vm864_vm3, %v2060_v27  ;;  %1719 = vmax.xlane.f32.xlu2 %v1718_v14  ;;  %v16325_v27 = vld [vmem:[#allocation19_spill] sm:$0xff] }
 0x522   : > { %v11736_v31 = vld [vmem:[#allocation1] sm:$0xff] }
 0x523   : > { %2864 = vst [vmem:[#allocation1] ss:$9 sm:$0xff] %v11047_v49 }
 0x52a   : > { %v11743_v17 = vld [vmem:[#allocation1] sm:$0xff] }
 0x52b   : > { %2870 = vst [vmem:[#allocation1] ss:$9 sm:$0xff] %v11013_v53 }
 0x52c   : > { %2872 = vst [vmem:[#allocation1 + $0x1] ss:$9 sm:$0xff] %v11016_v50 }
 0x52d   : > { %2874 = vst [vmem:[#allocation1 + $0x2] ss:$9 sm:$0xff] %v11019_v48 }
 0x52e   : > { %2876 = vst [vmem:[#allocation1 + $0x3] ss:$9 sm:$0xff] %v11027_v45 }
 0x52f   : > { %2878 = vst [vmem:[#allocation1 + $0x4] ss:$9 sm:$0xff] %v11031_v43 }
 0x530   : > { %2880 = vst [vmem:[#allocation1 + $0x5] ss:$9 sm:$0xff] %v11023_v46 }
 0x531   : > { %2882 = vst [vmem:[#allocation1 + $0x6] ss:$9 sm:$0xff] %v11037_v38 }
 0x532   : > { %2884 = vst [vmem:[#allocation1 + $0x7] ss:$9 sm:$0xff] %v11040_v54 }
 0x539   : > { %v11763_v16 = vld [vmem:[#allocation1] sm:$0xff] }
 0x53a   : > { %2886 = vst [vmem:[#allocation1] ss:$9 sm:$0xff] %v11047_v49 }
 0x541   : > { %v11766_v40 = vld [vmem:[#allocation1] sm:$0xff] }
 0x542   : > { %3011 = vst [vmem:[#allocation1] ss:$9 sm:$0xff] %v10862_v4  ;;  %v11789_v4 = vpop.f32.mrf.mxu2 }
 0x543   : > { %3013 = vst [vmem:[#allocation1 + $0x1] ss:$9 sm:$0xff] %v10865_v5 }
 0x544   : > { %3015 = vst [vmem:[#allocation1 + $0x2] ss:$9 sm:$0xff] %v10868_v6 }
 0x545   : > { %3017 = vst [vmem:[#allocation1 + $0x3] ss:$9 sm:$0xff] %v10871_v7 }
 0x546   : > { %3019 = vst [vmem:[#allocation1 + $0x4] ss:$9 sm:$0xff] %v10875_v8 }
 0x547   : > { %3021 = vst [vmem:[#allocation1 + $0x5] ss:$9 sm:$0xff] %v10878_v9 }
 0x548   : > { %3023 = vst [vmem:[#allocation1 + $0x6] ss:$9 sm:$0xff] %v10882_v10 }
 0x549   : > { %3025 = vst [vmem:[#allocation1 + $0x7] ss:$9 sm:$0xff] %v10886_v11 }
 0x54d   : > { %v11794_v6 = vpop.f32.mrf.mxu2 }
 0x550   : > { %v11776_v3 = vld [vmem:[#allocation1] sm:$0xff] }
 0x551   : > { %3027 = vst [vmem:[#allocation1] ss:$9 sm:$0xff] %v10894_v13 }
 0x555   : > { %v11800_v8 = vpop.f32.mrf.mxu2 }
 0x558   : > { %v11779_v24 = vld [vmem:[#allocation1] sm:$0xff] }
 0x559   : > { %3065 = vst [vmem:[#allocation1] ss:$9 sm:$0xff] %v10911_v23 }
 0x55a   : > { %3067 = vst [vmem:[#allocation1 + $0x1] ss:$9 sm:$0xff] %v10914_v26  ;;  %v11831_v26 = vpop.permute.xlu0 %2037 }
 0x55b   : > { %3069 = vst [vmem:[#allocation1 + $0x2] ss:$9 sm:$0xff] %v10917_v32 }
 0x55c   : > { %3071 = vst [vmem:[#allocation1 + $0x3] ss:$9 sm:$0xff] %v10922_v34 }
 0x55d   : > { %3073 = vst [vmem:[#allocation1 + $0x4] ss:$9 sm:$0xff] %v10926_v39  ;;  %v1559_v9 = vpop.f32.mrf.mxu2 }
 0x55e   : > { %3075 = vst [vmem:[#allocation1 + $0x5] ss:$9 sm:$0xff] %v10930_v44  ;;  %v1721_v10 = vsel %vm1109_vm4, %v1559_v9, -inf }
 0x55f   : > { %3077 = vst [vmem:[#allocation1 + $0x6] ss:$9 sm:$0xff] %v10934_v47  ;;  %1722 = vmax.xlane.f32.xlu2 %v1721_v10 }
 0x560   : > { %3079 = vst [vmem:[#allocation1 + $0x7] ss:$9 sm:$0xff] %v10939_v51 }
 0x562   : > { %v11845_v32 = vpop.permute.xlu0 %2114 }
 0x565   : > { %v1562_v13 = vpop.f32.mrf.mxu2 }
 0x567   : > { %v11791_v5 = vld [vmem:[#allocation1] sm:$0xff] }
 0x568   : > { %3081 = vst [vmem:[#allocation1] ss:$9 sm:$0xff] %v10945_v56 }
 0x56f   : > { %v11796_v7 = vld [vmem:[#allocation1] sm:$0xff] }
 0x570   : > { %3119 = vst [vmem:[#allocation1] ss:$9 sm:$0xff] %v10962_v12 }
 0x571   : > { %3121 = vst [vmem:[#allocation1 + $0x1] ss:$9 sm:$0xff] %v10965_v30 }
 0x572   : > { %3123 = vst [vmem:[#allocation1 + $0x2] ss:$9 sm:$0xff] %v10968_v63 }
 0x573   : > { %3125 = vst [vmem:[#allocation1 + $0x3] ss:$9 sm:$0xff] %v10973_v62  ;;  %v11814_v62 = vpop.f32.mrf.mxu3 }
 0x574   : > { %3127 = vst [vmem:[#allocation1 + $0x4] ss:$9 sm:$0xff] %v10980_v60  ;;  %v11812_v63 = vpop.f32.mrf.mxu1  ;;  %v1724_v60 = vsel %vm1113_vm5, %v1562_v13, -inf }
 0x575   : > { %3129 = vst [vmem:[#allocation1 + $0x5] ss:$9 sm:$0xff] %v10984_v59  ;;  %1725 = vmax.xlane.f32.xlu1 %v1724_v60 }
 0x576   : > { %3131 = vst [vmem:[#allocation1 + $0x6] ss:$9 sm:$0xff] %v10977_v61 }
 0x577   : > { %3133 = vst [vmem:[#allocation1 + $0x7] ss:$9 sm:$0xff] %v10990_v42 }
 0x57b   : > { %v11823_v61 = vpop.f32.mrf.mxu3 }
 0x57c   : > { %v11827_v23 = vpop.f32.mrf.mxu1 }
 0x57e   : > { %v11809_v11 = vld [vmem:[#allocation1] sm:$0xff] }
 0x57f   : > { %3135 = vst [vmem:[#allocation1] ss:$9 sm:$0xff] %v10996_v21 }
 0x586   : > { %v11817_v59 = vld [vmem:[#allocation1] sm:$0xff] }
 0x587   : > { %3173 = vst [vmem:[#allocation1] ss:$9 sm:$0xff] %v11013_v53  ;;  %v11833_v53 = vpop.f32.mrf.mxu3 }
 0x588   : > { %3175 = vst [vmem:[#allocation1 + $0x1] ss:$9 sm:$0xff] %v11016_v50  ;;  %v1717_v44 = vpop.xlane.xlu0 %1716 }
 0x589   : > { %3177 = vst [vmem:[#allocation1 + $0x2] ss:$9 sm:$0xff] %v11019_v48  ;;  %v1727_v48 = vsel %vm1109_vm4, %v11833_v53, -inf  ;;  %v1739_v47 = vsub.f32 %v11751_v2, %v1717_v44  ;;  %v16323_v2 = vld [vmem:[#allocation31_spill] sm:$0xff] }
 0x58a   : > { %3179 = vst [vmem:[#allocation1 + $0x3] ss:$9 sm:$0xff] %v11027_v45  ;;  %1728 = vmax.xlane.f32.xlu0 %v1727_v48 }
 0x58b   : > { %3181 = vst [vmem:[#allocation1 + $0x4] ss:$9 sm:$0xff] %v11031_v43  ;;  %v11840_v43 = vpop.f32.mrf.mxu1  ;;  %v1747_v51 = vmul.f32 1.442695, %v1739_v47 }
 0x58c   : > { %3183 = vst [vmem:[#allocation1 + $0x5] ss:$9 sm:$0xff] %v11023_v46 }
 0x58d   : > { %3185 = vst [vmem:[#allocation1 + $0x6] ss:$9 sm:$0xff] %v11037_v38  ;;  %v1733_v38 = vsel %vm1109_vm4, %v11840_v43, -inf  ;;  %10299 = vpow2.f32 %v1747_v51 }
 0x58e   : > { %3187 = vst [vmem:[#allocation1 + $0x7] ss:$9 sm:$0xff] %v11040_v54 }
 0x58f   : > { %v1637_v46 = vpop.f32.mrf.mxu3 }
 0x590   : > { %v1730_v50 = vsel %vm1113_vm5, %v1637_v46, -inf  ;;  %v1720_v56 = vpop.xlane.xlu2 %1719 }
 0x591   : > { %1731 = vmax.xlane.f32.xlu2 %v1730_v50  ;;  %v1740_v12 = vsub.f32 %v11759_v19, %v1720_v56 }
 0x592   : > { %1734 = vmax.xlane.f32.xlu0 %v1733_v38 }
 0x593   : > { %v1712_v34 = vpop.f32.mrf.mxu1  ;;  %v10300_v30 = vpop.eup %10299  ;;  %v1749_v42 = vmul.f32 1.442695, %v1740_v12  ;;  %v16326_v12 = vld [vmem:[#allocation21_spill] sm:$0xff] }
 0x594   : > { %v1736_v39 = vsel %vm1113_vm5, %v1712_v34, -inf  ;;  %v1763_v21 = vsel %vm1109_vm4, %v10300_v30, 0.0 }
 0x595   : > { %v11837_v45 = vld [vmem:[#allocation1] sm:$0xff]  ;;  %10301 = vpow2.f32 %v1749_v42  ;;  %1764 = vadd.xlane.f32.xlu1 %v1763_v21 }
 0x596   : > { %3189 = vst [vmem:[#allocation1] ss:$9 sm:$0xff] %v11047_v49 }
 0x599   : > { %1737 = vmax.xlane.f32.xlu2 %v1736_v39 }
 0x59b   : > { %v10302_v54 = vpop.eup %10301 }
 0x59c   : > { %v1766_v49 = vsel %vm1113_vm5, %v10302_v54, 0.0 }
 0x59d   : > { %1767 = vadd.xlane.f32.xlu0 %v1766_v49 }
 0x5b1   : > { %2209 = vrot.lane.b32.xlu2 %v16322_v35, %s16181_s1  ;;  %2211 = vrot.lane.b32.xlu0 %v16323_v2, %s16181_s1 }
 0x5b9   : > { %2187 = vrot.lane.b32.xlu0 %v16324_v55, %s16179_s20 }
 0x5c1   : > { %1985 = vrot.lane.b32.xlu0 %v16325_v27, %s16183_s19 }
 0x5d2   : > { %v1723_v19 = vpop.xlane.xlu2 %1722 }
 0x5d3   : > { %v1741_v14 = vsub.f32 %v1559_v9, %v1723_v19 }
 0x5d5   : > { %v1751_v10 = vmul.f32 1.442695, %v1741_v14 }
 0x5d7   : > { %10303 = vpow2.f32 %v1751_v10 }
 0x5dd   : > { %v11860_v38 = vpop.eup %10303 }
 0x5de   : > { %v1769_v39 = vsel %vm1109_vm4, %v11860_v38, 0.0 }
 0x5df   : > { %1770 = vadd.xlane.f32.xlu1 %v1769_v39 }
 0x5e8   : > { %v1726_v60 = vpop.xlane.xlu1 %1725 }
 0x5e9   : > { %v1742_v48 = vsub.f32 %v1562_v13, %v1726_v60 }
 0x5eb   : > { %v1753_v50 = vmul.f32 1.442695, %v1742_v48 }
 0x5ed   : > { %10305 = vpow2.f32 %v1753_v50 }
 0x5f3   : > { %v11864_v44 = vpop.eup %10305 }
 0x5f4   : > { %v1772_v47 = vsel %vm1113_vm5, %v11864_v44, 0.0 }
 0x5f5   : > { %1773 = vadd.xlane.f32.xlu2 %v1772_v47 }
 0x5f8   : > { %2039 = vrot.lane.b32.xlu1 %v16326_v12, %s16179_s20 }
 0x5fd   : > { %v1729_v21 = vpop.xlane.xlu0 %1728 }
 0x604   : > { %v1732_v51 = vpop.xlane.xlu2 %1731 }
 0x605   : > { %v1744_v9 = vsub.f32 %v1637_v46, %v1732_v51  ;;  %v1735_v27 = vpop.xlane.xlu0 %1734  ;;  %v16327_v51 = vld [vmem:[#allocation29_spill] sm:$0xff] }
 0x606   : > { %v1745_v39 = vsub.f32 %v11840_v43, %v1735_v27  ;;  %v16334_v27 = vld [vmem:[#allocation36_spill] sm:$0xff] }
 0x607   : > { %v1757_v56 = vmul.f32 1.442695, %v1744_v9 }
 0x608   : > { %v1765_v19 = vpop.xlane.xlu1 %1764  ;;  %v1759_v9 = vmul.f32 1.442695, %v1745_v39 }
 0x609   : > { %10307 = vpow2.f32 %v1757_v56  ;;  %v16329_v56 = vld [vmem:[#allocation18_spill] sm:$0xff] }
 0x60c   : > { %v1738_v13 = vpop.xlane.xlu2 %1737 }
 0x60d   : > { %v1746_v42 = vsub.f32 %v1712_v34, %v1738_v13  ;;  %v1743_v34 = vsub.f32 %v11833_v53, %v1729_v21  ;;  %v16328_v53 = vld [vmem:[#allocation37_spill] sm:$0xff] }
 0x60f   : > { %v1761_v49 = vmul.f32 1.442695, %v1746_v42  ;;  %v11870_v35 = vpop.eup %10307  ;;  %v1755_v48 = vmul.f32 1.442695, %v1743_v34  ;;  %v16330_v42 = vld [vmem:[#allocation35_spill] sm:$0xff] }
 0x610   : > { %v1778_v2 = vsel %vm1113_vm5, %v11870_v35, 0.0  ;;  %v1768_v60 = vpop.xlane.xlu0 %1767 }
 0x611   : > { %10309 = vpow2.f32 %v1761_v49  ;;  %1779 = vadd.xlane.f32.xlu2 %v1778_v2  ;;  %v16331_v49 = vld [vmem:[#allocation32_spill] sm:$0xff]  ;;  %v16332_v2 = vld [vmem:[#allocation33_spill] sm:$0xff] }
 0x612   : > { %10311 = vrcp.f32 %v1765_v19 }
 0x613   : > { %10313 = vrcp.f32 %v1768_v60 }
 0x614   : > { %10315 = vpow2.f32 %v1755_v48  ;;  %v2210_v13 = vpop.permute.xlu2 %2209 }
 0x615   : > { %10317 = vpow2.f32 %v1759_v9 }
 0x617   : > { %v11874_v55 = vpop.eup %10309 }
 0x618   : > { %v1784_v46 = vsel %vm1113_vm5, %v11874_v55, 0.0  ;;  %v10312_v14 = vpop.eup %10311 }
 0x619   : > { %1785 = vadd.xlane.f32.xlu0 %v1784_v46  ;;  %v1795_v10 = vmul.f32 %v10312_v14, %v10300_v30  ;;  %v10314_v50 = vpop.eup %10313  ;;  %v16333_v46 = vld [vmem:[#allocation38_spill] sm:$0xff] }
 0x61a   : > { %v1796_v47 = vmul.f32 %v10314_v50, %v10302_v54  ;;  %v11886_v30 = vpop.eup %10315  ;;  %v10215_v19 = vpack.i.bf16 %v16334_v27, %v16333_v46 }
 0x61b   : > { %9933 = vmatmul.msk.f32.vlgmr.msrb.gmra.mxu0 %vm1109_vm4, %v1795_v10  ;;  %v1775_v43 = vsel %vm1109_vm4, %v11886_v30, 0.0  ;;  %v11897_v12 = vpop.eup %10317 }
 0x61c   : > { %v1781_v21 = vsel %vm1109_vm4, %v11897_v12, 0.0 }
 0x622   : > { %1776 = vadd.xlane.f32.xlu1 %v1775_v43 }
 0x623   : > { %9934 = vmatmul.msk.f32.gmra.mxu0 %vm1109_vm4, %v1796_v47  ;;  %v2212_v54 = vpop.permute.xlu0 %2211 }
 0x624   : > { %9952 = vmatpush.xpose.msk.msrb.mxu3 %vm864_vm3, %v2212_v54 }
 0x628   : > { %9953 = vmatpush.xpose.msk.msrb.mxu3 %vm864_vm3, %v2210_v13 }
 0x629   : > { %2189 = vrot.lane.b32.xlu2 %v16327_v51, %s16179_s20 }
 0x62a   : > { %1782 = vadd.xlane.f32.xlu1 %v1781_v21 }
 0x62b   : > { %9946 = vmatmul.msk.f32.vlgmr.msra.gmra.mxu0 %vm864_vm3, %v11831_v26  ;;  %v11904_v26 = vpop.permute.xlu0 %2187 }
 0x62d   : > { %2427 = vrot.lane.b32.xlu0 %v16328_v53, %s16177_s21 }
 0x631   : > { %1983 = vrot.lane.b32.xlu2 %v16329_v56, %s16183_s19  ;;  %s16462_s19 = smov 80  }
 0x635   : > { %2740 = vrot.lane.b32.xlu0 %v11672_v25, %s16175_s22  ;;  %v1986_v25 = vpop.permute.xlu0 %1985 }
 0x636   : > { %9941 = vmatpush.msk.msrb.mxu1 %vm624_vm1, %v1986_v25 }
 0x639   : > { %2286 = vrot.lane.b32.xlu2 %v16330_v42, %s16181_s1 }
 0x63d   : > { %2533 = vrot.lane.b32.xlu0 %v11533_v29, %s16177_s21  ;;  %v16335_v29 = vld [vmem:[#allocation34_spill] sm:$0xff] }
 0x641   : > { %2262 = vrot.lane.b32.xlu2 %v16331_v49, %s16179_s20 }
 0x643   : > { %2284 = vrot.lane.b32.xlu1 %v16335_v29, %s16181_s1  ;;  %s16473_s1 = smov 112  }
 0x645   : > { %2815 = vrot.lane.b32.xlu0 %v11719_v1, %s16175_s22 }
 0x649   : > { %2264 = vrot.lane.b32.xlu2 %v16332_v2, %s16179_s20  ;;  %s16490_s20 = smov 48  }
 0x64b   : > { %2481 = vrot.lane.b32.xlu1 %v11514_v0, %s16177_s21 }
 0x64d   : > { %2813 = vrot.lane.b32.xlu0 %v11712_v41, %s16175_s22 }
 0x651   : > { %10216 = vrot.lane.b32.xlu2 %v10215_v19, %s16177_s21 }
 0x652   : > { %v1771_v1 = vpop.xlane.xlu1 %1770 }
 0x653   : > { %10319 = vrcp.f32 %v1771_v1  ;;  %2535 = vrot.lane.b32.xlu1 %v11538_v22, %s16177_s21 }
 0x659   : > { %2665 = vrot.lane.b32.xlu2 %v11634_v33, %s16175_s22  ;;  %v10320_v41 = vpop.eup %10319 }
 0x65a   : > { %v1797_v14 = vmul.f32 %v10320_v41, %v11860_v38 }
 0x65c   : > { %9936 = vmatmul.msk.f32.vlgmr.msra.gmra.mxu2 %vm1109_vm4, %v1797_v14 }
 0x661   : > { %2738 = vrot.lane.b32.xlu2 %v11668_v37, %s16175_s22 }
 0x668   : > { %v1774_v34 = vpop.xlane.xlu2 %1773 }
 0x669   : > { %2663 = vrot.lane.b32.xlu2 %v11625_v18, %s16175_s22  ;;  %10321 = vrcp.f32 %v1774_v34 }
 0x66a   : > { %v2040_v22 = vpop.permute.xlu1 %2039 }
 0x66b   : > { %9947 = vmatmul.msk.f32.gmra.mxu0 %vm864_vm3, %v2040_v22  ;;  %v16336_v22 = vld [vmem:[#allocation12_spill] sm:$0xff] }
 0x66f   : > { %v10322_v33 = vpop.eup %10321 }
 0x670   : > { %v1798_v0 = vmul.f32 %v10322_v33, %v11864_v44 }
 0x671   : > { %2716 = vrot.lane.b32.xlu2 %v11653_v15, %s16171_s23 }
 0x672   : > { %9937 = vmatmul.msk.f32.gmra.mxu2 %vm1109_vm4, %v1798_v0 }
 0x679   : > { %2641 = vrot.lane.b32.xlu2 %v11583_v20, %s16171_s23 }
 0x67a   : > { %9950 = vmatmul.msk.f32.vlgmr.msrb.gmra.mxu2 %vm864_vm3, %v11739_v52 }
 0x682   : > { %9951 = vmatmul.msk.f32.gmra.mxu2 %vm864_vm3, %v11845_v32 }
 0x684   : > { %v1780_v18 = vpop.xlane.xlu2 %1779 }
 0x68c   : > { %v2190_v37 = vpop.permute.xlu2 %2189  ;;  %v1786_v15 = vpop.xlane.xlu0 %1785 }
 0x694   : > { %v1984_v38 = vpop.permute.xlu2 %1983 }
 0x695   : > { %2011 = vmatpush.msrb.mxu1 %v1984_v38  ;;  %v1777_v48 = vpop.xlane.xlu1 %1776 }
 0x696   : > { %10323 = vrcp.f32 %v1777_v48 }
 0x697   : > { %10325 = vrcp.f32 %v1780_v18 }
 0x698   : > { %v11946_v60 = vpop.f32.mrf.mxu0 }
 0x69c   : > { %v2287_v44 = vpop.permute.xlu2 %2286  ;;  %v10324_v50 = vpop.eup %10323 }
 0x69d   : > { %9956 = vmatpush.xpose.msk.msra.mxu1 %vm864_vm3, %v2287_v44  ;;  %v1799_v39 = vmul.f32 %v10324_v50, %v11886_v30  ;;  %v1783_v47 = vpop.xlane.xlu1 %1782  ;;  %v10326_v53 = vpop.eup %10325 }
 0x69e   : > { %10327 = vrcp.f32 %v1783_v47  ;;  %v1800_v42 = vmul.f32 %v10326_v53, %v11870_v35 }
 0x69f   : > { %v2428_v10 = vpop.permute.xlu0 %2427  ;;  %9939 = vmatmul.msk.f32.vlgmr.msra.gmra.mxu3 %vm1109_vm4, %v1799_v39  ;;  %10329 = vrcp.f32 %v1786_v15 }
 0x6a0   : > { %9960 = vmatpush.msk.msrb.mxu0 %vm624_vm1, %v2428_v10  ;;  %v11949_v52 = vpop.f32.mrf.mxu0 }
 0x6a4   : > { %v2263_v20 = vpop.permute.xlu2 %2262  ;;  %v10328_v56 = vpop.eup %10327 }
 0x6a5   : > { %v1801_v54 = vmul.f32 %v10328_v56, %v11897_v12  ;;  %v10330_v30 = vpop.eup %10329 }
 0x6a6   : > { %v1802_v25 = vmul.f32 %v10330_v30, %v11874_v55 }
 0x6a7   : > { %9940 = vmatmul.msk.f32.gmra.mxu3 %vm1109_vm4, %v1800_v42  ;;  %9942 = vmatmul.msk.f32.vlgmr.msrb.gmra.mxu1 %vm1109_vm4, %v1801_v54  ;;  %v2741_v49 = vpop.permute.xlu0 %2740 }
 0x6a8   : > { %v11953_v51 = vpop.f32.mrf.mxu0 }
 0x6a9   : > { %v2319_v9 = vsel %vm1109_vm4, %v11953_v51, -inf }
 0x6aa   : > { %2320 = vmax.xlane.f32.xlu2 %v2319_v9 }
 0x6ac   : > { %v2265_v32 = vpop.permute.xlu2 %2264 }
 0x6af   : > { %9954 = vmatmul.msk.f32.vlgmr.msrb.gmra.mxu3 %vm864_vm3, %v11904_v26  ;;  %9943 = vmatmul.msk.f32.gmra.mxu1 %vm1109_vm4, %v1802_v25  ;;  %v2534_v35 = vpop.permute.xlu0 %2533 }
 0x6b4   : > { %v10217_v43 = vpop.permute.xlu2 %10216 }
 0x6b5   : > { %v10219_v13 = vunpack.i.h.bf16 %v10217_v43  ;;  %v2285_v2 = vpop.permute.xlu1 %2284  ;;  %v10218_v27 = vunpack.i.l.bf16 %v10217_v43 }
 0x6b6   : > { %9957 = vmatpush.xpose.msk.msra.mxu1 %vm864_vm3, %v2285_v2 }
 0x6b7   : > { %2453 = vmatpush.msrb.mxu0 %v10219_v13  ;;  %9955 = vmatmul.msk.f32.gmra.mxu3 %vm864_vm3, %v2190_v37  ;;  %v2816_v26 = vpop.permute.xlu0 %2815 }
 0x6b9   : > { %9958 = vmatmul.msk.f32.vlgmr.msra.gmra.mxu1 %vm864_vm3, %v2263_v20 }
 0x6bc   : > { %v2666_v21 = vpop.permute.xlu2 %2665 }
 0x6bd   : > { %9972 = vmatpush.xpose.msk.msra.mxu0 %vm864_vm3, %v2666_v21  ;;  %v2482_v55 = vpop.permute.xlu1 %2481 }
 0x6be   : > { %9963 = vmatpush.msk.msra.mxu2 %vm624_vm1, %v2482_v55 }
 0x6c0   : > { %2507 = vmatpush.msra.mxu2 %v10218_v27 }
 0x6c1   : > { %9959 = vmatmul.msk.f32.gmra.mxu1 %vm864_vm3, %v2265_v32 }
 0x6c2   : > { %2589 = vrot.lane.b32.xlu2 %v11568_v28, %s16177_s21  ;;  %9976 = vmatpush.xpose.msk.msrb.mxu2 %vm864_vm3, %v2741_v49  ;;  %v2814_v28 = vpop.permute.xlu0 %2813 }
 0x6c4   : > { %v2739_v12 = vpop.permute.xlu2 %2738 }
 0x6c5   : > { %v2536_v19 = vpop.permute.xlu1 %2535 }
 0x6c6   : > { %9977 = vmatpush.xpose.msk.msrb.mxu2 %vm864_vm3, %v2739_v12  ;;  %9966 = vmatpush.msk.msra.mxu3 %vm624_vm1, %v2536_v19 }
 0x6c8   : > { %2561 = vmatpush.msra.mxu3 %v2534_v35  ;;  %v16337_v35 = vld [vmem:[#allocation11_spill] sm:$0xff] }
 0x6ca   : > { %2718 = vrot.lane.b32.xlu2 %v11658_v36, %s16171_s23  ;;  %9980 = vmatpush.xpose.msk.msrb.mxu3 %vm864_vm3, %v2816_v26 }
 0x6cc   : > { %v2664_v46 = vpop.permute.xlu2 %2663 }
 0x6cd   : > { %9973 = vmatpush.xpose.msk.msra.mxu0 %vm864_vm3, %v2664_v46 }
 0x6ce   : > { %9981 = vmatpush.xpose.msk.msrb.mxu3 %vm864_vm3, %v2814_v28 }
 0x6d2   : > { %2793 = vrot.lane.b32.xlu2 %v11691_v58, %s16171_s23 }
 0x6d4   : > { %v11990_v0 = vpop.permute.xlu2 %2716 }
 0x6dc   : > { %v11994_v18 = vpop.permute.xlu2 %2641 }
 0x6df   : > { %v11983_v29 = vpop.f32.mrf.mxu2 }
 0x6e8   : > { %v2091_v1 = vpop.f32.mrf.mxu0 }
 0x6e9   : > { %v2322_v41 = vsel %vm1113_vm5, %v2091_v1, -inf }
 0x6ea   : > { %2323 = vmax.xlane.f32.xlu1 %v2322_v41 }
 0x6f5   : > { %v11985_v36 = vpop.f32.mrf.mxu2 }
 0x6fd   : > { %v2163_v14 = vpop.f32.mrf.mxu2 }
 0x6fe   : > { %v2325_v34 = vsel %vm1109_vm4, %v2163_v14, -inf }
 0x6ff   : > { %2326 = vmax.xlane.f32.xlu0 %v2325_v34 }
 0x703   : > { %2643 = vrot.lane.b32.xlu1 %v16336_v22, %s16171_s23 }
 0x705   : > { %v2166_v33 = vpop.f32.mrf.mxu2 }
 0x706   : > { %v2328_v58 = vsel %vm1113_vm5, %v2166_v33, -inf }
 0x707   : > { %2329 = vmax.xlane.f32.xlu0 %v2328_v58 }
 0x71d   : > { %v2321_v37 = vpop.xlane.xlu2 %2320 }
 0x71e   : > { %v2343_v9 = vsub.f32 %v11953_v51, %v2321_v37 }
 0x720   : > { %v2351_v56 = vmul.f32 1.442695, %v2343_v9 }
 0x722   : > { %v11997_v15 = vpop.f32.mrf.mxu3  ;;  %10331 = vpow2.f32 %v2351_v56 }
 0x724   : > { %v12001_v10 = vpop.f32.mrf.mxu1 }
 0x725   : > { %v2590_v38 = vpop.permute.xlu2 %2589 }
 0x726   : > { %9969 = vmatpush.msk.msrb.mxu1 %vm624_vm1, %v2590_v38 }
 0x728   : > { %v10332_v13 = vpop.eup %10331 }
 0x729   : > { %v2367_v42 = vsel %vm1109_vm4, %v10332_v13, 0.0 }
 0x72a   : > { %v11999_v44 = vpop.f32.mrf.mxu3 }
 0x72c   : > { %v12004_v50 = vpop.f32.mrf.mxu1 }
 0x732   : > { %v2238_v20 = vpop.f32.mrf.mxu3 }
 0x733   : > { %v2331_v48 = vsel %vm1109_vm4, %v2238_v20, -inf }
 0x734   : > { %2332 = vmax.xlane.f32.xlu0 %v2331_v48 }
 0x736   : > { %v2313_v47 = vpop.f32.mrf.mxu1 }
 0x737   : > { %v2337_v53 = vsel %vm1109_vm4, %v2313_v47, -inf }
 0x73a   : > { %v2241_v32 = vpop.f32.mrf.mxu3 }
 0x73b   : > { %v2334_v39 = vsel %vm1113_vm5, %v2241_v32, -inf }
 0x73c   : > { %2335 = vmax.xlane.f32.xlu0 %v2334_v39 }
 0x73e   : > { %v2316_v43 = vpop.f32.mrf.mxu1 }
 0x73f   : > { %v2340_v54 = vsel %vm1113_vm5, %v2316_v43, -inf }
 0x744   : > { %2338 = vmax.xlane.f32.xlu0 %v2337_v53 }
 0x74c   : > { %2341 = vmax.xlane.f32.xlu0 %v2340_v54 }
 0x754   : > { %2368 = vadd.xlane.f32.xlu0 %v2367_v42 }
 0x75d   : > { %v2324_v30 = vpop.xlane.xlu1 %2323 }
 0x75e   : > { %v2344_v21 = vsub.f32 %v2091_v1, %v2324_v30 }
 0x760   : > { %v2353_v49 = vmul.f32 1.442695, %v2344_v21 }
 0x762   : > { %10333 = vpow2.f32 %v2353_v49 }
 0x768   : > { %v10334_v2 = vpop.eup %10333  ;;  %2791 = vrot.lane.b32.xlu0 %v16337_v35, %s16171_s23  ;;  %v2719_v35 = vpop.permute.xlu2 %2718 }
 0x769   : > { %v2370_v46 = vsel %vm1113_vm5, %v10334_v2, 0.0 }
 0x76a   : > { %2371 = vadd.xlane.f32.xlu1 %v2370_v46 }
 0x770   : > { %v2794_v46 = vpop.permute.xlu2 %2793 }
 0x772   : > { %v2327_v25 = vpop.xlane.xlu0 %2326 }
 0x773   : > { %v2345_v12 = vsub.f32 %v2163_v14, %v2327_v25  ;;  %v16338_v14 = vld [vmem:[#allocation39_spill] sm:$0xff] }
 0x775   : > { %v2355_v51 = vmul.f32 1.442695, %v2345_v12 }
 0x777   : > { %10335 = vpow2.f32 %v2355_v51 }
 0x77a   : > { %v2330_v55 = vpop.xlane.xlu0 %2329 }
 0x77b   : > { %v2346_v27 = vsub.f32 %v2166_v33, %v2330_v55 }
 0x77d   : > { %v10336_v26 = vpop.eup %10335  ;;  %v2357_v19 = vmul.f32 1.442695, %v2346_v27 }
 0x77e   : > { %v2373_v28 = vsel %vm1109_vm4, %v10336_v26, 0.0 }
 0x77f   : > { %10337 = vpow2.f32 %v2357_v19  ;;  %2374 = vadd.xlane.f32.xlu2 %v2373_v28 }
 0x783   : > { %2587 = vrot.lane.b32.xlu1 %v16338_v14, %s16177_s21  ;;  %s16493_s21 = smov 72  }
 0x785   : > { %v10338_v1 = vpop.eup %10337 }
 0x786   : > { %v2376_v41 = vsel %vm1113_vm5, %v10338_v1, 0.0 }
 0x787   : > { %2377 = vadd.xlane.f32.xlu2 %v2376_v41 }
 0x79f   : > { %2890 = vrot.lane.b32.xlu2 %v11766_v40, %s16175_s22 }
 0x7a7   : > { %v2333_v34 = vpop.xlane.xlu0 %2332 }
 0x7a8   : > { %v2347_v58 = vsub.f32 %v2238_v20, %v2333_v34 }
 0x7aa   : > { %v2359_v22 = vmul.f32 1.442695, %v2347_v58 }
 0x7ac   : > { %10339 = vpow2.f32 %v2359_v22 }
 0x7af   : > { %v2336_v33 = vpop.xlane.xlu0 %2335 }
 0x7b0   : > { %v2348_v37 = vsub.f32 %v2241_v32, %v2336_v33 }
 0x7b2   : > { %v10340_v38 = vpop.eup %10339  ;;  %v2361_v48 = vmul.f32 1.442695, %v2348_v37 }
 0x7b3   : > { %v2379_v39 = vsel %vm1109_vm4, %v10340_v38, 0.0 }
 0x7b4   : > { %10341 = vpow2.f32 %v2361_v48  ;;  %2380 = vadd.xlane.f32.xlu0 %v2379_v39 }
 0x7b7   : > { %v2339_v9 = vpop.xlane.xlu0 %2338 }
 0x7b8   : > { %v2349_v53 = vsub.f32 %v2313_v47, %v2339_v9 }
 0x7ba   : > { %v10342_v56 = vpop.eup %10341  ;;  %v2363_v54 = vmul.f32 1.442695, %v2349_v53 }
 0x7bb   : > { %v2382_v42 = vsel %vm1113_vm5, %v10342_v56, 0.0 }
 0x7bc   : > { %10343 = vpow2.f32 %v2363_v54 }
 0x7bf   : > { %v2342_v40 = vpop.xlane.xlu0 %2341 }
 0x7c0   : > { %v2350_v20 = vsub.f32 %v2316_v43, %v2342_v40  ;;  %v2644_v43 = vpop.permute.xlu1 %2643 }
 0x7c2   : > { %v10344_v30 = vpop.eup %10343  ;;  %v2365_v21 = vmul.f32 1.442695, %v2350_v20 }
 0x7c3   : > { %v2385_v32 = vsel %vm1109_vm4, %v10344_v30, 0.0 }
 0x7c4   : > { %10345 = vpow2.f32 %v2365_v21  ;;  %2386 = vadd.xlane.f32.xlu1 %v2385_v32 }
 0x7c7   : > { %v2369_v49 = vpop.xlane.xlu0 %2368 }
 0x7c8   : > { %2383 = vadd.xlane.f32.xlu2 %v2382_v42  ;;  %10347 = vrcp.f32 %v2369_v49 }
 0x7ca   : > { %v10346_v25 = vpop.eup %10345 }
 0x7cb   : > { %v2388_v12 = vsel %vm1113_vm5, %v10346_v25, 0.0 }
 0x7cc   : > { %2389 = vadd.xlane.f32.xlu0 %v2388_v12 }
 0x7ce   : > { %v10348_v47 = vpop.eup %10347 }
 0x7cf   : > { %v2399_v51 = vmul.f32 %v10348_v47, %v10332_v13 }
 0x7d1   : > { %9961 = vmatmul.msk.f32.vlgmr.msrb.gmra.mxu0 %vm1109_vm4, %v2399_v51  ;;  %v10220_v51 = vpack.i.bf16 %v11791_v5, %v11776_v3 }
 0x7dd   : > { %v2372_v55 = vpop.xlane.xlu1 %2371  ;;  %2868 = vrot.lane.b32.xlu1 %v11743_v17, %s16171_s23 }
 0x7de   : > { %10349 = vrcp.f32 %v2372_v55 }
 0x7e0   : > { %2866 = vrot.lane.b32.xlu2 %v11736_v31, %s16171_s23  ;;  %2888 = vrot.lane.b32.xlu0 %v11763_v16, %s16175_s22  ;;  %v2792_v16 = vpop.permute.xlu0 %2791  ;;  %s10585_s23 = smov 16   ;;  %s16496_s22 = smov 104  }
 0x7e4   : > { %v10350_v27 = vpop.eup %10349 }
 0x7e5   : > { %v2400_v13 = vmul.f32 %v10350_v27, %v10334_v2 }
 0x7e7   : > { %9962 = vmatmul.msk.f32.gmra.mxu0 %vm1109_vm4, %v2400_v13 }
 0x7ef   : > { %9974 = vmatmul.msk.f32.vlgmr.msra.gmra.mxu0 %vm864_vm3, %v11994_v18 }
 0x7f2   : > { %v2375_v19 = vpop.xlane.xlu2 %2374 }
 0x7f3   : > { %10351 = vrcp.f32 %v2375_v19 }
 0x7f5   : > { %v2588_v34 = vpop.permute.xlu1 %2587 }
 0x7f6   : > { %2615 = vmatpush.msrb.mxu1 %v2588_v34 }
 0x7f7   : > { %9975 = vmatmul.msk.f32.gmra.mxu0 %vm864_vm3, %v2644_v43 }
 0x7f9   : > { %v10352_v28 = vpop.eup %10351 }
 0x7fa   : > { %v2401_v41 = vmul.f32 %v10352_v28, %v10336_v26  ;;  %v2378_v14 = vpop.xlane.xlu2 %2377 }
 0x7fb   : > { %10353 = vrcp.f32 %v2378_v14 }
 0x7fc   : > { %9964 = vmatmul.msk.f32.vlgmr.msra.gmra.mxu2 %vm1109_vm4, %v2401_v41 }
 0x801   : > { %v10354_v31 = vpop.eup %10353 }
 0x802   : > { %v2402_v17 = vmul.f32 %v10354_v31, %v10338_v1  ;;  %v2891_v58 = vpop.permute.xlu2 %2890 }
 0x803   : > { %9984 = vmatpush.xpose.msk.msra.mxu1 %vm864_vm3, %v2891_v58 }
 0x804   : > { %9965 = vmatmul.msk.f32.gmra.mxu2 %vm1109_vm4, %v2402_v17 }
 0x80c   : > { %9978 = vmatmul.msk.f32.vlgmr.msrb.gmra.mxu2 %vm864_vm3, %v11990_v0 }
 0x814   : > { %9979 = vmatmul.msk.f32.gmra.mxu2 %vm864_vm3, %v2719_v35 }
 0x827   : > { %v2381_v2 = vpop.xlane.xlu0 %2380 }
 0x828   : > { %10355 = vrcp.f32 %v2381_v2 }
 0x82e   : > { %v10356_v18 = vpop.eup %10355 }
 0x82f   : > { %v2403_v26 = vmul.f32 %v10356_v18, %v10340_v38 }
 0x831   : > { %9967 = vmatmul.msk.f32.vlgmr.msra.gmra.mxu3 %vm1109_vm4, %v2403_v26 }
 0x837   : > { %v2387_v33 = vpop.xlane.xlu1 %2386 }
 0x83b   : > { %v2384_v1 = vpop.xlane.xlu2 %2383 }
 0x83c   : > { %10357 = vrcp.f32 %v2384_v1 }
 0x83d   : > { %10359 = vrcp.f32 %v2387_v33 }
 0x83f   : > { %v2390_v0 = vpop.xlane.xlu0 %2389 }
 0x840   : > { %10361 = vrcp.f32 %v2390_v0 }
 0x842   : > { %v10358_v22 = vpop.eup %10357 }
 0x843   : > { %v2404_v37 = vmul.f32 %v10358_v22, %v10342_v56  ;;  %v10360_v48 = vpop.eup %10359  ;;  %v2867_v56 = vpop.permute.xlu2 %2866 }
 0x844   : > { %v2405_v39 = vmul.f32 %v10360_v48, %v10344_v30 }
 0x845   : > { %9968 = vmatmul.msk.f32.gmra.mxu3 %vm1109_vm4, %v2404_v37 }
 0x846   : > { %9970 = vmatmul.msk.f32.vlgmr.msrb.gmra.mxu1 %vm1109_vm4, %v2405_v39  ;;  %v10362_v9 = vpop.eup %10361 }
 0x847   : > { %v2406_v38 = vmul.f32 %v10362_v9, %v10346_v25 }
 0x84d   : > { %9982 = vmatmul.msk.f32.vlgmr.msrb.gmra.mxu3 %vm864_vm3, %v2792_v16 }
 0x84e   : > { %9971 = vmatmul.msk.f32.gmra.mxu1 %vm1109_vm4, %v2406_v38  ;;  %v12049_v54 = vpop.f32.mrf.mxu0 }
 0x84f   : > { %v2869_v42 = vpop.permute.xlu1 %2868 }
 0x852   : > { %v2889_v53 = vpop.permute.xlu0 %2888 }
 0x853   : > { %9985 = vmatpush.xpose.msk.msra.mxu1 %vm864_vm3, %v2889_v53 }
 0x855   : > { %9983 = vmatmul.msk.f32.gmra.mxu3 %vm864_vm3, %v2794_v46 }
 0x856   : > { %9986 = vmatmul.msk.f32.vlgmr.msra.gmra.mxu1 %vm864_vm3, %v2867_v56 }
 0x85e   : > { %9987 = vmatmul.msk.f32.gmra.mxu1 %vm864_vm3, %v2869_v42 }
 0x864   : > { %v12052_v40 = vpop.f32.mrf.mxu0 }
 0x86c   : > { %v2692_v20 = vpop.f32.mrf.mxu0 }
 0x86d   : > { %v2923_v30 = vsel %vm1109_vm4, %v2692_v20, -inf }
 0x86e   : > { %2924 = vmax.xlane.f32.xlu2 %v2923_v30 }
 0x874   : > { %v2695_v32 = vpop.f32.mrf.mxu0 }
 0x875   : > { %v2926_v49 = vsel %vm1113_vm5, %v2695_v32, -inf }
 0x876   : > { %2927 = vmax.xlane.f32.xlu0 %v2926_v49 }
 0x87f   : > { %v12055_v21 = vpop.f32.mrf.mxu2 }
 0x886   : > { %10221 = vrot.lane.b32.xlu2 %v10220_v51, %s16173_s25 }
 0x887   : > { %v12058_v25 = vpop.f32.mrf.mxu2 }
 0x88a   : > { %3085 = vrot.lane.b32.xlu0 %v11796_v7, %s16173_s25 }
 0x88f   : > { %v2767_v12 = vpop.f32.mrf.mxu2 }
 0x890   : > { %v2929_v47 = vsel %vm1109_vm4, %v2767_v12, -inf }
 0x891   : > { %2930 = vmax.xlane.f32.xlu1 %v2929_v47 }
 0x897   : > { %v2770_v55 = vpop.f32.mrf.mxu2 }
 0x898   : > { %v2932_v19 = vsel %vm1113_vm5, %v2770_v55, -inf }
 0x8aa   : > { %3031 = vrot.lane.b32.xlu1 %v11779_v24, %s16173_s25 }
 0x8b4   : > { %v12068_v35 = vpop.f32.mrf.mxu3 }
 0x8c3   : > { %v12072_v46 = vpop.f32.mrf.mxu1 }
 0x8c8   : > { %v12070_v43 = vpop.f32.mrf.mxu3 }
 0x8cb   : > { %v12076_v5 = vpop.f32.mrf.mxu1 }
 0x8d0   : > { %v2842_v27 = vpop.f32.mrf.mxu3 }
 0x8d1   : > { %v2935_v3 = vsel %vm1109_vm4, %v2842_v27, -inf }
 0x8d2   : > { %2936 = vmax.xlane.f32.xlu2 %v2935_v3 }
 0x8d3   : > { %v12079_v24 = vpop.f32.mrf.mxu1 }
 0x8d4   : > { %2933 = vmax.xlane.f32.xlu1 %v2932_v19  ;;  %v2941_v28 = vsel %vm1109_vm4, %v12079_v24, -inf }
 0x8d5   : > { %2942 = vmax.xlane.f32.xlu0 %v2941_v28  ;;  %v10225_v28 = vpack.i.bf16 %v11837_v45, %v11809_v11 }
 0x8d8   : > { %v2845_v7 = vpop.f32.mrf.mxu3 }
 0x8d9   : > { %v2938_v13 = vsel %vm1113_vm5, %v2845_v7, -inf }
 0x8da   : > { %2939 = vmax.xlane.f32.xlu2 %v2938_v13 }
 0x8db   : > { %v12083_v41 = vpop.f32.mrf.mxu1 }
 0x8dc   : > { %v2944_v14 = vsel %vm1113_vm5, %v12083_v41, -inf }
 0x8dd   : > { %2945 = vmax.xlane.f32.xlu1 %v2944_v14 }
 0x8e1   : > { %v2925_v31 = vpop.xlane.xlu2 %2924 }
 0x8e2   : > { %v2947_v17 = vsub.f32 %v2692_v20, %v2925_v31 }
 0x8e4   : > { %v2955_v34 = vmul.f32 1.442695, %v2947_v17 }
 0x8e6   : > { %10363 = vpow2.f32 %v2955_v34 }
 0x8e9   : > { %v2928_v58 = vpop.xlane.xlu0 %2927  ;;  %v10222_v39 = vpop.permute.xlu2 %10221 }
 0x8ea   : > { %v2948_v16 = vsub.f32 %v2695_v32, %v2928_v58  ;;  %v10224_v9 = vunpack.i.h.bf16 %v10222_v39  ;;  %v10223_v42 = vunpack.i.l.bf16 %v10222_v39 }
 0x8ec   : > { %v12087_v2 = vpop.eup %10363  ;;  %v2957_v18 = vmul.f32 1.442695, %v2948_v16 }
 0x8ed   : > { %v2971_v26 = vsel %vm1109_vm4, %v12087_v2, 0.0 }
 0x8ee   : > { %10365 = vpow2.f32 %v2957_v18  ;;  %2972 = vadd.xlane.f32.xlu2 %v2971_v26 }
 0x8f4   : > { %v12091_v1 = vpop.eup %10365 }
 0x8f5   : > { %v2974_v22 = vsel %vm1113_vm5, %v12091_v1, 0.0 }
 0x8f6   : > { %2975 = vadd.xlane.f32.xlu1 %v2974_v22 }
 0x8fc   : > { %v3086_v0 = vpop.permute.xlu0 %3085 }
 0x8fd   : > { %9991 = vmatpush.msk.msra.mxu2 %vm624_vm1, %v3086_v0 }
 0x8ff   : > { %3111 = vmatpush.msra.mxu2 %v10224_v9 }
 0x904   : > { %v2931_v33 = vpop.xlane.xlu1 %2930 }
 0x905   : > { %v2949_v37 = vsub.f32 %v2767_v12, %v2931_v33 }
 0x907   : > { %v2959_v48 = vmul.f32 1.442695, %v2949_v37 }
 0x909   : > { %10367 = vpow2.f32 %v2959_v48 }
 0x90f   : > { %v12096_v38 = vpop.eup %10367  ;;  %3139 = vrot.lane.b32.xlu1 %v11817_v59, %s16173_s25 }
 0x910   : > { %v2977_v53 = vsel %vm1109_vm4, %v12096_v38, 0.0 }
 0x911   : > { %2978 = vadd.xlane.f32.xlu0 %v2977_v53 }
 0x917   : > { %3235 = vrot.lane.b32.xlu1 %v11946_v60, %s10584_s26 }
 0x91c   : > { %v3032_v56 = vpop.permute.xlu1 %3031 }
 0x91d   : > { %9988 = vmatpush.msk.msrb.mxu0 %vm624_vm1, %v3032_v56 }
 0x91f   : > { %3057 = vmatpush.msrb.mxu0 %v10223_v42  ;;  %3267 = vrot.lane.b32.xlu1 %v12049_v54, %s10585_s23 }
 0x927   : > { %3239 = vrot.lane.b32.xlu1 %v11983_v29, %s10584_s26 }
 0x92f   : > { %3237 = vrot.lane.b32.xlu1 %v11949_v52, %s10584_s26 }
 0x937   : > { %3269 = vrot.lane.b32.xlu1 %v12052_v40, %s10585_s23 }
 0x93f   : > { %3243 = vrot.lane.b32.xlu1 %v11997_v15, %s10584_s26 }
 0x945   : > { %v2937_v59 = vpop.xlane.xlu2 %2936 }
 0x946   : > { %v2951_v32 = vsub.f32 %v2842_v27, %v2937_v59 }
 0x947   : > { %v2934_v20 = vpop.xlane.xlu1 %2933 }
 0x948   : > { %v2950_v30 = vsub.f32 %v2770_v55, %v2934_v20  ;;  %v2963_v12 = vmul.f32 1.442695, %v2951_v32  ;;  %v2943_v55 = vpop.xlane.xlu0 %2942 }
 0x949   : > { %v2953_v27 = vsub.f32 %v12079_v24, %v2943_v55  ;;  %v3190_v24 = vld [vmem:[#allocation1] sm:$0xff] }
 0x94a   : > { %v2961_v49 = vmul.f32 1.442695, %v2950_v30 }
 0x94b   : > { %v2967_v19 = vmul.f32 1.442695, %v2953_v27  ;;  %v3387_v27 = vld [vmem:[%s16119_s7 + $0x18] sm:$0xff] }
 0x94c   : > { %10369 = vpow2.f32 %v2961_v49  ;;  %3462 = vmatpush.msra.mxu0 %v3387_v27 }
 0x94d   : > { %10371 = vpow2.f32 %v2963_v12  ;;  %v2940_v60 = vpop.xlane.xlu2 %2939 }
 0x94e   : > { %v2952_v54 = vsub.f32 %v2845_v7, %v2940_v60 }
 0x950   : > { %v2965_v47 = vmul.f32 1.442695, %v2952_v54  ;;  %v2946_v14 = vpop.xlane.xlu1 %2945 }
 0x951   : > { %v2954_v11 = vsub.f32 %v12083_v41, %v2946_v14 }
 0x952   : > { %v10370_v29 = vpop.eup %10369  ;;  %10373 = vpow2.f32 %v2965_v47 }
 0x953   : > { %v10372_v51 = vpop.eup %10371  ;;  %v2980_v52 = vsel %vm1113_vm5, %v10370_v29, 0.0  ;;  %10375 = vpow2.f32 %v2967_v19  ;;  %v2969_v26 = vmul.f32 1.442695, %v2954_v11 }
 0x954   : > { %v2983_v40 = vsel %vm1109_vm4, %v10372_v51, 0.0  ;;  %2981 = vadd.xlane.f32.xlu0 %v2980_v52 }
 0x955   : > { %2984 = vadd.xlane.f32.xlu2 %v2983_v40 }
 0x958   : > { %v10374_v3 = vpop.eup %10373 }
 0x959   : > { %v2986_v15 = vsel %vm1113_vm5, %v10374_v3, 0.0  ;;  %v10376_v7 = vpop.eup %10375 }
 0x95a   : > { %v2989_v13 = vsel %vm1109_vm4, %v10376_v7, 0.0 }
 0x95c   : > { %2987 = vadd.xlane.f32.xlu0 %v2986_v15 }
 0x961   : > { %v2973_v31 = vpop.xlane.xlu2 %2972 }
 0x962   : > { %10377 = vrcp.f32 %v2973_v31 }
 0x964   : > { %2990 = vadd.xlane.f32.xlu0 %v2989_v13 }
 0x968   : > { %v10378_v17 = vpop.eup %10377 }
 0x969   : > { %v3003_v34 = vmul.f32 %v10378_v17, %v12087_v2  ;;  %v2976_v58 = vpop.xlane.xlu1 %2975 }
 0x96a   : > { %10379 = vrcp.f32 %v2976_v58 }
 0x96b   : > { %9989 = vmatmul.msk.f32.vlgmr.msrb.gmra.mxu0 %vm1109_vm4, %v3003_v34 }
 0x96d   : > { %10226 = vrot.lane.b32.xlu2 %v10225_v28, %s16173_s25 }
 0x970   : > { %v10380_v16 = vpop.eup %10379 }
 0x971   : > { %v3004_v18 = vmul.f32 %v10380_v16, %v12091_v1 }
 0x973   : > { %9990 = vmatmul.msk.f32.gmra.mxu0 %vm1109_vm4, %v3004_v18 }
 0x978   : > { %3193 = vrot.lane.b32.xlu0 %v3190_v24, %s16173_s25  ;;  %s10586_s25 = smov 24  }
 0x980   : > { %3271 = vrot.lane.b32.xlu0 %v12055_v21, %s10585_s23 }
 0x981   : > { %v3140_v33 = vpop.permute.xlu1 %3139 }
 0x982   : > { %9994 = vmatpush.msk.msra.mxu3 %vm624_vm1, %v3140_v33 }
 0x984   : > { %v2979_v45 = vpop.xlane.xlu0 %2978 }
 0x985   : > { %10381 = vrcp.f32 %v2979_v45 }
 0x986   : > { %10383 = vpow2.f32 %v2969_v26 }
 0x98b   : > { %v10382_v2 = vpop.eup %10381 }
 0x98c   : > { %v3005_v22 = vmul.f32 %v10382_v2, %v12096_v38  ;;  %v10384_v1 = vpop.eup %10383 }
 0x98d   : > { %v2992_v37 = vsel %vm1113_vm5, %v10384_v1, 0.0 }
 0x98e   : > { %9992 = vmatmul.msk.f32.vlgmr.msra.gmra.mxu2 %vm1109_vm4, %v3005_v22 }
 0x996   : > { %2993 = vadd.xlane.f32.xlu2 %v2992_v37 }
 0x9ae   : > { %3275 = vrot.lane.b32.xlu2 %v12068_v35, %s10585_s23 }
 0x9b6   : > { %3245 = vrot.lane.b32.xlu2 %v11999_v44, %s10584_s26 }
 0x9c7   : > { %v2982_v21 = vpop.xlane.xlu0 %2981 }
 0x9c8   : > { %v2985_v41 = vpop.xlane.xlu2 %2984  ;;  %10385 = vrcp.f32 %v2982_v21 }
 0x9c9   : > { %10387 = vrcp.f32 %v2985_v41 }
 0x9ce   : > { %v10386_v48 = vpop.eup %10385 }
 0x9cf   : > { %v10388_v39 = vpop.eup %10387  ;;  %v2988_v0 = vpop.xlane.xlu0 %2987  ;;  %v3006_v9 = vmul.f32 %v10386_v48, %v10370_v29 }
 0x9d0   : > { %v10227_v38 = vpop.permute.xlu2 %10226  ;;  %10389 = vrcp.f32 %v2988_v0  ;;  %v3007_v56 = vmul.f32 %v10388_v39, %v10372_v51  ;;  %v3236_v51 = vpop.permute.xlu1 %3235 }
 0x9d1   : > { %v10228_v53 = vunpack.i.l.bf16 %v10227_v38  ;;  %9993 = vmatmul.msk.f32.gmra.mxu2 %vm1109_vm4, %v3006_v9  ;;  %v10229_v30 = vunpack.i.h.bf16 %v10227_v38 }
 0x9d3   : > { %3165 = vmatpush.msra.mxu3 %v10228_v53 }
 0x9d4   : > { %9995 = vmatmul.msk.f32.vlgmr.msra.gmra.mxu3 %vm1109_vm4, %v3007_v56 }
 0x9d6   : > { %v10390_v35 = vpop.eup %10389 }
 0x9d7   : > { %v3008_v42 = vmul.f32 %v10390_v35, %v10374_v3  ;;  %v2991_v44 = vpop.xlane.xlu0 %2990 }
 0x9d8   : > { %10391 = vrcp.f32 %v2991_v44  ;;  %v3268_v55 = vpop.permute.xlu1 %3267 }
 0x9dc   : > { %9996 = vmatmul.msk.f32.gmra.mxu3 %vm1109_vm4, %v3008_v42 }
 0x9de   : > { %v10392_v20 = vpop.eup %10391 }
 0x9df   : > { %v3009_v32 = vmul.f32 %v10392_v20, %v10376_v7  ;;  %v3323_v7 = vsel %vm864_vm3, %v11741_v57, %v3236_v51 }
 0x9e0   : > { %v3240_v15 = vpop.permute.xlu1 %3239  ;;  %v3331_v13 = vsel %vm564_vm0, %v3323_v7, %v3268_v55 }
 0x9e1   : > { %v3325_v33 = vsel %vm864_vm3, %v11794_v6, %v3240_v15 }
 0x9e8   : > { %v3059_v49 = vpop.f32.mrf.mxu0  ;;  %v3238_v58 = vpop.permute.xlu1 %3237 }
 0x9e9   : > { %3299 = vrot.lane.b32.xlu0 %v3059_v49, %s10586_s25  ;;  %v3324_v26 = vsel %vm864_vm3, %v11789_v4, %v3238_v58 }
 0x9ea   : > { %v3194_v59 = vpop.permute.xlu0 %3193 }
 0x9eb   : > { %9997 = vmatpush.msk.msrb.mxu1 %vm624_vm1, %v3194_v59 }
 0x9ed   : > { %3219 = vmatpush.msrb.mxu1 %v10229_v30 }
 0x9ee   : > { %9998 = vmatmul.msk.f32.vlgmr.msrb.gmra.mxu1 %vm1109_vm4, %v3009_v32 }
 0x9f0   : > { %v3062_v12 = vpop.f32.mrf.mxu0  ;;  %v3270_v11 = vpop.permute.xlu1 %3269 }
 0x9f1   : > { %3301 = vrot.lane.b32.xlu0 %v3062_v12, %s10586_s25 }
 0x9f2   : > { %v3272_v3 = vpop.permute.xlu0 %3271 }
 0x9f8   : > { %v3244_v53 = vpop.permute.xlu1 %3243 }
 0x9f9   : > { %v3327_v30 = vsel %vm864_vm3, %v11814_v62, %v3244_v53 }
 0xa09   : > { %v2994_v60 = vpop.xlane.xlu2 %2993 }
 0xa0a   : > { %10393 = vrcp.f32 %v2994_v60 }
 0xa10   : > { %v10394_v54 = vpop.eup %10393 }
 0xa11   : > { %v3113_v29 = vpop.f32.mrf.mxu2  ;;  %v3010_v47 = vmul.f32 %v10394_v54, %v10384_v1  ;;  %v3276_v59 = vpop.permute.xlu2 %3275 }
 0xa12   : > { %3303 = vrot.lane.b32.xlu0 %v3113_v29, %s10586_s25  ;;  %v3335_v32 = vsel %vm564_vm0, %v3327_v30, %v3276_v59 }
 0xa13   : > { %9999 = vmatmul.msk.f32.gmra.mxu1 %vm1109_vm4, %v3010_v47 }
 0xa1a   : > { %3241 = vrot.lane.b32.xlu0 %v11985_v36, %s10584_s26  ;;  %v3386_v36 = vld [vmem:[%s16119_s7 + $0x10] sm:$0xff] }
 0xa1b   : > { %3463 = vmatpush.msra.mxu0 %v3386_v36 }
 0xa22   : > { %3273 = vrot.lane.b32.xlu0 %v12058_v25, %s10585_s23  ;;  %v3385_v25 = vld [vmem:[%s16119_s7 + $0x8] sm:$0xff] }
 0xa23   : > { %3464 = vmatpush.msra.mxu0 %v3385_v25 }
 0xa2a   : > { %3247 = vrot.lane.b32.xlu0 %v12001_v10, %s10584_s26  ;;  %v3384_v10 = vld [vmem:[%s16119_s7] sm:$0xff] }
 0xa2b   : > { %3465 = vmatpush.msra.mxu0 %v3384_v10 }
 0xa54   : > { %v3116_v52 = vpop.f32.mrf.mxu2 }
 0xa55   : > { %3305 = vrot.lane.b32.xlu1 %v3116_v52, %s10586_s25 }
 0xa57   : > { %v3167_v40 = vpop.f32.mrf.mxu3 }
 0xa5b   : > { %v3300_v28 = vpop.permute.xlu0 %3299 }
 0xa5c   : > { %v3340_v14 = vsel %vm3339_vm6, %v3331_v13, %v3300_v28 }
 0xa5d   : > { %3307 = vrot.lane.b32.xlu1 %v3167_v40, %s10586_s25  ;;  %v3356_v31 = vrot.slane %v3340_v14, 1  ;;  %v3357_v17 = vrot.slane %v3340_v14, 2  ;;  %v3358_v24 = vrot.slane %v3340_v14, 3  ;;  %3392 = vst [vmem:[#allocation1] ss:$9 sm:$0xff] %v3340_v14  ;;  %v3359_v16 = vrot.slane %v3340_v14, 4  ;;  %v3246_v40 = vpop.permute.xlu2 %3245 }
 0xa5e   : > { %v3360_v18 = vrot.slane %v3340_v14, 5  ;;  %v3361_v57 = vrot.slane %v3340_v14, 6  ;;  %v3328_v15 = vsel %vm864_vm3, %v11823_v61, %v3246_v40  ;;  %v16347_v40 = vld [vmem:[#allocation2_spill] sm:$0xff] }
 0xa5f   : > { %v3170_v19 = vpop.f32.mrf.mxu3  ;;  %3394 = vst [vmem:[#allocation1 + $0x1] ss:$9 sm:$0xff] %v3356_v31 }
 0xa60   : > { %3309 = vrot.lane.b32.xlu2 %v3170_v19, %s10586_s25  ;;  %3396 = vst [vmem:[#allocation1 + $0x2] ss:$9 sm:$0xff] %v3357_v17 }
 0xa61   : > { %3398 = vst [vmem:[#allocation1 + $0x3] ss:$9 sm:$0xff] %v3358_v24 }
 0xa62   : > { %3400 = vst [vmem:[#allocation1 + $0x4] ss:$9 sm:$0xff] %v3359_v16 }
 0xa63   : > { %3402 = vst [vmem:[#allocation1 + $0x5] ss:$9 sm:$0xff] %v3360_v18  ;;  %v3302_v45 = vpop.permute.xlu0 %3301 }
 0xa64   : > { %3404 = vst [vmem:[#allocation1 + $0x6] ss:$9 sm:$0xff] %v3361_v57 }
 0xa65   : > { %3279 = vrot.lane.b32.xlu1 %v12072_v46, %s10585_s23  ;;  %v3362_v46 = vrot.slane %v3340_v14, 7 }
 0xa67   : > { %3406 = vst [vmem:[#allocation1 + $0x7] ss:$9 sm:$0xff] %v3362_v46 }
 0xa6b   : > { %v3221_v34 = vpop.f32.mrf.mxu1 }
 0xa6c   : > { %3311 = vrot.lane.b32.xlu0 %v3221_v34, %s10586_s25 }
 0xa6d   : > { %3277 = vrot.lane.b32.xlu1 %v12070_v43, %s10585_s23  ;;  %v3332_v43 = vsel %vm564_vm0, %v3324_v26, %v3270_v11 }
 0xa6e   : > { %v3407_v2 = vld [vmem:[#allocation1] sm:$0xff]  ;;  %v3341_v22 = vsel %vm3339_vm6, %v3332_v43, %v3302_v45 }
 0xa6f   : > { %3408 = vst [vmem:[#allocation1] ss:$9 sm:$0xff] %v3341_v22  ;;  %10000 = vmatmul.msk.f32.vlgmr.msra.gmra.mxu0 %vm745_vm2, %v3407_v2 }
 0xa74   : > { %3249 = vrot.lane.b32.xlu0 %v12004_v50, %s10584_s26  ;;  %v3333_v50 = vsel %vm564_vm0, %v3325_v33, %v3272_v3 }
 0xa75   : > { %3281 = vrot.lane.b32.xlu1 %v12076_v5, %s10585_s23 }
 0xa84   : > { %v3304_v1 = vpop.permute.xlu0 %3303 }
 0xa85   : > { %v3342_v5 = vsel %vm3339_vm6, %v3333_v50, %v3304_v1 }
 0xa86   : > { %v3363_v37 = vrot.slane %v3342_v5, 1  ;;  %v3364_v21 = vrot.slane %v3342_v5, 2  ;;  %v3365_v41 = vrot.slane %v3342_v5, 3  ;;  %3409 = vst [vmem:[#allocation1 + $0x1] ss:$9 sm:$0xff] %v3342_v5  ;;  %v3366_v4 = vrot.slane %v3342_v5, 4 }
 0xa87   : > { %v3367_v48 = vrot.slane %v3342_v5, 5  ;;  %v3368_v39 = vrot.slane %v3342_v5, 6  ;;  %v3369_v6 = vrot.slane %v3342_v5, 7 }
 0xa88   : > { %3410 = vst [vmem:[#allocation1 + $0x2] ss:$9 sm:$0xff] %v3363_v37 }
 0xa89   : > { %3411 = vst [vmem:[#allocation1 + $0x3] ss:$9 sm:$0xff] %v3364_v21  ;;  %v16339_v21 = vld [vmem:[#allocation3_spill] sm:$0xff] }
 0xa8a   : > { %3412 = vst [vmem:[#allocation1 + $0x4] ss:$9 sm:$0xff] %v3365_v41  ;;  %v16343_v53 = vrot.slane %v16339_v21, 4  ;;  %v16346_v59 = vrot.slane %v16339_v21, 7 }
 0xa8b   : > { %3413 = vst [vmem:[#allocation1 + $0x5] ss:$9 sm:$0xff] %v3366_v4 }
 0xa8c   : > { %3414 = vst [vmem:[#allocation1 + $0x6] ss:$9 sm:$0xff] %v3367_v48  ;;  %v3242_v38 = vpop.permute.xlu0 %3241  ;;  %v16340_v48 = vrot.slane %v16339_v21, 1 }
 0xa8d   : > { %3415 = vst [vmem:[#allocation1 + $0x7] ss:$9 sm:$0xff] %v3368_v39  ;;  %v3326_v35 = vsel %vm864_vm3, %v11800_v8, %v3242_v38 }
 0xa90   : > { %v3224_v0 = vpop.f32.mrf.mxu1 }
 0xa91   : > { %3313 = vrot.lane.b32.xlu2 %v3224_v0, %s10586_s25  ;;  %v16341_v0 = vrot.slane %v16339_v21, 2 }
 0xa94   : > { %v3416_v9 = vld [vmem:[#allocation1] sm:$0xff]  ;;  %v3274_v56 = vpop.permute.xlu0 %3273 }
 0xa95   : > { %3417 = vst [vmem:[#allocation1] ss:$9 sm:$0xff] %v3369_v6  ;;  %10001 = vmatmul.msk.f32.gmra.mxu0 %vm745_vm2, %v3416_v9  ;;  %v3334_v42 = vsel %vm564_vm0, %v3326_v35, %v3274_v56  ;;  %v16342_v9 = vrot.slane %v16339_v21, 3  ;;  %v16344_v35 = vrot.slane %v16339_v21, 5 }
 0xa9c   : > { %v3248_v51 = vpop.permute.xlu0 %3247 }
 0xa9d   : > { %v3329_v62 = vsel %vm864_vm3, %v11812_v63, %v3248_v51 }
 0xaba   : > { %v3310_v31 = vpop.permute.xlu2 %3309 }
 0xac7   : > { %v3306_v44 = vpop.permute.xlu1 %3305 }
 0xac8   : > { %v3343_v20 = vsel %vm3339_vm6, %v3334_v42, %v3306_v44  ;;  %v16345_v44 = vrot.slane %v16339_v21, 6 }
 0xac9   : > { %3418 = vst [vmem:[#allocation1 + $0x1] ss:$9 sm:$0xff] %v3343_v20 }
 0xacf   : > { %v3308_v49 = vpop.permute.xlu1 %3307 }
 0xad0   : > { %v3344_v12 = vsel %vm3339_vm6, %v3335_v32, %v3308_v49 }
 0xad1   : > { %v3370_v60 = vrot.slane %v3344_v12, 1  ;;  %v3371_v54 = vrot.slane %v3344_v12, 2  ;;  %v3372_v29 = vrot.slane %v3344_v12, 3  ;;  %3419 = vst [vmem:[#allocation1 + $0x2] ss:$9 sm:$0xff] %v3344_v12  ;;  %v3373_v8 = vrot.slane %v3344_v12, 4 }
 0xad2   : > { %v3374_v47 = vrot.slane %v3344_v12, 5  ;;  %v3375_v55 = vrot.slane %v3344_v12, 6  ;;  %v3376_v27 = vrot.slane %v3344_v12, 7 }
 0xad3   : > { %3420 = vst [vmem:[#allocation1 + $0x3] ss:$9 sm:$0xff] %v3370_v60 }
 0xad4   : > { %3421 = vst [vmem:[#allocation1 + $0x4] ss:$9 sm:$0xff] %v3371_v54 }
 0xad5   : > { %3422 = vst [vmem:[#allocation1 + $0x5] ss:$9 sm:$0xff] %v3372_v29 }
 0xad6   : > { %3423 = vst [vmem:[#allocation1 + $0x6] ss:$9 sm:$0xff] %v3373_v8 }
 0xad7   : > { %3424 = vst [vmem:[#allocation1 + $0x7] ss:$9 sm:$0xff] %v3374_v47  ;;  %v3280_v52 = vpop.permute.xlu1 %3279 }
 0xad8   : > { %v3337_v25 = vsel %vm564_vm0, %v3329_v62, %v3280_v52 }
 0xade   : > { %v3425_v36 = vld [vmem:[#allocation1] sm:$0xff]  ;;  %v3312_v10 = vpop.permute.xlu0 %3311 }
 0xadf   : > { %3426 = vst [vmem:[#allocation1] ss:$9 sm:$0xff] %v3375_v55  ;;  %10002 = vmatmul.msk.f32.gmra.mxu0 %vm745_vm2, %v3425_v36  ;;  %v3346_v19 = vsel %vm3339_vm6, %v3337_v25, %v3312_v10  ;;  %v3278_v3 = vpop.permute.xlu1 %3277 }
 0xae0   : > { %3427 = vst [vmem:[#allocation1 + $0x1] ss:$9 sm:$0xff] %v3376_v27  ;;  %v3377_v7 = vrot.slane %v3346_v19, 1  ;;  %v3378_v13 = vrot.slane %v3346_v19, 2  ;;  %v3379_v28 = vrot.slane %v3346_v19, 3  ;;  %v3380_v63 = vrot.slane %v3346_v19, 4 }
 0xae1   : > { %3429 = vst [vmem:[#allocation1 + $0x3] ss:$9 sm:$0xff] %v3346_v19  ;;  %v3336_v14 = vsel %vm564_vm0, %v3328_v15, %v3278_v3  ;;  %v3383_v16 = vrot.slane %v3346_v19, 7  ;;  %v3381_v18 = vrot.slane %v3346_v19, 5  ;;  %v3382_v11 = vrot.slane %v3346_v19, 6  ;;  %v16348_v27 = vld [vmem:[#allocation5_spill] sm:$0xff] }
 0xae2   : > { %3430 = vst [vmem:[#allocation1 + $0x4] ss:$9 sm:$0xff] %v3377_v7  ;;  %v3345_v17 = vsel %vm3339_vm6, %v3336_v14, %v3310_v31  ;;  %v16349_v25 = vrot.slane %v16348_v27, 1  ;;  %v16350_v19 = vrot.slane %v16348_v27, 2  ;;  %v16351_v15 = vrot.slane %v16348_v27, 3 }
 0xae3   : > { %3431 = vst [vmem:[#allocation1 + $0x5] ss:$9 sm:$0xff] %v3378_v13  ;;  %v16352_v13 = vrot.slane %v16348_v27, 4  ;;  %v16354_v31 = vrot.slane %v16348_v27, 6 }
 0xae4   : > { %3432 = vst [vmem:[#allocation1 + $0x6] ss:$9 sm:$0xff] %v3379_v28 }
 0xae5   : > { %3433 = vst [vmem:[#allocation1 + $0x7] ss:$9 sm:$0xff] %v3380_v63  ;;  %v16353_v63 = vrot.slane %v16348_v27, 5 }
 0xae6   : > { %3428 = vst [vmem:[#allocation1 + $0x2] ss:$9 sm:$0xff] %v3345_v17  ;;  %v3250_v24 = vpop.permute.xlu0 %3249 }
 0xae7   : > { %v3330_v61 = vsel %vm864_vm3, %v11827_v23, %v3250_v24  ;;  %v3282_v34 = vpop.permute.xlu1 %3281  ;;  %v12218_v23 = vld [vmem:[%s16120_s8] ss:$0 sm:$0xff] }
 0xae8   : > { %v3338_v46 = vsel %vm564_vm0, %v3330_v61, %v3282_v34 }
 0xaeb   : > { %v3314_v58 = vpop.permute.xlu2 %3313 }
 0xaec   : > { %v3347_v45 = vsel %vm3339_vm6, %v3338_v46, %v3314_v58  ;;  %v3467_v43 = vpop.f32.mrf.mxu0 }
 0xaed   : > { %v3434_v57 = vld [vmem:[#allocation1] sm:$0xff]  ;;  %v3468_v2 = vadd.f32 %v12218_v23, %v3467_v43 }
 0xaee   : > { %3437 = vst [vmem:[#allocation1 + $0x2] ss:$9 sm:$0xff] %v3383_v16  ;;  %10003 = vmatmul.msk.f32.gmra.mxu0 %vm745_vm2, %v3434_v57 }
 0xaef   : > { %3435 = vst [vmem:[#allocation1] ss:$9 sm:$0xff] %v3381_v18  ;;  %v3487_v22 = vrot.slane %v3468_v2, 1  ;;  %v3488_v33 = vrot.slane %v3468_v2, 2  ;;  %v3489_v50 = vrot.slane %v3468_v2, 3  ;;  %v3490_v1 = vrot.slane %v3468_v2, 4 }
 0xaf0   : > { %3436 = vst [vmem:[#allocation1 + $0x1] ss:$9 sm:$0xff] %v3382_v11  ;;  %v3491_v5 = vrot.slane %v3468_v2, 5  ;;  %v3492_v37 = vrot.slane %v3468_v2, 6  ;;  %v12223_v41 = vadd.f32 %v3468_v2, %v16339_v21  ;;  %v3493_v4 = vrot.slane %v3468_v2, 7 }
 0xaf1   : > { %3438 = vst [vmem:[#allocation1 + $0x3] ss:$9 sm:$0xff] %v3347_v45  ;;  %v12227_v39 = vadd.f32 %v3487_v22, %v16340_v48  ;;  %v12231_v6 = vadd.f32 %v3488_v33, %v16341_v0  ;;  %v12235_v38 = vadd.f32 %v3489_v50, %v16342_v9  ;;  %v12239_v56 = vadd.f32 %v3490_v1, %v16343_v53  ;;  %v16356_v22 = vld [vmem:[#allocation4_spill] sm:$0xff]  ;;  %v16357_v50 = vld [vmem:[#allocation7_spill] sm:$0xff] }
 0xaf2   : > { %v12244_v42 = vadd.f32 %v3491_v5, %v16344_v35  ;;  %v12249_v20 = vadd.f32 %v3492_v37, %v16345_v44  ;;  %v12254_v30 = vadd.f32 %v3493_v4, %v16346_v59  ;;  %v16358_v5 = vrot.slane %v16357_v50, 1 }
 0xaf3   : > { %v16359_v21 = vrot.slane %v16357_v50, 2  ;;  %v16360_v48 = vrot.slane %v16357_v50, 3  ;;  %v16361_v9 = vrot.slane %v16357_v50, 4  ;;  %v16362_v35 = vrot.slane %v16357_v50, 5 }
 0xaf4   : > { %v10587_v59 = vmov 32.0  }
 0xaf5   : > { %10395 = vrcp.f32 %v10587_v59 }
 0xaf8   : > { %v3439_v26 = vld [vmem:[#allocation1] sm:$0xff] }
 0xaf9   : > { %10004 = vmatmul.msk.f32.gmra.mxu0 %vm745_vm2, %v3439_v26  ;;  %3623 = vst [vmem:[#allocation1] ss:$9 sm:$0xff] %v12223_v41  ;;  %v16355_v26 = vrot.slane %v16348_v27, 7 }
 0xafa   : > { %3625 = vst [vmem:[#allocation1 + $0x1] ss:$9 sm:$0xff] %v12227_v39 }
 0xafb   : > { %3627 = vst [vmem:[#allocation1 + $0x2] ss:$9 sm:$0xff] %v12231_v6 }
 0xafc   : > { %3629 = vst [vmem:[#allocation1 + $0x3] ss:$9 sm:$0xff] %v12235_v38 }
 0xafd   : > { %3631 = vst [vmem:[#allocation1 + $0x4] ss:$9 sm:$0xff] %v12239_v56 }
 0xafe   : > { %3633 = vst [vmem:[#allocation1 + $0x5] ss:$9 sm:$0xff] %v12244_v42 }
 0xaff   : > { %3635 = vst [vmem:[#allocation1 + $0x6] ss:$9 sm:$0xff] %v12249_v20 }
 0xb00   : > { %3637 = vst [vmem:[#allocation1 + $0x7] ss:$9 sm:$0xff] %v12254_v30 }
 0xb07   : > { %v3638_v32 = vld [vmem:[#allocation1] sm:$0xff] }
 0xb08   : > { %v3676_v49 = vsel %vm745_vm2, %v3638_v32, 0.0 }
 0xb09   : > { %3677 = vadd.xlane.f32.xlu0 %v3676_v49  ;;  %v10396_v49 = vpop.eup %10395 }
 0xb0a   : > { %vm3697_vm7 = vweird.f32 %v10396_v49 }
 0xb12   : > { %v3470_v12 = vpop.f32.mrf.mxu0 }
 0xb13   : > { %v3471_v60 = vadd.f32 %v12218_v23, %v3470_v12 }
 0xb15   : > { %v3494_v54 = vrot.slane %v3471_v60, 1  ;;  %v3495_v29 = vrot.slane %v3471_v60, 2  ;;  %v3496_v8 = vrot.slane %v3471_v60, 3  ;;  %v3497_v47 = vrot.slane %v3471_v60, 4 }
 0xb16   : > { %v3498_v51 = vrot.slane %v3471_v60, 5  ;;  %v3499_v52 = vrot.slane %v3471_v60, 6  ;;  %v12264_v62 = vadd.f32 %v3471_v60, %v16347_v40  ;;  %v3500_v55 = vrot.slane %v3471_v60, 7 }
 0xb17   : > { %v12267_v36 = vadd.f32 %v3494_v54, %v16348_v27  ;;  %v12271_v10 = vadd.f32 %v3495_v29, %v16349_v25  ;;  %v12275_v3 = vadd.f32 %v3496_v8, %v16350_v19  ;;  %v12279_v7 = vadd.f32 %v3497_v47, %v16351_v15 }
 0xb18   : > { %3639 = vst [vmem:[#allocation1] ss:$9 sm:$0xff] %v12264_v62  ;;  %v12284_v28 = vadd.f32 %v3498_v51, %v16352_v13  ;;  %v12289_v14 = vadd.f32 %v3499_v52, %v16353_v63  ;;  %v12294_v17 = vadd.f32 %v3500_v55, %v16354_v31  ;;  %v16363_v52 = vrot.slane %v16357_v50, 6  ;;  %v16365_v13 = vld [vmem:[#allocation6_spill] sm:$0xff]  ;;  %v16366_v31 = vld [vmem:[#allocation9_spill] sm:$0xff] }
 0xb19   : > { %3640 = vst [vmem:[#allocation1 + $0x1] ss:$9 sm:$0xff] %v12267_v36  ;;  %v3693_v55 = vmul.f32 32.0, %v10396_v49  ;;  %v16364_v19 = vrot.slane %v16357_v50, 7 }
 0xb1a   : > { %3641 = vst [vmem:[#allocation1 + $0x2] ss:$9 sm:$0xff] %v12271_v10 }
 0xb1b   : > { %3642 = vst [vmem:[#allocation1 + $0x3] ss:$9 sm:$0xff] %v12275_v3 }
 0xb1c   : > { %3643 = vst [vmem:[#allocation1 + $0x4] ss:$9 sm:$0xff] %v12279_v7 }
 0xb1d   : > { %3644 = vst [vmem:[#allocation1 + $0x5] ss:$9 sm:$0xff] %v12284_v28 }
 0xb1e   : > { %3645 = vst [vmem:[#allocation1 + $0x6] ss:$9 sm:$0xff] %v12289_v14 }
 0xb1f   : > { %3646 = vst [vmem:[#allocation1 + $0x7] ss:$9 sm:$0xff] %v12294_v17 }
 0xb26   : > { %v3647_v24 = vld [vmem:[#allocation1] sm:$0xff] }
 0xb27   : > { %v3679_v61 = vsel %vm745_vm2, %v3647_v24, 0.0 }
 0xb28   : > { %3680 = vadd.xlane.f32.xlu1 %v3679_v61  ;;  %v16367_v61 = vrot.slane %v16366_v31, 1 }
 0xb5c   : > { %v3473_v34 = vpop.f32.mrf.mxu0 }
 0xb5d   : > { %v3474_v58 = vadd.f32 %v12218_v23, %v3473_v34 }
 0xb5f   : > { %v3501_v16 = vrot.slane %v3474_v58, 1  ;;  %v3502_v18 = vrot.slane %v3474_v58, 2  ;;  %v3503_v57 = vrot.slane %v3474_v58, 3  ;;  %v3504_v46 = vrot.slane %v3474_v58, 4 }
 0xb60   : > { %v3505_v11 = vrot.slane %v3474_v58, 5  ;;  %v3506_v45 = vrot.slane %v3474_v58, 6  ;;  %v12305_v43 = vadd.f32 %v3474_v58, %v16355_v26  ;;  %v3507_v2 = vrot.slane %v3474_v58, 7 }
 0xb61   : > { %v12308_v33 = vadd.f32 %v3501_v16, %v16356_v22  ;;  %v12311_v1 = vadd.f32 %v3502_v18, %v16357_v50  ;;  %v12315_v37 = vadd.f32 %v3503_v57, %v16358_v5  ;;  %v12319_v4 = vadd.f32 %v3504_v46, %v16359_v21 }
 0xb62   : > { %3648 = vst [vmem:[#allocation1] ss:$9 sm:$0xff] %v12305_v43  ;;  %v12324_v0 = vadd.f32 %v3505_v11, %v16360_v48  ;;  %v12329_v53 = vadd.f32 %v3506_v45, %v16361_v9  ;;  %v12334_v44 = vadd.f32 %v3507_v2, %v16362_v35  ;;  %v16368_v16 = vrot.slane %v16366_v31, 2 }
 0xb63   : > { %3649 = vst [vmem:[#allocation1 + $0x1] ss:$9 sm:$0xff] %v12308_v33  ;;  %v16369_v57 = vrot.slane %v16366_v31, 3  ;;  %v3694_v11 = vsub.f32 1.0, %v3693_v55  ;;  %v16370_v45 = vrot.slane %v16366_v31, 4  ;;  %v16371_v35 = vrot.slane %v16366_v31, 5 }
 0xb64   : > { %3650 = vst [vmem:[#allocation1 + $0x2] ss:$9 sm:$0xff] %v12311_v1 }
 0xb65   : > { %3651 = vst [vmem:[#allocation1 + $0x3] ss:$9 sm:$0xff] %v12315_v37  ;;  %v3695_v50 = vmul.f32 %v10396_v49, %v3694_v11 }
 0xb66   : > { %3652 = vst [vmem:[#allocation1 + $0x4] ss:$9 sm:$0xff] %v12319_v4 }
 0xb67   : > { %3653 = vst [vmem:[#allocation1 + $0x5] ss:$9 sm:$0xff] %v12324_v0  ;;  %v3696_v9 = vadd.f32 %v10396_v49, %v3695_v50 }
 0xb68   : > { %3654 = vst [vmem:[#allocation1 + $0x6] ss:$9 sm:$0xff] %v12329_v53 }
 0xb69   : > { %3655 = vst [vmem:[#allocation1 + $0x7] ss:$9 sm:$0xff] %v12334_v44 }
 0xb6b   : > { %v3476_v32 = vpop.f32.mrf.mxu0 }
 0xb6c   : > { %v3477_v12 = vadd.f32 %v12218_v23, %v3476_v32  ;;  %v16372_v32 = vrot.slane %v16366_v31, 6 }
 0xb6e   : > { %v3508_v60 = vrot.slane %v3477_v12, 1  ;;  %v3509_v54 = vrot.slane %v3477_v12, 2  ;;  %v3510_v29 = vrot.slane %v3477_v12, 3  ;;  %v3511_v8 = vrot.slane %v3477_v12, 4 }
 0xb6f   : > { %v3512_v47 = vrot.slane %v3477_v12, 5  ;;  %v3513_v51 = vrot.slane %v3477_v12, 6  ;;  %v12344_v40 = vadd.f32 %v3477_v12, %v16363_v52  ;;  %v3514_v25 = vrot.slane %v3477_v12, 7 }
 0xb70   : > { %v3656_v27 = vld [vmem:[#allocation1] sm:$0xff]  ;;  %v12348_v15 = vadd.f32 %v3508_v60, %v16364_v19  ;;  %v12351_v63 = vadd.f32 %v3509_v54, %v16365_v13  ;;  %v12354_v24 = vadd.f32 %v3510_v29, %v16366_v31  ;;  %v12358_v34 = vadd.f32 %v3511_v8, %v16367_v61  ;;  %v16374_v29 = vld [vmem:[#allocation8_spill] sm:$0xff] }
 0xb71   : > { %3657 = vst [vmem:[#allocation1] ss:$9 sm:$0xff] %v12344_v40  ;;  %v3682_v58 = vsel %vm745_vm2, %v3656_v27, 0.0  ;;  %v12364_v18 = vadd.f32 %v3512_v47, %v16368_v16  ;;  %v12369_v46 = vadd.f32 %v3513_v51, %v16369_v57  ;;  %v12374_v26 = vadd.f32 %v3514_v25, %v16370_v45 }
 0xb72   : > { %3658 = vst [vmem:[#allocation1 + $0x1] ss:$9 sm:$0xff] %v12348_v15  ;;  %3683 = vadd.xlane.f32.xlu2 %v3682_v58  ;;  %v16373_v60 = vrot.slane %v16366_v31, 7  ;;  %v12397_v47 = vsel %vm3697_vm7, %v10396_v49, %v3696_v9 }
 0xb73   : > { %3659 = vst [vmem:[#allocation1 + $0x2] ss:$9 sm:$0xff] %v12351_v63 }
 0xb74   : > { %3660 = vst [vmem:[#allocation1 + $0x3] ss:$9 sm:$0xff] %v12354_v24 }
 0xb75   : > { %3661 = vst [vmem:[#allocation1 + $0x4] ss:$9 sm:$0xff] %v12358_v34 }
 0xb76   : > { %3662 = vst [vmem:[#allocation1 + $0x5] ss:$9 sm:$0xff] %v12364_v18  ;;  %v3479_v2 = vpop.f32.mrf.mxu0 }
 0xb77   : > { %3663 = vst [vmem:[#allocation1 + $0x6] ss:$9 sm:$0xff] %v12369_v46  ;;  %v3480_v22 = vadd.f32 %v12218_v23, %v3479_v2 }
 0xb78   : > { %3664 = vst [vmem:[#allocation1 + $0x7] ss:$9 sm:$0xff] %v12374_v26 }
 0xb79   : > { %v3515_v5 = vrot.slane %v3480_v22, 1  ;;  %v3516_v21 = vrot.slane %v3480_v22, 2  ;;  %v3517_v48 = vrot.slane %v3480_v22, 3  ;;  %v12384_v59 = vadd.f32 %v3480_v22, %v16371_v35  ;;  %16375 = vst [vmem:[#allocation10_spill] sm:$0xff] %v12397_v47 }
 0xb7b   : > { %v12388_v12 = vadd.f32 %v3515_v5, %v16372_v32  ;;  %v12392_v54 = vadd.f32 %v3516_v21, %v16373_v60  ;;  %v12395_v8 = vadd.f32 %v3517_v48, %v16374_v29 }
 0xb7c   : > { %v3678_v52 = vpop.xlane.xlu0 %3677 }
 0xb7d   : > { %v3699_v55 = vmul.f32 %v12397_v47, %v3678_v52 }
 0xb7f   : > { %v3665_v23 = vld [vmem:[#allocation1] sm:$0xff]  ;;  %v3709_v27 = vperm.slane %v3699_v55, 0  ;;  %v3710_v25 = vperm.slane %v3699_v55, 1  ;;  %v3711_v19 = vperm.slane %v3699_v55, 2  ;;  %v3712_v13 = vperm.slane %v3699_v55, 3 }
 0xb80   : > { %3666 = vst [vmem:[#allocation1] ss:$9 sm:$0xff] %v12384_v59  ;;  %v3685_v51 = vsel %vm745_vm2, %v3665_v23, 0.0  ;;  %v3713_v49 = vperm.slane %v3699_v55, 4  ;;  %v3714_v31 = vperm.slane %v3699_v55, 5  ;;  %v3715_v16 = vperm.slane %v3699_v55, 6 }
 0xb81   : > { %3667 = vst [vmem:[#allocation1 + $0x1] ss:$9 sm:$0xff] %v12388_v12  ;;  %3686 = vadd.xlane.f32.xlu0 %v3685_v51  ;;  %v12406_v61 = vsub.f32 %v12223_v41, %v3709_v27  ;;  %v12409_v58 = vsub.f32 %v12227_v39, %v3710_v25  ;;  %v12412_v57 = vsub.f32 %v12231_v6, %v3711_v19  ;;  %v3716_v11 = vperm.slane %v3699_v55, 7 }
 0xb82   : > { %3668 = vst [vmem:[#allocation1 + $0x2] ss:$9 sm:$0xff] %v12392_v54  ;;  %v12415_v45 = vsub.f32 %v12235_v38, %v3712_v13  ;;  %v12418_v2 = vsub.f32 %v12239_v56, %v3713_v49  ;;  %v12423_v50 = vsub.f32 %v12244_v42, %v3714_v31  ;;  %v12428_v6 = vsub.f32 %v12249_v20, %v3715_v16 }
 0xb83   : > { %3669 = vst [vmem:[#allocation1 + $0x3] ss:$9 sm:$0xff] %v12395_v8  ;;  %v3817_v22 = vmul.f32 %v12406_v61, %v12406_v61  ;;  %v3818_v39 = vmul.f32 %v12409_v58, %v12409_v58  ;;  %v3819_v38 = vmul.f32 %v12412_v57, %v12412_v57  ;;  %v12434_v5 = vsub.f32 %v12254_v30, %v3716_v11 }
 0xb84   : > { %v3820_v21 = vmul.f32 %v12415_v45, %v12415_v45  ;;  %v3821_v42 = vmul.f32 %v12418_v2, %v12418_v2  ;;  %v3822_v20 = vmul.f32 %v12423_v50, %v12423_v50  ;;  %v3823_v48 = vmul.f32 %v12428_v6, %v12428_v6 }
 0xb85   : > { %v3824_v30 = vmul.f32 %v12434_v5, %v12434_v5 }
 0xb8a   : > { %v3670_v41 = vld [vmem:[#allocation1] sm:$0xff] }
 0xb8b   : > { %3889 = vst [vmem:[#allocation1] ss:$9 sm:$0xff] %v3817_v22  ;;  %v3689_v56 = vsel %vm3688_vm8, %v3670_v41, 0.0 }
 0xb8c   : > { %3891 = vst [vmem:[#allocation1 + $0x1] ss:$9 sm:$0xff] %v3818_v39  ;;  %3690 = vadd.xlane.f32.xlu2 %v3689_v56 }
 0xb8d   : > { %3893 = vst [vmem:[#allocation1 + $0x2] ss:$9 sm:$0xff] %v3819_v38 }
 0xb8e   : > { %3895 = vst [vmem:[#allocation1 + $0x3] ss:$9 sm:$0xff] %v3820_v21 }
 0xb8f   : > { %3897 = vst [vmem:[#allocation1 + $0x4] ss:$9 sm:$0xff] %v3821_v42 }
 0xb90   : > { %3899 = vst [vmem:[#allocation1 + $0x5] ss:$9 sm:$0xff] %v3822_v20 }
 0xb91   : > { %3901 = vst [vmem:[#allocation1 + $0x6] ss:$9 sm:$0xff] %v3823_v48 }
 0xb92   : > { %3903 = vst [vmem:[#allocation1 + $0x7] ss:$9 sm:$0xff] %v3824_v30 }
 0xb99   : > { %v3904_v9 = vld [vmem:[#allocation1] sm:$0xff] }
 0xb9a   : > { %v3942_v35 = vsel %vm745_vm2, %v3904_v9, 0.0 }
 0xb9b   : > { %3943 = vadd.xlane.f32.xlu1 %v3942_v35  ;;  %v3681_v32 = vpop.xlane.xlu1 %3680 }
 0xb9c   : > { %v3700_v60 = vmul.f32 %v12397_v47, %v3681_v32 }
 0xb9e   : > { %v3717_v23 = vperm.slane %v3700_v60, 0  ;;  %v3718_v29 = vperm.slane %v3700_v60, 1  ;;  %v3719_v51 = vperm.slane %v3700_v60, 2  ;;  %v3720_v52 = vperm.slane %v3700_v60, 3 }
 0xb9f   : > { %v3721_v55 = vperm.slane %v3700_v60, 4  ;;  %v3722_v27 = vperm.slane %v3700_v60, 5  ;;  %v3723_v25 = vperm.slane %v3700_v60, 6  ;;  %v3724_v19 = vperm.slane %v3700_v60, 7 }
 0xba0   : > { %v12449_v13 = vsub.f32 %v12264_v62, %v3717_v23  ;;  %v12452_v49 = vsub.f32 %v12267_v36, %v3718_v29  ;;  %v12455_v31 = vsub.f32 %v12271_v10, %v3719_v51  ;;  %v12458_v16 = vsub.f32 %v12275_v3, %v3720_v52 }
 0xba1   : > { %v12461_v11 = vsub.f32 %v12279_v7, %v3721_v55  ;;  %v12464_v22 = vsub.f32 %v12284_v28, %v3722_v27  ;;  %v12467_v41 = vsub.f32 %v12289_v14, %v3723_v25  ;;  %v12476_v3 = vsub.f32 %v12294_v17, %v3724_v19 }
 0xba2   : > { %v3825_v62 = vmul.f32 %v12449_v13, %v12449_v13  ;;  %v3826_v36 = vmul.f32 %v12452_v49, %v12452_v49  ;;  %v3827_v10 = vmul.f32 %v12455_v31, %v12455_v31  ;;  %v3828_v7 = vmul.f32 %v12458_v16, %v12458_v16 }
 0xba3   : > { %v3829_v28 = vmul.f32 %v12461_v11, %v12461_v11  ;;  %v3830_v14 = vmul.f32 %v12464_v22, %v12464_v22  ;;  %v3831_v39 = vmul.f32 %v12467_v41, %v12467_v41  ;;  %v3832_v38 = vmul.f32 %v12476_v3, %v12476_v3 }
 0xba4   : > { %3905 = vst [vmem:[#allocation1] ss:$9 sm:$0xff] %v3825_v62 }
 0xba5   : > { %3906 = vst [vmem:[#allocation1 + $0x1] ss:$9 sm:$0xff] %v3826_v36 }
 0xba6   : > { %3907 = vst [vmem:[#allocation1 + $0x2] ss:$9 sm:$0xff] %v3827_v10 }
 0xba7   : > { %3908 = vst [vmem:[#allocation1 + $0x3] ss:$9 sm:$0xff] %v3828_v7 }
 0xba8   : > { %3909 = vst [vmem:[#allocation1 + $0x4] ss:$9 sm:$0xff] %v3829_v28 }
 0xba9   : > { %3910 = vst [vmem:[#allocation1 + $0x5] ss:$9 sm:$0xff] %v3830_v14 }
 0xbaa   : > { %3911 = vst [vmem:[#allocation1 + $0x6] ss:$9 sm:$0xff] %v3831_v39 }
 0xbab   : > { %3912 = vst [vmem:[#allocation1 + $0x7] ss:$9 sm:$0xff] %v3832_v38 }
 0xbb2   : > { %v3913_v17 = vld [vmem:[#allocation1] sm:$0xff] }
 0xbb3   : > { %v3945_v56 = vsel %vm745_vm2, %v3913_v17, 0.0 }
 0xbb4   : > { %3946 = vadd.xlane.f32.xlu0 %v3945_v56 }
 0xbe5   : > { %v3684_v21 = vpop.xlane.xlu2 %3683 }
 0xbe6   : > { %v3701_v42 = vmul.f32 %v12397_v47, %v3684_v21 }
 0xbe8   : > { %v3725_v20 = vperm.slane %v3701_v42, 0  ;;  %v3726_v48 = vperm.slane %v3701_v42, 1  ;;  %v3727_v30 = vperm.slane %v3701_v42, 2  ;;  %v3728_v9 = vperm.slane %v3701_v42, 3 }
 0xbe9   : > { %v3729_v35 = vperm.slane %v3701_v42, 4  ;;  %v3730_v32 = vperm.slane %v3701_v42, 5  ;;  %v3731_v60 = vperm.slane %v3701_v42, 6  ;;  %v3732_v23 = vperm.slane %v3701_v42, 7 }
 0xbea   : > { %v12491_v29 = vsub.f32 %v12305_v43, %v3725_v20  ;;  %v12494_v51 = vsub.f32 %v12308_v33, %v3726_v48  ;;  %v12497_v52 = vsub.f32 %v12311_v1, %v3727_v30  ;;  %v12500_v55 = vsub.f32 %v12315_v37, %v3728_v9 }
 0xbeb   : > { %v12503_v27 = vsub.f32 %v12319_v4, %v3729_v35  ;;  %v12506_v25 = vsub.f32 %v12324_v0, %v3730_v32  ;;  %v12509_v19 = vsub.f32 %v12329_v53, %v3731_v60  ;;  %v12518_v37 = vsub.f32 %v12334_v44, %v3732_v23 }
 0xbec   : > { %v3833_v43 = vmul.f32 %v12491_v29, %v12491_v29  ;;  %v3834_v33 = vmul.f32 %v12494_v51, %v12494_v51  ;;  %v3835_v1 = vmul.f32 %v12497_v52, %v12497_v52  ;;  %v3836_v4 = vmul.f32 %v12500_v55, %v12500_v55 }
 0xbed   : > { %v3837_v0 = vmul.f32 %v12503_v27, %v12503_v27  ;;  %v3838_v53 = vmul.f32 %v12506_v25, %v12506_v25  ;;  %v3839_v62 = vmul.f32 %v12509_v19, %v12509_v19  ;;  %v3840_v36 = vmul.f32 %v12518_v37, %v12518_v37 }
 0xbee   : > { %3914 = vst [vmem:[#allocation1] ss:$9 sm:$0xff] %v3833_v43 }
 0xbef   : > { %3915 = vst [vmem:[#allocation1 + $0x1] ss:$9 sm:$0xff] %v3834_v33 }
 0xbf0   : > { %3916 = vst [vmem:[#allocation1 + $0x2] ss:$9 sm:$0xff] %v3835_v1 }
 0xbf1   : > { %3917 = vst [vmem:[#allocation1 + $0x3] ss:$9 sm:$0xff] %v3836_v4 }
 0xbf2   : > { %3918 = vst [vmem:[#allocation1 + $0x4] ss:$9 sm:$0xff] %v3837_v0 }
 0xbf3   : > { %3919 = vst [vmem:[#allocation1 + $0x5] ss:$9 sm:$0xff] %v3838_v53 }
 0xbf4   : > { %3920 = vst [vmem:[#allocation1 + $0x6] ss:$9 sm:$0xff] %v3839_v62  ;;  %v3687_v44 = vpop.xlane.xlu0 %3686 }
 0xbf5   : > { %3921 = vst [vmem:[#allocation1 + $0x7] ss:$9 sm:$0xff] %v3840_v36  ;;  %v3702_v10 = vmul.f32 %v12397_v47, %v3687_v44 }
 0xbf7   : > { %v3733_v7 = vperm.slane %v3702_v10, 0  ;;  %v3734_v28 = vperm.slane %v3702_v10, 1  ;;  %v3735_v14 = vperm.slane %v3702_v10, 2  ;;  %v3736_v39 = vperm.slane %v3702_v10, 3 }
 0xbf8   : > { %v3737_v38 = vperm.slane %v3702_v10, 4  ;;  %v3738_v17 = vperm.slane %v3702_v10, 5  ;;  %v3739_v56 = vperm.slane %v3702_v10, 6  ;;  %v3740_v21 = vperm.slane %v3702_v10, 7 }
 0xbf9   : > { %v12532_v42 = vsub.f32 %v12344_v40, %v3733_v7  ;;  %v12535_v20 = vsub.f32 %v12348_v15, %v3734_v28  ;;  %v12538_v48 = vsub.f32 %v12351_v63, %v3735_v14  ;;  %v12541_v30 = vsub.f32 %v12354_v24, %v3736_v39 }
 0xbfa   : > { %v12544_v9 = vsub.f32 %v12358_v34, %v3737_v38  ;;  %v12547_v35 = vsub.f32 %v12364_v18, %v3738_v17  ;;  %v12550_v32 = vsub.f32 %v12369_v46, %v3739_v56  ;;  %v12559_v60 = vsub.f32 %v12374_v26, %v3740_v21 }
 0xbfb   : > { %v3841_v40 = vmul.f32 %v12532_v42, %v12532_v42  ;;  %v3842_v15 = vmul.f32 %v12535_v20, %v12535_v20  ;;  %v3843_v63 = vmul.f32 %v12538_v48, %v12538_v48  ;;  %v3844_v34 = vmul.f32 %v12541_v30, %v12541_v30 }
 0xbfc   : > { %v3922_v24 = vld [vmem:[#allocation1] sm:$0xff]  ;;  %v3845_v18 = vmul.f32 %v12544_v9, %v12544_v9  ;;  %v3846_v23 = vmul.f32 %v12547_v35, %v12547_v35  ;;  %v3847_v43 = vmul.f32 %v12550_v32, %v12550_v32  ;;  %v3848_v33 = vmul.f32 %v12559_v60, %v12559_v60 }
 0xbfd   : > { %3923 = vst [vmem:[#allocation1] ss:$9 sm:$0xff] %v3841_v40  ;;  %v3948_v46 = vsel %vm745_vm2, %v3922_v24, 0.0 }
 0xbfe   : > { %3924 = vst [vmem:[#allocation1 + $0x1] ss:$9 sm:$0xff] %v3842_v15  ;;  %3949 = vadd.xlane.f32.xlu2 %v3948_v46 }
 0xbff   : > { %3925 = vst [vmem:[#allocation1 + $0x2] ss:$9 sm:$0xff] %v3843_v63  ;;  %v3691_v26 = vpop.xlane.xlu2 %3690  ;;  %v4239_v63 = vld [vmem:[%s16123_s11 + $0x18] sm:$0xff] }
 0xc00   : > { %3926 = vst [vmem:[#allocation1 + $0x3] ss:$9 sm:$0xff] %v3844_v34  ;;  %v3703_v1 = vmul.f32 %v12397_v47, %v3691_v26  ;;  %4350 = vmatpush.msrb.mxu2 %v4239_v63  ;;  %v12602_v34 = vld [vmem:[%s16121_s9] ss:$0 sm:$0xff] }
 0xc01   : > { %3927 = vst [vmem:[#allocation1 + $0x4] ss:$9 sm:$0xff] %v3845_v18  ;;  %v4238_v18 = vld [vmem:[%s16123_s11 + $0x10] sm:$0xff] }
 0xc02   : > { %3928 = vst [vmem:[#allocation1 + $0x5] ss:$9 sm:$0xff] %v3846_v23  ;;  %v3741_v4 = vperm.slane %v3703_v1, 0  ;;  %v3742_v0 = vperm.slane %v3703_v1, 1  ;;  %v3743_v53 = vperm.slane %v3703_v1, 2  ;;  %v3744_v62 = vperm.slane %v3703_v1, 3  ;;  %4351 = vmatpush.msrb.mxu2 %v4238_v18 }
 0xc03   : > { %3929 = vst [vmem:[#allocation1 + $0x6] ss:$9 sm:$0xff] %v3847_v43  ;;  %v12610_v23 = vld [vmem:[%s16122_s10] ss:$0 sm:$0xff]  ;;  %v4237_v43 = vld [vmem:[%s16123_s11 + $0x8] sm:$0xff]  ;;  %v12619_v1 = vrot.slane %v12602_v34, 2 }
 0xc04   : > { %3930 = vst [vmem:[#allocation1 + $0x7] ss:$9 sm:$0xff] %v3848_v33  ;;  %v12574_v36 = vsub.f32 %v12384_v59, %v3741_v4  ;;  %v12577_v44 = vsub.f32 %v12388_v12, %v3742_v0  ;;  %v12580_v10 = vsub.f32 %v12392_v54, %v3743_v53  ;;  %v12583_v7 = vsub.f32 %v12395_v8, %v3744_v62  ;;  %v4236_v4 = vld [vmem:[%s16123_s11] sm:$0xff] }
 0xc05   : > { %4352 = vmatpush.msrb.mxu2 %v4237_v43  ;;  %v12616_v33 = vrot.slane %v12602_v34, 1  ;;  %v12625_v0 = vrot.slane %v12602_v34, 3  ;;  %v12628_v53 = vrot.slane %v12602_v34, 4 }
 0xc06   : > { %16376 = vst [vmem:[#allocation14_spill] sm:$0xff] %v12574_v36  ;;  %v3849_v28 = vmul.f32 %v12574_v36, %v12574_v36  ;;  %v3850_v14 = vmul.f32 %v12577_v44, %v12577_v44  ;;  %v3851_v39 = vmul.f32 %v12580_v10, %v12580_v10  ;;  %v3852_v12 = vmul.f32 %v12583_v7, %v12583_v7 }
 0xc07   : > { %16377 = vst [vmem:[#allocation13_spill] sm:$0xff] %v12577_v44  ;;  %4353 = vmatpush.msrb.mxu2 %v4236_v4 }
 0xc08   : > { %16378 = vst [vmem:[#allocation15_spill] sm:$0xff] %v12580_v10 }
 0xc09   : > { %16379 = vst [vmem:[#allocation17_spill] sm:$0xff] %v12583_v7 }
 0xc0b   : > { %v3931_v59 = vld [vmem:[#allocation1] sm:$0xff] }
 0xc0c   : > { %3932 = vst [vmem:[#allocation1] ss:$9 sm:$0xff] %v3849_v28  ;;  %v3951_v54 = vsel %vm745_vm2, %v3931_v59, 0.0  ;;  %v12631_v28 = vrot.slane %v12602_v34, 5  ;;  %v12640_v59 = vrot.slane %v12610_v23, 1 }
 0xc0d   : > { %3933 = vst [vmem:[#allocation1 + $0x1] ss:$9 sm:$0xff] %v3850_v14  ;;  %3952 = vadd.xlane.f32.xlu1 %v3951_v54  ;;  %v12634_v14 = vrot.slane %v12602_v34, 6  ;;  %v12646_v54 = vrot.slane %v12610_v23, 3 }
 0xc0e   : > { %3934 = vst [vmem:[#allocation1 + $0x2] ss:$9 sm:$0xff] %v3851_v39  ;;  %v3944_v8 = vpop.xlane.xlu1 %3943  ;;  %v12637_v39 = vrot.slane %v12602_v34, 7 }
 0xc0f   : > { %3935 = vst [vmem:[#allocation1 + $0x3] ss:$9 sm:$0xff] %v3852_v12  ;;  %v3957_v38 = vmul.f32 %v3944_v8, %v12397_v47  ;;  %v12643_v12 = vrot.slane %v12610_v23, 2  ;;  %v12649_v8 = vrot.slane %v12610_v23, 4 }
 0xc11   : > { %v3962_v17 = vadd.f32 1e-05, %v3957_v38 }
 0xc13   : > { %10397 = vrsqrt.f32 %v3962_v17  ;;  %vm3973_vm10 = vweird.f32 %v3962_v17 }
 0xc16   : > { %v3936_v56 = vld [vmem:[#allocation1] sm:$0xff] }
 0xc17   : > { %v3954_v21 = vsel %vm3688_vm8, %v3936_v56, 0.0 }
 0xc18   : > { %3955 = vadd.xlane.f32.xlu0 %v3954_v21 }
 0xc19   : > { %v10398_v40 = vpop.eup %10397 }
 0xc1a   : > { %v3968_v15 = vmul.f32 %v10398_v40, %v3962_v17  ;;  %vm3974_vm9 = vweird.f32 %v10398_v40 }
 0xc1b   : > { %vm3975_vm11 = vmor %vm3973_vm10, %vm3974_vm9 }
 0xc1c   : > { %v3969_v24 = vmul.f32 %v10398_v40, %v3968_v15 }
 0xc1e   : > { %v3970_v46 = vmul.f32 0.5, %v3969_v24 }
 0xc20   : > { %v3971_v26 = vsub.f32 1.5, %v3970_v46 }
 0xc22   : > { %v3972_v62 = vmul.f32 %v10398_v40, %v3971_v26 }
 0xc24   : > { %v3976_v38 = vsel %vm3975_vm11, %v10398_v40, %v3972_v62 }
 0xc25   : > { %v4022_v17 = vperm.slane %v3976_v38, 0  ;;  %v4023_v56 = vperm.slane %v3976_v38, 1  ;;  %v4024_v21 = vperm.slane %v3976_v38, 2  ;;  %v4025_v15 = vperm.slane %v3976_v38, 3 }
 0xc26   : > { %v4026_v63 = vperm.slane %v3976_v38, 4  ;;  %v4027_v24 = vperm.slane %v3976_v38, 5  ;;  %v4028_v18 = vperm.slane %v3976_v38, 6  ;;  %v4029_v46 = vperm.slane %v3976_v38, 7 }
 0xc27   : > { %v4094_v43 = vmul.f32 %v4022_v17, %v12406_v61  ;;  %v4095_v26 = vmul.f32 %v4023_v56, %v12409_v58  ;;  %v4096_v4 = vmul.f32 %v4024_v21, %v12412_v57  ;;  %v4097_v7 = vmul.f32 %v4025_v15, %v12415_v45 }
 0xc28   : > { %v4098_v10 = vmul.f32 %v4026_v63, %v12418_v2  ;;  %v4099_v40 = vmul.f32 %v4027_v24, %v12423_v50  ;;  %v4100_v62 = vmul.f32 %v4028_v18, %v12428_v6  ;;  %v4101_v44 = vmul.f32 %v4029_v46, %v12434_v5  ;;  %v3947_v6 = vpop.xlane.xlu0 %3946 }
 0xc29   : > { %v4147_v36 = vmul.f32 %v12602_v34, %v4094_v43  ;;  %v4148_v38 = vmul.f32 %v12616_v33, %v4095_v26  ;;  %v4149_v61 = vmul.f32 %v12619_v1, %v4096_v4  ;;  %v4150_v58 = vmul.f32 %v12625_v0, %v4097_v7 }
 0xc2a   : > { %v12664_v57 = vrot.slane %v12610_v23, 5  ;;  %v12667_v45 = vrot.slane %v12610_v23, 6  ;;  %v4151_v2 = vmul.f32 %v12628_v53, %v4098_v10  ;;  %v4152_v50 = vmul.f32 %v12631_v28, %v4099_v40 }
 0xc2b   : > { %v4153_v5 = vmul.f32 %v12634_v14, %v4100_v62  ;;  %v12673_v17 = vadd.f32 %v12610_v23, %v4147_v36  ;;  %v12676_v56 = vadd.f32 %v12640_v59, %v4148_v38  ;;  %v12679_v7 = vadd.f32 %v12643_v12, %v4149_v61 }
 0xc2c   : > { %v12682_v21 = vrot.slane %v12610_v23, 7  ;;  %v4154_v15 = vmul.f32 %v12637_v39, %v4101_v44  ;;  %v12686_v10 = vadd.f32 %v12646_v54, %v4150_v58  ;;  %v12689_v63 = vadd.f32 %v12649_v8, %v4151_v2 }
 0xc2d   : > { %4280 = vst [vmem:[#allocation1] ss:$9 sm:$0xff] %v12673_v17  ;;  %v3958_v36 = vmul.f32 %v3947_v6, %v12397_v47  ;;  %v12694_v24 = vadd.f32 %v12664_v57, %v4152_v50  ;;  %v12698_v18 = vadd.f32 %v12667_v45, %v4153_v5 }
 0xc2e   : > { %4282 = vst [vmem:[#allocation1 + $0x1] ss:$9 sm:$0xff] %v12676_v56  ;;  %v12702_v46 = vadd.f32 %v12682_v21, %v4154_v15 }
 0xc2f   : > { %16380 = vst [vmem:[#allocation22_spill] sm:$0xff] %v12694_v24  ;;  %v3963_v44 = vadd.f32 1e-05, %v3958_v36 }
 0xc30   : > { %16381 = vst [vmem:[#allocation27_spill] sm:$0xff] %v12698_v18 }
 0xc31   : > { %4284 = vst [vmem:[#allocation1 + $0x2] ss:$9 sm:$0xff] %v12679_v7  ;;  %10399 = vrsqrt.f32 %v3963_v44  ;;  %vm3983_vm13 = vweird.f32 %v3963_v44 }
 0xc32   : > { %16382 = vst [vmem:[#allocation16_spill] sm:$0xff] %v12702_v46 }
 0xc33   : > { %4286 = vst [vmem:[#allocation1 + $0x3] ss:$9 sm:$0xff] %v12686_v10 }
 0xc34   : > { %4288 = vst [vmem:[#allocation1 + $0x4] ss:$9 sm:$0xff] %v12689_v63 }
 0xc35   : > { %4290 = vst [vmem:[#allocation1 + $0x5] ss:$9 sm:$0xff] %v12694_v24 }
 0xc36   : > { %4292 = vst [vmem:[#allocation1 + $0x6] ss:$9 sm:$0xff] %v12698_v18 }
 0xc37   : > { %4294 = vst [vmem:[#allocation1 + $0x7] ss:$9 sm:$0xff] %v12702_v46  ;;  %v10400_v43 = vpop.eup %10399 }
 0xc38   : > { %v3978_v26 = vmul.f32 %v10400_v43, %v3963_v44  ;;  %vm3984_vm12 = vweird.f32 %v10400_v43 }
 0xc39   : > { %vm3985_vm14 = vmor %vm3983_vm13, %vm3984_vm12 }
 0xc3a   : > { %v3979_v4 = vmul.f32 %v10400_v43, %v3978_v26 }
 0xc3c   : > { %v3980_v62 = vmul.f32 0.5, %v3979_v4 }
 0xc3e   : > { %v4295_v40 = vld [vmem:[#allocation1] sm:$0xff]  ;;  %v3981_v38 = vsub.f32 1.5, %v3980_v62 }
 0xc3f   : > { %10005 = vmatmul.msk.f32.vlgmr.msrb.gmra.mxu2 %vm745_vm2, %v4295_v40 }
 0xc40   : > { %v3982_v61 = vmul.f32 %v10400_v43, %v3981_v38 }
 0xc42   : > { %v3986_v58 = vsel %vm3985_vm14, %v10400_v43, %v3982_v61 }
 0xc43   : > { %v4030_v2 = vperm.slane %v3986_v58, 0  ;;  %v4031_v50 = vperm.slane %v3986_v58, 1  ;;  %v4032_v6 = vperm.slane %v3986_v58, 2  ;;  %v4033_v5 = vperm.slane %v3986_v58, 3 }
 0xc44   : > { %v4034_v15 = vperm.slane %v3986_v58, 4  ;;  %v4035_v36 = vperm.slane %v3986_v58, 5  ;;  %v4036_v46 = vperm.slane %v3986_v58, 6  ;;  %v4037_v18 = vperm.slane %v3986_v58, 7 }
 0xc45   : > { %v4102_v26 = vmul.f32 %v4030_v2, %v12449_v13  ;;  %v4103_v4 = vmul.f32 %v4031_v50, %v12452_v49  ;;  %v4104_v40 = vmul.f32 %v4032_v6, %v12455_v31  ;;  %v4105_v62 = vmul.f32 %v4033_v5, %v12458_v16 }
 0xc46   : > { %v4106_v44 = vmul.f32 %v4034_v15, %v12461_v11  ;;  %v4107_v43 = vmul.f32 %v4035_v36, %v12464_v22  ;;  %v4108_v38 = vmul.f32 %v4036_v46, %v12467_v41  ;;  %v4109_v61 = vmul.f32 %v4037_v18, %v12476_v3 }
 0xc47   : > { %v4155_v24 = vmul.f32 %v12602_v34, %v4102_v26  ;;  %v4156_v58 = vmul.f32 %v12616_v33, %v4103_v4  ;;  %v4157_v13 = vmul.f32 %v12619_v1, %v4104_v40  ;;  %v4158_v49 = vmul.f32 %v12625_v0, %v4105_v62 }
 0xc48   : > { %v4159_v31 = vmul.f32 %v12628_v53, %v4106_v44  ;;  %v4160_v16 = vmul.f32 %v12631_v28, %v4107_v43  ;;  %v4161_v11 = vmul.f32 %v12634_v14, %v4108_v38  ;;  %v4162_v18 = vmul.f32 %v12637_v39, %v4109_v61 }
 0xc49   : > { %v12726_v22 = vadd.f32 %v12610_v23, %v4155_v24  ;;  %v12729_v41 = vadd.f32 %v12640_v59, %v4156_v58  ;;  %v12732_v3 = vadd.f32 %v12643_v12, %v4157_v13  ;;  %v12736_v46 = vadd.f32 %v12646_v54, %v4158_v49 }
 0xc4a   : > { %v12739_v2 = vadd.f32 %v12649_v8, %v4159_v31  ;;  %v12743_v50 = vadd.f32 %v12664_v57, %v4160_v16  ;;  %v12747_v24 = vadd.f32 %v12667_v45, %v4161_v11  ;;  %v12751_v6 = vadd.f32 %v12682_v21, %v4162_v18 }
 0xc4b   : > { %4296 = vst [vmem:[#allocation1] ss:$9 sm:$0xff] %v12726_v22 }
 0xc4c   : > { %4297 = vst [vmem:[#allocation1 + $0x1] ss:$9 sm:$0xff] %v12729_v41 }
 0xc4d   : > { %4298 = vst [vmem:[#allocation1 + $0x2] ss:$9 sm:$0xff] %v12732_v3 }
 0xc4e   : > { %16383 = vst [vmem:[#allocation26_spill] sm:$0xff] %v12751_v6 }
 0xc4f   : > { %4299 = vst [vmem:[#allocation1 + $0x3] ss:$9 sm:$0xff] %v12736_v46 }
 0xc50   : > { %4300 = vst [vmem:[#allocation1 + $0x4] ss:$9 sm:$0xff] %v12739_v2 }
 0xc51   : > { %4301 = vst [vmem:[#allocation1 + $0x5] ss:$9 sm:$0xff] %v12743_v50 }
 0xc52   : > { %4302 = vst [vmem:[#allocation1 + $0x6] ss:$9 sm:$0xff] %v12747_v24 }
 0xc53   : > { %4303 = vst [vmem:[#allocation1 + $0x7] ss:$9 sm:$0xff] %v12751_v6 }
 0xc5a   : > { %v4304_v5 = vld [vmem:[#allocation1] sm:$0xff] }
 0xc5b   : > { %10006 = vmatmul.msk.f32.gmra.mxu2 %vm745_vm2, %v4304_v5 }
 0xc71   : > { %v3950_v15 = vpop.xlane.xlu2 %3949 }
 0xc72   : > { %v3959_v36 = vmul.f32 %v3950_v15, %v12397_v47 }
 0xc74   : > { %v3964_v26 = vadd.f32 1e-05, %v3959_v36 }
 0xc76   : > { %10401 = vrsqrt.f32 %v3964_v26  ;;  %vm3993_vm7 = vweird.f32 %v3964_v26 }
 0xc7c   : > { %v10402_v4 = vpop.eup %10401 }
 0xc7d   : > { %v3988_v40 = vmul.f32 %v10402_v4, %v3964_v26  ;;  %vm3994_vm15 = vweird.f32 %v10402_v4 }
 0xc7e   : > { %vm3995_vm9 = vmor %vm3993_vm7, %vm3994_vm15  ;;  %vm4387_vm7 = vcmask 523264  }
 0xc7f   : > { %v3989_v62 = vmul.f32 %v10402_v4, %v3988_v40 }
 0xc80   : > { %v3953_v44 = vpop.xlane.xlu1 %3952 }
 0xc81   : > { %v3990_v43 = vmul.f32 0.5, %v3989_v62  ;;  %v3960_v38 = vmul.f32 %v3953_v44, %v12397_v47 }
 0xc83   : > { %v3991_v61 = vsub.f32 1.5, %v3990_v43  ;;  %v3965_v58 = vadd.f32 1e-05, %v3960_v38 }
 0xc85   : > { %v3992_v13 = vmul.f32 %v10402_v4, %v3991_v61  ;;  %10403 = vrsqrt.f32 %v3965_v58  ;;  %vm4003_vm11 = vweird.f32 %v3965_v58 }
 0xc87   : > { %v3996_v49 = vsel %vm3995_vm9, %v10402_v4, %v3992_v13 }
 0xc88   : > { %v4038_v31 = vperm.slane %v3996_v49, 0  ;;  %v4039_v16 = vperm.slane %v3996_v49, 1  ;;  %v4040_v11 = vperm.slane %v3996_v49, 2  ;;  %v4041_v18 = vperm.slane %v3996_v49, 3 }
 0xc89   : > { %v4042_v5 = vperm.slane %v3996_v49, 4  ;;  %v4043_v15 = vperm.slane %v3996_v49, 5  ;;  %v4044_v36 = vperm.slane %v3996_v49, 6  ;;  %v4045_v40 = vperm.slane %v3996_v49, 7 }
 0xc8a   : > { %v4110_v62 = vmul.f32 %v4038_v31, %v12491_v29  ;;  %v4111_v44 = vmul.f32 %v4039_v16, %v12494_v51  ;;  %v4112_v43 = vmul.f32 %v4040_v11, %v12497_v52  ;;  %v4113_v38 = vmul.f32 %v4041_v18, %v12500_v55 }
 0xc8b   : > { %v4114_v26 = vmul.f32 %v4042_v5, %v12503_v27  ;;  %v4115_v4 = vmul.f32 %v4043_v15, %v12506_v25  ;;  %v4116_v61 = vmul.f32 %v4044_v36, %v12509_v19  ;;  %v4117_v13 = vmul.f32 %v4045_v40, %v12518_v37  ;;  %v10404_v31 = vpop.eup %10403  ;;  %v3956_v18 = vpop.xlane.xlu0 %3955 }
 0xc8c   : > { %v4163_v6 = vmul.f32 %v12602_v34, %v4110_v62  ;;  %v4164_v49 = vmul.f32 %v12616_v33, %v4111_v44  ;;  %v4165_v29 = vmul.f32 %v12619_v1, %v4112_v43  ;;  %v4166_v51 = vmul.f32 %v12625_v0, %v4113_v38 }
 0xc8d   : > { %v4167_v52 = vmul.f32 %v12628_v53, %v4114_v26  ;;  %v4168_v55 = vmul.f32 %v12631_v28, %v4115_v4  ;;  %v4169_v27 = vmul.f32 %v12634_v14, %v4116_v61  ;;  %v4170_v16 = vmul.f32 %v12637_v39, %v4117_v13 }
 0xc8e   : > { %v12777_v25 = vadd.f32 %v12610_v23, %v4163_v6  ;;  %v12780_v19 = vadd.f32 %v12640_v59, %v4164_v49  ;;  %v12783_v37 = vadd.f32 %v12643_v12, %v4165_v29  ;;  %v12787_v11 = vadd.f32 %v12646_v54, %v4166_v51 }
 0xc8f   : > { %v12790_v5 = vadd.f32 %v12649_v8, %v4167_v52  ;;  %v3998_v15 = vmul.f32 %v10404_v31, %v3965_v58  ;;  %v12794_v6 = vadd.f32 %v12664_v57, %v4168_v55  ;;  %v12798_v36 = vadd.f32 %v12667_v45, %v4169_v27 }
 0xc90   : > { %4305 = vst [vmem:[#allocation1] ss:$9 sm:$0xff] %v12777_v25  ;;  %v3961_v62 = vmul.f32 %v3956_v18, %v12397_v47  ;;  %v12803_v44 = vadd.f32 %v12682_v21, %v4170_v16  ;;  %vm4004_vm10 = vweird.f32 %v10404_v31  ;;  %v4382_v18 = vld [vmem:[%s16125_s13 + $0x38] sm:$0xff] }
 0xc91   : > { %4306 = vst [vmem:[#allocation1 + $0x1] ss:$9 sm:$0xff] %v12780_v19  ;;  %v3999_v40 = vmul.f32 %v10404_v31, %v3998_v15  ;;  %vm4005_vm12 = vmor %vm4003_vm11, %vm4004_vm10  ;;  %4411 = vmatpush.msrb.mxu3 %v4382_v18 }
 0xc92   : > { %4307 = vst [vmem:[#allocation1 + $0x2] ss:$9 sm:$0xff] %v12783_v37  ;;  %v12809_v26 = vadd.f32 1e-05, %v3961_v62 }
 0xc93   : > { %4308 = vst [vmem:[#allocation1 + $0x3] ss:$9 sm:$0xff] %v12787_v11  ;;  %v4000_v43 = vmul.f32 0.5, %v3999_v40 }
 0xc94   : > { %4309 = vst [vmem:[#allocation1 + $0x4] ss:$9 sm:$0xff] %v12790_v5  ;;  %10405 = vrsqrt.f32 %v12809_v26  ;;  %vm4013_vm14 = vweird.f32 %v12809_v26 }
 0xc95   : > { %4310 = vst [vmem:[#allocation1 + $0x5] ss:$9 sm:$0xff] %v12794_v6  ;;  %v4001_v38 = vsub.f32 1.5, %v4000_v43 }
 0xc96   : > { %4311 = vst [vmem:[#allocation1 + $0x6] ss:$9 sm:$0xff] %v12798_v36 }
 0xc97   : > { %4312 = vst [vmem:[#allocation1 + $0x7] ss:$9 sm:$0xff] %v12803_v44  ;;  %v4002_v4 = vmul.f32 %v10404_v31, %v4001_v38 }
 0xc99   : > { %v4006_v61 = vsel %vm4005_vm12, %v10404_v31, %v4002_v4 }
 0xc9a   : > { %v4046_v13 = vperm.slane %v4006_v61, 0  ;;  %v4047_v49 = vperm.slane %v4006_v61, 1  ;;  %v4048_v29 = vperm.slane %v4006_v61, 2  ;;  %v4049_v51 = vperm.slane %v4006_v61, 3 }
 0xc9b   : > { %v4050_v52 = vperm.slane %v4006_v61, 4  ;;  %v4051_v55 = vperm.slane %v4006_v61, 5  ;;  %v4052_v27 = vperm.slane %v4006_v61, 6  ;;  %v4053_v16 = vperm.slane %v4006_v61, 7 }
 0xc9c   : > { %v4118_v15 = vmul.f32 %v4046_v13, %v12532_v42  ;;  %v4119_v58 = vmul.f32 %v4047_v49, %v12535_v20  ;;  %v4120_v31 = vmul.f32 %v4048_v29, %v12538_v48  ;;  %v4121_v40 = vmul.f32 %v4049_v51, %v12541_v30  ;;  %v4381_v42 = vld [vmem:[%s16125_s13 + $0x30] sm:$0xff] }
 0xc9d   : > { %v4122_v43 = vmul.f32 %v4050_v52, %v12544_v9  ;;  %v4123_v38 = vmul.f32 %v4051_v55, %v12547_v35  ;;  %v4124_v4 = vmul.f32 %v4052_v27, %v12550_v32  ;;  %v4125_v61 = vmul.f32 %v4053_v16, %v12559_v60  ;;  %v10406_v9 = vpop.eup %10405  ;;  %4412 = vmatpush.msrb.mxu3 %v4381_v42  ;;  %v4380_v60 = vld [vmem:[%s16125_s13 + $0x28] sm:$0xff]  ;;  %v4378_v16 = vld [vmem:[%s16125_s13 + $0x18] sm:$0xff] }
 0xc9e   : > { %v4313_v62 = vld [vmem:[#allocation1] sm:$0xff]  ;;  %v4171_v20 = vmul.f32 %v12602_v34, %v4118_v15  ;;  %v4172_v48 = vmul.f32 %v12616_v33, %v4119_v58  ;;  %v4173_v30 = vmul.f32 %v12619_v1, %v4120_v31  ;;  %v4174_v13 = vmul.f32 %v12625_v0, %v4121_v40  ;;  %v4377_v15 = vld [vmem:[%s16125_s13 + $0x10] sm:$0xff]  ;;  %v16384_v42 = vld [vmem:[#allocation14_spill] sm:$0xff] }
 0xc9f   : > { %10007 = vmatmul.msk.f32.gmra.mxu2 %vm745_vm2, %v4313_v62  ;;  %v4175_v35 = vmul.f32 %v12628_v53, %v4122_v43  ;;  %v4176_v32 = vmul.f32 %v12631_v28, %v4123_v38  ;;  %v4177_v49 = vmul.f32 %v12634_v14, %v4124_v4  ;;  %v4379_v53 = vld [vmem:[%s16125_s13 + $0x20] sm:$0xff]  ;;  %v4178_v28 = vmul.f32 %v12637_v39, %v4125_v61 }
 0xca0   : > { %v12839_v29 = vadd.f32 %v12610_v23, %v4171_v20  ;;  %v12842_v51 = vadd.f32 %v12640_v59, %v4172_v48  ;;  %v12845_v52 = vadd.f32 %v12643_v12, %v4173_v30  ;;  %v12852_v55 = vadd.f32 %v12646_v54, %v4174_v13  ;;  %4413 = vmatpush.msrb.mxu3 %v4380_v60  ;;  %v16385_v48 = vld [vmem:[#allocation13_spill] sm:$0xff]  ;;  %v16386_v13 = vld [vmem:[#allocation15_spill] sm:$0xff] }
 0xca1   : > { %v12855_v14 = vadd.f32 %v12649_v8, %v4175_v35  ;;  %v4008_v27 = vmul.f32 %v10406_v9, %v12809_v26  ;;  %v12863_v18 = vadd.f32 %v12664_v57, %v4176_v32  ;;  %v12867_v39 = vadd.f32 %v12667_v45, %v4177_v49  ;;  %v4376_v45 = vld [vmem:[%s16125_s13 + $0x8] sm:$0xff]  ;;  %v16387_v32 = vld [vmem:[#allocation17_spill] sm:$0xff] }
 0xca2   : > { %4314 = vst [vmem:[#allocation1] ss:$9 sm:$0xff] %v12839_v29  ;;  %4414 = vmatpush.msrb.mxu3 %v4379_v53  ;;  %v12874_v58 = vadd.f32 %v12682_v21, %v4178_v28  ;;  %vm4014_vm13 = vweird.f32 %v10406_v9  ;;  %v4375_v21 = vld [vmem:[%s16125_s13] sm:$0xff] }
 0xca3   : > { %4315 = vst [vmem:[#allocation1 + $0x1] ss:$9 sm:$0xff] %v12842_v51  ;;  %v4009_v8 = vmul.f32 %v10406_v9, %v4008_v27  ;;  %vm4015_vm15 = vmor %vm4013_vm14, %vm4014_vm13 }
 0xca4   : > { %4316 = vst [vmem:[#allocation1 + $0x2] ss:$9 sm:$0xff] %v12845_v52  ;;  %4415 = vmatpush.msrb.mxu3 %v4378_v16 }
 0xca5   : > { %4317 = vst [vmem:[#allocation1 + $0x3] ss:$9 sm:$0xff] %v12852_v55  ;;  %v4010_v57 = vmul.f32 0.5, %v4009_v8 }
 0xca6   : > { %4318 = vst [vmem:[#allocation1 + $0x4] ss:$9 sm:$0xff] %v12855_v14  ;;  %4416 = vmatpush.msrb.mxu3 %v4377_v15 }
 0xca7   : > { %4319 = vst [vmem:[#allocation1 + $0x5] ss:$9 sm:$0xff] %v12863_v18  ;;  %v4011_v31 = vsub.f32 1.5, %v4010_v57 }
 0xca8   : > { %4320 = vst [vmem:[#allocation1 + $0x6] ss:$9 sm:$0xff] %v12867_v39  ;;  %4417 = vmatpush.msrb.mxu3 %v4376_v45 }
 0xca9   : > { %4321 = vst [vmem:[#allocation1 + $0x7] ss:$9 sm:$0xff] %v12874_v58  ;;  %v4012_v40 = vmul.f32 %v10406_v9, %v4011_v31 }
 0xcaa   : > { %4418 = vmatpush.msrb.mxu3 %v4375_v21 }
 0xcab   : > { %v4016_v62 = vsel %vm4015_vm15, %v10406_v9, %v4012_v40 }
 0xcac   : > { %v4054_v43 = vperm.slane %v4016_v62, 0  ;;  %v4055_v38 = vperm.slane %v4016_v62, 1  ;;  %v4056_v4 = vperm.slane %v4016_v62, 2  ;;  %v4057_v61 = vperm.slane %v4016_v62, 3 }
 0xcae   : > { %v4126_v20 = vmul.f32 %v4054_v43, %v16384_v42  ;;  %v4127_v30 = vmul.f32 %v4055_v38, %v16385_v48  ;;  %v4128_v35 = vmul.f32 %v4056_v4, %v16386_v13  ;;  %v4129_v60 = vmul.f32 %v4057_v61, %v16387_v32  ;;  %v12924_v38 = vld [vmem:[%s16126_s14] ss:$0 sm:$0xff] }
 0xcb0   : > { %v4322_v49 = vld [vmem:[#allocation1] sm:$0xff]  ;;  %v4179_v53 = vmul.f32 %v12602_v34, %v4126_v20  ;;  %v4180_v26 = vmul.f32 %v12616_v33, %v4127_v30  ;;  %v4181_v28 = vmul.f32 %v12619_v1, %v4128_v35  ;;  %v4182_v9 = vmul.f32 %v12625_v0, %v4129_v60 }
 0xcb1   : > { %10008 = vmatmul.msk.f32.gmra.mxu2 %vm745_vm2, %v4322_v49  ;;  %v10255_v34 = vld [vmem:[%s16124_s12] ss:$0 sm:$0xff] }
 0xcb2   : > { %v12898_v27 = vadd.f32 %v12610_v23, %v4179_v53  ;;  %v12901_v16 = vadd.f32 %v12640_v59, %v4180_v26  ;;  %v12904_v8 = vadd.f32 %v12643_v12, %v4181_v28  ;;  %v12907_v15 = vadd.f32 %v12646_v54, %v4182_v9 }
 0xcb4   : > { %4323 = vst [vmem:[#allocation1] ss:$9 sm:$0xff] %v12898_v27 }
 0xcb5   : > { %4324 = vst [vmem:[#allocation1 + $0x1] ss:$9 sm:$0xff] %v12901_v16 }
 0xcb6   : > { %4325 = vst [vmem:[#allocation1 + $0x2] ss:$9 sm:$0xff] %v12904_v8 }
 0xcb7   : > { %4326 = vst [vmem:[#allocation1 + $0x3] ss:$9 sm:$0xff] %v12907_v15 }
 0xcbe   : > { %v4327_v33 = vld [vmem:[#allocation1] sm:$0xff] }
 0xcbf   : > { %10009 = vmatmul.msk.f32.gmra.mxu2 %vm745_vm2, %v4327_v33 }
 0xcc2   : > { %v4355_v23 = vpop.f32.mrf.mxu2 }
 0xcc3   : > { %v4356_v1 = vadd.f32 %v10255_v34, %v4355_v23  ;;  %v16388_v23 = vld [vmem:[#allocation22_spill] sm:$0xff] }
 0xcc5   : > { %v4370_v0 = vmax.f32 %v4356_v1, 0.0 }
 0xcc7   : > { %10010 = vmatmul.msk.f32.vlgmr.msrb.gmra.mxu3 %vm4387_vm7, %v4370_v0 }
 0xcde   : > { %v4358_v59 = vpop.f32.mrf.mxu2 }
 0xcdf   : > { %v4359_v12 = vadd.f32 %v10255_v34, %v4358_v59 }
 0xce1   : > { %v4371_v54 = vmax.f32 %v4359_v12, 0.0 }
 0xce3   : > { %10011 = vmatmul.msk.f32.gmra.mxu3 %vm4387_vm7, %v4371_v54 }
 0xd22   : > { %v4361_v57 = vpop.f32.mrf.mxu2 }
 0xd23   : > { %v4362_v45 = vadd.f32 %v10255_v34, %v4361_v57 }
 0xd25   : > { %v4372_v31 = vmax.f32 %v4362_v45, 0.0 }
 0xd27   : > { %10012 = vmatmul.msk.f32.gmra.mxu3 %vm4387_vm7, %v4372_v31 }
 0xd34   : > { %v4364_v21 = vpop.f32.mrf.mxu2 }
 0xd35   : > { %v4365_v40 = vadd.f32 %v10255_v34, %v4364_v21 }
 0xd37   : > { %v4373_v62 = vmax.f32 %v4365_v40, 0.0 }
 0xd39   : > { %10013 = vmatmul.msk.f32.gmra.mxu3 %vm4387_vm7, %v4373_v62 }
 0xd42   : > { %v4367_v43 = vpop.f32.mrf.mxu2 }
 0xd43   : > { %v4368_v4 = vadd.f32 %v10255_v34, %v4367_v43 }
 0xd45   : > { %v4374_v61 = vmax.f32 %v4368_v4, 0.0 }
 0xd47   : > { %10014 = vmatmul.msk.f32.gmra.mxu3 %vm4387_vm7, %v4374_v61 }
 0xd4a   : > { %v4420_v42 = vpop.f32.mrf.mxu3 }
 0xd4b   : > { %v4421_v20 = vadd.f32 %v12924_v38, %v4420_v42 }
 0xd4d   : > { %v4440_v48 = vrot.slane %v4421_v20, 1  ;;  %v4441_v30 = vrot.slane %v4421_v20, 2  ;;  %v4442_v13 = vrot.slane %v4421_v20, 3  ;;  %v4443_v35 = vrot.slane %v4421_v20, 4 }
 0xd4e   : > { %v4444_v32 = vrot.slane %v4421_v20, 5  ;;  %v4445_v60 = vrot.slane %v4421_v20, 6  ;;  %v12929_v49 = vadd.f32 %v4421_v20, %v12673_v17  ;;  %v4446_v53 = vrot.slane %v4421_v20, 7  ;;  %v16389_v17 = vld [vmem:[#allocation27_spill] sm:$0xff] }
 0xd4f   : > { %v12932_v26 = vadd.f32 %v4440_v48, %v12676_v56  ;;  %v12935_v28 = vadd.f32 %v4441_v30, %v12679_v7  ;;  %v12938_v9 = vadd.f32 %v4442_v13, %v12686_v10  ;;  %v12941_v34 = vadd.f32 %v4443_v35, %v12689_v63  ;;  %v16390_v56 = vld [vmem:[#allocation16_spill] sm:$0xff] }
 0xd50   : > { %4576 = vst [vmem:[#allocation1] ss:$9 sm:$0xff] %v12929_v49  ;;  %v12945_v33 = vadd.f32 %v4444_v32, %v16388_v23  ;;  %v12949_v1 = vadd.f32 %v4445_v60, %v16389_v17  ;;  %v12953_v7 = vadd.f32 %v4446_v53, %v16390_v56 }
 0xd51   : > { %4578 = vst [vmem:[#allocation1 + $0x1] ss:$9 sm:$0xff] %v12932_v26 }
 0xd52   : > { %4580 = vst [vmem:[#allocation1 + $0x2] ss:$9 sm:$0xff] %v12935_v28 }
 0xd53   : > { %4582 = vst [vmem:[#allocation1 + $0x3] ss:$9 sm:$0xff] %v12938_v9 }
 0xd54   : > { %4584 = vst [vmem:[#allocation1 + $0x4] ss:$9 sm:$0xff] %v12941_v34 }
 0xd55   : > { %4586 = vst [vmem:[#allocation1 + $0x5] ss:$9 sm:$0xff] %v12945_v33 }
 0xd56   : > { %4588 = vst [vmem:[#allocation1 + $0x6] ss:$9 sm:$0xff] %v12949_v1 }
 0xd57   : > { %4590 = vst [vmem:[#allocation1 + $0x7] ss:$9 sm:$0xff] %v12953_v7 }
 0xd5e   : > { %v4591_v10 = vld [vmem:[#allocation1] sm:$0xff] }
 0xd5f   : > { %v4629_v63 = vsel %vm745_vm2, %v4591_v10, 0.0 }
 0xd60   : > { %4630 = vadd.xlane.f32.xlu2 %v4629_v63 }
 0xd66   : > { %v4423_v0 = vpop.f32.mrf.mxu3 }
 0xd67   : > { %v4424_v59 = vadd.f32 %v12924_v38, %v4423_v0 }
 0xd69   : > { %v4447_v12 = vrot.slane %v4424_v59, 1  ;;  %v4448_v54 = vrot.slane %v4424_v59, 2  ;;  %v4449_v57 = vrot.slane %v4424_v59, 3  ;;  %v4450_v45 = vrot.slane %v4424_v59, 4 }
 0xd6a   : > { %v4451_v31 = vrot.slane %v4424_v59, 5  ;;  %v4452_v21 = vrot.slane %v4424_v59, 6  ;;  %v12963_v40 = vadd.f32 %v4424_v59, %v12726_v22  ;;  %v4453_v62 = vrot.slane %v4424_v59, 7 }
 0xd6b   : > { %v12966_v43 = vadd.f32 %v4447_v12, %v12729_v41  ;;  %v12969_v4 = vadd.f32 %v4448_v54, %v12732_v3  ;;  %v12972_v61 = vadd.f32 %v4449_v57, %v12736_v46  ;;  %v12975_v42 = vadd.f32 %v4450_v45, %v12739_v2  ;;  %v16391_v41 = vld [vmem:[#allocation26_spill] sm:$0xff] }
 0xd6c   : > { %4592 = vst [vmem:[#allocation1] ss:$9 sm:$0xff] %v12963_v40  ;;  %v12979_v20 = vadd.f32 %v4451_v31, %v12743_v50  ;;  %v12983_v22 = vadd.f32 %v4452_v21, %v12747_v24  ;;  %v12987_v3 = vadd.f32 %v4453_v62, %v16391_v41 }
 0xd6d   : > { %4593 = vst [vmem:[#allocation1 + $0x1] ss:$9 sm:$0xff] %v12966_v43 }
 0xd6e   : > { %4594 = vst [vmem:[#allocation1 + $0x2] ss:$9 sm:$0xff] %v12969_v4 }
 0xd6f   : > { %4595 = vst [vmem:[#allocation1 + $0x3] ss:$9 sm:$0xff] %v12972_v61 }
 0xd70   : > { %4596 = vst [vmem:[#allocation1 + $0x4] ss:$9 sm:$0xff] %v12975_v42 }
 0xd71   : > { %4597 = vst [vmem:[#allocation1 + $0x5] ss:$9 sm:$0xff] %v12979_v20 }
 0xd72   : > { %4598 = vst [vmem:[#allocation1 + $0x6] ss:$9 sm:$0xff] %v12983_v22 }
 0xd73   : > { %4599 = vst [vmem:[#allocation1 + $0x7] ss:$9 sm:$0xff] %v12987_v3 }
 0xd7a   : > { %v4600_v46 = vld [vmem:[#allocation1] sm:$0xff] }
 0xd7b   : > { %v4632_v2 = vsel %vm745_vm2, %v4600_v46, 0.0 }
 0xd7c   : > { %4633 = vadd.xlane.f32.xlu1 %v4632_v2 }
 0xdaa   : > { %v4426_v50 = vpop.f32.mrf.mxu3 }
 0xdab   : > { %v4427_v24 = vadd.f32 %v12924_v38, %v4426_v50 }
 0xdad   : > { %v4454_v48 = vrot.slane %v4427_v24, 1  ;;  %v4455_v30 = vrot.slane %v4427_v24, 2  ;;  %v4456_v13 = vrot.slane %v4427_v24, 3  ;;  %v4457_v35 = vrot.slane %v4427_v24, 4 }
 0xdae   : > { %v4458_v32 = vrot.slane %v4427_v24, 5  ;;  %v4459_v60 = vrot.slane %v4427_v24, 6  ;;  %v12997_v53 = vadd.f32 %v4427_v24, %v12777_v25  ;;  %v4460_v23 = vrot.slane %v4427_v24, 7 }
 0xdaf   : > { %v13000_v17 = vadd.f32 %v4454_v48, %v12780_v19  ;;  %v13003_v56 = vadd.f32 %v4455_v30, %v12783_v37  ;;  %v13006_v10 = vadd.f32 %v4456_v13, %v12787_v11  ;;  %v13009_v63 = vadd.f32 %v4457_v35, %v12790_v5 }
 0xdb0   : > { %4601 = vst [vmem:[#allocation1] ss:$9 sm:$0xff] %v12997_v53  ;;  %v13013_v0 = vadd.f32 %v4458_v32, %v12794_v6  ;;  %v13017_v25 = vadd.f32 %v4459_v60, %v12798_v36  ;;  %v13021_v19 = vadd.f32 %v4460_v23, %v12803_v44 }
 0xdb1   : > { %4602 = vst [vmem:[#allocation1 + $0x1] ss:$9 sm:$0xff] %v13000_v17 }
 0xdb2   : > { %4603 = vst [vmem:[#allocation1 + $0x2] ss:$9 sm:$0xff] %v13003_v56 }
 0xdb3   : > { %4604 = vst [vmem:[#allocation1 + $0x3] ss:$9 sm:$0xff] %v13006_v10 }
 0xdb4   : > { %4605 = vst [vmem:[#allocation1 + $0x4] ss:$9 sm:$0xff] %v13009_v63 }
 0xdb5   : > { %4606 = vst [vmem:[#allocation1 + $0x5] ss:$9 sm:$0xff] %v13013_v0 }
 0xdb6   : > { %4607 = vst [vmem:[#allocation1 + $0x6] ss:$9 sm:$0xff] %v13017_v25 }
 0xdb7   : > { %4608 = vst [vmem:[#allocation1 + $0x7] ss:$9 sm:$0xff] %v13021_v19 }
 0xdbc   : > { %v4429_v37 = vpop.f32.mrf.mxu3 }
 0xdbd   : > { %v4430_v5 = vadd.f32 %v12924_v38, %v4429_v37 }
 0xdbe   : > { %v4609_v11 = vld [vmem:[#allocation1] sm:$0xff] }
 0xdbf   : > { %v4635_v6 = vsel %vm745_vm2, %v4609_v11, 0.0  ;;  %v4461_v36 = vrot.slane %v4430_v5, 1  ;;  %v4462_v59 = vrot.slane %v4430_v5, 2  ;;  %v4463_v44 = vrot.slane %v4430_v5, 3 }
 0xdc0   : > { %v4464_v12 = vrot.slane %v4430_v5, 4  ;;  %4636 = vadd.xlane.f32.xlu0 %v4635_v6  ;;  %v4465_v54 = vrot.slane %v4430_v5, 5  ;;  %v4466_v57 = vrot.slane %v4430_v5, 6  ;;  %v13031_v45 = vadd.f32 %v4430_v5, %v12839_v29 }
 0xdc1   : > { %v4467_v31 = vrot.slane %v4430_v5, 7  ;;  %v13034_v21 = vadd.f32 %v4461_v36, %v12842_v51  ;;  %v13037_v62 = vadd.f32 %v4462_v59, %v12845_v52  ;;  %v13040_v41 = vadd.f32 %v4463_v44, %v12852_v55 }
 0xdc2   : > { %v13043_v46 = vadd.f32 %v4464_v12, %v12855_v14  ;;  %4610 = vst [vmem:[#allocation1] ss:$9 sm:$0xff] %v13031_v45  ;;  %v13047_v2 = vadd.f32 %v4465_v54, %v12863_v18  ;;  %v13051_v29 = vadd.f32 %v4466_v57, %v12867_v39 }
 0xdc3   : > { %4611 = vst [vmem:[#allocation1 + $0x1] ss:$9 sm:$0xff] %v13034_v21  ;;  %v13055_v51 = vadd.f32 %v4467_v31, %v12874_v58 }
 0xdc4   : > { %4612 = vst [vmem:[#allocation1 + $0x2] ss:$9 sm:$0xff] %v13037_v62 }
 0xdc5   : > { %4613 = vst [vmem:[#allocation1 + $0x3] ss:$9 sm:$0xff] %v13040_v41 }
 0xdc6   : > { %4614 = vst [vmem:[#allocation1 + $0x4] ss:$9 sm:$0xff] %v13043_v46 }
 0xdc7   : > { %4615 = vst [vmem:[#allocation1 + $0x5] ss:$9 sm:$0xff] %v13047_v2 }
 0xdc8   : > { %4616 = vst [vmem:[#allocation1 + $0x6] ss:$9 sm:$0xff] %v13051_v29 }
 0xdc9   : > { %4617 = vst [vmem:[#allocation1 + $0x7] ss:$9 sm:$0xff] %v13055_v51 }
 0xdca   : > { %v4432_v52 = vpop.f32.mrf.mxu3 }
 0xdcb   : > { %v4433_v55 = vadd.f32 %v12924_v38, %v4432_v52 }
 0xdcd   : > { %v4468_v14 = vrot.slane %v4433_v55, 1  ;;  %v4469_v18 = vrot.slane %v4433_v55, 2  ;;  %v4470_v39 = vrot.slane %v4433_v55, 3  ;;  %v13064_v50 = vadd.f32 %v4433_v55, %v12898_v27 }
 0xdcf   : > { %v13067_v48 = vadd.f32 %v4468_v14, %v12901_v16  ;;  %v13070_v30 = vadd.f32 %v4469_v18, %v12904_v8  ;;  %v13073_v13 = vadd.f32 %v4470_v39, %v12907_v15 }
 0xdd0   : > { %v4618_v24 = vld [vmem:[#allocation1] sm:$0xff] }
 0xdd1   : > { %4619 = vst [vmem:[#allocation1] ss:$9 sm:$0xff] %v13064_v50  ;;  %v4638_v38 = vsel %vm745_vm2, %v4618_v24, 0.0 }
 0xdd2   : > { %4620 = vst [vmem:[#allocation1 + $0x1] ss:$9 sm:$0xff] %v13067_v48  ;;  %4639 = vadd.xlane.f32.xlu1 %v4638_v38 }
 0xdd3   : > { %v4631_v58 = vpop.xlane.xlu2 %4630  ;;  %4621 = vst [vmem:[#allocation1 + $0x2] ss:$9 sm:$0xff] %v13070_v30 }
 0xdd4   : > { %v4644_v35 = vmul.f32 %v4631_v58, %v12397_v47  ;;  %4622 = vst [vmem:[#allocation1 + $0x3] ss:$9 sm:$0xff] %v13073_v13 }
 0xdd6   : > { %v4654_v27 = vperm.slane %v4644_v35, 0  ;;  %v4655_v32 = vperm.slane %v4644_v35, 1  ;;  %v4656_v60 = vperm.slane %v4644_v35, 2  ;;  %v4657_v16 = vperm.slane %v4644_v35, 3 }
 0xdd7   : > { %v4658_v8 = vperm.slane %v4644_v35, 4  ;;  %v4659_v23 = vperm.slane %v4644_v35, 5  ;;  %v4660_v11 = vperm.slane %v4644_v35, 6  ;;  %v4661_v6 = vperm.slane %v4644_v35, 7 }
 0xdd8   : > { %v13082_v15 = vsub.f32 %v12929_v49, %v4654_v27  ;;  %v13085_v37 = vsub.f32 %v12932_v26, %v4655_v32  ;;  %v13088_v5 = vsub.f32 %v12935_v28, %v4656_v60  ;;  %v13091_v36 = vsub.f32 %v12938_v9, %v4657_v16 }
 0xdd9   : > { %v13094_v59 = vsub.f32 %v12941_v34, %v4658_v8  ;;  %v13099_v49 = vsub.f32 %v12945_v33, %v4659_v23  ;;  %v13104_v12 = vsub.f32 %v12949_v1, %v4660_v11  ;;  %v13109_v54 = vsub.f32 %v12953_v7, %v4661_v6 }
 0xdda   : > { %v4762_v44 = vmul.f32 %v13082_v15, %v13082_v15  ;;  %v4763_v26 = vmul.f32 %v13085_v37, %v13085_v37  ;;  %v4764_v28 = vmul.f32 %v13088_v5, %v13088_v5  ;;  %v4765_v34 = vmul.f32 %v13091_v36, %v13091_v36 }
 0xddb   : > { %v4623_v9 = vld [vmem:[#allocation1] sm:$0xff]  ;;  %v4766_v33 = vmul.f32 %v13094_v59, %v13094_v59  ;;  %v4767_v57 = vmul.f32 %v13099_v49, %v13099_v49  ;;  %v4768_v1 = vmul.f32 %v13104_v12, %v13104_v12  ;;  %v4769_v31 = vmul.f32 %v13109_v54, %v13109_v54 }
 0xddc   : > { %4834 = vst [vmem:[#allocation1] ss:$9 sm:$0xff] %v4762_v44  ;;  %v4641_v44 = vsel %vm3688_vm8, %v4623_v9, 0.0 }
 0xddd   : > { %4836 = vst [vmem:[#allocation1 + $0x1] ss:$9 sm:$0xff] %v4763_v26 }
 0xdde   : > { %4838 = vst [vmem:[#allocation1 + $0x2] ss:$9 sm:$0xff] %v4764_v28 }
 0xddf   : > { %4840 = vst [vmem:[#allocation1 + $0x3] ss:$9 sm:$0xff] %v4765_v34 }
 0xde0   : > { %4842 = vst [vmem:[#allocation1 + $0x4] ss:$9 sm:$0xff] %v4766_v33 }
 0xde1   : > { %4844 = vst [vmem:[#allocation1 + $0x5] ss:$9 sm:$0xff] %v4767_v57 }
 0xde2   : > { %4846 = vst [vmem:[#allocation1 + $0x6] ss:$9 sm:$0xff] %v4768_v1 }
 0xde3   : > { %4848 = vst [vmem:[#allocation1 + $0x7] ss:$9 sm:$0xff] %v4769_v31 }
 0xdea   : > { %v4849_v7 = vld [vmem:[#allocation1] sm:$0xff] }
 0xdeb   : > { %v4887_v52 = vsel %vm745_vm2, %v4849_v7, 0.0 }
 0xdec   : > { %4888 = vadd.xlane.f32.xlu2 %v4887_v52 }
 0xdef   : > { %v4634_v55 = vpop.xlane.xlu1 %4633 }
 0xdf0   : > { %v4645_v14 = vmul.f32 %v4634_v55, %v12397_v47 }
 0xdf2   : > { %v4662_v18 = vperm.slane %v4645_v14, 0  ;;  %v4663_v39 = vperm.slane %v4645_v14, 1  ;;  %v4664_v58 = vperm.slane %v4645_v14, 2  ;;  %v4665_v24 = vperm.slane %v4645_v14, 3 }
 0xdf3   : > { %v4666_v35 = vperm.slane %v4645_v14, 4  ;;  %v4667_v38 = vperm.slane %v4645_v14, 5  ;;  %v4668_v27 = vperm.slane %v4645_v14, 6  ;;  %v4669_v32 = vperm.slane %v4645_v14, 7 }
 0xdf4   : > { %v13124_v60 = vsub.f32 %v12963_v40, %v4662_v18  ;;  %v13127_v16 = vsub.f32 %v12966_v43, %v4663_v39  ;;  %v13130_v8 = vsub.f32 %v12969_v4, %v4664_v58  ;;  %v13133_v23 = vsub.f32 %v12972_v61, %v4665_v24  ;;  %4642 = vadd.xlane.f32.xlu2 %v4641_v44 }
 0xdf5   : > { %v13136_v11 = vsub.f32 %v12975_v42, %v4666_v35  ;;  %v13139_v6 = vsub.f32 %v12979_v20, %v4667_v38  ;;  %v13143_v40 = vsub.f32 %v12983_v22, %v4668_v27  ;;  %v13152_v42 = vsub.f32 %v12987_v3, %v4669_v32 }
 0xdf6   : > { %v4770_v43 = vmul.f32 %v13124_v60, %v13124_v60  ;;  %v4771_v4 = vmul.f32 %v13127_v16, %v13127_v16  ;;  %v4772_v61 = vmul.f32 %v13130_v8, %v13130_v8  ;;  %v4773_v20 = vmul.f32 %v13133_v23, %v13133_v23 }
 0xdf7   : > { %v4774_v22 = vmul.f32 %v13136_v11, %v13136_v11  ;;  %v4775_v26 = vmul.f32 %v13139_v6, %v13139_v6  ;;  %v4776_v28 = vmul.f32 %v13143_v40, %v13143_v40  ;;  %v4777_v9 = vmul.f32 %v13152_v42, %v13152_v42 }
 0xdf8   : > { %4850 = vst [vmem:[#allocation1] ss:$9 sm:$0xff] %v4770_v43 }
 0xdf9   : > { %4851 = vst [vmem:[#allocation1 + $0x1] ss:$9 sm:$0xff] %v4771_v4 }
 0xdfa   : > { %4852 = vst [vmem:[#allocation1 + $0x2] ss:$9 sm:$0xff] %v4772_v61 }
 0xdfb   : > { %4853 = vst [vmem:[#allocation1 + $0x3] ss:$9 sm:$0xff] %v4773_v20 }
 0xdfc   : > { %4854 = vst [vmem:[#allocation1 + $0x4] ss:$9 sm:$0xff] %v4774_v22 }
 0xdfd   : > { %4855 = vst [vmem:[#allocation1 + $0x5] ss:$9 sm:$0xff] %v4775_v26 }
 0xdfe   : > { %4856 = vst [vmem:[#allocation1 + $0x6] ss:$9 sm:$0xff] %v4776_v28 }
 0xdff   : > { %4857 = vst [vmem:[#allocation1 + $0x7] ss:$9 sm:$0xff] %v4777_v9 }
 0xe06   : > { %v4858_v3 = vld [vmem:[#allocation1] sm:$0xff] }
 0xe07   : > { %v4890_v34 = vsel %vm745_vm2, %v4858_v3, 0.0 }
 0xe08   : > { %4891 = vadd.xlane.f32.xlu0 %v4890_v34 }
 0xe33   : > { %v4637_v33 = vpop.xlane.xlu0 %4636 }
 0xe34   : > { %v4646_v57 = vmul.f32 %v4637_v33, %v12397_v47 }
 0xe36   : > { %v4670_v1 = vperm.slane %v4646_v57, 0  ;;  %v4671_v31 = vperm.slane %v4646_v57, 1  ;;  %v4672_v7 = vperm.slane %v4646_v57, 2  ;;  %v4673_v52 = vperm.slane %v4646_v57, 3 }
 0xe37   : > { %v4674_v55 = vperm.slane %v4646_v57, 4  ;;  %v4675_v14 = vperm.slane %v4646_v57, 5  ;;  %v4676_v18 = vperm.slane %v4646_v57, 6  ;;  %v4677_v39 = vperm.slane %v4646_v57, 7 }
 0xe38   : > { %v13167_v58 = vsub.f32 %v12997_v53, %v4670_v1  ;;  %v13170_v24 = vsub.f32 %v13000_v17, %v4671_v31  ;;  %v13173_v35 = vsub.f32 %v13003_v56, %v4672_v7  ;;  %v13176_v38 = vsub.f32 %v13006_v10, %v4673_v52 }
 0xe39   : > { %v13179_v27 = vsub.f32 %v13009_v63, %v4674_v55  ;;  %v13182_v32 = vsub.f32 %v13013_v0, %v4675_v14  ;;  %v13185_v44 = vsub.f32 %v13017_v25, %v4676_v18  ;;  %v13194_v10 = vsub.f32 %v13021_v19, %v4677_v39 }
 0xe3a   : > { %v4778_v53 = vmul.f32 %v13167_v58, %v13167_v58  ;;  %v4779_v17 = vmul.f32 %v13170_v24, %v13170_v24  ;;  %v4780_v56 = vmul.f32 %v13173_v35, %v13173_v35  ;;  %v4781_v63 = vmul.f32 %v13176_v38, %v13176_v38 }
 0xe3b   : > { %v4782_v0 = vmul.f32 %v13179_v27, %v13179_v27  ;;  %v4783_v25 = vmul.f32 %v13182_v32, %v13182_v32  ;;  %v4784_v43 = vmul.f32 %v13185_v44, %v13185_v44  ;;  %v4785_v4 = vmul.f32 %v13194_v10, %v13194_v10 }
 0xe3c   : > { %4859 = vst [vmem:[#allocation1] ss:$9 sm:$0xff] %v4778_v53 }
 0xe3d   : > { %4860 = vst [vmem:[#allocation1 + $0x1] ss:$9 sm:$0xff] %v4779_v17 }
 0xe3e   : > { %4861 = vst [vmem:[#allocation1 + $0x2] ss:$9 sm:$0xff] %v4780_v56 }
 0xe3f   : > { %4862 = vst [vmem:[#allocation1 + $0x3] ss:$9 sm:$0xff] %v4781_v63 }
 0xe40   : > { %4863 = vst [vmem:[#allocation1 + $0x4] ss:$9 sm:$0xff] %v4782_v0 }
 0xe41   : > { %4864 = vst [vmem:[#allocation1 + $0x5] ss:$9 sm:$0xff] %v4783_v25 }
 0xe42   : > { %4865 = vst [vmem:[#allocation1 + $0x6] ss:$9 sm:$0xff] %v4784_v43 }
 0xe43   : > { %4866 = vst [vmem:[#allocation1 + $0x7] ss:$9 sm:$0xff] %v4785_v4 }
 0xe45   : > { %v4640_v19 = vpop.xlane.xlu1 %4639 }
 0xe46   : > { %v4647_v61 = vmul.f32 %v4640_v19, %v12397_v47 }
 0xe48   : > { %v4678_v20 = vperm.slane %v4647_v61, 0  ;;  %v4679_v22 = vperm.slane %v4647_v61, 1  ;;  %v4680_v26 = vperm.slane %v4647_v61, 2  ;;  %v4681_v28 = vperm.slane %v4647_v61, 3 }
 0xe49   : > { %v4682_v9 = vperm.slane %v4647_v61, 4  ;;  %v4683_v3 = vperm.slane %v4647_v61, 5  ;;  %v4684_v34 = vperm.slane %v4647_v61, 6  ;;  %v4685_v33 = vperm.slane %v4647_v61, 7 }
 0xe4a   : > { %v13208_v57 = vsub.f32 %v13031_v45, %v4678_v20  ;;  %v13211_v1 = vsub.f32 %v13034_v21, %v4679_v22  ;;  %v13214_v31 = vsub.f32 %v13037_v62, %v4680_v26  ;;  %v13217_v7 = vsub.f32 %v13040_v41, %v4681_v28  ;;  %v4867_v52 = vld [vmem:[#allocation1] sm:$0xff]  ;;  %v10018_v28 = vld [vmem:[%s16117_s5 + $0x38] sm:$0xff] }
 0xe4b   : > { %v13220_v55 = vsub.f32 %v13043_v46, %v4682_v9  ;;  %v13223_v14 = vsub.f32 %v13047_v2, %v4683_v3  ;;  %v13226_v18 = vsub.f32 %v13051_v29, %v4684_v34  ;;  %v13235_v41 = vsub.f32 %v13055_v51, %v4685_v33  ;;  %5297 = vmatpush.msra.mxu1 %v10018_v28 }
 0xe4c   : > { %v4786_v45 = vmul.f32 %v13208_v57, %v13208_v57  ;;  %v4787_v21 = vmul.f32 %v13211_v1, %v13211_v1  ;;  %v4788_v62 = vmul.f32 %v13214_v31, %v13214_v31  ;;  %v4789_v46 = vmul.f32 %v13217_v7, %v13217_v7 }
 0xe4d   : > { %v4790_v2 = vmul.f32 %v13220_v55, %v13220_v55  ;;  %v4893_v29 = vsel %vm745_vm2, %v4867_v52, 0.0  ;;  %v4791_v39 = vmul.f32 %v13223_v14, %v13223_v14  ;;  %v4792_v53 = vmul.f32 %v13226_v18, %v13226_v18 }
 0xe4e   : > { %4868 = vst [vmem:[#allocation1] ss:$9 sm:$0xff] %v4786_v45  ;;  %4894 = vadd.xlane.f32.xlu1 %v4893_v29  ;;  %v4793_v51 = vmul.f32 %v13235_v41, %v13235_v41  ;;  %v10017_v45 = vld [vmem:[%s16117_s5 + $0x30] sm:$0xff]  ;;  %v13288_v29 = vld [vmem:[%s16128_s16] ss:$0 sm:$0xff] }
 0xe4f   : > { %4869 = vst [vmem:[#allocation1 + $0x1] ss:$9 sm:$0xff] %v4787_v21  ;;  %5298 = vmatpush.msra.mxu1 %v10017_v45 }
 0xe50   : > { %4870 = vst [vmem:[#allocation1 + $0x2] ss:$9 sm:$0xff] %v4788_v62  ;;  %v10016_v62 = vld [vmem:[%s16117_s5 + $0x28] sm:$0xff] }
 0xe51   : > { %4871 = vst [vmem:[#allocation1 + $0x3] ss:$9 sm:$0xff] %v4789_v46  ;;  %5299 = vmatpush.msra.mxu1 %v10016_v62 }
 0xe52   : > { %4872 = vst [vmem:[#allocation1 + $0x4] ss:$9 sm:$0xff] %v4790_v2 }
 0xe53   : > { %4873 = vst [vmem:[#allocation1 + $0x5] ss:$9 sm:$0xff] %v4791_v39  ;;  %v10015_v39 = vld [vmem:[%s16117_s5 + $0x20] sm:$0xff] }
 0xe54   : > { %4874 = vst [vmem:[#allocation1 + $0x6] ss:$9 sm:$0xff] %v4792_v53  ;;  %5300 = vmatpush.msra.mxu1 %v10015_v39 }
 0xe55   : > { %4875 = vst [vmem:[#allocation1 + $0x7] ss:$9 sm:$0xff] %v4793_v51 }
 0xe5c   : > { %v4876_v17 = vld [vmem:[#allocation1] sm:$0xff] }
 0xe5d   : > { %v4896_v56 = vsel %vm745_vm2, %v4876_v17, 0.0 }
 0xe5e   : > { %4897 = vadd.xlane.f32.xlu0 %v4896_v56 }
 0xe5f   : > { %v4889_v63 = vpop.xlane.xlu2 %4888 }
 0xe60   : > { %v4902_v0 = vmul.f32 %v4889_v63, %v12397_v47 }
 0xe62   : > { %v4907_v25 = vadd.f32 1e-05, %v4902_v0 }
 0xe64   : > { %10407 = vrsqrt.f32 %v4907_v25  ;;  %vm4918_vm10 = vweird.f32 %v4907_v25 }
 0xe67   : > { %v4643_v43 = vpop.xlane.xlu2 %4642 }
 0xe68   : > { %v4648_v4 = vmul.f32 %v4643_v43, %v12397_v47 }
 0xe6a   : > { %v10408_v19 = vpop.eup %10407  ;;  %v4686_v61 = vperm.slane %v4648_v4, 0  ;;  %v4687_v20 = vperm.slane %v4648_v4, 1  ;;  %v4688_v22 = vperm.slane %v4648_v4, 2  ;;  %v4689_v26 = vperm.slane %v4648_v4, 3 }
 0xe6b   : > { %v4913_v9 = vmul.f32 %v10408_v19, %v4907_v25  ;;  %vm4919_vm9 = vweird.f32 %v10408_v19  ;;  %v13322_v25 = vrot.slane %v13288_v29, 3 }
 0xe6c   : > { %v13255_v3 = vsub.f32 %v13064_v50, %v4686_v61  ;;  %v13258_v34 = vsub.f32 %v13067_v48, %v4687_v20  ;;  %v13261_v33 = vsub.f32 %v13070_v30, %v4688_v22  ;;  %v13264_v52 = vsub.f32 %v13073_v13, %v4689_v26  ;;  %v13272_v50 = vld [vmem:[%s16127_s15] ss:$0 sm:$0xff]  ;;  %vm4920_vm11 = vmor %vm4918_vm10, %vm4919_vm9 }
 0xe6d   : > { %v4914_v21 = vmul.f32 %v10408_v19, %v4913_v9  ;;  %v13294_v51 = vrot.slane %v13272_v50, 1  ;;  %v13297_v17 = vrot.slane %v13272_v50, 2  ;;  %v13300_v56 = vrot.slane %v13272_v50, 3 }
 0xe6e   : > { %16392 = vst [vmem:[#allocation20_spill] sm:$0xff] %v13255_v3  ;;  %v4794_v48 = vmul.f32 %v13255_v3, %v13255_v3  ;;  %v4795_v30 = vmul.f32 %v13258_v34, %v13258_v34  ;;  %v4796_v13 = vmul.f32 %v13261_v33, %v13261_v33  ;;  %v4797_v2 = vmul.f32 %v13264_v52, %v13264_v52 }
 0xe6f   : > { %16393 = vst [vmem:[#allocation24_spill] sm:$0xff] %v13258_v34  ;;  %v4915_v46 = vmul.f32 0.5, %v4914_v21  ;;  %v13303_v63 = vrot.slane %v13272_v50, 4  ;;  %v13306_v43 = vrot.slane %v13272_v50, 5  ;;  %v13309_v4 = vrot.slane %v13272_v50, 6 }
 0xe70   : > { %16394 = vst [vmem:[#allocation25_spill] sm:$0xff] %v13261_v33  ;;  %v13312_v61 = vrot.slane %v13272_v50, 7  ;;  %v13315_v20 = vrot.slane %v13288_v29, 1  ;;  %v13319_v22 = vrot.slane %v13288_v29, 2  ;;  %v13325_v26 = vrot.slane %v13288_v29, 4 }
 0xe71   : > { %16395 = vst [vmem:[#allocation23_spill] sm:$0xff] %v13264_v52  ;;  %v4916_v53 = vsub.f32 1.5, %v4915_v46 }
 0xe72   : > { %4877 = vst [vmem:[#allocation1] ss:$9 sm:$0xff] %v4794_v48 }
 0xe73   : > { %4878 = vst [vmem:[#allocation1 + $0x1] ss:$9 sm:$0xff] %v4795_v30  ;;  %v4917_v0 = vmul.f32 %v10408_v19, %v4916_v53 }
 0xe74   : > { %4879 = vst [vmem:[#allocation1 + $0x2] ss:$9 sm:$0xff] %v4796_v13 }
 0xe75   : > { %4880 = vst [vmem:[#allocation1 + $0x3] ss:$9 sm:$0xff] %v4797_v2  ;;  %v4921_v28 = vsel %vm4920_vm11, %v10408_v19, %v4917_v0 }
 0xe76   : > { %v4967_v9 = vperm.slane %v4921_v28, 0  ;;  %v4968_v45 = vperm.slane %v4921_v28, 1  ;;  %v4969_v21 = vperm.slane %v4921_v28, 2  ;;  %v4970_v48 = vperm.slane %v4921_v28, 3 }
 0xe77   : > { %v4971_v30 = vperm.slane %v4921_v28, 4  ;;  %v4972_v13 = vperm.slane %v4921_v28, 5  ;;  %v4973_v62 = vperm.slane %v4921_v28, 6  ;;  %v4974_v46 = vperm.slane %v4921_v28, 7 }
 0xe78   : > { %v5039_v2 = vmul.f32 %v4967_v9, %v13082_v15  ;;  %v5040_v39 = vmul.f32 %v4968_v45, %v13085_v37  ;;  %v5041_v53 = vmul.f32 %v4969_v21, %v13088_v5  ;;  %v5042_v52 = vmul.f32 %v4970_v48, %v13091_v36 }
 0xe79   : > { %v5043_v33 = vmul.f32 %v4971_v30, %v13094_v59  ;;  %v5044_v19 = vmul.f32 %v4972_v13, %v13099_v49  ;;  %v5045_v0 = vmul.f32 %v4973_v62, %v13104_v12  ;;  %v5046_v34 = vmul.f32 %v4974_v46, %v13109_v54 }
 0xe7a   : > { %v5092_v3 = vmul.f32 %v13272_v50, %v5039_v2  ;;  %v5093_v28 = vmul.f32 %v13294_v51, %v5040_v39  ;;  %v5094_v15 = vmul.f32 %v13297_v17, %v5041_v53  ;;  %v5095_v37 = vmul.f32 %v13300_v56, %v5042_v52 }
 0xe7b   : > { %v13340_v5 = vrot.slane %v13288_v29, 5  ;;  %v13343_v36 = vrot.slane %v13288_v29, 6  ;;  %v5096_v59 = vmul.f32 %v13303_v63, %v5043_v33  ;;  %v5097_v49 = vmul.f32 %v13306_v43, %v5044_v19  ;;  %v4892_v54 = vpop.xlane.xlu0 %4891 }
 0xe7c   : > { %v4881_v12 = vld [vmem:[#allocation1] sm:$0xff]  ;;  %v5098_v9 = vmul.f32 %v13309_v4, %v5045_v0  ;;  %v13349_v45 = vadd.f32 %v13288_v29, %v5092_v3  ;;  %v13352_v21 = vadd.f32 %v13315_v20, %v5093_v28  ;;  %v13355_v52 = vadd.f32 %v13319_v22, %v5094_v15 }
 0xe7d   : > { %v13358_v48 = vrot.slane %v13288_v29, 7  ;;  %v5099_v33 = vmul.f32 %v13312_v61, %v5046_v34  ;;  %v13362_v30 = vadd.f32 %v13322_v25, %v5095_v37  ;;  %v13365_v13 = vadd.f32 %v13325_v26, %v5096_v59 }
 0xe7e   : > { %16396 = vst [vmem:[#allocation30_spill] sm:$0xff] %v13349_v45  ;;  %v4903_v3 = vmul.f32 %v4892_v54, %v12397_v47  ;;  %v4899_v62 = vsel %vm3688_vm8, %v4881_v12, 0.0  ;;  %v13371_v46 = vadd.f32 %v13340_v5, %v5097_v49  ;;  %v13375_v34 = vadd.f32 %v13343_v36, %v5098_v9 }
 0xe7f   : > { %16397 = vst [vmem:[#allocation31_spill] sm:$0xff] %v13352_v21  ;;  %4900 = vadd.xlane.f32.xlu2 %v4899_v62  ;;  %v13379_v39 = vadd.f32 %v13358_v48, %v5099_v33 }
 0xe80   : > { %16398 = vst [vmem:[#allocation28_spill] sm:$0xff] %v13355_v52  ;;  %v4908_v2 = vadd.f32 1e-05, %v4903_v3 }
 0xe81   : > { %16399 = vst [vmem:[#allocation19_spill] sm:$0xff] %v13362_v30 }
 0xe82   : > { %16400 = vst [vmem:[#allocation21_spill] sm:$0xff] %v13365_v13  ;;  %10409 = vrsqrt.f32 %v4908_v2  ;;  %vm4928_vm13 = vweird.f32 %v4908_v2 }
 0xe83   : > { %5227 = vst [vmem:[#allocation1] ss:$9 sm:$0xff] %v13349_v45 }
 0xe84   : > { %16401 = vst [vmem:[#allocation29_spill] sm:$0xff] %v13371_v46 }
 0xe85   : > { %5229 = vst [vmem:[#allocation1 + $0x1] ss:$9 sm:$0xff] %v13352_v21 }
 0xe86   : > { %16402 = vst [vmem:[#allocation37_spill] sm:$0xff] %v13375_v34 }
 0xe87   : > { %5231 = vst [vmem:[#allocation1 + $0x2] ss:$9 sm:$0xff] %v13355_v52 }
 0xe88   : > { %16403 = vst [vmem:[#allocation18_spill] sm:$0xff] %v13379_v39  ;;  %v10410_v53 = vpop.eup %10409 }
 0xe89   : > { %5233 = vst [vmem:[#allocation1 + $0x3] ss:$9 sm:$0xff] %v13362_v30  ;;  %v4923_v19 = vmul.f32 %v10410_v53, %v4908_v2  ;;  %vm4929_vm12 = vweird.f32 %v10410_v53 }
 0xe8a   : > { %5235 = vst [vmem:[#allocation1 + $0x4] ss:$9 sm:$0xff] %v13365_v13  ;;  %vm4930_vm14 = vmor %vm4928_vm13, %vm4929_vm12 }
 0xe8b   : > { %5237 = vst [vmem:[#allocation1 + $0x5] ss:$9 sm:$0xff] %v13371_v46  ;;  %v4924_v0 = vmul.f32 %v10410_v53, %v4923_v19 }
 0xe8c   : > { %5239 = vst [vmem:[#allocation1 + $0x6] ss:$9 sm:$0xff] %v13375_v34 }
 0xe8d   : > { %5241 = vst [vmem:[#allocation1 + $0x7] ss:$9 sm:$0xff] %v13379_v39  ;;  %v4925_v15 = vmul.f32 0.5, %v4924_v0 }
 0xe8f   : > { %v4926_v37 = vsub.f32 1.5, %v4925_v15 }
 0xe91   : > { %v4927_v59 = vmul.f32 %v10410_v53, %v4926_v37 }
 0xe93   : > { %v4931_v49 = vsel %vm4930_vm14, %v10410_v53, %v4927_v59 }
 0xe94   : > { %v5242_v28 = vld [vmem:[#allocation1] sm:$0xff]  ;;  %v4975_v12 = vperm.slane %v4931_v49, 0  ;;  %v4976_v54 = vperm.slane %v4931_v49, 1  ;;  %v4977_v9 = vperm.slane %v4931_v49, 2  ;;  %v4978_v33 = vperm.slane %v4931_v49, 3 }
 0xe95   : > { %10020 = vmatmul.msk.f32.vlgmr.msra.gmra.mxu1 %vm745_vm2, %v5242_v28  ;;  %v4979_v3 = vperm.slane %v4931_v49, 4  ;;  %v4980_v62 = vperm.slane %v4931_v49, 5  ;;  %v4981_v39 = vperm.slane %v4931_v49, 6  ;;  %v4982_v34 = vperm.slane %v4931_v49, 7 }
 0xe96   : > { %v5047_v19 = vmul.f32 %v4975_v12, %v13124_v60  ;;  %v5048_v0 = vmul.f32 %v4976_v54, %v13127_v16  ;;  %v5049_v28 = vmul.f32 %v4977_v9, %v13130_v8  ;;  %v5050_v15 = vmul.f32 %v4978_v33, %v13133_v23 }
 0xe97   : > { %v5051_v2 = vmul.f32 %v4979_v3, %v13136_v11  ;;  %v5052_v53 = vmul.f32 %v4980_v62, %v13139_v6  ;;  %v5053_v37 = vmul.f32 %v4981_v39, %v13143_v40  ;;  %v5054_v59 = vmul.f32 %v4982_v34, %v13152_v42 }
 0xe98   : > { %v5100_v46 = vmul.f32 %v13272_v50, %v5047_v19  ;;  %v5101_v49 = vmul.f32 %v13294_v51, %v5048_v0  ;;  %v5102_v60 = vmul.f32 %v13297_v17, %v5049_v28  ;;  %v5103_v16 = vmul.f32 %v13300_v56, %v5050_v15 }
 0xe99   : > { %v5104_v8 = vmul.f32 %v13303_v63, %v5051_v2  ;;  %v5105_v23 = vmul.f32 %v13306_v43, %v5052_v53  ;;  %v5106_v11 = vmul.f32 %v13309_v4, %v5053_v37  ;;  %v5107_v34 = vmul.f32 %v13312_v61, %v5054_v59 }
 0xe9a   : > { %v13403_v6 = vadd.f32 %v13288_v29, %v5100_v46  ;;  %v13406_v40 = vadd.f32 %v13315_v20, %v5101_v49  ;;  %v13409_v42 = vadd.f32 %v13319_v22, %v5102_v60  ;;  %v13413_v39 = vadd.f32 %v13322_v25, %v5103_v16 }
 0xe9b   : > { %v13416_v12 = vadd.f32 %v13325_v26, %v5104_v8  ;;  %v13420_v54 = vadd.f32 %v13340_v5, %v5105_v23  ;;  %v13424_v46 = vadd.f32 %v13343_v36, %v5106_v11  ;;  %v13428_v9 = vadd.f32 %v13358_v48, %v5107_v34 }
 0xe9c   : > { %16404 = vst [vmem:[#allocation35_spill] sm:$0xff] %v13403_v6 }
 0xe9d   : > { %16405 = vst [vmem:[#allocation32_spill] sm:$0xff] %v13406_v40 }
 0xe9e   : > { %16406 = vst [vmem:[#allocation33_spill] sm:$0xff] %v13409_v42 }
 0xe9f   : > { %16407 = vst [vmem:[#allocation38_spill] sm:$0xff] %v13413_v39 }
 0xea0   : > { %16408 = vst [vmem:[#allocation36_spill] sm:$0xff] %v13416_v12 }
 0xea1   : > { %5243 = vst [vmem:[#allocation1] ss:$9 sm:$0xff] %v13403_v6 }
 0xea2   : > { %16409 = vst [vmem:[#allocation34_spill] sm:$0xff] %v13420_v54 }
 0xea3   : > { %5244 = vst [vmem:[#allocation1 + $0x1] ss:$9 sm:$0xff] %v13406_v40 }
 0xea4   : > { %16410 = vst [vmem:[#allocation12_spill] sm:$0xff] %v13424_v46 }
 0xea5   : > { %5245 = vst [vmem:[#allocation1 + $0x2] ss:$9 sm:$0xff] %v13409_v42 }
 0xea6   : > { %16411 = vst [vmem:[#allocation11_spill] sm:$0xff] %v13428_v9 }
 0xea7   : > { %5246 = vst [vmem:[#allocation1 + $0x3] ss:$9 sm:$0xff] %v13413_v39 }
 0xea8   : > { %5247 = vst [vmem:[#allocation1 + $0x4] ss:$9 sm:$0xff] %v13416_v12 }
 0xea9   : > { %5248 = vst [vmem:[#allocation1 + $0x5] ss:$9 sm:$0xff] %v13420_v54 }
 0xeaa   : > { %5249 = vst [vmem:[#allocation1 + $0x6] ss:$9 sm:$0xff] %v13424_v46 }
 0xeab   : > { %5250 = vst [vmem:[#allocation1 + $0x7] ss:$9 sm:$0xff] %v13428_v9 }
 0xeb2   : > { %v5251_v33 = vld [vmem:[#allocation1] sm:$0xff] }
 0xeb3   : > { %10021 = vmatmul.msk.f32.gmra.mxu1 %vm745_vm2, %v5251_v33 }
 0xec1   : > { %v4895_v3 = vpop.xlane.xlu1 %4894 }
 0xec2   : > { %v4904_v62 = vmul.f32 %v4895_v3, %v12397_v47 }
 0xec4   : > { %v4909_v19 = vadd.f32 1e-05, %v4904_v62 }
 0xec6   : > { %10411 = vrsqrt.f32 %v4909_v19  ;;  %vm4938_vm9 = vweird.f32 %v4909_v19 }
 0xecc   : > { %v10412_v0 = vpop.eup %10411 }
 0xecd   : > { %v4933_v28 = vmul.f32 %v10412_v0, %v4909_v19  ;;  %vm4939_vm15 = vweird.f32 %v10412_v0 }
 0xece   : > { %vm4940_vm10 = vmor %vm4938_vm9, %vm4939_vm15 }
 0xecf   : > { %v4934_v15 = vmul.f32 %v10412_v0, %v4933_v28 }
 0xed1   : > { %v4898_v2 = vpop.xlane.xlu0 %4897  ;;  %v4935_v53 = vmul.f32 0.5, %v4934_v15 }
 0xed2   : > { %v4905_v37 = vmul.f32 %v4898_v2, %v12397_v47 }
 0xed3   : > { %v4936_v59 = vsub.f32 1.5, %v4935_v53 }
 0xed4   : > { %v4910_v49 = vadd.f32 1e-05, %v4905_v37 }
 0xed5   : > { %v4937_v60 = vmul.f32 %v10412_v0, %v4936_v59 }
 0xed6   : > { %10413 = vrsqrt.f32 %v4910_v49  ;;  %vm4948_vm12 = vweird.f32 %v4910_v49 }
 0xed7   : > { %v4941_v16 = vsel %vm4940_vm10, %v10412_v0, %v4937_v60 }
 0xed8   : > { %v4983_v8 = vperm.slane %v4941_v16, 0  ;;  %v4984_v23 = vperm.slane %v4941_v16, 1  ;;  %v4985_v11 = vperm.slane %v4941_v16, 2  ;;  %v4986_v34 = vperm.slane %v4941_v16, 3 }
 0xed9   : > { %v4987_v33 = vperm.slane %v4941_v16, 4  ;;  %v4988_v3 = vperm.slane %v4941_v16, 5  ;;  %v4989_v62 = vperm.slane %v4941_v16, 6  ;;  %v4990_v28 = vperm.slane %v4941_v16, 7 }
 0xeda   : > { %v5055_v15 = vmul.f32 %v4983_v8, %v13167_v58  ;;  %v5056_v2 = vmul.f32 %v4984_v23, %v13170_v24  ;;  %v5057_v53 = vmul.f32 %v4985_v11, %v13173_v35  ;;  %v5058_v37 = vmul.f32 %v4986_v34, %v13176_v38 }
 0xedb   : > { %v5059_v19 = vmul.f32 %v4987_v33, %v13179_v27  ;;  %v5060_v0 = vmul.f32 %v4988_v3, %v13182_v32  ;;  %v5061_v59 = vmul.f32 %v4989_v62, %v13185_v44  ;;  %v5062_v60 = vmul.f32 %v4990_v28, %v13194_v10 }
 0xedc   : > { %v5108_v9 = vmul.f32 %v13272_v50, %v5055_v15  ;;  %v5109_v16 = vmul.f32 %v13294_v51, %v5056_v2  ;;  %v5110_v58 = vmul.f32 %v13297_v17, %v5057_v53  ;;  %v5111_v24 = vmul.f32 %v13300_v56, %v5058_v37  ;;  %v10414_v8 = vpop.eup %10413 }
 0xedd   : > { %v5112_v35 = vmul.f32 %v13303_v63, %v5059_v19  ;;  %v5113_v38 = vmul.f32 %v13306_v43, %v5060_v0  ;;  %v5114_v27 = vmul.f32 %v13309_v4, %v5061_v59  ;;  %v5115_v23 = vmul.f32 %v13312_v61, %v5062_v60 }
 0xede   : > { %v13454_v32 = vadd.f32 %v13288_v29, %v5108_v9  ;;  %v13457_v44 = vadd.f32 %v13315_v20, %v5109_v16  ;;  %v13460_v10 = vadd.f32 %v13319_v22, %v5110_v58  ;;  %v13464_v11 = vadd.f32 %v13322_v25, %v5111_v24 }
 0xedf   : > { %v13467_v34 = vadd.f32 %v13325_v26, %v5112_v35  ;;  %v4943_v33 = vmul.f32 %v10414_v8, %v4910_v49  ;;  %v13471_v9 = vadd.f32 %v13340_v5, %v5113_v38  ;;  %v13475_v3 = vadd.f32 %v13343_v36, %v5114_v27 }
 0xee0   : > { %16412 = vst [vmem:[#allocation39_spill] sm:$0xff] %v13454_v32  ;;  %v13479_v28 = vadd.f32 %v13358_v48, %v5115_v23  ;;  %vm4949_vm11 = vweird.f32 %v10414_v8 }
 0xee1   : > { %16413 = vst [vmem:[#allocation3_spill] sm:$0xff] %v13457_v44  ;;  %v4944_v62 = vmul.f32 %v10414_v8, %v4943_v33  ;;  %vm4950_vm13 = vmor %vm4948_vm12, %vm4949_vm11 }
 0xee2   : > { %16414 = vst [vmem:[#allocation2_spill] sm:$0xff] %v13460_v10 }
 0xee3   : > { %16415 = vst [vmem:[#allocation5_spill] sm:$0xff] %v13464_v11  ;;  %v4945_v15 = vmul.f32 0.5, %v4944_v62 }
 0xee4   : > { %16416 = vst [vmem:[#allocation4_spill] sm:$0xff] %v13467_v34 }
 0xee5   : > { %5252 = vst [vmem:[#allocation1] ss:$9 sm:$0xff] %v13454_v32  ;;  %v4946_v2 = vsub.f32 1.5, %v4945_v15 }
 0xee6   : > { %16417 = vst [vmem:[#allocation7_spill] sm:$0xff] %v13471_v9 }
 0xee7   : > { %5253 = vst [vmem:[#allocation1 + $0x1] ss:$9 sm:$0xff] %v13457_v44  ;;  %v4947_v53 = vmul.f32 %v10414_v8, %v4946_v2 }
 0xee8   : > { %16418 = vst [vmem:[#allocation6_spill] sm:$0xff] %v13475_v3 }
 0xee9   : > { %5254 = vst [vmem:[#allocation1 + $0x2] ss:$9 sm:$0xff] %v13460_v10  ;;  %v4951_v37 = vsel %vm4950_vm13, %v10414_v8, %v4947_v53 }
 0xeea   : > { %16419 = vst [vmem:[#allocation9_spill] sm:$0xff] %v13479_v28  ;;  %v4991_v19 = vperm.slane %v4951_v37, 0  ;;  %v4992_v0 = vperm.slane %v4951_v37, 1  ;;  %v4993_v59 = vperm.slane %v4951_v37, 2  ;;  %v4994_v60 = vperm.slane %v4951_v37, 3 }
 0xeeb   : > { %5255 = vst [vmem:[#allocation1 + $0x3] ss:$9 sm:$0xff] %v13464_v11  ;;  %v4995_v16 = vperm.slane %v4951_v37, 4  ;;  %v4996_v58 = vperm.slane %v4951_v37, 5  ;;  %v4997_v24 = vperm.slane %v4951_v37, 6  ;;  %v4998_v35 = vperm.slane %v4951_v37, 7 }
 0xeec   : > { %5256 = vst [vmem:[#allocation1 + $0x4] ss:$9 sm:$0xff] %v13467_v34  ;;  %v5063_v38 = vmul.f32 %v4991_v19, %v13208_v57  ;;  %v5064_v27 = vmul.f32 %v4992_v0, %v13211_v1  ;;  %v5065_v23 = vmul.f32 %v4993_v59, %v13214_v31  ;;  %v5066_v33 = vmul.f32 %v4994_v60, %v13217_v7 }
 0xeed   : > { %5257 = vst [vmem:[#allocation1 + $0x5] ss:$9 sm:$0xff] %v13471_v9  ;;  %v5067_v49 = vmul.f32 %v4995_v16, %v13220_v55  ;;  %v5068_v8 = vmul.f32 %v4996_v58, %v13223_v14  ;;  %v5069_v15 = vmul.f32 %v4997_v24, %v13226_v18  ;;  %v5070_v2 = vmul.f32 %v4998_v35, %v13235_v41 }
 0xeee   : > { %5258 = vst [vmem:[#allocation1 + $0x6] ss:$9 sm:$0xff] %v13475_v3  ;;  %v5116_v53 = vmul.f32 %v13272_v50, %v5063_v38  ;;  %v5117_v37 = vmul.f32 %v13294_v51, %v5064_v27  ;;  %v5118_v57 = vmul.f32 %v13297_v17, %v5065_v23  ;;  %v5119_v1 = vmul.f32 %v13300_v56, %v5066_v33 }
 0xeef   : > { %5259 = vst [vmem:[#allocation1 + $0x7] ss:$9 sm:$0xff] %v13479_v28  ;;  %v5120_v31 = vmul.f32 %v13303_v63, %v5067_v49  ;;  %v5121_v7 = vmul.f32 %v13306_v43, %v5068_v8  ;;  %v5122_v55 = vmul.f32 %v13309_v4, %v5069_v15  ;;  %v5123_v0 = vmul.f32 %v13312_v61, %v5070_v2  ;;  %v16428_v49 = vld [vmem:[#allocation20_spill] sm:$0xff] }
 0xef0   : > { %v13503_v14 = vadd.f32 %v13288_v29, %v5116_v53  ;;  %v13506_v18 = vadd.f32 %v13315_v20, %v5117_v37  ;;  %v13509_v41 = vadd.f32 %v13319_v22, %v5118_v57  ;;  %v13513_v59 = vadd.f32 %v13322_v25, %v5119_v1  ;;  %v16429_v15 = vld [vmem:[#allocation24_spill] sm:$0xff]  ;;  %v16430_v53 = vld [vmem:[#allocation25_spill] sm:$0xff]  ;;  %v16431_v57 = vld [vmem:[#allocation23_spill] sm:$0xff] }
 0xef1   : > { %v13516_v63 = vadd.f32 %v13325_v26, %v5120_v31  ;;  %v13521_v4 = vadd.f32 %v13340_v5, %v5121_v7  ;;  %v13525_v60 = vadd.f32 %v13343_v36, %v5122_v55  ;;  %v13529_v16 = vadd.f32 %v13358_v48, %v5123_v0 }
 0xef2   : > { %16420 = vst [vmem:[#allocation8_spill] sm:$0xff] %v13503_v14  ;;  %v4901_v19 = vpop.xlane.xlu2 %4900 }
 0xef3   : > { %16421 = vst [vmem:[#allocation14_spill] sm:$0xff] %v13506_v18  ;;  %v4906_v43 = vmul.f32 %v4901_v19, %v12397_v47 }
 0xef4   : > { %16422 = vst [vmem:[#allocation13_spill] sm:$0xff] %v13509_v41 }
 0xef5   : > { %16423 = vst [vmem:[#allocation15_spill] sm:$0xff] %v13513_v59  ;;  %v4911_v61 = vadd.f32 1e-05, %v4906_v43 }
 0xef6   : > { %v5260_v62 = vld [vmem:[#allocation1] sm:$0xff]  ;;  %16424 = vst [vmem:[#allocation17_spill] sm:$0xff] %v13516_v63 }
 0xef7   : > { %10022 = vmatmul.msk.f32.gmra.mxu1 %vm745_vm2, %v5260_v62  ;;  %5261 = vst [vmem:[#allocation1] ss:$9 sm:$0xff] %v13503_v14  ;;  %10415 = vrsqrt.f32 %v4911_v61  ;;  %vm4958_vm15 = vweird.f32 %v4911_v61 }
 0xef8   : > { %16425 = vst [vmem:[#allocation22_spill] sm:$0xff] %v13521_v4 }
 0xef9   : > { %5262 = vst [vmem:[#allocation1 + $0x1] ss:$9 sm:$0xff] %v13506_v18 }
 0xefa   : > { %16426 = vst [vmem:[#allocation27_spill] sm:$0xff] %v13525_v60 }
 0xefb   : > { %5263 = vst [vmem:[#allocation1 + $0x2] ss:$9 sm:$0xff] %v13509_v41 }
 0xefc   : > { %16427 = vst [vmem:[#allocation16_spill] sm:$0xff] %v13529_v16 }
 0xefd   : > { %5264 = vst [vmem:[#allocation1 + $0x3] ss:$9 sm:$0xff] %v13513_v59  ;;  %v10416_v26 = vpop.eup %10415 }
 0xefe   : > { %5265 = vst [vmem:[#allocation1 + $0x4] ss:$9 sm:$0xff] %v13516_v63  ;;  %v4953_v5 = vmul.f32 %v10416_v26, %v4911_v61  ;;  %vm4959_vm14 = vweird.f32 %v10416_v26 }
 0xeff   : > { %5266 = vst [vmem:[#allocation1 + $0x5] ss:$9 sm:$0xff] %v13521_v4  ;;  %vm4960_vm9 = vmor %vm4958_vm15, %vm4959_vm14 }
 0xf00   : > { %5267 = vst [vmem:[#allocation1 + $0x6] ss:$9 sm:$0xff] %v13525_v60  ;;  %v4954_v36 = vmul.f32 %v10416_v26, %v4953_v5 }
 0xf01   : > { %5268 = vst [vmem:[#allocation1 + $0x7] ss:$9 sm:$0xff] %v13529_v16 }
 0xf02   : > { %v4955_v24 = vmul.f32 0.5, %v4954_v36 }
 0xf04   : > { %v4956_v48 = vsub.f32 1.5, %v4955_v24 }
 0xf06   : > { %v4957_v35 = vmul.f32 %v10416_v26, %v4956_v48 }
 0xf08   : > { %v5269_v58 = vld [vmem:[#allocation1] sm:$0xff]  ;;  %v4961_v38 = vsel %vm4960_vm9, %v10416_v26, %v4957_v35 }
 0xf09   : > { %10023 = vmatmul.msk.f32.gmra.mxu1 %vm745_vm2, %v5269_v58  ;;  %v4999_v27 = vperm.slane %v4961_v38, 0  ;;  %v5000_v23 = vperm.slane %v4961_v38, 1  ;;  %v5001_v33 = vperm.slane %v4961_v38, 2  ;;  %v5002_v62 = vperm.slane %v4961_v38, 3 }
 0xf0b   : > { %v5071_v8 = vmul.f32 %v4999_v27, %v16428_v49  ;;  %v5072_v2 = vmul.f32 %v5000_v23, %v16429_v15  ;;  %v5073_v37 = vmul.f32 %v5001_v33, %v16430_v53  ;;  %v5074_v1 = vmul.f32 %v5002_v62, %v16431_v57 }
 0xf0d   : > { %v5124_v31 = vmul.f32 %v13272_v50, %v5071_v8  ;;  %v5125_v7 = vmul.f32 %v13294_v51, %v5072_v2  ;;  %v5126_v55 = vmul.f32 %v13297_v17, %v5073_v37  ;;  %v5127_v19 = vmul.f32 %v13300_v56, %v5074_v1  ;;  %v13563_v50 = vld [vmem:[%s16118_s6 + $0x1] ss:$0 sm:$0xff] }
 0xf0f   : > { %v13546_v0 = vadd.f32 %v13288_v29, %v5124_v31  ;;  %v13549_v43 = vadd.f32 %v13315_v20, %v5125_v7  ;;  %v13552_v61 = vadd.f32 %v13319_v22, %v5126_v55  ;;  %v13555_v26 = vadd.f32 %v13322_v25, %v5127_v19 }
 0xf11   : > { %16432 = vst [vmem:[#allocation26_spill] sm:$0xff] %v13546_v0 }
 0xf12   : > { %16433 = vst [vmem:[#allocation20_spill] sm:$0xff] %v13549_v43  ;;  %v5302_v29 = vpop.f32.mrf.mxu1 }
 0xf13   : > { %16434 = vst [vmem:[#allocation24_spill] sm:$0xff] %v13552_v61  ;;  %v13567_v51 = vadd.f32 %v13563_v50, %v5302_v29 }
 0xf14   : > { %16435 = vst [vmem:[#allocation25_spill] sm:$0xff] %v13555_v26 }
 0xf15   : > { %5270 = vst [vmem:[#allocation1] ss:$9 sm:$0xff] %v13546_v0  ;;  %v13570_v56 = vrot.slane %v13567_v51, 1  ;;  %v13573_v20 = vrot.slane %v13567_v51, 2  ;;  %v13578_v22 = vrot.slane %v13567_v51, 3  ;;  %v13582_v25 = vrot.slane %v13567_v51, 4 }
 0xf16   : > { %5271 = vst [vmem:[#allocation1 + $0x1] ss:$9 sm:$0xff] %v13549_v43  ;;  %v13586_v5 = vrot.slane %v13567_v51, 5  ;;  %v13590_v36 = vrot.slane %v13567_v51, 6  ;;  %v13594_v58 = vrot.slane %v13567_v51, 7 }
 0xf17   : > { %5272 = vst [vmem:[#allocation1 + $0x2] ss:$9 sm:$0xff] %v13552_v61 }
 0xf18   : > { %5273 = vst [vmem:[#allocation1 + $0x3] ss:$9 sm:$0xff] %v13555_v26 }
 0xf1f   : > { %v5274_v17 = vld [vmem:[#allocation1] sm:$0xff] }
 0xf20   : > { %5353 = vst [vmem:[#allocation1] ss:$9 sm:$0xff] %v13567_v51  ;;  %10024 = vmatmul.msk.f32.gmra.mxu1 %vm745_vm2, %v5274_v17 }
 0xf21   : > { %5355 = vst [vmem:[#allocation1 + $0x1] ss:$9 sm:$0xff] %v13570_v56 }
 0xf22   : > { %5357 = vst [vmem:[#allocation1 + $0x2] ss:$9 sm:$0xff] %v13573_v20 }
 0xf23   : > { %5359 = vst [vmem:[#allocation1 + $0x3] ss:$9 sm:$0xff] %v13578_v22 }
 0xf24   : > { %5361 = vst [vmem:[#allocation1 + $0x4] ss:$9 sm:$0xff] %v13582_v25 }
 0xf25   : > { %5363 = vst [vmem:[#allocation1 + $0x5] ss:$9 sm:$0xff] %v13586_v5 }
 0xf26   : > { %5365 = vst [vmem:[#allocation1 + $0x6] ss:$9 sm:$0xff] %v13590_v36 }
 0xf27   : > { %5367 = vst [vmem:[#allocation1 + $0x7] ss:$9 sm:$0xff] %v13594_v58 }
 0xf2e   : > { %v13602_v35 = vld [vmem:[#allocation1] sm:$0xff] }
 0xf30   : > { %v5305_v24 = vpop.f32.mrf.mxu1 }
 0xf31   : > { %v13600_v48 = vadd.f32 %v13563_v50, %v5305_v24 }
 0xf33   : > { %5369 = vst [vmem:[#allocation1] ss:$9 sm:$0xff] %v13600_v48  ;;  %v13618_v23 = vrot.slane %v13600_v48, 1  ;;  %v13621_v33 = vrot.slane %v13600_v48, 2  ;;  %v13624_v49 = vrot.slane %v13600_v48, 3  ;;  %v13628_v8 = vrot.slane %v13600_v48, 4 }
 0xf34   : > { %v13632_v15 = vrot.slane %v13600_v48, 5  ;;  %v13636_v2 = vrot.slane %v13600_v48, 6  ;;  %v13640_v53 = vrot.slane %v13600_v48, 7 }
 0xf3a   : > { %v13605_v38 = vld [vmem:[#allocation1] sm:$0xff] }
 0xf3b   : > { %5371 = vst [vmem:[#allocation1] ss:$9 sm:$0xff] %v13567_v51 }
 0xf3c   : > { %5373 = vst [vmem:[#allocation1 + $0x1] ss:$9 sm:$0xff] %v13570_v56 }
 0xf3d   : > { %5375 = vst [vmem:[#allocation1 + $0x2] ss:$9 sm:$0xff] %v13573_v20 }
 0xf3e   : > { %5377 = vst [vmem:[#allocation1 + $0x3] ss:$9 sm:$0xff] %v13578_v22 }
 0xf3f   : > { %5379 = vst [vmem:[#allocation1 + $0x4] ss:$9 sm:$0xff] %v13582_v25 }
 0xf40   : > { %5381 = vst [vmem:[#allocation1 + $0x5] ss:$9 sm:$0xff] %v13586_v5 }
 0xf41   : > { %5383 = vst [vmem:[#allocation1 + $0x6] ss:$9 sm:$0xff] %v13590_v36 }
 0xf42   : > { %5385 = vst [vmem:[#allocation1 + $0x7] ss:$9 sm:$0xff] %v13594_v58 }
 0xf49   : > { %v5386_v27 = vld [vmem:[#allocation1] sm:$0xff] }
 0xf4a   : > { %5387 = vst [vmem:[#allocation1] ss:$9 sm:$0xff] %v13600_v48  ;;  %5389 = vrot.lane.b32.xlu2 %v5386_v27, %s10573_s27 }
 0xf51   : > { %v5388_v62 = vld [vmem:[#allocation1] sm:$0xff] }
 0xf52   : > { %5424 = vst [vmem:[#allocation1] ss:$9 sm:$0xff] %v13618_v23 }
 0xf53   : > { %5426 = vst [vmem:[#allocation1 + $0x1] ss:$9 sm:$0xff] %v13621_v33 }
 0xf54   : > { %5428 = vst [vmem:[#allocation1 + $0x2] ss:$9 sm:$0xff] %v13624_v49 }
 0xf55   : > { %5430 = vst [vmem:[#allocation1 + $0x3] ss:$9 sm:$0xff] %v13628_v8 }
 0xf56   : > { %5432 = vst [vmem:[#allocation1 + $0x4] ss:$9 sm:$0xff] %v13632_v15 }
 0xf57   : > { %5434 = vst [vmem:[#allocation1 + $0x5] ss:$9 sm:$0xff] %v13636_v2 }
 0xf58   : > { %5436 = vst [vmem:[#allocation1 + $0x6] ss:$9 sm:$0xff] %v13640_v53 }
 0xf74   : > { %v5308_v37 = vpop.f32.mrf.mxu1 }
 0xf75   : > { %v13646_v57 = vadd.f32 %v13563_v50, %v5308_v37 }
 0xf77   : > { %5438 = vst [vmem:[#allocation1 + $0x7] ss:$9 sm:$0xff] %v13646_v57  ;;  %v13650_v1 = vrot.slane %v13646_v57, 1  ;;  %v13668_v19 = vrot.slane %v13646_v57, 2  ;;  %v13671_v17 = vrot.slane %v13646_v57, 3  ;;  %v13674_v27 = vrot.slane %v13646_v57, 4 }
 0xf78   : > { %v13679_v37 = vrot.slane %v13646_v57, 5  ;;  %v13686_v47 = vrot.slane %v13646_v57, 6  ;;  %v13690_v26 = vrot.slane %v13646_v57, 7 }
 0xf7a   : > { %16437 = vst [vmem:[#allocation40_spill] sm:$0xff] %v13686_v47 }
 0xf7b   : > { %16438 = vst [vmem:[#allocation41_spill] sm:$0xff] %v13690_v26 }
 0xf7e   : > { %v13652_v31 = vld [vmem:[#allocation1] sm:$0xff] }
 0xf7f   : > { %5440 = vst [vmem:[#allocation1] ss:$9 sm:$0xff] %v13650_v1 }
 0xf86   : > { %v13655_v7 = vld [vmem:[#allocation1] sm:$0xff]  ;;  %v5311_v29 = vpop.f32.mrf.mxu1 }
 0xf87   : > { %5442 = vst [vmem:[#allocation1] ss:$9 sm:$0xff] %v13618_v23 }
 0xf88   : > { %5444 = vst [vmem:[#allocation1 + $0x1] ss:$9 sm:$0xff] %v13621_v33 }
 0xf89   : > { %5446 = vst [vmem:[#allocation1 + $0x2] ss:$9 sm:$0xff] %v13624_v49 }
 0xf8a   : > { %5448 = vst [vmem:[#allocation1 + $0x3] ss:$9 sm:$0xff] %v13628_v8 }
 0xf8b   : > { %5450 = vst [vmem:[#allocation1 + $0x4] ss:$9 sm:$0xff] %v13632_v15 }
 0xf8c   : > { %5452 = vst [vmem:[#allocation1 + $0x5] ss:$9 sm:$0xff] %v13636_v2 }
 0xf8d   : > { %5454 = vst [vmem:[#allocation1 + $0x6] ss:$9 sm:$0xff] %v13640_v53 }
 0xf8e   : > { %5456 = vst [vmem:[#allocation1 + $0x7] ss:$9 sm:$0xff] %v13646_v57 }
 0xf95   : > { %v5457_v55 = vld [vmem:[#allocation1] sm:$0xff] }
 0xf96   : > { %5458 = vst [vmem:[#allocation1] ss:$9 sm:$0xff] %v13650_v1  ;;  %5460 = vrot.lane.b32.xlu0 %v5457_v55, %s10573_s27  ;;  %v13683_v55 = vadd.f32 %v13563_v50, %v5311_v29 }
 0xf98   : > { %16436 = vst [vmem:[#allocation23_spill] sm:$0xff] %v13683_v55  ;;  %v13702_v29 = vrot.slane %v13683_v55, 2  ;;  %v13720_v16 = vrot.slane %v13683_v55, 3  ;;  %v13723_v60 = vrot.slane %v13683_v55, 4  ;;  %v13726_v63 = vrot.slane %v13683_v55, 5 }
 0xf99   : > { %v13738_v41 = vrot.slane %v13683_v55, 7 }
 0xf9d   : > { %v5459_v24 = vld [vmem:[#allocation1] sm:$0xff]  ;;  %v5314_v0 = vpop.f32.mrf.mxu1 }
 0xf9e   : > { %5495 = vst [vmem:[#allocation1] ss:$9 sm:$0xff] %v13668_v19  ;;  %5462 = vrot.lane.b32.xlu1 %v5459_v24, %s10573_s27  ;;  %v13696_v24 = vrot.slane %v13683_v55, 1  ;;  %v13730_v59 = vadd.f32 %v13563_v50, %v5314_v0 }
 0xf9f   : > { %5497 = vst [vmem:[#allocation1 + $0x1] ss:$9 sm:$0xff] %v13671_v17 }
 0xfa0   : > { %5499 = vst [vmem:[#allocation1 + $0x2] ss:$9 sm:$0xff] %v13674_v27  ;;  %v13744_v18 = vrot.slane %v13730_v59, 1  ;;  %v13747_v0 = vrot.slane %v13730_v59, 2 }
 0xfa1   : > { %5501 = vst [vmem:[#allocation1 + $0x3] ss:$9 sm:$0xff] %v13679_v37 }
 0xfa2   : > { %5503 = vst [vmem:[#allocation1 + $0x4] ss:$9 sm:$0xff] %v13686_v47 }
 0xfa3   : > { %5505 = vst [vmem:[#allocation1 + $0x5] ss:$9 sm:$0xff] %v13690_v26 }
 0xfa4   : > { %16439 = vst [vmem:[#allocation42_spill] sm:$0xff] %v13696_v24  ;;  %v5390_v6 = vpop.permute.xlu2 %5389 }
 0xfa5   : > { %5507 = vst [vmem:[#allocation1 + $0x6] ss:$9 sm:$0xff] %v13683_v55 }
 0xfa6   : > { %5509 = vst [vmem:[#allocation1 + $0x7] ss:$9 sm:$0xff] %v13696_v24  ;;  %5391 = vrot.lane.b32.xlu1 %v5388_v62, %s10573_s27 }
 0xfad   : > { %v13704_v61 = vld [vmem:[#allocation1] sm:$0xff] }
 0xfae   : > { %5511 = vst [vmem:[#allocation1] ss:$9 sm:$0xff] %v13702_v29 }
 0xfb5   : > { %v13707_v43 = vld [vmem:[#allocation1] sm:$0xff] }
 0xfb6   : > { %5513 = vst [vmem:[#allocation1] ss:$9 sm:$0xff] %v13668_v19 }
 0xfb7   : > { %5515 = vst [vmem:[#allocation1 + $0x1] ss:$9 sm:$0xff] %v13671_v17 }
 0xfb8   : > { %5517 = vst [vmem:[#allocation1 + $0x2] ss:$9 sm:$0xff] %v13674_v27 }
 0xfb9   : > { %5519 = vst [vmem:[#allocation1 + $0x3] ss:$9 sm:$0xff] %v13679_v37 }
 0xfba   : > { %5521 = vst [vmem:[#allocation1 + $0x4] ss:$9 sm:$0xff] %v13686_v47 }
 0xfbb   : > { %5523 = vst [vmem:[#allocation1 + $0x5] ss:$9 sm:$0xff] %v13690_v26 }
 0xfbc   : > { %5525 = vst [vmem:[#allocation1 + $0x6] ss:$9 sm:$0xff] %v13683_v55 }
 0xfbd   : > { %5527 = vst [vmem:[#allocation1 + $0x7] ss:$9 sm:$0xff] %v13696_v24 }
 0xfc4   : > { %v5528_v62 = vld [vmem:[#allocation1] sm:$0xff] }
 0xfc5   : > { %5529 = vst [vmem:[#allocation1] ss:$9 sm:$0xff] %v13702_v29  ;;  %5531 = vrot.lane.b32.xlu0 %v5528_v62, %s10573_s27  ;;  %v13734_v62 = vrot.slane %v13683_v55, 6 }
 0xfcc   : > { %v5530_v4 = vld [vmem:[#allocation1] sm:$0xff] }
 0xfcd   : > { %5566 = vst [vmem:[#allocation1] ss:$9 sm:$0xff] %v13720_v16  ;;  %5533 = vrot.lane.b32.xlu2 %v5530_v4, %s10573_s27  ;;  %v13753_v4 = vrot.slane %v13730_v59, 3 }
 0xfce   : > { %5568 = vst [vmem:[#allocation1 + $0x1] ss:$9 sm:$0xff] %v13723_v60 }
 0xfcf   : > { %5570 = vst [vmem:[#allocation1 + $0x2] ss:$9 sm:$0xff] %v13726_v63 }
 0xfd0   : > { %5572 = vst [vmem:[#allocation1 + $0x3] ss:$9 sm:$0xff] %v13734_v62 }
 0xfd1   : > { %5574 = vst [vmem:[#allocation1 + $0x4] ss:$9 sm:$0xff] %v13738_v41 }
 0xfd2   : > { %5576 = vst [vmem:[#allocation1 + $0x5] ss:$9 sm:$0xff] %v13730_v59 }
 0xfd3   : > { %5578 = vst [vmem:[#allocation1 + $0x6] ss:$9 sm:$0xff] %v13744_v18 }
 0xfd4   : > { %5580 = vst [vmem:[#allocation1 + $0x7] ss:$9 sm:$0xff] %v13747_v0 }
 0xfdb   : > { %v13755_v50 = vld [vmem:[#allocation1] sm:$0xff] }
 0xfdc   : > { %5582 = vst [vmem:[#allocation1] ss:$9 sm:$0xff] %v13753_v4 }
 0xfe3   : > { %v13758_v14 = vld [vmem:[#allocation1] sm:$0xff] }
 0xfe4   : > { %5584 = vst [vmem:[#allocation1] ss:$9 sm:$0xff] %v13720_v16 }
 0xfe5   : > { %5586 = vst [vmem:[#allocation1 + $0x1] ss:$9 sm:$0xff] %v13723_v60 }
 0xfe6   : > { %5588 = vst [vmem:[#allocation1 + $0x2] ss:$9 sm:$0xff] %v13726_v63 }
 0xfe7   : > { %5590 = vst [vmem:[#allocation1 + $0x3] ss:$9 sm:$0xff] %v13734_v62 }
 0xfe8   : > { %5592 = vst [vmem:[#allocation1 + $0x4] ss:$9 sm:$0xff] %v13738_v41 }
 0xfe9   : > { %5594 = vst [vmem:[#allocation1 + $0x5] ss:$9 sm:$0xff] %v13730_v59 }
 0xfea   : > { %5596 = vst [vmem:[#allocation1 + $0x6] ss:$9 sm:$0xff] %v13744_v18 }
 0xfeb   : > { %5598 = vst [vmem:[#allocation1 + $0x7] ss:$9 sm:$0xff] %v13747_v0 }
 0xff2   : > { %v5599_v28 = vld [vmem:[#allocation1] sm:$0xff] }
 0xff3   : > { %5600 = vst [vmem:[#allocation1] ss:$9 sm:$0xff] %v13753_v4  ;;  %5602 = vrot.lane.b32.xlu1 %v5599_v28, %s10573_s27 }
 0xffa   : > { %v5601_v3 = vld [vmem:[#allocation1] sm:$0xff] }
 0xffb   : > { %5725 = vst [vmem:[#allocation1] ss:$9 sm:$0xff] %v13567_v51  ;;  %5604 = vrot.lane.b32.xlu0 %v5601_v3, %s10573_s27  ;;  %s16442_s27 = smov 120  }
 0xffc   : > { %5727 = vst [vmem:[#allocation1 + $0x1] ss:$9 sm:$0xff] %v13570_v56 }
 0xffd   : > { %5729 = vst [vmem:[#allocation1 + $0x2] ss:$9 sm:$0xff] %v13573_v20 }
 0xffe   : > { %5731 = vst [vmem:[#allocation1 + $0x3] ss:$9 sm:$0xff] %v13578_v22 }
 0xfff   : > { %5733 = vst [vmem:[#allocation1 + $0x4] ss:$9 sm:$0xff] %v13582_v25 }
0x1000   : > { %5735 = vst [vmem:[#allocation1 + $0x5] ss:$9 sm:$0xff] %v13586_v5 }
0x1001   : > { %5737 = vst [vmem:[#allocation1 + $0x6] ss:$9 sm:$0xff] %v13590_v36 }
0x1002   : > { %5739 = vst [vmem:[#allocation1 + $0x7] ss:$9 sm:$0xff] %v13594_v58 }
0x1009   : > { %v5740_v28 = vld [vmem:[#allocation1] sm:$0xff] }
0x100a   : > { %5741 = vst [vmem:[#allocation1] ss:$9 sm:$0xff] %v13600_v48  ;;  %5743 = vrot.lane.b32.xlu2 %v5740_v28, %s16440_s29 }
0x1010   : > { %v5463_v13 = vpop.permute.xlu1 %5462 }
0x1011   : > { %v5742_v3 = vld [vmem:[#allocation1] sm:$0xff]  ;;  %10029 = vmatpush.xpose.msk.msra.mxu2 %vm864_vm3, %v5463_v13 }
0x1012   : > { %5779 = vst [vmem:[#allocation1] ss:$9 sm:$0xff] %v13618_v23  ;;  %5745 = vrot.lane.b32.xlu1 %v5742_v3, %s16440_s29 }
0x1013   : > { %5781 = vst [vmem:[#allocation1 + $0x1] ss:$9 sm:$0xff] %v13621_v33 }
0x1014   : > { %5783 = vst [vmem:[#allocation1 + $0x2] ss:$9 sm:$0xff] %v13624_v49 }
0x1015   : > { %5785 = vst [vmem:[#allocation1 + $0x3] ss:$9 sm:$0xff] %v13628_v8 }
0x1016   : > { %5787 = vst [vmem:[#allocation1 + $0x4] ss:$9 sm:$0xff] %v13632_v15 }
0x1017   : > { %5789 = vst [vmem:[#allocation1 + $0x5] ss:$9 sm:$0xff] %v13636_v2 }
0x1018   : > { %5791 = vst [vmem:[#allocation1 + $0x6] ss:$9 sm:$0xff] %v13640_v53 }
0x1019   : > { %5793 = vst [vmem:[#allocation1 + $0x7] ss:$9 sm:$0xff] %v13646_v57 }
0x1020   : > { %v13790_v28 = vld [vmem:[#allocation1] sm:$0xff] }
0x1021   : > { %5795 = vst [vmem:[#allocation1] ss:$9 sm:$0xff] %v13650_v1 }
0x1028   : > { %v5796_v9 = vld [vmem:[#allocation1] sm:$0xff] }
0x1029   : > { %5833 = vst [vmem:[#allocation1] ss:$9 sm:$0xff] %v13668_v19  ;;  %5799 = vrot.lane.b32.xlu2 %v5796_v9, %s16440_s29 }
0x102a   : > { %5835 = vst [vmem:[#allocation1 + $0x1] ss:$9 sm:$0xff] %v13671_v17 }
0x102b   : > { %5837 = vst [vmem:[#allocation1 + $0x2] ss:$9 sm:$0xff] %v13674_v27 }
0x102c   : > { %5839 = vst [vmem:[#allocation1 + $0x3] ss:$9 sm:$0xff] %v13679_v37 }
0x102d   : > { %5841 = vst [vmem:[#allocation1 + $0x4] ss:$9 sm:$0xff] %v13686_v47 }
0x102e   : > { %5843 = vst [vmem:[#allocation1 + $0x5] ss:$9 sm:$0xff] %v13690_v26 }
0x102f   : > { %5845 = vst [vmem:[#allocation1 + $0x6] ss:$9 sm:$0xff] %v13683_v55 }
0x1030   : > { %5847 = vst [vmem:[#allocation1 + $0x7] ss:$9 sm:$0xff] %v13696_v24 }
0x1037   : > { %v13802_v3 = vld [vmem:[#allocation1] sm:$0xff] }
0x1038   : > { %5849 = vst [vmem:[#allocation1] ss:$9 sm:$0xff] %v13702_v29  ;;  %v10230_v42 = vpack.i.bf16 %v13802_v3, %v13790_v28  ;;  %v5392_v28 = vpop.permute.xlu1 %5391  ;;  %v5534_v3 = vpop.permute.xlu2 %5533 }
0x1039   : > { %10025 = vmatpush.xpose.msk.msrb.mxu0 %vm864_vm3, %v5392_v28  ;;  %10033 = vmatpush.xpose.msk.msra.mxu3 %vm864_vm3, %v5534_v3 }
0x103a   : > { %10231 = vrot.lane.b32.xlu0 %v10230_v42, %s16440_s29  ;;  %v5461_v42 = vpop.permute.xlu0 %5460 }
0x103b   : > { %10030 = vmatpush.xpose.msk.msra.mxu2 %vm864_vm3, %v5461_v42 }
0x103d   : > { %10026 = vmatpush.xpose.msk.msrb.mxu0 %vm864_vm3, %v5390_v6 }
0x103e   : > { %10031 = vmatmul.msk.f32.vlgmr.msra.gmra.mxu2 %vm864_vm3, %v13652_v31 }
0x103f   : > { %v5850_v34 = vld [vmem:[#allocation1] sm:$0xff] }
0x1040   : > { %5887 = vst [vmem:[#allocation1] ss:$9 sm:$0xff] %v13720_v16  ;;  %5853 = vrot.lane.b32.xlu1 %v5850_v34, %s16440_s29  ;;  %10027 = vmatmul.msk.f32.vlgmr.msrb.gmra.mxu0 %vm864_vm3, %v13602_v35 }
0x1041   : > { %5889 = vst [vmem:[#allocation1 + $0x1] ss:$9 sm:$0xff] %v13723_v60 }
0x1042   : > { %5891 = vst [vmem:[#allocation1 + $0x2] ss:$9 sm:$0xff] %v13726_v63  ;;  %v5532_v6 = vpop.permute.xlu0 %5531 }
0x1043   : > { %5893 = vst [vmem:[#allocation1 + $0x3] ss:$9 sm:$0xff] %v13734_v62  ;;  %10034 = vmatpush.xpose.msk.msra.mxu3 %vm864_vm3, %v5532_v6 }
0x1044   : > { %5895 = vst [vmem:[#allocation1 + $0x4] ss:$9 sm:$0xff] %v13738_v41 }
0x1045   : > { %5897 = vst [vmem:[#allocation1 + $0x5] ss:$9 sm:$0xff] %v13730_v59 }
0x1046   : > { %5899 = vst [vmem:[#allocation1 + $0x6] ss:$9 sm:$0xff] %v13744_v18  ;;  %10032 = vmatmul.msk.f32.gmra.mxu2 %vm864_vm3, %v13655_v7  ;;  %10035 = vmatmul.msk.f32.vlgmr.msra.gmra.mxu3 %vm864_vm3, %v13704_v61 }
0x1047   : > { %5901 = vst [vmem:[#allocation1 + $0x7] ss:$9 sm:$0xff] %v13747_v0 }
0x1048   : > { %10028 = vmatmul.msk.f32.gmra.mxu0 %vm864_vm3, %v13605_v38 }
0x104e   : > { %v13814_v9 = vld [vmem:[#allocation1] sm:$0xff]  ;;  %10036 = vmatmul.msk.f32.gmra.mxu3 %vm864_vm3, %v13707_v43 }
0x104f   : > { %5903 = vst [vmem:[#allocation1] ss:$9 sm:$0xff] %v13753_v4 }
0x1056   : > { %v13817_v11 = vld [vmem:[#allocation1] sm:$0xff] }
0x1057   : > { %5941 = vst [vmem:[#allocation1] ss:$9 sm:$0xff] %v13567_v51 }
0x1058   : > { %5943 = vst [vmem:[#allocation1 + $0x1] ss:$9 sm:$0xff] %v13570_v56 }
0x1059   : > { %5945 = vst [vmem:[#allocation1 + $0x2] ss:$9 sm:$0xff] %v13573_v20 }
0x105a   : > { %5947 = vst [vmem:[#allocation1 + $0x3] ss:$9 sm:$0xff] %v13578_v22 }
0x105b   : > { %5949 = vst [vmem:[#allocation1 + $0x4] ss:$9 sm:$0xff] %v13582_v25 }
0x105c   : > { %5951 = vst [vmem:[#allocation1 + $0x5] ss:$9 sm:$0xff] %v13586_v5 }
0x105d   : > { %5953 = vst [vmem:[#allocation1 + $0x6] ss:$9 sm:$0xff] %v13590_v36 }
0x105e   : > { %5955 = vst [vmem:[#allocation1 + $0x7] ss:$9 sm:$0xff] %v13594_v58 }
0x1064   : > { %v5744_v38 = vpop.permute.xlu2 %5743 }
0x1065   : > { %v13827_v34 = vld [vmem:[#allocation1] sm:$0xff]  ;;  %v5603_v7 = vpop.permute.xlu1 %5602 }
0x1066   : > { %16441 = vst [vmem:[#allocation43_spill] sm:$0xff] %v13827_v34 }
0x1067   : > { %5957 = vst [vmem:[#allocation1] ss:$9 sm:$0xff] %v13600_v48 }
0x106d   : > { %v5605_v31 = vpop.permute.xlu0 %5604 }
0x106e   : > { %v13830_v10 = vld [vmem:[#allocation1] sm:$0xff]  ;;  %10037 = vmatpush.xpose.msk.msrb.mxu1 %vm864_vm3, %v5605_v31 }
0x106f   : > { %5963 = vst [vmem:[#allocation1] ss:$9 sm:$0xff] %v13567_v51 }
0x1070   : > { %5965 = vst [vmem:[#allocation1 + $0x1] ss:$9 sm:$0xff] %v13570_v56 }
0x1071   : > { %5967 = vst [vmem:[#allocation1 + $0x2] ss:$9 sm:$0xff] %v13573_v20 }
0x1072   : > { %5969 = vst [vmem:[#allocation1 + $0x3] ss:$9 sm:$0xff] %v13578_v22  ;;  %10038 = vmatpush.xpose.msk.msrb.mxu1 %vm864_vm3, %v5603_v7 }
0x1073   : > { %5971 = vst [vmem:[#allocation1 + $0x4] ss:$9 sm:$0xff] %v13582_v25 }
0x1074   : > { %5973 = vst [vmem:[#allocation1 + $0x5] ss:$9 sm:$0xff] %v13586_v5 }
0x1075   : > { %5975 = vst [vmem:[#allocation1 + $0x6] ss:$9 sm:$0xff] %v13590_v36  ;;  %10039 = vmatmul.msk.f32.vlgmr.msrb.gmra.mxu1 %vm864_vm3, %v13755_v50 }
0x1076   : > { %5977 = vst [vmem:[#allocation1 + $0x7] ss:$9 sm:$0xff] %v13594_v58 }
0x107d   : > { %v13840_v44 = vld [vmem:[#allocation1] sm:$0xff]  ;;  %10040 = vmatmul.msk.f32.gmra.mxu1 %vm864_vm3, %v13758_v14 }
0x107e   : > { %5979 = vst [vmem:[#allocation1] ss:$9 sm:$0xff] %v13600_v48 }
0x1084   : > { %v5746_v42 = vpop.permute.xlu1 %5745 }
0x1085   : > { %v13843_v32 = vld [vmem:[#allocation1] sm:$0xff]  ;;  %10041 = vmatpush.msk.msra.mxu0 %vm624_vm1, %v5746_v42 }
0x1086   : > { %6016 = vst [vmem:[#allocation1] ss:$9 sm:$0xff] %v13618_v23 }
0x1087   : > { %6018 = vst [vmem:[#allocation1 + $0x1] ss:$9 sm:$0xff] %v13621_v33  ;;  %5771 = vmatpush.msra.mxu0 %v5744_v38 }
0x1088   : > { %6020 = vst [vmem:[#allocation1 + $0x2] ss:$9 sm:$0xff] %v13624_v49 }
0x1089   : > { %6022 = vst [vmem:[#allocation1 + $0x3] ss:$9 sm:$0xff] %v13628_v8 }
0x108a   : > { %6024 = vst [vmem:[#allocation1 + $0x4] ss:$9 sm:$0xff] %v13632_v15 }
0x108b   : > { %6026 = vst [vmem:[#allocation1 + $0x5] ss:$9 sm:$0xff] %v13636_v2 }
0x108c   : > { %6028 = vst [vmem:[#allocation1 + $0x6] ss:$9 sm:$0xff] %v13640_v53 }
0x108d   : > { %6030 = vst [vmem:[#allocation1 + $0x7] ss:$9 sm:$0xff] %v13646_v57 }
0x1094   : > { %v6031_v46 = vld [vmem:[#allocation1] sm:$0xff] }
0x1095   : > { %6032 = vst [vmem:[#allocation1] ss:$9 sm:$0xff] %v13650_v1  ;;  %6034 = vrot.lane.b32.xlu0 %v6031_v46, %s16442_s27 }
0x109c   : > { %v6033_v54 = vld [vmem:[#allocation1] sm:$0xff] }
0x109d   : > { %6038 = vst [vmem:[#allocation1] ss:$9 sm:$0xff] %v13618_v23  ;;  %6036 = vrot.lane.b32.xlu2 %v6033_v54, %s16442_s27 }
0x109e   : > { %6040 = vst [vmem:[#allocation1 + $0x1] ss:$9 sm:$0xff] %v13621_v33 }
0x109f   : > { %6042 = vst [vmem:[#allocation1 + $0x2] ss:$9 sm:$0xff] %v13624_v49 }
0x10a0   : > { %6044 = vst [vmem:[#allocation1 + $0x3] ss:$9 sm:$0xff] %v13628_v8 }
0x10a1   : > { %6046 = vst [vmem:[#allocation1 + $0x4] ss:$9 sm:$0xff] %v13632_v15 }
0x10a2   : > { %6048 = vst [vmem:[#allocation1 + $0x5] ss:$9 sm:$0xff] %v13636_v2 }
0x10a3   : > { %6050 = vst [vmem:[#allocation1 + $0x6] ss:$9 sm:$0xff] %v13640_v53 }
0x10a4   : > { %6052 = vst [vmem:[#allocation1 + $0x7] ss:$9 sm:$0xff] %v13646_v57 }
0x10ab   : > { %v6053_v12 = vld [vmem:[#allocation1] sm:$0xff] }
0x10ac   : > { %6054 = vst [vmem:[#allocation1] ss:$9 sm:$0xff] %v13650_v1  ;;  %6056 = vrot.lane.b32.xlu1 %v6053_v12, %s16443_s0  ;;  %v10232_v50 = vpop.permute.xlu0 %10231 }
0x10ad   : > { %v10233_v3 = vunpack.i.l.bf16 %v10232_v50  ;;  %v10234_v31 = vunpack.i.h.bf16 %v10232_v50 }
0x10b2   : > { %v5854_v38 = vpop.permute.xlu1 %5853 }
0x10b3   : > { %v6055_v54 = vld [vmem:[#allocation1] sm:$0xff]  ;;  %10047 = vmatpush.msk.msrb.mxu3 %vm624_vm1, %v5854_v38 }
0x10b4   : > { %6091 = vst [vmem:[#allocation1] ss:$9 sm:$0xff] %v13668_v19  ;;  %6058 = vrot.lane.b32.xlu1 %v6055_v54, %s16443_s0 }
0x10b5   : > { %6093 = vst [vmem:[#allocation1 + $0x1] ss:$9 sm:$0xff] %v13671_v17  ;;  %5879 = vmatpush.msrb.mxu3 %v10234_v31 }
0x10b6   : > { %6095 = vst [vmem:[#allocation1 + $0x2] ss:$9 sm:$0xff] %v13674_v27 }
0x10b7   : > { %6097 = vst [vmem:[#allocation1 + $0x3] ss:$9 sm:$0xff] %v13679_v37 }
0x10b8   : > { %6099 = vst [vmem:[#allocation1 + $0x4] ss:$9 sm:$0xff] %v13686_v47 }
0x10b9   : > { %6101 = vst [vmem:[#allocation1 + $0x5] ss:$9 sm:$0xff] %v13690_v26 }
0x10ba   : > { %6103 = vst [vmem:[#allocation1 + $0x6] ss:$9 sm:$0xff] %v13683_v55 }
0x10bb   : > { %6105 = vst [vmem:[#allocation1 + $0x7] ss:$9 sm:$0xff] %v13696_v24 }
0x10bd   : > { %v14009_v50 = vpop.f32.mrf.mxu0 }
0x10c1   : > { %v14006_v42 = vpop.f32.mrf.mxu2 }
0x10c2   : > { %v6106_v12 = vld [vmem:[#allocation1] sm:$0xff] }
0x10c3   : > { %6107 = vst [vmem:[#allocation1] ss:$9 sm:$0xff] %v13702_v29  ;;  %6109 = vrot.lane.b32.xlu0 %v6106_v12, %s16442_s27  ;;  %v5800_v12 = vpop.permute.xlu2 %5799 }
0x10c4   : > { %10044 = vmatpush.msk.msrb.mxu2 %vm624_vm1, %v5800_v12 }
0x10c5   : > { %v14020_v21 = vpop.f32.mrf.mxu0 }
0x10c6   : > { %5825 = vmatpush.msrb.mxu2 %v10233_v3  ;;  %v5637_v3 = vsel %vm1109_vm4, %v14009_v50, -inf  ;;  %v5640_v45 = vsel %vm1113_vm5, %v14020_v21, -inf }
0x10c7   : > { %5638 = vmax.xlane.f32.xlu2 %v5637_v3 }
0x10c9   : > { %v14015_v31 = vpop.f32.mrf.mxu2  ;;  %v14030_v3 = vpop.f32.mrf.mxu3 }
0x10ca   : > { %v13875_v39 = vld [vmem:[#allocation1] sm:$0xff]  ;;  %v5646_v52 = vsel %vm1113_vm5, %v14015_v31, -inf }
0x10cb   : > { %6113 = vst [vmem:[#allocation1] ss:$9 sm:$0xff] %v13668_v19 }
0x10cc   : > { %6115 = vst [vmem:[#allocation1 + $0x1] ss:$9 sm:$0xff] %v13671_v17 }
0x10cd   : > { %6117 = vst [vmem:[#allocation1 + $0x2] ss:$9 sm:$0xff] %v13674_v27 }
0x10ce   : > { %6119 = vst [vmem:[#allocation1 + $0x3] ss:$9 sm:$0xff] %v13679_v37 }
0x10cf   : > { %6121 = vst [vmem:[#allocation1 + $0x4] ss:$9 sm:$0xff] %v13686_v47 }
0x10d0   : > { %6123 = vst [vmem:[#allocation1 + $0x5] ss:$9 sm:$0xff] %v13690_v26 }
0x10d1   : > { %6125 = vst [vmem:[#allocation1 + $0x6] ss:$9 sm:$0xff] %v13683_v55 }
0x10d2   : > { %6127 = vst [vmem:[#allocation1 + $0x7] ss:$9 sm:$0xff] %v13696_v24 }
0x10d9   : > { %v6128_v54 = vld [vmem:[#allocation1] sm:$0xff] }
0x10da   : > { %6129 = vst [vmem:[#allocation1] ss:$9 sm:$0xff] %v13702_v29  ;;  %6131 = vrot.lane.b32.xlu0 %v6128_v54, %s16443_s0 }
0x10de   : > { %5641 = vmax.xlane.f32.xlu1 %v5640_v45  ;;  %v14038_v45 = vpop.f32.mrf.mxu3 }
0x10e1   : > { %v13889_v40 = vld [vmem:[#allocation1] sm:$0xff] }
0x10e2   : > { %6166 = vst [vmem:[#allocation1] ss:$9 sm:$0xff] %v13720_v16  ;;  %6133 = vrot.lane.b32.xlu2 %v13889_v40, %s16443_s0 }
0x10e3   : > { %6168 = vst [vmem:[#allocation1 + $0x1] ss:$9 sm:$0xff] %v13723_v60 }
0x10e4   : > { %6170 = vst [vmem:[#allocation1 + $0x2] ss:$9 sm:$0xff] %v13726_v63 }
0x10e5   : > { %6172 = vst [vmem:[#allocation1 + $0x3] ss:$9 sm:$0xff] %v13734_v62 }
0x10e6   : > { %6174 = vst [vmem:[#allocation1 + $0x4] ss:$9 sm:$0xff] %v13738_v41 }
0x10e7   : > { %6176 = vst [vmem:[#allocation1 + $0x5] ss:$9 sm:$0xff] %v13730_v59 }
0x10e8   : > { %6178 = vst [vmem:[#allocation1 + $0x6] ss:$9 sm:$0xff] %v13744_v18 }
0x10e9   : > { %6180 = vst [vmem:[#allocation1 + $0x7] ss:$9 sm:$0xff] %v13747_v0 }
0x10f0   : > { %v13905_v30 = vld [vmem:[#allocation1] sm:$0xff] }
0x10f1   : > { %16444 = vst [vmem:[#allocation44_spill] sm:$0xff] %v13905_v30 }
0x10f2   : > { %6182 = vst [vmem:[#allocation1] ss:$9 sm:$0xff] %v13753_v4 }
0x10f9   : > { %v13915_v13 = vld [vmem:[#allocation1] sm:$0xff] }
0x10fa   : > { %6188 = vst [vmem:[#allocation1] ss:$9 sm:$0xff] %v13720_v16 }
0x10fb   : > { %6190 = vst [vmem:[#allocation1 + $0x1] ss:$9 sm:$0xff] %v13723_v60 }
0x10fc   : > { %6192 = vst [vmem:[#allocation1 + $0x2] ss:$9 sm:$0xff] %v13726_v63 }
0x10fd   : > { %6194 = vst [vmem:[#allocation1 + $0x3] ss:$9 sm:$0xff] %v13734_v62 }
0x10fe   : > { %6196 = vst [vmem:[#allocation1 + $0x4] ss:$9 sm:$0xff] %v13738_v41 }
0x10ff   : > { %6198 = vst [vmem:[#allocation1 + $0x5] ss:$9 sm:$0xff] %v13730_v59 }
0x1100   : > { %6200 = vst [vmem:[#allocation1 + $0x6] ss:$9 sm:$0xff] %v13744_v18 }
0x1101   : > { %6202 = vst [vmem:[#allocation1 + $0x7] ss:$9 sm:$0xff] %v13747_v0 }
0x1104   : > { %5647 = vmax.xlane.f32.xlu0 %v5646_v52  ;;  %v5649_v52 = vsel %vm1109_vm4, %v14030_v3, -inf }
0x1105   : > { %5650 = vmax.xlane.f32.xlu1 %v5649_v52 }
0x1108   : > { %v13931_v46 = vld [vmem:[#allocation1] sm:$0xff] }
0x1109   : > { %6204 = vst [vmem:[#allocation1] ss:$9 sm:$0xff] %v13753_v4 }
0x1110   : > { %v13936_v35 = vld [vmem:[#allocation1] sm:$0xff] }
0x1111   : > { %6329 = vst [vmem:[#allocation1] ss:$9 sm:$0xff] %v13567_v51 }
0x1112   : > { %6331 = vst [vmem:[#allocation1 + $0x1] ss:$9 sm:$0xff] %v13570_v56 }
0x1113   : > { %6333 = vst [vmem:[#allocation1 + $0x2] ss:$9 sm:$0xff] %v13573_v20 }
0x1114   : > { %6335 = vst [vmem:[#allocation1 + $0x3] ss:$9 sm:$0xff] %v13578_v22 }
0x1115   : > { %6337 = vst [vmem:[#allocation1 + $0x4] ss:$9 sm:$0xff] %v13582_v25 }
0x1116   : > { %6339 = vst [vmem:[#allocation1 + $0x5] ss:$9 sm:$0xff] %v13586_v5 }
0x1117   : > { %6341 = vst [vmem:[#allocation1 + $0x6] ss:$9 sm:$0xff] %v13590_v36 }
0x1118   : > { %6343 = vst [vmem:[#allocation1 + $0x7] ss:$9 sm:$0xff] %v13594_v58 }
0x111e   : > { %v6057_v40 = vpop.permute.xlu1 %6056  ;;  %5983 = vrot.lane.b32.xlu1 %v13843_v32, %s16443_s0  ;;  %v5643_v32 = vsel %vm1109_vm4, %v14006_v42, -inf }
0x111f   : > { %v13946_v61 = vld [vmem:[#allocation1] sm:$0xff]  ;;  %5644 = vmax.xlane.f32.xlu2 %v5643_v32 }
0x1120   : > { %6345 = vst [vmem:[#allocation1] ss:$9 sm:$0xff] %v13600_v48 }
0x1127   : > { %v13949_v43 = vld [vmem:[#allocation1] sm:$0xff] }
0x1128   : > { %6383 = vst [vmem:[#allocation1] ss:$9 sm:$0xff] %v13618_v23 }
0x1129   : > { %6385 = vst [vmem:[#allocation1 + $0x1] ss:$9 sm:$0xff] %v13621_v33 }
0x112a   : > { %6387 = vst [vmem:[#allocation1 + $0x2] ss:$9 sm:$0xff] %v13624_v49 }
0x112b   : > { %6389 = vst [vmem:[#allocation1 + $0x3] ss:$9 sm:$0xff] %v13628_v8 }
0x112c   : > { %6391 = vst [vmem:[#allocation1 + $0x4] ss:$9 sm:$0xff] %v13632_v15 }
0x112d   : > { %6393 = vst [vmem:[#allocation1 + $0x5] ss:$9 sm:$0xff] %v13636_v2 }
0x112e   : > { %6395 = vst [vmem:[#allocation1 + $0x6] ss:$9 sm:$0xff] %v13640_v53 }
0x112f   : > { %6397 = vst [vmem:[#allocation1 + $0x7] ss:$9 sm:$0xff] %v13646_v57 }
0x1136   : > { %v13964_v54 = vld [vmem:[#allocation1] sm:$0xff] }
0x1137   : > { %6399 = vst [vmem:[#allocation1] ss:$9 sm:$0xff] %v13650_v1  ;;  %5981 = vrot.lane.b32.xlu2 %v13840_v44, %s16443_s0  ;;  %v14111_v44 = vpop.permute.xlu0 %6034 }
0x1138   : > { %16458 = vst [vmem:[#allocation58_spill] sm:$0xff] %v14111_v44 }
0x113e   : > { %v13970_v28 = vld [vmem:[#allocation1] sm:$0xff] }
0x113f   : > { %6437 = vst [vmem:[#allocation1] ss:$9 sm:$0xff] %v13668_v19 }
0x1140   : > { %6439 = vst [vmem:[#allocation1 + $0x1] ss:$9 sm:$0xff] %v13671_v17 }
0x1141   : > { %6441 = vst [vmem:[#allocation1 + $0x2] ss:$9 sm:$0xff] %v13674_v27 }
0x1142   : > { %6443 = vst [vmem:[#allocation1 + $0x3] ss:$9 sm:$0xff] %v13679_v37 }
0x1143   : > { %6445 = vst [vmem:[#allocation1 + $0x4] ss:$9 sm:$0xff] %v13686_v47 }
0x1144   : > { %6447 = vst [vmem:[#allocation1 + $0x5] ss:$9 sm:$0xff] %v13690_v26 }
0x1145   : > { %6449 = vst [vmem:[#allocation1 + $0x6] ss:$9 sm:$0xff] %v13683_v55 }
0x1146   : > { %6451 = vst [vmem:[#allocation1 + $0x7] ss:$9 sm:$0xff] %v13696_v24 }
0x114d   : > { %v13980_v14 = vld [vmem:[#allocation1] sm:$0xff] }
0x114e   : > { %6453 = vst [vmem:[#allocation1] ss:$9 sm:$0xff] %v13702_v29 }
0x1155   : > { %v13983_v6 = vld [vmem:[#allocation1] sm:$0xff] }
0x1156   : > { %16445 = vst [vmem:[#allocation45_spill] sm:$0xff] %v13983_v6 }
0x1157   : > { %6491 = vst [vmem:[#allocation1] ss:$9 sm:$0xff] %v13720_v16 }
0x1158   : > { %6493 = vst [vmem:[#allocation1 + $0x1] ss:$9 sm:$0xff] %v13723_v60 }
0x1159   : > { %6495 = vst [vmem:[#allocation1 + $0x2] ss:$9 sm:$0xff] %v13726_v63 }
0x115a   : > { %6497 = vst [vmem:[#allocation1 + $0x3] ss:$9 sm:$0xff] %v13734_v62 }
0x115b   : > { %6499 = vst [vmem:[#allocation1 + $0x4] ss:$9 sm:$0xff] %v13738_v41 }
0x115c   : > { %6501 = vst [vmem:[#allocation1 + $0x5] ss:$9 sm:$0xff] %v13730_v59 }
0x115d   : > { %6503 = vst [vmem:[#allocation1 + $0x6] ss:$9 sm:$0xff] %v13744_v18 }
0x115e   : > { %6505 = vst [vmem:[#allocation1 + $0x7] ss:$9 sm:$0xff] %v13747_v0 }
0x1165   : > { %v13994_v7 = vld [vmem:[#allocation1] sm:$0xff] }
0x1166   : > { %16446 = vst [vmem:[#allocation46_spill] sm:$0xff] %v13994_v7 }
0x1167   : > { %6507 = vst [vmem:[#allocation1] ss:$9 sm:$0xff] %v13753_v4 }
0x116e   : > { %v13997_v12 = vld [vmem:[#allocation1] sm:$0xff] }
0x116f   : > { %16447 = vst [vmem:[#allocation47_spill] sm:$0xff] %v13997_v12  ;;  %v5652_v12 = vsel %vm1113_vm5, %v14038_v45, -inf }
0x1170   : > { %6545 = vst [vmem:[#allocation1] ss:$9 sm:$0xff] %v13567_v51  ;;  %5653 = vmax.xlane.f32.xlu0 %v5652_v12  ;;  %v6059_v12 = vpop.permute.xlu1 %6058 }
0x1171   : > { %6547 = vst [vmem:[#allocation1 + $0x1] ss:$9 sm:$0xff] %v13570_v56  ;;  %10057 = vmatpush.xpose.msk.msra.mxu2 %vm864_vm3, %v6059_v12 }
0x1172   : > { %6549 = vst [vmem:[#allocation1 + $0x2] ss:$9 sm:$0xff] %v13573_v20 }
0x1173   : > { %6551 = vst [vmem:[#allocation1 + $0x3] ss:$9 sm:$0xff] %v13578_v22 }
0x1174   : > { %6553 = vst [vmem:[#allocation1 + $0x4] ss:$9 sm:$0xff] %v13582_v25 }
0x1175   : > { %6555 = vst [vmem:[#allocation1 + $0x5] ss:$9 sm:$0xff] %v13586_v5  ;;  %10058 = vmatpush.xpose.msk.msra.mxu2 %vm864_vm3, %v6057_v40  ;;  %v14076_v40 = vpop.f32.mrf.mxu1 }
0x1176   : > { %6557 = vst [vmem:[#allocation1 + $0x6] ss:$9 sm:$0xff] %v13590_v36 }
0x1177   : > { %6559 = vst [vmem:[#allocation1 + $0x7] ss:$9 sm:$0xff] %v13594_v58 }
0x1178   : > { %v5642_v34 = vpop.xlane.xlu1 %5641 }
0x117e   : > { %v14013_v38 = vld [vmem:[#allocation1] sm:$0xff] }
0x117f   : > { %16448 = vst [vmem:[#allocation48_spill] sm:$0xff] %v14013_v38 }
0x1180   : > { %6561 = vst [vmem:[#allocation1] ss:$9 sm:$0xff] %v13600_v48 }
0x1187   : > { %v14024_v7 = vld [vmem:[#allocation1] sm:$0xff] }
0x1188   : > { %16449 = vst [vmem:[#allocation49_spill] sm:$0xff] %v14024_v7 }
0x1189   : > { %6567 = vst [vmem:[#allocation1] ss:$9 sm:$0xff] %v13567_v51 }
0x118a   : > { %6569 = vst [vmem:[#allocation1 + $0x1] ss:$9 sm:$0xff] %v13570_v56 }
0x118b   : > { %6571 = vst [vmem:[#allocation1 + $0x2] ss:$9 sm:$0xff] %v13573_v20 }
0x118c   : > { %6573 = vst [vmem:[#allocation1 + $0x3] ss:$9 sm:$0xff] %v13578_v22 }
0x118d   : > { %6575 = vst [vmem:[#allocation1 + $0x4] ss:$9 sm:$0xff] %v13582_v25 }
0x118e   : > { %6577 = vst [vmem:[#allocation1 + $0x5] ss:$9 sm:$0xff] %v13586_v5 }
0x118f   : > { %6579 = vst [vmem:[#allocation1 + $0x6] ss:$9 sm:$0xff] %v13590_v36 }
0x1190   : > { %6581 = vst [vmem:[#allocation1 + $0x7] ss:$9 sm:$0xff] %v13594_v58 }
0x1197   : > { %v14044_v7 = vld [vmem:[#allocation1] sm:$0xff] }
0x1198   : > { %16450 = vst [vmem:[#allocation50_spill] sm:$0xff] %v14044_v7  ;;  %v14083_v7 = vpop.f32.mrf.mxu1 }
0x1199   : > { %6583 = vst [vmem:[#allocation1] ss:$9 sm:$0xff] %v13600_v48  ;;  %v5658_v32 = vsel %vm1113_vm5, %v14083_v7, -inf }
0x119a   : > { %16454 = vst [vmem:[#allocation54_spill] sm:$0xff] %v14083_v7  ;;  %5659 = vmax.xlane.f32.xlu1 %v5658_v32  ;;  %v14105_v32 = vpop.permute.xlu2 %6036 }
0x119b   : > { %16457 = vst [vmem:[#allocation57_spill] sm:$0xff] %v14105_v32 }
0x11a0   : > { %v14047_v38 = vld [vmem:[#allocation1] sm:$0xff] }
0x11a1   : > { %16451 = vst [vmem:[#allocation51_spill] sm:$0xff] %v14047_v38 }
0x11a2   : > { %6620 = vst [vmem:[#allocation1] ss:$9 sm:$0xff] %v13618_v23 }
0x11a3   : > { %6622 = vst [vmem:[#allocation1 + $0x1] ss:$9 sm:$0xff] %v13621_v33 }
0x11a4   : > { %6624 = vst [vmem:[#allocation1 + $0x2] ss:$9 sm:$0xff] %v13624_v49 }
0x11a5   : > { %6626 = vst [vmem:[#allocation1 + $0x3] ss:$9 sm:$0xff] %v13628_v8 }
0x11a6   : > { %6628 = vst [vmem:[#allocation1 + $0x4] ss:$9 sm:$0xff] %v13632_v15 }
0x11a7   : > { %6630 = vst [vmem:[#allocation1 + $0x5] ss:$9 sm:$0xff] %v13636_v2 }
0x11a8   : > { %6632 = vst [vmem:[#allocation1 + $0x6] ss:$9 sm:$0xff] %v13640_v53 }
0x11a9   : > { %6634 = vst [vmem:[#allocation1 + $0x7] ss:$9 sm:$0xff] %v13646_v57 }
0x11b0   : > { %v14059_v52 = vld [vmem:[#allocation1] sm:$0xff] }
0x11b1   : > { %16452 = vst [vmem:[#allocation52_spill] sm:$0xff] %v14059_v52  ;;  %v14116_v52 = vpop.permute.xlu0 %6109 }
0x11b2   : > { %6636 = vst [vmem:[#allocation1] ss:$9 sm:$0xff] %v13650_v1 }
0x11b9   : > { %v14064_v38 = vld [vmem:[#allocation1] sm:$0xff] }
0x11ba   : > { %16453 = vst [vmem:[#allocation53_spill] sm:$0xff] %v14064_v38 }
0x11bb   : > { %6642 = vst [vmem:[#allocation1] ss:$9 sm:$0xff] %v13618_v23 }
0x11bc   : > { %6644 = vst [vmem:[#allocation1 + $0x1] ss:$9 sm:$0xff] %v13621_v33 }
0x11bd   : > { %6646 = vst [vmem:[#allocation1 + $0x2] ss:$9 sm:$0xff] %v13624_v49 }
0x11be   : > { %6648 = vst [vmem:[#allocation1 + $0x3] ss:$9 sm:$0xff] %v13628_v8 }
0x11bf   : > { %6650 = vst [vmem:[#allocation1 + $0x4] ss:$9 sm:$0xff] %v13632_v15 }
0x11c0   : > { %6652 = vst [vmem:[#allocation1 + $0x5] ss:$9 sm:$0xff] %v13636_v2 }
0x11c1   : > { %6654 = vst [vmem:[#allocation1 + $0x6] ss:$9 sm:$0xff] %v13640_v53 }
0x11c2   : > { %6656 = vst [vmem:[#allocation1 + $0x7] ss:$9 sm:$0xff] %v13646_v57 }
0x11c9   : > { %v14078_v12 = vld [vmem:[#allocation1] sm:$0xff] }
0x11ca   : > { %6658 = vst [vmem:[#allocation1] ss:$9 sm:$0xff] %v13650_v1 }
0x11d1   : > { %v14081_v38 = vld [vmem:[#allocation1] sm:$0xff] }
0x11d2   : > { %6695 = vst [vmem:[#allocation1] ss:$9 sm:$0xff] %v13668_v19 }
0x11d3   : > { %6697 = vst [vmem:[#allocation1 + $0x1] ss:$9 sm:$0xff] %v13671_v17 }
0x11d4   : > { %6699 = vst [vmem:[#allocation1 + $0x2] ss:$9 sm:$0xff] %v13674_v27 }
0x11d5   : > { %6701 = vst [vmem:[#allocation1 + $0x3] ss:$9 sm:$0xff] %v13679_v37 }
0x11d6   : > { %6703 = vst [vmem:[#allocation1 + $0x4] ss:$9 sm:$0xff] %v13686_v47 }
0x11d7   : > { %6705 = vst [vmem:[#allocation1 + $0x5] ss:$9 sm:$0xff] %v13690_v26 }
0x11d8   : > { %6707 = vst [vmem:[#allocation1 + $0x6] ss:$9 sm:$0xff] %v13683_v55 }
0x11d9   : > { %6709 = vst [vmem:[#allocation1 + $0x7] ss:$9 sm:$0xff] %v13696_v24 }
0x11e0   : > { %v14097_v6 = vld [vmem:[#allocation1] sm:$0xff] }
0x11e1   : > { %16455 = vst [vmem:[#allocation55_spill] sm:$0xff] %v14097_v6  ;;  %v5639_v6 = vpop.xlane.xlu2 %5638 }
0x11e2   : > { %6711 = vst [vmem:[#allocation1] ss:$9 sm:$0xff] %v13702_v29  ;;  %v5661_v7 = vsub.f32 %v14009_v50, %v5639_v6  ;;  %v5655_v6 = vsel %vm1109_vm4, %v14076_v40, -inf }
0x11e3   : > { %5656 = vmax.xlane.f32.xlu2 %v5655_v6 }
0x11e4   : > { %v5669_v32 = vmul.f32 1.442695, %v5661_v7 }
0x11e6   : > { %10417 = vpow2.f32 %v5669_v32 }
0x11e9   : > { %v14100_v30 = vld [vmem:[#allocation1] sm:$0xff] }
0x11ea   : > { %16456 = vst [vmem:[#allocation56_spill] sm:$0xff] %v14100_v30 }
0x11eb   : > { %6717 = vst [vmem:[#allocation1] ss:$9 sm:$0xff] %v13668_v19 }
0x11ec   : > { %6719 = vst [vmem:[#allocation1 + $0x1] ss:$9 sm:$0xff] %v13671_v17 }
0x11ed   : > { %6721 = vst [vmem:[#allocation1 + $0x2] ss:$9 sm:$0xff] %v13674_v27 }
0x11ee   : > { %6723 = vst [vmem:[#allocation1 + $0x3] ss:$9 sm:$0xff] %v13679_v37 }
0x11ef   : > { %6725 = vst [vmem:[#allocation1 + $0x4] ss:$9 sm:$0xff] %v13686_v47  ;;  %v6134_v47 = vpop.permute.xlu2 %6133 }
0x11f0   : > { %6727 = vst [vmem:[#allocation1 + $0x5] ss:$9 sm:$0xff] %v13690_v26  ;;  %v5662_v26 = vsub.f32 %v14020_v21, %v5642_v34  ;;  %10061 = vmatpush.xpose.msk.msra.mxu3 %vm864_vm3, %v6134_v47  ;;  %v14132_v47 = vpop.eup %10417  ;;  %v5651_v21 = vpop.xlane.xlu1 %5650 }
0x11f1   : > { %6729 = vst [vmem:[#allocation1 + $0x6] ss:$9 sm:$0xff] %v13683_v55  ;;  %v5685_v7 = vsel %vm1109_vm4, %v14132_v47, 0.0 }
0x11f2   : > { %6731 = vst [vmem:[#allocation1 + $0x7] ss:$9 sm:$0xff] %v13696_v24  ;;  %v5671_v55 = vmul.f32 1.442695, %v5662_v26  ;;  %v6132_v24 = vpop.permute.xlu0 %6131  ;;  %5686 = vadd.xlane.f32.xlu2 %v5685_v7 }
0x11f4   : > { %10419 = vpow2.f32 %v5671_v55  ;;  %10062 = vmatpush.xpose.msk.msra.mxu3 %vm864_vm3, %v6132_v24  ;;  %v5665_v55 = vsub.f32 %v14030_v3, %v5651_v21 }
0x11f6   : > { %v5677_v34 = vmul.f32 1.442695, %v5665_v55 }
0x11f8   : > { %10421 = vpow2.f32 %v5677_v34  ;;  %v5984_v21 = vpop.permute.xlu1 %5983 }
0x11f9   : > { %v14114_v30 = vld [vmem:[#allocation1] sm:$0xff]  ;;  %10053 = vmatpush.xpose.msk.msrb.mxu0 %vm864_vm3, %v5984_v21 }
0x11fa   : > { %6733 = vst [vmem:[#allocation1] ss:$9 sm:$0xff] %v13702_v29  ;;  %v14135_v26 = vpop.eup %10419 }
0x11fb   : > { %v5688_v24 = vsel %vm1113_vm5, %v14135_v26, 0.0 }
0x11fc   : > { %5689 = vadd.xlane.f32.xlu1 %v5688_v24 }
0x11fe   : > { %v14147_v32 = vpop.eup %10421 }
0x11ff   : > { %v5697_v3 = vsel %vm1109_vm4, %v14147_v32, 0.0 }
0x1201   : > { %v14122_v44 = vld [vmem:[#allocation1] sm:$0xff] }
0x1202   : > { %6770 = vst [vmem:[#allocation1] ss:$9 sm:$0xff] %v13720_v16 }
0x1203   : > { %6772 = vst [vmem:[#allocation1 + $0x1] ss:$9 sm:$0xff] %v13723_v60 }
0x1204   : > { %6774 = vst [vmem:[#allocation1 + $0x2] ss:$9 sm:$0xff] %v13726_v63  ;;  %5698 = vadd.xlane.f32.xlu1 %v5697_v3 }
0x1205   : > { %6776 = vst [vmem:[#allocation1 + $0x3] ss:$9 sm:$0xff] %v13734_v62 }
0x1206   : > { %6778 = vst [vmem:[#allocation1 + $0x4] ss:$9 sm:$0xff] %v13738_v41 }
0x1207   : > { %6780 = vst [vmem:[#allocation1 + $0x5] ss:$9 sm:$0xff] %v13730_v59 }
0x1208   : > { %6782 = vst [vmem:[#allocation1 + $0x6] ss:$9 sm:$0xff] %v13744_v18 }
0x1209   : > { %6784 = vst [vmem:[#allocation1 + $0x7] ss:$9 sm:$0xff] %v13747_v0 }
0x120a   : > { %6111 = vrot.lane.b32.xlu2 %v13875_v39, %s16442_s27  ;;  %v10235_v39 = vpack.i.bf16 %v13980_v14, %v13964_v54 }
0x1210   : > { %v14144_v50 = vld [vmem:[#allocation1] sm:$0xff] }
0x1211   : > { %6786 = vst [vmem:[#allocation1] ss:$9 sm:$0xff] %v13753_v4 }
0x1212   : > { %5961 = vrot.lane.b32.xlu2 %v13830_v10, %s16442_s27  ;;  %v5648_v10 = vpop.xlane.xlu0 %5647 }
0x1213   : > { %v5664_v54 = vsub.f32 %v14015_v31, %v5648_v10 }
0x1215   : > { %v5675_v7 = vmul.f32 1.442695, %v5664_v54  ;;  %v16467_v54 = vld [vmem:[#allocation42_spill] sm:$0xff] }
0x1218   : > { %v14151_v6 = vld [vmem:[#allocation1] sm:$0xff] }
0x1219   : > { %16459 = vst [vmem:[#allocation59_spill] sm:$0xff] %v14151_v6 }
0x121a   : > { %6792 = vst [vmem:[#allocation1] ss:$9 sm:$0xff] %v13720_v16  ;;  %10236 = vrot.lane.b32.xlu2 %v10235_v39, %s16460_s18  ;;  %v5654_v3 = vpop.xlane.xlu0 %5653 }
0x121b   : > { %6794 = vst [vmem:[#allocation1 + $0x1] ss:$9 sm:$0xff] %v13723_v60  ;;  %v5666_v31 = vsub.f32 %v14038_v45, %v5654_v3 }
0x121c   : > { %6796 = vst [vmem:[#allocation1 + $0x2] ss:$9 sm:$0xff] %v13726_v63 }
0x121d   : > { %6798 = vst [vmem:[#allocation1 + $0x3] ss:$9 sm:$0xff] %v13734_v62  ;;  %5907 = vrot.lane.b32.xlu1 %v13817_v11, %s16440_s29  ;;  %v5645_v11 = vpop.xlane.xlu2 %5644 }
0x121e   : > { %6800 = vst [vmem:[#allocation1 + $0x4] ss:$9 sm:$0xff] %v13738_v41  ;;  %v5663_v34 = vsub.f32 %v14006_v42, %v5645_v11 }
0x121f   : > { %6802 = vst [vmem:[#allocation1 + $0x5] ss:$9 sm:$0xff] %v13730_v59 }
0x1220   : > { %6804 = vst [vmem:[#allocation1 + $0x6] ss:$9 sm:$0xff] %v13744_v18  ;;  %v5673_v14 = vmul.f32 1.442695, %v5663_v34  ;;  %v16466_v34 = vld [vmem:[#allocation23_spill] sm:$0xff] }
0x1221   : > { %6806 = vst [vmem:[#allocation1 + $0x7] ss:$9 sm:$0xff] %v13747_v0 }
0x1222   : > { %10423 = vpow2.f32 %v5673_v14  ;;  %6349 = vrot.lane.b32.xlu2 %v13949_v43, %s16460_s18  ;;  %v5660_v14 = vpop.xlane.xlu1 %5659 }
0x1223   : > { %10425 = vpow2.f32 %v5675_v7  ;;  %v16469_v7 = vld [vmem:[#allocation54_spill] sm:$0xff] }
0x1224   : > { %v5668_v3 = vsub.f32 %v16469_v7, %v5660_v14 }
0x1225   : > { %5905 = vrot.lane.b32.xlu1 %v13814_v9, %s16440_s29  ;;  %v5982_v21 = vpop.permute.xlu2 %5981  ;;  %s16501_s29 = smov 40  }
0x1226   : > { %10054 = vmatpush.xpose.msk.msrb.mxu0 %vm864_vm3, %v5982_v21 }
0x1228   : > { %v14164_v55 = vld [vmem:[#allocation1] sm:$0xff]  ;;  %v14196_v42 = vpop.eup %10423 }
0x1229   : > { %6808 = vst [vmem:[#allocation1] ss:$9 sm:$0xff] %v13753_v4  ;;  %v5691_v43 = vsel %vm1109_vm4, %v14196_v42, 0.0  ;;  %v14207_v10 = vpop.eup %10425 }
0x122a   : > { %5692 = vadd.xlane.f32.xlu0 %v5691_v43  ;;  %6347 = vrot.lane.b32.xlu2 %v13946_v61, %s16460_s18  ;;  %v5694_v61 = vsel %vm1113_vm5, %v14207_v10, 0.0 }
0x122d   : > { %6208 = vrot.lane.b32.xlu1 %v13936_v35, %s16443_s0  ;;  %v5679_v35 = vmul.f32 1.442695, %v5666_v31  ;;  %v5683_v31 = vmul.f32 1.442695, %v5668_v3 }
0x122f   : > { %10427 = vpow2.f32 %v5679_v35 }
0x1230   : > { %v14171_v24 = vld [vmem:[#allocation1] sm:$0xff]  ;;  %10429 = vpow2.f32 %v5683_v31 }
0x1231   : > { %6933 = vst [vmem:[#allocation1] ss:$9 sm:$0xff] %v13567_v51 }
0x1232   : > { %6935 = vst [vmem:[#allocation1 + $0x1] ss:$9 sm:$0xff] %v13570_v56  ;;  %5695 = vadd.xlane.f32.xlu0 %v5694_v61  ;;  %6662 = vrot.lane.b32.xlu2 %v14081_v38, %s16462_s19 }
0x1233   : > { %6937 = vst [vmem:[#allocation1 + $0x2] ss:$9 sm:$0xff] %v13573_v20 }
0x1234   : > { %6939 = vst [vmem:[#allocation1 + $0x3] ss:$9 sm:$0xff] %v13578_v22 }
0x1235   : > { %6941 = vst [vmem:[#allocation1 + $0x4] ss:$9 sm:$0xff] %v13582_v25  ;;  %6206 = vrot.lane.b32.xlu1 %v13931_v46, %s16443_s0  ;;  %v14223_v46 = vpop.eup %10427 }
0x1236   : > { %6943 = vst [vmem:[#allocation1 + $0x5] ss:$9 sm:$0xff] %v13586_v5  ;;  %v5700_v45 = vsel %vm1113_vm5, %v14223_v46, 0.0  ;;  %v14256_v61 = vpop.eup %10429 }
0x1237   : > { %6945 = vst [vmem:[#allocation1 + $0x6] ss:$9 sm:$0xff] %v13590_v36 }
0x1238   : > { %6947 = vst [vmem:[#allocation1 + $0x7] ss:$9 sm:$0xff] %v13594_v58 }
0x123a   : > { %5701 = vadd.xlane.f32.xlu0 %v5700_v45  ;;  %6660 = vrot.lane.b32.xlu2 %v14078_v12, %s16462_s19  ;;  %v16465_v12 = vld [vmem:[#allocation41_spill] sm:$0xff]  ;;  %v5706_v45 = vsel %vm1113_vm5, %v14256_v61, 0.0 }
0x123d   : > { %6186 = vrot.lane.b32.xlu1 %v13915_v13, %s16442_s27  ;;  %v16464_v13 = vld [vmem:[#allocation40_spill] sm:$0xff] }
0x123f   : > { %v14192_v9 = vld [vmem:[#allocation1] sm:$0xff] }
0x1240   : > { %6949 = vst [vmem:[#allocation1] ss:$9 sm:$0xff] %v13600_v48 }
0x1245   : > { %6403 = vrot.lane.b32.xlu1 %v13970_v28, %s16460_s18  ;;  %v16468_v28 = vld [vmem:[#allocation43_spill] sm:$0xff] }
0x1247   : > { %v14205_v39 = vld [vmem:[#allocation1] sm:$0xff] }
0x1248   : > { %16461 = vst [vmem:[#allocation60_spill] sm:$0xff] %v14205_v39 }
0x1249   : > { %6987 = vst [vmem:[#allocation1] ss:$9 sm:$0xff] %v13618_v23 }
0x124a   : > { %6989 = vst [vmem:[#allocation1 + $0x1] ss:$9 sm:$0xff] %v13621_v33 }
0x124b   : > { %6991 = vst [vmem:[#allocation1 + $0x2] ss:$9 sm:$0xff] %v13624_v49 }
0x124c   : > { %6993 = vst [vmem:[#allocation1 + $0x3] ss:$9 sm:$0xff] %v13628_v8 }
0x124d   : > { %6995 = vst [vmem:[#allocation1 + $0x4] ss:$9 sm:$0xff] %v13632_v15 }
0x124e   : > { %6997 = vst [vmem:[#allocation1 + $0x5] ss:$9 sm:$0xff] %v13636_v2  ;;  %5959 = vrot.lane.b32.xlu0 %v16468_v28, %s16442_s27 }
0x124f   : > { %6999 = vst [vmem:[#allocation1 + $0x6] ss:$9 sm:$0xff] %v13640_v53 }
0x1250   : > { %7001 = vst [vmem:[#allocation1 + $0x7] ss:$9 sm:$0xff] %v13646_v57 }
0x1256   : > { %v5657_v35 = vpop.xlane.xlu2 %5656 }
0x1257   : > { %v14229_v11 = vld [vmem:[#allocation1] sm:$0xff]  ;;  %v5667_v28 = vsub.f32 %v14076_v40, %v5657_v35 }
0x1258   : > { %7003 = vst [vmem:[#allocation1] ss:$9 sm:$0xff] %v13650_v1 }
0x1259   : > { %v5681_v3 = vmul.f32 1.442695, %v5667_v28 }
0x125f   : > { %v14234_v38 = vld [vmem:[#allocation1] sm:$0xff] }
0x1260   : > { %16463 = vst [vmem:[#allocation61_spill] sm:$0xff] %v14234_v38 }
0x1261   : > { %7041 = vst [vmem:[#allocation1] ss:$9 sm:$0xff] %v13668_v19 }
0x1262   : > { %7043 = vst [vmem:[#allocation1 + $0x1] ss:$9 sm:$0xff] %v13671_v17 }
0x1263   : > { %7045 = vst [vmem:[#allocation1 + $0x2] ss:$9 sm:$0xff] %v13674_v27  ;;  %5707 = vadd.xlane.f32.xlu2 %v5706_v45 }
0x1264   : > { %7047 = vst [vmem:[#allocation1 + $0x3] ss:$9 sm:$0xff] %v13679_v37 }
0x1265   : > { %7049 = vst [vmem:[#allocation1 + $0x4] ss:$9 sm:$0xff] %v16464_v13  ;;  %v5687_v7 = vpop.xlane.xlu2 %5686 }
0x1266   : > { %7051 = vst [vmem:[#allocation1 + $0x5] ss:$9 sm:$0xff] %v16465_v12  ;;  %10431 = vrcp.f32 %v5687_v7 }
0x1267   : > { %7053 = vst [vmem:[#allocation1 + $0x6] ss:$9 sm:$0xff] %v16466_v34  ;;  %10433 = vpow2.f32 %v5681_v3 }
0x1268   : > { %7055 = vst [vmem:[#allocation1 + $0x7] ss:$9 sm:$0xff] %v16467_v54 }
0x126c   : > { %v10432_v39 = vpop.eup %10431 }
0x126d   : > { %v5717_v6 = vmul.f32 %v10432_v39, %v14132_v47  ;;  %v14274_v35 = vpop.eup %10433 }
0x126f   : > { %v14247_v21 = vld [vmem:[#allocation1] sm:$0xff]  ;;  %v5690_v14 = vpop.xlane.xlu1 %5689  ;;  %10042 = vmatmul.msk.f32.vlgmr.msra.gmra.mxu0 %vm1109_vm4, %v5717_v6  ;;  %v5703_v6 = vsel %vm1109_vm4, %v14274_v35, 0.0 }
0x1270   : > { %16470 = vst [vmem:[#allocation40_spill] sm:$0xff] %v14247_v21  ;;  %10435 = vrcp.f32 %v5690_v14  ;;  %v14269_v21 = vpop.permute.xlu2 %6111 }
0x1271   : > { %7057 = vst [vmem:[#allocation1] ss:$9 sm:$0xff] %v13702_v29 }
0x1276   : > { %v10436_v45 = vpop.eup %10435 }
0x1277   : > { %v5699_v38 = vpop.xlane.xlu1 %5698 }
0x1278   : > { %v14250_v43 = vld [vmem:[#allocation1] sm:$0xff]  ;;  %10437 = vrcp.f32 %v5699_v38  ;;  %v14281_v39 = vpop.permute.xlu2 %5961  ;;  %v5718_v38 = vmul.f32 %v10436_v45, %v14135_v26  ;;  %5704 = vadd.xlane.f32.xlu0 %v5703_v6 }
0x1279   : > { %7095 = vst [vmem:[#allocation1] ss:$9 sm:$0xff] %v13720_v16 }
0x127a   : > { %7097 = vst [vmem:[#allocation1 + $0x1] ss:$9 sm:$0xff] %v13723_v60  ;;  %10043 = vmatmul.msk.f32.gmra.mxu0 %vm1109_vm4, %v5718_v38  ;;  %v16477_v38 = vld [vmem:[#allocation45_spill] sm:$0xff] }
0x127b   : > { %7099 = vst [vmem:[#allocation1 + $0x2] ss:$9 sm:$0xff] %v13726_v63 }
0x127c   : > { %7101 = vst [vmem:[#allocation1 + $0x3] ss:$9 sm:$0xff] %v13734_v62 }
0x127d   : > { %7103 = vst [vmem:[#allocation1 + $0x4] ss:$9 sm:$0xff] %v13738_v41 }
0x127e   : > { %7105 = vst [vmem:[#allocation1 + $0x5] ss:$9 sm:$0xff] %v13730_v59  ;;  %v10438_v28 = vpop.eup %10437 }
0x127f   : > { %7107 = vst [vmem:[#allocation1 + $0x6] ss:$9 sm:$0xff] %v13744_v18  ;;  %v5721_v47 = vmul.f32 %v10438_v28, %v14147_v32  ;;  %v16474_v32 = vld [vmem:[#allocation52_spill] sm:$0xff] }
0x1280   : > { %7109 = vst [vmem:[#allocation1 + $0x7] ss:$9 sm:$0xff] %v13747_v0  ;;  %6638 = vrot.lane.b32.xlu2 %v16474_v32, %s16473_s1  ;;  %v14294_v14 = vpop.permute.xlu2 %10236  ;;  %v16476_v28 = vld [vmem:[#allocation44_spill] sm:$0xff] }
0x1281   : > { %10048 = vmatmul.msk.f32.vlgmr.msrb.gmra.mxu3 %vm1109_vm4, %v5721_v47 }
0x1287   : > { %v14265_v31 = vld [vmem:[#allocation1] sm:$0xff] }
0x1288   : > { %16471 = vst [vmem:[#allocation41_spill] sm:$0xff] %v14265_v31  ;;  %v6350_v3 = vpop.permute.xlu2 %6349 }
0x1289   : > { %7111 = vst [vmem:[#allocation1] ss:$9 sm:$0xff] %v13753_v4  ;;  %10069 = vmatpush.msk.msra.mxu0 %vm624_vm1, %v6350_v3 }
0x128c   : > { %6184 = vrot.lane.b32.xlu0 %v16476_v28, %s16442_s27 }
0x128f   : > { %v5908_v26 = vpop.permute.xlu1 %5907 }
0x1290   : > { %v14272_v40 = vld [vmem:[#allocation1] sm:$0xff]  ;;  %10050 = vmatpush.msk.msra.mxu1 %vm624_vm1, %v5908_v26  ;;  %v6348_v6 = vpop.permute.xlu2 %6347 }
0x1291   : > { %16472 = vst [vmem:[#allocation23_spill] sm:$0xff] %v14272_v40  ;;  %6375 = vmatpush.msra.mxu0 %v6348_v6 }
0x1292   : > { %7149 = vst [vmem:[#allocation1] ss:$9 sm:$0xff] %v13567_v51 }
0x1293   : > { %7151 = vst [vmem:[#allocation1 + $0x1] ss:$9 sm:$0xff] %v13570_v56 }
0x1294   : > { %7153 = vst [vmem:[#allocation1 + $0x2] ss:$9 sm:$0xff] %v13573_v20  ;;  %6457 = vrot.lane.b32.xlu0 %v16477_v38, %s16460_s18 }
0x1295   : > { %7155 = vst [vmem:[#allocation1 + $0x3] ss:$9 sm:$0xff] %v13578_v22 }
0x1296   : > { %7157 = vst [vmem:[#allocation1 + $0x4] ss:$9 sm:$0xff] %v13582_v25 }
0x1297   : > { %7159 = vst [vmem:[#allocation1 + $0x5] ss:$9 sm:$0xff] %v13586_v5  ;;  %v5906_v47 = vpop.permute.xlu1 %5905 }
0x1298   : > { %7161 = vst [vmem:[#allocation1 + $0x6] ss:$9 sm:$0xff] %v13590_v36  ;;  %5933 = vmatpush.msra.mxu1 %v5906_v47 }
0x1299   : > { %7163 = vst [vmem:[#allocation1 + $0x7] ss:$9 sm:$0xff] %v13594_v58 }
0x129d   : > { %v5693_v3 = vpop.xlane.xlu0 %5692 }
0x129e   : > { %10439 = vrcp.f32 %v5693_v3 }
0x129f   : > { %v6209_v32 = vpop.permute.xlu1 %6208 }
0x12a0   : > { %v14296_v7 = vld [vmem:[#allocation1] sm:$0xff]  ;;  %10065 = vmatpush.xpose.msk.msrb.mxu1 %vm864_vm3, %v6209_v32 }
0x12a1   : > { %7165 = vst [vmem:[#allocation1] ss:$9 sm:$0xff] %v13600_v48 }
0x12a4   : > { %v10440_v6 = vpop.eup %10439 }
0x12a5   : > { %v5719_v38 = vmul.f32 %v10440_v6, %v14196_v42  ;;  %v5696_v32 = vpop.xlane.xlu0 %5695  ;;  %v10238_v6 = vunpack.i.l.bf16 %v14294_v14 }
0x12a6   : > { %10441 = vrcp.f32 %v5696_v32  ;;  %v6663_v32 = vpop.permute.xlu2 %6662 }
0x12a7   : > { %v6207_v28 = vpop.permute.xlu1 %6206  ;;  %10045 = vmatmul.msk.f32.vlgmr.msrb.gmra.mxu2 %vm1109_vm4, %v5719_v38 }
0x12a8   : > { %v14301_v45 = vld [vmem:[#allocation1] sm:$0xff]  ;;  %10066 = vmatpush.xpose.msk.msrb.mxu1 %vm864_vm3, %v6207_v28 }
0x12a9   : > { %16475 = vst [vmem:[#allocation42_spill] sm:$0xff] %v14301_v45 }
0x12aa   : > { %7171 = vst [vmem:[#allocation1] ss:$9 sm:$0xff] %v13567_v51 }
0x12ab   : > { %7173 = vst [vmem:[#allocation1 + $0x1] ss:$9 sm:$0xff] %v13570_v56 }
0x12ac   : > { %7175 = vst [vmem:[#allocation1 + $0x2] ss:$9 sm:$0xff] %v13573_v20  ;;  %v10442_v28 = vpop.eup %10441 }
0x12ad   : > { %7177 = vst [vmem:[#allocation1 + $0x3] ss:$9 sm:$0xff] %v13578_v22  ;;  %v5702_v45 = vpop.xlane.xlu0 %5701  ;;  %v5720_v31 = vmul.f32 %v10442_v28, %v14207_v10  ;;  %v16479_v10 = vld [vmem:[#allocation58_spill] sm:$0xff] }
0x12ae   : > { %7179 = vst [vmem:[#allocation1 + $0x4] ss:$9 sm:$0xff] %v13582_v25  ;;  %10443 = vrcp.f32 %v5702_v45 }
0x12af   : > { %7181 = vst [vmem:[#allocation1 + $0x5] ss:$9 sm:$0xff] %v13586_v5  ;;  %v14329_v3 = vpop.permute.xlu1 %6186  ;;  %10046 = vmatmul.msk.f32.gmra.mxu2 %vm1109_vm4, %v5720_v31  ;;  %v6661_v31 = vpop.permute.xlu2 %6660 }
0x12b0   : > { %7183 = vst [vmem:[#allocation1 + $0x6] ss:$9 sm:$0xff] %v13590_v36 }
0x12b1   : > { %7185 = vst [vmem:[#allocation1 + $0x7] ss:$9 sm:$0xff] %v13594_v58 }
0x12b4   : > { %v10444_v38 = vpop.eup %10443 }
0x12b7   : > { %v6404_v40 = vpop.permute.xlu1 %6403  ;;  %10059 = vmatmul.msk.f32.vlgmr.msra.gmra.mxu2 %vm864_vm3, %v16479_v10 }
0x12b8   : > { %v14316_v26 = vld [vmem:[#allocation1] sm:$0xff]  ;;  %10072 = vmatpush.msk.msrb.mxu2 %vm624_vm1, %v6404_v40 }
0x12b9   : > { %16478 = vst [vmem:[#allocation43_spill] sm:$0xff] %v14316_v26  ;;  %v5722_v26 = vmul.f32 %v10444_v38, %v14223_v46  ;;  %v16480_v46 = vld [vmem:[#allocation57_spill] sm:$0xff] }
0x12ba   : > { %7187 = vst [vmem:[#allocation1] ss:$9 sm:$0xff] %v13600_v48  ;;  %6429 = vmatpush.msrb.mxu2 %v10238_v6 }
0x12bb   : > { %10049 = vmatmul.msk.f32.gmra.mxu3 %vm1109_vm4, %v5722_v26 }
0x12bc   : > { %10085 = vmatpush.xpose.msk.msra.mxu2 %vm864_vm3, %v6663_v32 }
0x12bf   : > { %10060 = vmatmul.msk.f32.gmra.mxu2 %vm864_vm3, %v16480_v46 }
0x12c0   : > { %10086 = vmatpush.xpose.msk.msra.mxu2 %vm864_vm3, %v6661_v31  ;;  %v5960_v40 = vpop.permute.xlu0 %5959 }
0x12c1   : > { %v14320_v47 = vld [vmem:[#allocation1] sm:$0xff]  ;;  %10055 = vmatmul.msk.f32.vlgmr.msrb.gmra.mxu0 %vm864_vm3, %v5960_v40 }
0x12c2   : > { %7224 = vst [vmem:[#allocation1] ss:$9 sm:$0xff] %v13618_v23 }
0x12c3   : > { %7226 = vst [vmem:[#allocation1 + $0x1] ss:$9 sm:$0xff] %v13621_v33  ;;  %10063 = vmatmul.msk.f32.vlgmr.msra.gmra.mxu3 %vm864_vm3, %v14116_v52 }
0x12c4   : > { %7228 = vst [vmem:[#allocation1 + $0x2] ss:$9 sm:$0xff] %v13624_v49 }
0x12c5   : > { %7230 = vst [vmem:[#allocation1 + $0x3] ss:$9 sm:$0xff] %v13628_v8 }
0x12c6   : > { %7232 = vst [vmem:[#allocation1 + $0x4] ss:$9 sm:$0xff] %v13632_v15 }
0x12c7   : > { %7234 = vst [vmem:[#allocation1 + $0x5] ss:$9 sm:$0xff] %v13636_v2 }
0x12c8   : > { %7236 = vst [vmem:[#allocation1 + $0x6] ss:$9 sm:$0xff] %v13640_v53 }
0x12c9   : > { %7238 = vst [vmem:[#allocation1 + $0x7] ss:$9 sm:$0xff] %v13646_v57  ;;  %10056 = vmatmul.msk.f32.gmra.mxu0 %vm864_vm3, %v14281_v39 }
0x12cb   : > { %10064 = vmatmul.msk.f32.gmra.mxu3 %vm864_vm3, %v14269_v21 }
0x12d0   : > { %v14336_v42 = vld [vmem:[#allocation1] sm:$0xff] }
0x12d1   : > { %7240 = vst [vmem:[#allocation1] ss:$9 sm:$0xff] %v13650_v1 }
0x12d6   : > { %v5708_v6 = vpop.xlane.xlu2 %5707 }
0x12d8   : > { %v14345_v45 = vld [vmem:[#allocation1] sm:$0xff] }
0x12d9   : > { %7246 = vst [vmem:[#allocation1] ss:$9 sm:$0xff] %v13618_v23 }
0x12da   : > { %7248 = vst [vmem:[#allocation1 + $0x1] ss:$9 sm:$0xff] %v13621_v33 }
0x12db   : > { %7250 = vst [vmem:[#allocation1 + $0x2] ss:$9 sm:$0xff] %v13624_v49 }
0x12dc   : > { %7252 = vst [vmem:[#allocation1 + $0x3] ss:$9 sm:$0xff] %v13628_v8 }
0x12dd   : > { %7254 = vst [vmem:[#allocation1 + $0x4] ss:$9 sm:$0xff] %v13632_v15 }
0x12de   : > { %7256 = vst [vmem:[#allocation1 + $0x5] ss:$9 sm:$0xff] %v13636_v2 }
0x12df   : > { %7258 = vst [vmem:[#allocation1 + $0x6] ss:$9 sm:$0xff] %v13640_v53 }
0x12e0   : > { %7260 = vst [vmem:[#allocation1 + $0x7] ss:$9 sm:$0xff] %v13646_v57 }
0x12e7   : > { %v14362_v26 = vld [vmem:[#allocation1] sm:$0xff] }
0x12e8   : > { %7262 = vst [vmem:[#allocation1] ss:$9 sm:$0xff] %v13650_v1 }
0x12eb   : > { %v5705_v39 = vpop.xlane.xlu0 %5704 }
0x12ec   : > { %10445 = vrcp.f32 %v5705_v39 }
0x12ed   : > { %10447 = vrcp.f32 %v5708_v6 }
0x12ef   : > { %v14369_v28 = vld [vmem:[#allocation1] sm:$0xff] }
0x12f0   : > { %7299 = vst [vmem:[#allocation1] ss:$9 sm:$0xff] %v13668_v19 }
0x12f1   : > { %7301 = vst [vmem:[#allocation1 + $0x1] ss:$9 sm:$0xff] %v13671_v17 }
0x12f2   : > { %7303 = vst [vmem:[#allocation1 + $0x2] ss:$9 sm:$0xff] %v13674_v27  ;;  %v10446_v32 = vpop.eup %10445 }
0x12f3   : > { %7305 = vst [vmem:[#allocation1 + $0x3] ss:$9 sm:$0xff] %v13679_v37  ;;  %v5723_v38 = vmul.f32 %v10446_v32, %v14274_v35  ;;  %v10448_v31 = vpop.eup %10447  ;;  %v10239_v35 = vunpack.i.h.bf16 %v14294_v14 }
0x12f4   : > { %7307 = vst [vmem:[#allocation1 + $0x4] ss:$9 sm:$0xff] %v16464_v13  ;;  %v5724_v46 = vmul.f32 %v10448_v31, %v14256_v61  ;;  %v14435_v31 = vpop.f32.mrf.mxu0 }
0x12f5   : > { %7309 = vst [vmem:[#allocation1 + $0x5] ss:$9 sm:$0xff] %v16465_v12  ;;  %10051 = vmatmul.msk.f32.vlgmr.msra.gmra.mxu1 %vm1109_vm4, %v5723_v38 }
0x12f6   : > { %7311 = vst [vmem:[#allocation1 + $0x6] ss:$9 sm:$0xff] %v16466_v34 }
0x12f7   : > { %7313 = vst [vmem:[#allocation1 + $0x7] ss:$9 sm:$0xff] %v16467_v54 }
0x12fd   : > { %10052 = vmatmul.msk.f32.gmra.mxu1 %vm1109_vm4, %v5724_v46 }
0x12fe   : > { %v14379_v52 = vld [vmem:[#allocation1] sm:$0xff]  ;;  %v6185_v39 = vpop.permute.xlu0 %6184 }
0x12ff   : > { %7315 = vst [vmem:[#allocation1] ss:$9 sm:$0xff] %v13702_v29 }
0x1305   : > { %10067 = vmatmul.msk.f32.vlgmr.msrb.gmra.mxu1 %vm864_vm3, %v6185_v39  ;;  %v14446_v39 = vpop.f32.mrf.mxu0 }
0x1306   : > { %v14382_v21 = vld [vmem:[#allocation1] sm:$0xff]  ;;  %v6458_v61 = vpop.permute.xlu0 %6457 }
0x1307   : > { %7321 = vst [vmem:[#allocation1] ss:$9 sm:$0xff] %v13668_v19  ;;  %10075 = vmatpush.msk.msrb.mxu3 %vm624_vm1, %v6458_v61 }
0x1308   : > { %7323 = vst [vmem:[#allocation1 + $0x1] ss:$9 sm:$0xff] %v13671_v17 }
0x1309   : > { %7325 = vst [vmem:[#allocation1 + $0x2] ss:$9 sm:$0xff] %v13674_v27  ;;  %6483 = vmatpush.msrb.mxu3 %v10239_v35 }
0x130a   : > { %7327 = vst [vmem:[#allocation1 + $0x3] ss:$9 sm:$0xff] %v13679_v37 }
0x130b   : > { %7329 = vst [vmem:[#allocation1 + $0x4] ss:$9 sm:$0xff] %v16464_v13 }
0x130c   : > { %7331 = vst [vmem:[#allocation1 + $0x5] ss:$9 sm:$0xff] %v16465_v12 }
0x130d   : > { %7333 = vst [vmem:[#allocation1 + $0x6] ss:$9 sm:$0xff] %v16466_v34  ;;  %10068 = vmatmul.msk.f32.gmra.mxu1 %vm864_vm3, %v14329_v3 }
0x130e   : > { %7335 = vst [vmem:[#allocation1 + $0x7] ss:$9 sm:$0xff] %v16467_v54 }
0x1315   : > { %v14393_v10 = vld [vmem:[#allocation1] sm:$0xff] }
0x1316   : > { %7337 = vst [vmem:[#allocation1] ss:$9 sm:$0xff] %v13702_v29 }
0x131d   : > { %v14398_v40 = vld [vmem:[#allocation1] sm:$0xff] }
0x131e   : > { %7374 = vst [vmem:[#allocation1] ss:$9 sm:$0xff] %v13720_v16 }
0x131f   : > { %7376 = vst [vmem:[#allocation1 + $0x1] ss:$9 sm:$0xff] %v13723_v60 }
0x1320   : > { %7378 = vst [vmem:[#allocation1 + $0x2] ss:$9 sm:$0xff] %v13726_v63 }
0x1321   : > { %7380 = vst [vmem:[#allocation1 + $0x3] ss:$9 sm:$0xff] %v13734_v62 }
0x1322   : > { %7382 = vst [vmem:[#allocation1 + $0x4] ss:$9 sm:$0xff] %v13738_v41 }
0x1323   : > { %7384 = vst [vmem:[#allocation1 + $0x5] ss:$9 sm:$0xff] %v13730_v59 }
0x1324   : > { %7386 = vst [vmem:[#allocation1 + $0x6] ss:$9 sm:$0xff] %v13744_v18 }
0x1325   : > { %7388 = vst [vmem:[#allocation1 + $0x7] ss:$9 sm:$0xff] %v13747_v0 }
0x132a   : > { %v14430_v3 = vpop.f32.mrf.mxu2 }
0x132c   : > { %v14412_v6 = vld [vmem:[#allocation1] sm:$0xff] }
0x132d   : > { %7390 = vst [vmem:[#allocation1] ss:$9 sm:$0xff] %v13753_v4 }
0x1332   : > { %v14443_v46 = vpop.f32.mrf.mxu2 }
0x1334   : > { %v14417_v32 = vld [vmem:[#allocation1] sm:$0xff] }
0x1335   : > { %7396 = vst [vmem:[#allocation1] ss:$9 sm:$0xff] %v13720_v16 }
0x1336   : > { %7398 = vst [vmem:[#allocation1 + $0x1] ss:$9 sm:$0xff] %v13723_v60 }
0x1337   : > { %7400 = vst [vmem:[#allocation1 + $0x2] ss:$9 sm:$0xff] %v13726_v63 }
0x1338   : > { %7402 = vst [vmem:[#allocation1 + $0x3] ss:$9 sm:$0xff] %v13734_v62 }
0x1339   : > { %7404 = vst [vmem:[#allocation1 + $0x4] ss:$9 sm:$0xff] %v13738_v41 }
0x133a   : > { %7406 = vst [vmem:[#allocation1 + $0x5] ss:$9 sm:$0xff] %v13730_v59  ;;  %v14450_v61 = vpop.f32.mrf.mxu2 }
0x133b   : > { %7408 = vst [vmem:[#allocation1 + $0x6] ss:$9 sm:$0xff] %v13744_v18 }
0x133c   : > { %7410 = vst [vmem:[#allocation1 + $0x7] ss:$9 sm:$0xff] %v13747_v0 }
0x1343   : > { %v14427_v14 = vld [vmem:[#allocation1] sm:$0xff] }
0x1344   : > { %7412 = vst [vmem:[#allocation1] ss:$9 sm:$0xff] %v13753_v4 }
0x134b   : > { %v14432_v38 = vld [vmem:[#allocation1] sm:$0xff] }
0x134c   : > { %7537 = vst [vmem:[#allocation1] ss:$9 sm:$0xff] %v13567_v51 }
0x134d   : > { %7539 = vst [vmem:[#allocation1 + $0x1] ss:$9 sm:$0xff] %v13570_v56  ;;  %v6247_v56 = vsel %vm1109_vm4, %v14450_v61, -inf }
0x134e   : > { %7541 = vst [vmem:[#allocation1 + $0x2] ss:$9 sm:$0xff] %v13573_v20  ;;  %6248 = vmax.xlane.f32.xlu1 %v6247_v56  ;;  %v14455_v20 = vpop.f32.mrf.mxu0 }
0x134f   : > { %7543 = vst [vmem:[#allocation1 + $0x3] ss:$9 sm:$0xff] %v13578_v22  ;;  %v6241_v22 = vsel %vm1109_vm4, %v14455_v20, -inf }
0x1350   : > { %7545 = vst [vmem:[#allocation1 + $0x4] ss:$9 sm:$0xff] %v13582_v25  ;;  %6242 = vmax.xlane.f32.xlu0 %v6241_v22 }
0x1351   : > { %7547 = vst [vmem:[#allocation1 + $0x5] ss:$9 sm:$0xff] %v13586_v5 }
0x1352   : > { %7549 = vst [vmem:[#allocation1 + $0x6] ss:$9 sm:$0xff] %v13590_v36 }
0x1353   : > { %7551 = vst [vmem:[#allocation1 + $0x7] ss:$9 sm:$0xff] %v13594_v58 }
0x1356   : > { %v14465_v5 = vpop.f32.mrf.mxu0 }
0x1357   : > { %v6244_v36 = vsel %vm1113_vm5, %v14465_v5, -inf }
0x1358   : > { %6245 = vmax.xlane.f32.xlu2 %v6244_v36 }
0x135a   : > { %v14448_v51 = vld [vmem:[#allocation1] sm:$0xff] }
0x135b   : > { %7553 = vst [vmem:[#allocation1] ss:$9 sm:$0xff] %v13600_v48  ;;  %v16481_v48 = vld [vmem:[#allocation50_spill] sm:$0xff] }
0x1362   : > { %v14459_v25 = vld [vmem:[#allocation1] sm:$0xff] }
0x1363   : > { %7591 = vst [vmem:[#allocation1] ss:$9 sm:$0xff] %v13618_v23 }
0x1364   : > { %7593 = vst [vmem:[#allocation1 + $0x1] ss:$9 sm:$0xff] %v13621_v33  ;;  %6585 = vrot.lane.b32.xlu0 %v16481_v48, %s16462_s19  ;;  %v16482_v33 = vld [vmem:[#allocation51_spill] sm:$0xff] }
0x1365   : > { %7595 = vst [vmem:[#allocation1 + $0x2] ss:$9 sm:$0xff] %v13624_v49 }
0x1366   : > { %7597 = vst [vmem:[#allocation1 + $0x3] ss:$9 sm:$0xff] %v13628_v8 }
0x1367   : > { %7599 = vst [vmem:[#allocation1 + $0x4] ss:$9 sm:$0xff] %v13632_v15  ;;  %6737 = vrot.lane.b32.xlu1 %v14122_v44, %s16462_s19  ;;  %v16483_v15 = vld [vmem:[#allocation53_spill] sm:$0xff] }
0x1368   : > { %7601 = vst [vmem:[#allocation1 + $0x5] ss:$9 sm:$0xff] %v13636_v2 }
0x1369   : > { %7603 = vst [vmem:[#allocation1 + $0x6] ss:$9 sm:$0xff] %v13640_v53 }
0x136a   : > { %7605 = vst [vmem:[#allocation1 + $0x7] ss:$9 sm:$0xff] %v13646_v57 }
0x1370   : > { %6587 = vrot.lane.b32.xlu2 %v16482_v33, %s16462_s19 }
0x1371   : > { %v14473_v58 = vld [vmem:[#allocation1] sm:$0xff] }
0x1372   : > { %7607 = vst [vmem:[#allocation1] ss:$9 sm:$0xff] %v13650_v1  ;;  %v14503_v2 = vpop.f32.mrf.mxu1 }
0x1378   : > { %6735 = vrot.lane.b32.xlu2 %v14114_v30, %s16462_s19 }
0x1379   : > { %v14480_v23 = vld [vmem:[#allocation1] sm:$0xff] }
0x137a   : > { %7645 = vst [vmem:[#allocation1] ss:$9 sm:$0xff] %v13668_v19  ;;  %v14511_v30 = vpop.f32.mrf.mxu1 }
0x137b   : > { %7647 = vst [vmem:[#allocation1 + $0x1] ss:$9 sm:$0xff] %v13671_v17 }
0x137c   : > { %7649 = vst [vmem:[#allocation1 + $0x2] ss:$9 sm:$0xff] %v13674_v27 }
0x137d   : > { %7651 = vst [vmem:[#allocation1 + $0x3] ss:$9 sm:$0xff] %v13679_v37 }
0x137e   : > { %7653 = vst [vmem:[#allocation1 + $0x4] ss:$9 sm:$0xff] %v16464_v13 }
0x137f   : > { %7655 = vst [vmem:[#allocation1 + $0x5] ss:$9 sm:$0xff] %v16465_v12 }
0x1380   : > { %7657 = vst [vmem:[#allocation1 + $0x6] ss:$9 sm:$0xff] %v16466_v34  ;;  %6640 = vrot.lane.b32.xlu2 %v16483_v15, %s16473_s1 }
0x1381   : > { %7659 = vst [vmem:[#allocation1 + $0x7] ss:$9 sm:$0xff] %v16467_v54 }
0x1388   : > { %v14492_v49 = vld [vmem:[#allocation1] sm:$0xff] }
0x1389   : > { %7661 = vst [vmem:[#allocation1] ss:$9 sm:$0xff] %v13702_v29 }
0x1390   : > { %v14497_v8 = vld [vmem:[#allocation1] sm:$0xff] }
0x1391   : > { %7699 = vst [vmem:[#allocation1] ss:$9 sm:$0xff] %v13720_v16  ;;  %v14518_v16 = vpop.f32.mrf.mxu3 }
0x1392   : > { %7701 = vst [vmem:[#allocation1 + $0x1] ss:$9 sm:$0xff] %v13723_v60  ;;  %v14516_v60 = vpop.f32.mrf.mxu1 }
0x1393   : > { %7703 = vst [vmem:[#allocation1 + $0x2] ss:$9 sm:$0xff] %v13726_v63 }
0x1394   : > { %7705 = vst [vmem:[#allocation1 + $0x3] ss:$9 sm:$0xff] %v13734_v62  ;;  %v6259_v62 = vsel %vm1109_vm4, %v14516_v60, -inf }
0x1395   : > { %7707 = vst [vmem:[#allocation1 + $0x4] ss:$9 sm:$0xff] %v13738_v41 }
0x1396   : > { %7709 = vst [vmem:[#allocation1 + $0x5] ss:$9 sm:$0xff] %v13730_v59 }
0x1397   : > { %7711 = vst [vmem:[#allocation1 + $0x6] ss:$9 sm:$0xff] %v13744_v18  ;;  %v6088_v18 = vpop.f32.mrf.mxu2 }
0x1398   : > { %7713 = vst [vmem:[#allocation1 + $0x7] ss:$9 sm:$0xff] %v13747_v0  ;;  %v6250_v57 = vsel %vm1113_vm5, %v6088_v18, -inf }
0x1399   : > { %v14524_v59 = vpop.f32.mrf.mxu3 }
0x139a   : > { %v14520_v63 = vpop.f32.mrf.mxu1 }
0x139b   : > { %v6262_v41 = vsel %vm1113_vm5, %v14520_v63, -inf }
0x139c   : > { %6263 = vmax.xlane.f32.xlu1 %v6262_v41 }
0x139f   : > { %v14513_v53 = vld [vmem:[#allocation1] sm:$0xff] }
0x13a0   : > { %7715 = vst [vmem:[#allocation1] ss:$9 sm:$0xff] %v13753_v4  ;;  %v14532_v4 = vpop.permute.xlu2 %6638 }
0x13a1   : > { %v6160_v1 = vpop.f32.mrf.mxu3 }
0x13a2   : > { %v6253_v19 = vsel %vm1109_vm4, %v6160_v1, -inf }
0x13a9   : > { %6251 = vmax.xlane.f32.xlu2 %v6250_v57  ;;  %v6163_v17 = vpop.f32.mrf.mxu3 }
0x13aa   : > { %v6256_v27 = vsel %vm1113_vm5, %v6163_v17, -inf }
0x13b1   : > { %6254 = vmax.xlane.f32.xlu2 %v6253_v19 }
0x13b9   : > { %6257 = vmax.xlane.f32.xlu2 %v6256_v27 }
0x13c1   : > { %v6249_v37 = vpop.xlane.xlu1 %6248  ;;  %6260 = vmax.xlane.f32.xlu2 %v6259_v62 }
0x13c2   : > { %v6267_v29 = vsub.f32 %v14450_v61, %v6249_v37 }
0x13c3   : > { %v6243_v44 = vpop.xlane.xlu0 %6242 }
0x13c4   : > { %v6277_v0 = vmul.f32 1.442695, %v6267_v29  ;;  %v6265_v13 = vsub.f32 %v14455_v20, %v6243_v44 }
0x13c6   : > { %10449 = vpow2.f32 %v6277_v0  ;;  %v6273_v12 = vmul.f32 1.442695, %v6265_v13 }
0x13c8   : > { %10451 = vpow2.f32 %v6273_v12 }
0x13cb   : > { %v6246_v54 = vpop.xlane.xlu2 %6245 }
0x13cc   : > { %v10450_v34 = vpop.eup %10449  ;;  %v6266_v56 = vsub.f32 %v14465_v5, %v6246_v54 }
0x13cd   : > { %v6295_v35 = vsel %vm1109_vm4, %v10450_v34, 0.0 }
0x13ce   : > { %6296 = vadd.xlane.f32.xlu2 %v6295_v35  ;;  %v10452_v61 = vpop.eup %10451  ;;  %v6275_v22 = vmul.f32 1.442695, %v6266_v56 }
0x13cf   : > { %v6289_v36 = vsel %vm1109_vm4, %v10452_v61, 0.0 }
0x13d0   : > { %10453 = vpow2.f32 %v6275_v22  ;;  %6290 = vadd.xlane.f32.xlu0 %v6289_v36 }
0x13d3   : > { %v6588_v48 = vpop.permute.xlu2 %6587 }
0x13d4   : > { %10081 = vmatpush.xpose.msk.msrb.mxu0 %vm864_vm3, %v6588_v48 }
0x13d6   : > { %v10454_v33 = vpop.eup %10453  ;;  %v6586_v20 = vpop.permute.xlu0 %6585 }
0x13d7   : > { %v6292_v41 = vsel %vm1113_vm5, %v10454_v33, 0.0 }
0x13d8   : > { %6293 = vadd.xlane.f32.xlu0 %v6292_v41  ;;  %10082 = vmatpush.xpose.msk.msrb.mxu0 %vm864_vm3, %v6586_v20  ;;  %v16484_v20 = vld [vmem:[#allocation48_spill] sm:$0xff] }
0x13d9   : > { %v6738_v15 = vpop.permute.xlu1 %6737 }
0x13da   : > { %10089 = vmatpush.xpose.msk.msra.mxu3 %vm864_vm3, %v6738_v15  ;;  %v16485_v15 = vld [vmem:[#allocation56_spill] sm:$0xff] }
0x13db   : > { %v6736_v5 = vpop.permute.xlu2 %6735 }
0x13de   : > { %10090 = vmatpush.xpose.msk.msra.mxu3 %vm864_vm3, %v6736_v5 }
0x13e3   : > { %v14543_v57 = vpop.permute.xlu2 %6640 }
0x141c   : > { %v6252_v19 = vpop.xlane.xlu2 %6251 }
0x141d   : > { %v6268_v27 = vsub.f32 %v6088_v18, %v6252_v19  ;;  %v16486_v19 = vld [vmem:[#allocation49_spill] sm:$0xff] }
0x141f   : > { %v6279_v37 = vmul.f32 1.442695, %v6268_v27 }
0x1421   : > { %10455 = vpow2.f32 %v6279_v37 }
0x1424   : > { %v6255_v29 = vpop.xlane.xlu2 %6254 }
0x1425   : > { %v6269_v62 = vsub.f32 %v6160_v1, %v6255_v29 }
0x1427   : > { %v14545_v0 = vpop.eup %10455  ;;  %v6281_v44 = vmul.f32 1.442695, %v6269_v62  ;;  %v16487_v62 = vld [vmem:[#allocation47_spill] sm:$0xff] }
0x1428   : > { %v6298_v13 = vsel %vm1113_vm5, %v14545_v0, 0.0 }
0x1429   : > { %10457 = vpow2.f32 %v6281_v44  ;;  %6299 = vadd.xlane.f32.xlu2 %v6298_v13  ;;  %v16488_v13 = vld [vmem:[#allocation55_spill] sm:$0xff] }
0x142c   : > { %v6258_v12 = vpop.xlane.xlu2 %6257 }
0x142d   : > { %v6270_v54 = vsub.f32 %v6163_v17, %v6258_v12 }
0x142f   : > { %v14549_v35 = vpop.eup %10457  ;;  %v6283_v56 = vmul.f32 1.442695, %v6270_v54  ;;  %v6264_v54 = vpop.xlane.xlu1 %6263 }
0x1430   : > { %v6301_v18 = vsel %vm1109_vm4, %v14549_v35, 0.0 }
0x1431   : > { %10459 = vpow2.f32 %v6283_v56  ;;  %6302 = vadd.xlane.f32.xlu0 %v6301_v18 }
0x1434   : > { %v6261_v1 = vpop.xlane.xlu2 %6260 }
0x1435   : > { %v6271_v18 = vsub.f32 %v14516_v60, %v6261_v1  ;;  %v16492_v60 = vld [vmem:[#allocation61_spill] sm:$0xff] }
0x1437   : > { %v14553_v22 = vpop.eup %10459 }
0x1438   : > { %v6304_v36 = vsel %vm1113_vm5, %v14553_v22, 0.0 }
0x1439   : > { %6305 = vadd.xlane.f32.xlu1 %v6304_v36  ;;  %v6285_v36 = vmul.f32 1.442695, %v6271_v18 }
0x1441   : > { %v6297_v48 = vpop.xlane.xlu2 %6296  ;;  %6563 = vrot.lane.b32.xlu2 %v16484_v20, %s16473_s1 }
0x1442   : > { %10461 = vrcp.f32 %v6297_v48 }
0x1443   : > { %v6291_v17 = vpop.xlane.xlu0 %6290 }
0x1444   : > { %10463 = vrcp.f32 %v6291_v17 }
0x1445   : > { %6715 = vrot.lane.b32.xlu0 %v16485_v15, %s16473_s1 }
0x1448   : > { %v10462_v41 = vpop.eup %10461 }
0x1449   : > { %v6323_v5 = vmul.f32 %v10462_v41, %v10450_v34  ;;  %6565 = vrot.lane.b32.xlu2 %v16486_v19, %s16473_s1  ;;  %v16489_v34 = vld [vmem:[#allocation46_spill] sm:$0xff] }
0x144a   : > { %v10464_v27 = vpop.eup %10463 }
0x144b   : > { %10073 = vmatmul.msk.f32.vlgmr.msrb.gmra.mxu2 %vm1109_vm4, %v6323_v5  ;;  %v6321_v37 = vmul.f32 %v10464_v27, %v10452_v61  ;;  %v6294_v29 = vpop.xlane.xlu0 %6293  ;;  %v6272_v61 = vsub.f32 %v14520_v63, %v6264_v54 }
0x144c   : > { %10465 = vrcp.f32 %v6294_v29 }
0x144d   : > { %10070 = vmatmul.msk.f32.vlgmr.msra.gmra.mxu0 %vm1109_vm4, %v6321_v37  ;;  %6511 = vrot.lane.b32.xlu0 %v16487_v62, %s16460_s18  ;;  %v6287_v56 = vmul.f32 1.442695, %v6272_v61 }
0x144f   : > { %10467 = vpow2.f32 %v6287_v56 }
0x1450   : > { %10469 = vpow2.f32 %v6285_v36 }
0x1452   : > { %v10466_v44 = vpop.eup %10465  ;;  %6713 = vrot.lane.b32.xlu1 %v16488_v13, %s16473_s1 }
0x1453   : > { %v6322_v12 = vmul.f32 %v10466_v44, %v10454_v33 }
0x1455   : > { %10071 = vmatmul.msk.f32.gmra.mxu0 %vm1109_vm4, %v6322_v12  ;;  %6509 = vrot.lane.b32.xlu0 %v16489_v34, %s16460_s18  ;;  %v14580_v33 = vpop.eup %10467 }
0x1456   : > { %v6310_v48 = vsel %vm1113_vm5, %v14580_v33, 0.0 }
0x145d   : > { %6812 = vrot.lane.b32.xlu0 %v14171_v24, %s16462_s19  ;;  %v10240_v24 = vpack.i.bf16 %v14192_v9, %v14229_v11  ;;  %v16494_v9 = vld [vmem:[#allocation59_spill] sm:$0xff] }
0x1465   : > { %6810 = vrot.lane.b32.xlu0 %v14164_v55, %s16462_s19  ;;  %v10470_v55 = vpop.eup %10469 }
0x1466   : > { %v6307_v63 = vsel %vm1109_vm4, %v10470_v55, 0.0 }
0x146d   : > { %6788 = vrot.lane.b32.xlu0 %v14144_v50, %s16473_s1  ;;  %v16491_v50 = vld [vmem:[#allocation40_spill] sm:$0xff] }
0x1472   : > { %6311 = vadd.xlane.f32.xlu2 %v6310_v48 }
0x1475   : > { %10241 = vrot.lane.b32.xlu0 %v10240_v24, %s16490_s20 }
0x147c   : > { %6308 = vadd.xlane.f32.xlu1 %v6307_v63 }
0x147d   : > { %7061 = vrot.lane.b32.xlu0 %v14250_v43, %s16490_s20  ;;  %v16495_v43 = vld [vmem:[#allocation60_spill] sm:$0xff] }
0x1485   : > { %7059 = vrot.lane.b32.xlu0 %v16491_v50, %s16490_s20 }
0x148a   : > { %7007 = vrot.lane.b32.xlu2 %v16492_v60, %s16490_s20 }
0x148d   : > { %7266 = vrot.lane.b32.xlu0 %v14369_v28, %s16493_s21 }
0x1492   : > { %7264 = vrot.lane.b32.xlu2 %v14362_v26, %s16493_s21 }
0x1495   : > { %6790 = vrot.lane.b32.xlu1 %v16494_v9, %s16473_s1  ;;  %7191 = vrot.lane.b32.xlu0 %v14320_v47, %s16493_s21  ;;  %v16497_v47 = vld [vmem:[#allocation43_spill] sm:$0xff] }
0x149c   : > { %v6300_v11 = vpop.xlane.xlu2 %6299 }
0x149d   : > { %10471 = vrcp.f32 %v6300_v11  ;;  %6953 = vrot.lane.b32.xlu1 %v16495_v43, %s16490_s20  ;;  %7242 = vrot.lane.b32.xlu0 %v14336_v42, %s16496_s22 }
0x14a3   : > { %v10472_v1 = vpop.eup %10471 }
0x14a4   : > { %v6303_v20 = vpop.xlane.xlu0 %6302  ;;  %v6564_v28 = vpop.permute.xlu2 %6563  ;;  %v6324_v17 = vmul.f32 %v10472_v1, %v14545_v0 }
0x14a5   : > { %10473 = vrcp.f32 %v6303_v20  ;;  %10083 = vmatmul.msk.f32.vlgmr.msrb.gmra.mxu0 %vm864_vm3, %v6564_v28  ;;  %7167 = vrot.lane.b32.xlu1 %v14296_v7, %s16496_s22 }
0x14a6   : > { %7189 = vrot.lane.b32.xlu0 %v16497_v47, %s16493_s21  ;;  %10074 = vmatmul.msk.f32.gmra.mxu2 %vm1109_vm4, %v6324_v17 }
0x14ab   : > { %v10474_v26 = vpop.eup %10473 }
0x14ac   : > { %v6325_v15 = vmul.f32 %v10474_v26, %v14549_v35  ;;  %v6566_v42 = vpop.permute.xlu2 %6565  ;;  %v6306_v41 = vpop.xlane.xlu1 %6305 }
0x14ad   : > { %10475 = vrcp.f32 %v6306_v41  ;;  %10084 = vmatmul.msk.f32.gmra.mxu0 %vm864_vm3, %v6566_v42 }
0x14ae   : > { %7341 = vrot.lane.b32.xlu0 %v14398_v40, %s16493_s21  ;;  %10076 = vmatmul.msk.f32.vlgmr.msrb.gmra.mxu3 %vm1109_vm4, %v6325_v15 }
0x14af   : > { %10087 = vmatmul.msk.f32.vlgmr.msra.gmra.mxu2 %vm864_vm3, %v14532_v4 }
0x14b3   : > { %v10476_v7 = vpop.eup %10475 }
0x14b4   : > { %v6326_v0 = vmul.f32 %v10476_v7, %v14553_v22 }
0x14b6   : > { %10077 = vmatmul.msk.f32.gmra.mxu3 %vm1109_vm4, %v6326_v0 }
0x14b7   : > { %10088 = vmatmul.msk.f32.gmra.mxu2 %vm864_vm3, %v14543_v57  ;;  %v6716_v35 = vpop.permute.xlu0 %6715 }
0x14bf   : > { %v6512_v5 = vpop.permute.xlu0 %6511 }
0x14c0   : > { %10078 = vmatpush.msk.msra.mxu1 %vm624_vm1, %v6512_v5 }
0x14c4   : > { %v6714_v19 = vpop.permute.xlu1 %6713 }
0x14c5   : > { %10091 = vmatmul.msk.f32.vlgmr.msra.gmra.mxu3 %vm864_vm3, %v6714_v19 }
0x14c7   : > { %v6510_v40 = vpop.permute.xlu0 %6509 }
0x14c8   : > { %6537 = vmatpush.msra.mxu1 %v6510_v40 }
0x14ca   : > { %v14639_v50 = vpop.f32.mrf.mxu0 }
0x14cd   : > { %10092 = vmatmul.msk.f32.gmra.mxu3 %vm864_vm3, %v6716_v35 }
0x14ce   : > { %v14647_v43 = vpop.f32.mrf.mxu2 }
0x14cf   : > { %v6813_v4 = vpop.permute.xlu0 %6812 }
0x14d0   : > { %10093 = vmatpush.xpose.msk.msrb.mxu1 %vm864_vm3, %v6813_v4  ;;  %v16498_v4 = vld [vmem:[#allocation23_spill] sm:$0xff] }
0x14d2   : > { %v14645_v9 = vpop.f32.mrf.mxu0 }
0x14d7   : > { %v6811_v22 = vpop.permute.xlu0 %6810 }
0x14d8   : > { %10094 = vmatpush.xpose.msk.msrb.mxu1 %vm864_vm3, %v6811_v22 }
0x14df   : > { %v6789_v27 = vpop.permute.xlu0 %6788 }
0x14e5   : > { %v6312_v37 = vpop.xlane.xlu2 %6311 }
0x14e7   : > { %v10242_v57 = vpop.permute.xlu0 %10241 }
0x14e8   : > { %v10243_v62 = vunpack.i.l.bf16 %v10242_v57  ;;  %v10244_v60 = vunpack.i.h.bf16 %v10242_v57 }
0x14ed   : > { %v7008_v29 = vpop.permute.xlu2 %7007 }
0x14ee   : > { %10100 = vmatpush.msk.msrb.mxu2 %vm624_vm1, %v7008_v29 }
0x14ef   : > { %v6309_v44 = vpop.xlane.xlu1 %6308  ;;  %v7062_v13 = vpop.permute.xlu0 %7061 }
0x14f0   : > { %10477 = vrcp.f32 %v6309_v44  ;;  %7033 = vmatpush.msrb.mxu2 %v10243_v62  ;;  %10103 = vmatpush.msk.msrb.mxu3 %vm624_vm1, %v7062_v13 }
0x14f1   : > { %10479 = vrcp.f32 %v6312_v37 }
0x14f5   : > { %v7265_v36 = vpop.permute.xlu2 %7264 }
0x14f6   : > { %v10478_v12 = vpop.eup %10477 }
0x14f7   : > { %v6327_v34 = vmul.f32 %v10478_v12, %v10470_v55  ;;  %v7060_v54 = vpop.permute.xlu0 %7059  ;;  %v10480_v61 = vpop.eup %10479 }
0x14f8   : > { %7087 = vmatpush.msrb.mxu3 %v7060_v54  ;;  %v6328_v18 = vmul.f32 %v10480_v61, %v14580_v33 }
0x14f9   : > { %10079 = vmatmul.msk.f32.vlgmr.msra.gmra.mxu1 %vm1109_vm4, %v6327_v34 }
0x14ff   : > { %v7267_v56 = vpop.permute.xlu0 %7266 }
0x1500   : > { %10113 = vmatpush.xpose.msk.msra.mxu2 %vm864_vm3, %v7267_v56 }
0x1501   : > { %10080 = vmatmul.msk.f32.gmra.mxu1 %vm1109_vm4, %v6328_v18 }
0x1504   : > { %10114 = vmatpush.xpose.msk.msra.mxu2 %vm864_vm3, %v7265_v36 }
0x1507   : > { %v6791_v48 = vpop.permute.xlu1 %6790  ;;  %v7192_v24 = vpop.permute.xlu0 %7191 }
0x1509   : > { %10095 = vmatmul.msk.f32.vlgmr.msrb.gmra.mxu1 %vm864_vm3, %v6789_v27 }
0x150f   : > { %v6954_v55 = vpop.permute.xlu1 %6953  ;;  %v14637_v63 = vpop.permute.xlu0 %7242 }
0x1510   : > { %10097 = vmatpush.msk.msra.mxu0 %vm624_vm1, %v6954_v55 }
0x1511   : > { %10096 = vmatmul.msk.f32.gmra.mxu1 %vm864_vm3, %v6791_v48 }
0x1512   : > { %6979 = vmatpush.msra.mxu0 %v10244_v60 }
0x1514   : > { %10109 = vmatpush.xpose.msk.msrb.mxu0 %vm864_vm3, %v7192_v24 }
0x1518   : > { %v7190_v33 = vpop.permute.xlu0 %7189 }
0x1519   : > { %10110 = vmatpush.xpose.msk.msrb.mxu0 %vm864_vm3, %v7190_v33 }
0x1520   : > { %v7342_v11 = vpop.permute.xlu0 %7341 }
0x1521   : > { %10117 = vmatpush.xpose.msk.msra.mxu3 %vm864_vm3, %v7342_v11 }
0x1522   : > { %v6614_v1 = vpop.f32.mrf.mxu0 }
0x1523   : > { %v6845_v20 = vsel %vm1109_vm4, %v6614_v1, -inf }
0x1524   : > { %6846 = vmax.xlane.f32.xlu2 %v6845_v20 }
0x1529   : > { %v14651_v28 = vpop.f32.mrf.mxu2 }
0x152a   : > { %v6617_v17 = vpop.f32.mrf.mxu0 }
0x152b   : > { %v6848_v47 = vsel %vm1113_vm5, %v6617_v17, -inf }
0x152c   : > { %6849 = vmax.xlane.f32.xlu2 %v6848_v47 }
0x1531   : > { %v14655_v42 = vpop.f32.mrf.mxu3 }
0x1532   : > { %v6689_v26 = vpop.f32.mrf.mxu2 }
0x1533   : > { %v6851_v15 = vsel %vm1109_vm4, %v6689_v26, -inf }
0x1534   : > { %6852 = vmax.xlane.f32.xlu0 %v6851_v15 }
0x1539   : > { %v14658_v0 = vpop.f32.mrf.mxu3 }
0x153a   : > { %v6692_v41 = vpop.f32.mrf.mxu2 }
0x153b   : > { %v6854_v7 = vsel %vm1113_vm5, %v6692_v41, -inf }
0x153c   : > { %6855 = vmax.xlane.f32.xlu2 %v6854_v7 }
0x1548   : > { %v6764_v35 = vpop.f32.mrf.mxu3 }
0x1549   : > { %v6857_v5 = vsel %vm1109_vm4, %v6764_v35, -inf }
0x154a   : > { %6858 = vmax.xlane.f32.xlu1 %v6857_v5 }
0x1550   : > { %v6767_v19 = vpop.f32.mrf.mxu3 }
0x1551   : > { %v6860_v40 = vsel %vm1113_vm5, %v6767_v19, -inf }
0x1552   : > { %6861 = vmax.xlane.f32.xlu2 %v6860_v40 }
0x1563   : > { %7115 = vrot.lane.b32.xlu1 %v16498_v4, %s16490_s20 }
0x1576   : > { %v14664_v22 = vpop.f32.mrf.mxu1 }
0x157e   : > { %v14666_v27 = vpop.f32.mrf.mxu1 }
0x1586   : > { %v6839_v37 = vpop.f32.mrf.mxu1 }
0x1587   : > { %v6863_v57 = vsel %vm1109_vm4, %v6839_v37, -inf }
0x1588   : > { %6864 = vmax.xlane.f32.xlu2 %v6863_v57 }
0x158e   : > { %v14669_v29 = vpop.f32.mrf.mxu1 }
0x158f   : > { %v6866_v62 = vsel %vm1113_vm5, %v14669_v29, -inf }
0x1590   : > { %6867 = vmax.xlane.f32.xlu0 %v6866_v62 }
0x1597   : > { %v6847_v44 = vpop.xlane.xlu2 %6846 }
0x1598   : > { %v6869_v13 = vsub.f32 %v6614_v1, %v6847_v44  ;;  %v14682_v1 = vpop.permute.xlu1 %7167 }
0x159a   : > { %v6877_v12 = vmul.f32 1.442695, %v6869_v13  ;;  %v16499_v13 = vld [vmem:[#allocation41_spill] sm:$0xff] }
0x159c   : > { %10481 = vpow2.f32 %v6877_v12 }
0x159f   : > { %v6850_v34 = vpop.xlane.xlu2 %6849 }
0x15a0   : > { %v6870_v54 = vsub.f32 %v6617_v17, %v6850_v34  ;;  %v16500_v34 = vld [vmem:[#allocation42_spill] sm:$0xff] }
0x15a2   : > { %v10482_v61 = vpop.eup %10481  ;;  %v6879_v56 = vmul.f32 1.442695, %v6870_v54 }
0x15a3   : > { %v6893_v18 = vsel %vm1109_vm4, %v10482_v61, 0.0 }
0x15a4   : > { %10483 = vpow2.f32 %v6879_v56  ;;  %6894 = vadd.xlane.f32.xlu0 %v6893_v18 }
0x15a7   : > { %v6853_v36 = vpop.xlane.xlu0 %6852 }
0x15a8   : > { %v6871_v48 = vsub.f32 %v6689_v26, %v6853_v36 }
0x15aa   : > { %v14674_v24 = vpop.eup %10483  ;;  %v6881_v55 = vmul.f32 1.442695, %v6871_v48 }
0x15ab   : > { %v6896_v60 = vsel %vm1113_vm5, %v14674_v24, 0.0 }
0x15ac   : > { %10485 = vpow2.f32 %v6881_v55  ;;  %6897 = vadd.xlane.f32.xlu2 %v6896_v60 }
0x15af   : > { %v6856_v20 = vpop.xlane.xlu2 %6855 }
0x15b2   : > { %v14678_v33 = vpop.eup %10485 }
0x15b3   : > { %v6899_v11 = vsel %vm1109_vm4, %v14678_v33, 0.0 }
0x15b4   : > { %6900 = vadd.xlane.f32.xlu2 %v6899_v11 }
0x15b8   : > { %7317 = vrot.lane.b32.xlu0 %v14379_v52, %s16496_s22 }
0x15bd   : > { %v6859_v17 = vpop.xlane.xlu1 %6858 }
0x15be   : > { %v6873_v47 = vsub.f32 %v6764_v35, %v6859_v17 }
0x15c0   : > { %v6885_v26 = vmul.f32 1.442695, %v6873_v47  ;;  %7244 = vrot.lane.b32.xlu0 %v14345_v45, %s16496_s22  ;;  %v6872_v45 = vsub.f32 %v6692_v41, %v6856_v20 }
0x15c2   : > { %10487 = vpow2.f32 %v6885_v26  ;;  %v6883_v62 = vmul.f32 1.442695, %v6872_v45 }
0x15c5   : > { %v6862_v15 = vpop.xlane.xlu2 %6861 }
0x15c6   : > { %v6874_v7 = vsub.f32 %v6767_v19, %v6862_v15 }
0x15c8   : > { %v10488_v5 = vpop.eup %10487  ;;  %v6887_v40 = vmul.f32 1.442695, %v6874_v7 }
0x15c9   : > { %v6905_v4 = vsel %vm1109_vm4, %v10488_v5, 0.0 }
0x15ca   : > { %10489 = vpow2.f32 %v6887_v40  ;;  %6906 = vadd.xlane.f32.xlu1 %v6905_v4 }
0x15cb   : > { %10491 = vpow2.f32 %v6883_v62 }
0x15cc   : > { %7339 = vrot.lane.b32.xlu2 %v14393_v10, %s16493_s21 }
0x15d0   : > { %v10490_v52 = vpop.eup %10489 }
0x15d1   : > { %v6908_v57 = vsel %vm1113_vm5, %v10490_v52, 0.0  ;;  %v14693_v19 = vpop.eup %10491 }
0x15d2   : > { %6909 = vadd.xlane.f32.xlu1 %v6908_v57  ;;  %v6902_v44 = vsel %vm1113_vm5, %v14693_v19, 0.0 }
0x15d5   : > { %v7116_v35 = vpop.permute.xlu1 %7115 }
0x15d6   : > { %10106 = vmatpush.msk.msra.mxu1 %vm624_vm1, %v7116_v35 }
0x15ea   : > { %6903 = vadd.xlane.f32.xlu0 %v6902_v44 }
0x15eb   : > { %7113 = vrot.lane.b32.xlu1 %v16499_v13, %s16490_s20 }
0x15f3   : > { %7319 = vrot.lane.b32.xlu1 %v14382_v21, %s16496_s22 }
0x15fb   : > { %v6865_v10 = vpop.xlane.xlu2 %6864  ;;  %7416 = vrot.lane.b32.xlu1 %v14432_v38, %s16493_s21 }
0x15fc   : > { %v6875_v12 = vsub.f32 %v6839_v37, %v6865_v10 }
0x15fe   : > { %v6889_v41 = vmul.f32 1.442695, %v6875_v12  ;;  %7169 = vrot.lane.b32.xlu0 %v16500_v34, %s16496_s22 }
0x1600   : > { %10493 = vpow2.f32 %v6889_v41 }
0x1603   : > { %7392 = vrot.lane.b32.xlu1 %v14412_v6, %s16496_s22  ;;  %v6868_v21 = vpop.xlane.xlu0 %6867 }
0x1604   : > { %v6876_v38 = vsub.f32 %v14669_v29, %v6868_v21 }
0x1606   : > { %v14707_v54 = vpop.eup %10493  ;;  %v6891_v18 = vmul.f32 1.442695, %v6876_v38 }
0x1607   : > { %v6911_v56 = vsel %vm1109_vm4, %v14707_v54, 0.0 }
0x1608   : > { %6912 = vadd.xlane.f32.xlu2 %v6911_v56 }
0x160b   : > { %7394 = vrot.lane.b32.xlu1 %v14417_v32, %s16496_s22 }
0x1617   : > { %v6895_v37 = vpop.xlane.xlu0 %6894 }
0x1618   : > { %10495 = vrcp.f32 %v6895_v37  ;;  %v10245_v37 = vpack.i.bf16 %v14473_v58, %v14448_v51 }
0x1619   : > { %10497 = vpow2.f32 %v6891_v18 }
0x161e   : > { %v10496_v36 = vpop.eup %10495 }
0x161f   : > { %v6925_v48 = vmul.f32 %v10496_v36, %v10482_v61  ;;  %v6898_v55 = vpop.xlane.xlu2 %6897  ;;  %v10498_v6 = vpop.eup %10497 }
0x1620   : > { %10499 = vrcp.f32 %v6898_v55  ;;  %7414 = vrot.lane.b32.xlu2 %v14427_v14, %s16493_s21  ;;  %v6914_v32 = vsel %vm1113_vm5, %v10498_v6, 0.0 }
0x1621   : > { %10098 = vmatmul.msk.f32.vlgmr.msra.gmra.mxu0 %vm1109_vm4, %v6925_v48 }
0x1626   : > { %v10500_v60 = vpop.eup %10499 }
0x1627   : > { %v6901_v11 = vpop.xlane.xlu2 %6900  ;;  %v6926_v29 = vmul.f32 %v10500_v60, %v14674_v24 }
0x1628   : > { %10501 = vrcp.f32 %v6901_v11  ;;  %6915 = vadd.xlane.f32.xlu0 %v6914_v32 }
0x1629   : > { %10099 = vmatmul.msk.f32.gmra.mxu0 %vm1109_vm4, %v6926_v29 }
0x162e   : > { %v10502_v20 = vpop.eup %10501 }
0x162f   : > { %v6927_v61 = vmul.f32 %v10502_v20, %v14678_v33  ;;  %v7340_v17 = vpop.permute.xlu2 %7339  ;;  %v7318_v33 = vpop.permute.xlu0 %7317 }
0x1630   : > { %10118 = vmatpush.xpose.msk.msra.mxu3 %vm864_vm3, %v7340_v17 }
0x1631   : > { %10101 = vmatmul.msk.f32.vlgmr.msrb.gmra.mxu2 %vm1109_vm4, %v6927_v61  ;;  %10111 = vmatmul.msk.f32.vlgmr.msrb.gmra.mxu0 %vm864_vm3, %v14682_v1 }
0x1637   : > { %v7245_v1 = vpop.permute.xlu0 %7244 }
0x163c   : > { %7557 = vrot.lane.b32.xlu0 %v14459_v25, %s16501_s29 }
0x163d   : > { %v6907_v14 = vpop.xlane.xlu1 %6906 }
0x163e   : > { %10503 = vrcp.f32 %v6907_v14 }
0x1644   : > { %v10504_v24 = vpop.eup %10503  ;;  %7665 = vrot.lane.b32.xlu0 %v14497_v8, %s16501_s29 }
0x1645   : > { %v6929_v47 = vmul.f32 %v10504_v24, %v10488_v5  ;;  %v6910_v26 = vpop.xlane.xlu1 %6909 }
0x1646   : > { %10505 = vrcp.f32 %v6910_v26 }
0x1647   : > { %10104 = vmatmul.msk.f32.vlgmr.msrb.gmra.mxu3 %vm1109_vm4, %v6929_v47 }
0x164c   : > { %v10506_v15 = vpop.eup %10505 }
0x164d   : > { %v6930_v7 = vmul.f32 %v10506_v15, %v10490_v52 }
0x164f   : > { %10105 = vmatmul.msk.f32.gmra.mxu3 %vm1109_vm4, %v6930_v7 }
0x1657   : > { %10119 = vmatmul.msk.f32.vlgmr.msra.gmra.mxu3 %vm864_vm3, %v7318_v33 }
0x165d   : > { %v7114_v25 = vpop.permute.xlu1 %7113  ;;  %v6904_v40 = vpop.xlane.xlu0 %6903 }
0x165e   : > { %10507 = vrcp.f32 %v6904_v40  ;;  %7141 = vmatpush.msra.mxu1 %v7114_v25 }
0x1664   : > { %v10508_v4 = vpop.eup %10507 }
0x1665   : > { %v7320_v57 = vpop.permute.xlu1 %7319  ;;  %v6928_v8 = vmul.f32 %v10508_v4, %v14693_v19 }
0x1666   : > { %10120 = vmatmul.msk.f32.gmra.mxu3 %vm864_vm3, %v7320_v57 }
0x1667   : > { %10102 = vmatmul.msk.f32.gmra.mxu2 %vm1109_vm4, %v6928_v8 }
0x166d   : > { %v7417_v5 = vpop.permute.xlu1 %7416 }
0x166e   : > { %10121 = vmatpush.xpose.msk.msrb.mxu1 %vm864_vm3, %v7417_v5 }
0x166f   : > { %10115 = vmatmul.msk.f32.vlgmr.msra.gmra.mxu2 %vm864_vm3, %v14637_v63 }
0x1670   : > { %v7170_v52 = vpop.permute.xlu0 %7169 }
0x1671   : > { %10112 = vmatmul.msk.f32.gmra.mxu0 %vm864_vm3, %v7170_v52 }
0x1675   : > { %v7393_v41 = vpop.permute.xlu1 %7392 }
0x1677   : > { %10116 = vmatmul.msk.f32.gmra.mxu2 %vm864_vm3, %v7245_v1 }
0x167b   : > { %v6913_v35 = vpop.xlane.xlu2 %6912 }
0x167c   : > { %10509 = vrcp.f32 %v6913_v35 }
0x167d   : > { %v7395_v21 = vpop.permute.xlu1 %7394 }
0x1682   : > { %v10510_v45 = vpop.eup %10509 }
0x1683   : > { %v6931_v62 = vmul.f32 %v10510_v45, %v14707_v54  ;;  %v7415_v19 = vpop.permute.xlu2 %7414 }
0x1684   : > { %10122 = vmatpush.xpose.msk.msrb.mxu1 %vm864_vm3, %v7415_v19 }
0x1685   : > { %10107 = vmatmul.msk.f32.vlgmr.msra.gmra.mxu1 %vm1109_vm4, %v6931_v62 }
0x169b   : > { %v6916_v44 = vpop.xlane.xlu0 %6915 }
0x169c   : > { %10511 = vrcp.f32 %v6916_v44 }
0x169e   : > { %v14743_v13 = vpop.f32.mrf.mxu0 }
0x16a2   : > { %v10512_v63 = vpop.eup %10511 }
0x16a3   : > { %v6932_v10 = vmul.f32 %v10512_v63, %v10498_v6 }
0x16a5   : > { %10108 = vmatmul.msk.f32.gmra.mxu1 %vm1109_vm4, %v6932_v10 }
0x16a6   : > { %v14746_v12 = vpop.f32.mrf.mxu0 }
0x16ad   : > { %10123 = vmatmul.msk.f32.vlgmr.msrb.gmra.mxu1 %vm864_vm3, %v7393_v41 }
0x16ae   : > { %v7218_v34 = vpop.f32.mrf.mxu0  ;;  %v7558_v54 = vpop.permute.xlu0 %7557 }
0x16af   : > { %10125 = vmatpush.msk.msra.mxu0 %vm624_vm1, %v7558_v54  ;;  %v7449_v56 = vsel %vm1109_vm4, %v7218_v34, -inf }
0x16b0   : > { %7450 = vmax.xlane.f32.xlu1 %v7449_v56 }
0x16b4   : > { %v14756_v18 = vpop.f32.mrf.mxu2 }
0x16b5   : > { %10124 = vmatmul.msk.f32.gmra.mxu1 %vm864_vm3, %v7395_v21 }
0x16b6   : > { %v7666_v38 = vpop.permute.xlu0 %7665 }
0x16b7   : > { %10131 = vmatpush.msk.msrb.mxu3 %vm624_vm1, %v7666_v38 }
0x16c9   : > { %10246 = vrot.lane.b32.xlu1 %v10245_v37, %s16501_s29 }
0x16ca   : > { %v14760_v48 = vpop.f32.mrf.mxu3 }
0x16d2   : > { %v14764_v32 = vpop.f32.mrf.mxu3 }
0x16da   : > { %v7368_v58 = vpop.f32.mrf.mxu3 }
0x16db   : > { %v7461_v20 = vsel %vm1109_vm4, %v7368_v58, -inf }
0x16e9   : > { %v7371_v61 = vpop.f32.mrf.mxu3 }
0x16ea   : > { %v14758_v36 = vpop.f32.mrf.mxu2  ;;  %v7464_v17 = vsel %vm1113_vm5, %v7371_v61, -inf }
0x16ee   : > { %v7221_v55 = vpop.f32.mrf.mxu0 }
0x16ef   : > { %v7452_v6 = vsel %vm1113_vm5, %v7221_v55, -inf }
0x16f0   : > { %7453 = vmax.xlane.f32.xlu2 %v7452_v6 }
0x16f2   : > { %v7293_v60 = vpop.f32.mrf.mxu2 }
0x16f3   : > { %v7455_v11 = vsel %vm1109_vm4, %v7293_v60, -inf }
0x16f4   : > { %7456 = vmax.xlane.f32.xlu0 %v7455_v11 }
0x16fa   : > { %v7296_v29 = vpop.f32.mrf.mxu2 }
0x16fb   : > { %v7458_v51 = vsel %vm1113_vm5, %v7296_v29, -inf }
0x16fc   : > { %7459 = vmax.xlane.f32.xlu0 %v7458_v51 }
0x1702   : > { %v14771_v14 = vpop.f32.mrf.mxu1 }
0x1704   : > { %7462 = vmax.xlane.f32.xlu0 %v7461_v20 }
0x1708   : > { %7611 = vrot.lane.b32.xlu2 %v14480_v23, %s16501_s29 }
0x170c   : > { %7465 = vmax.xlane.f32.xlu0 %v7464_v17 }
0x1722   : > { %v14773_v24 = vpop.f32.mrf.mxu1 }
0x1723   : > { %v7451_v47 = vpop.xlane.xlu1 %7450 }
0x1724   : > { %v7473_v26 = vsub.f32 %v7218_v34, %v7451_v47  ;;  %v7716_v47 = vld [vmem:[#allocation1] sm:$0xff] }
0x1726   : > { %v7481_v33 = vmul.f32 1.442695, %v7473_v26 }
0x1728   : > { %10513 = vpow2.f32 %v7481_v33 }
0x172a   : > { %v7443_v15 = vpop.f32.mrf.mxu1 }
0x172b   : > { %v7467_v7 = vsel %vm1109_vm4, %v7443_v15, -inf }
0x172c   : > { %7468 = vmax.xlane.f32.xlu0 %v7467_v7 }
0x172e   : > { %v14776_v1 = vpop.eup %10513 }
0x172f   : > { %v7497_v23 = vsel %vm1109_vm4, %v14776_v1, 0.0 }
0x1730   : > { %7498 = vadd.xlane.f32.xlu1 %v7497_v23 }
0x1732   : > { %v7446_v25 = vpop.f32.mrf.mxu1 }
0x1733   : > { %v7470_v40 = vsel %vm1113_vm5, %v7446_v25, -inf }
0x1734   : > { %7471 = vmax.xlane.f32.xlu0 %v7470_v40 }
0x173b   : > { %v10247_v4 = vpop.permute.xlu1 %10246 }
0x173c   : > { %v10248_v57 = vunpack.i.l.bf16 %v10247_v4  ;;  %v10249_v44 = vunpack.i.h.bf16 %v10247_v4 }
0x173e   : > { %7583 = vmatpush.msra.mxu0 %v10248_v57 }
0x1763   : > { %v7454_v8 = vpop.xlane.xlu2 %7453 }
0x1764   : > { %v7474_v5 = vsub.f32 %v7221_v55, %v7454_v8 }
0x1766   : > { %v7483_v52 = vmul.f32 1.442695, %v7474_v5 }
0x1767   : > { %v7457_v35 = vpop.xlane.xlu0 %7456 }
0x1768   : > { %10515 = vpow2.f32 %v7483_v52  ;;  %v7475_v45 = vsub.f32 %v7293_v60, %v7457_v35 }
0x176a   : > { %v7485_v62 = vmul.f32 1.442695, %v7475_v45 }
0x176b   : > { %v7612_v19 = vpop.permute.xlu2 %7611 }
0x176c   : > { %10517 = vpow2.f32 %v7485_v62  ;;  %10128 = vmatpush.msk.msrb.mxu2 %vm624_vm1, %v7612_v19 }
0x176e   : > { %v14782_v63 = vpop.eup %10515  ;;  %7637 = vmatpush.msrb.mxu2 %v10249_v44 }
0x176f   : > { %v7460_v10 = vpop.xlane.xlu0 %7459  ;;  %v7500_v41 = vsel %vm1113_vm5, %v14782_v63, 0.0 }
0x1770   : > { %v7476_v34 = vsub.f32 %v7296_v29, %v7460_v10  ;;  %7501 = vadd.xlane.f32.xlu0 %v7500_v41 }
0x1772   : > { %v10518_v54 = vpop.eup %10517  ;;  %v7487_v56 = vmul.f32 1.442695, %v7476_v34 }
0x1773   : > { %v7503_v21 = vsel %vm1109_vm4, %v10518_v54, 0.0 }
0x1774   : > { %10519 = vpow2.f32 %v7487_v56  ;;  %7504 = vadd.xlane.f32.xlu2 %v7503_v21 }
0x1777   : > { %v7463_v38 = vpop.xlane.xlu0 %7462 }
0x1778   : > { %v7477_v37 = vsub.f32 %v7368_v58, %v7463_v38 }
0x177a   : > { %v10520_v55 = vpop.eup %10519  ;;  %v7489_v6 = vmul.f32 1.442695, %v7477_v37 }
0x177b   : > { %v7506_v60 = vsel %vm1113_vm5, %v10520_v55, 0.0 }
0x177c   : > { %10521 = vpow2.f32 %v7489_v6  ;;  %7507 = vadd.xlane.f32.xlu2 %v7506_v60 }
0x177f   : > { %v7466_v11 = vpop.xlane.xlu0 %7465 }
0x1780   : > { %v7478_v51 = vsub.f32 %v7371_v61, %v7466_v11 }
0x1782   : > { %v10522_v20 = vpop.eup %10521  ;;  %v7491_v17 = vmul.f32 1.442695, %v7478_v51 }
0x1783   : > { %v7509_v29 = vsel %vm1109_vm4, %v10522_v20, 0.0 }
0x1784   : > { %10523 = vpow2.f32 %v7491_v17  ;;  %7510 = vadd.xlane.f32.xlu1 %v7509_v29  ;;  %7719 = vrot.lane.b32.xlu0 %v7716_v47, %s16501_s29  ;;  %v10140_v29 = vld [vmem:[%s16119_s7 + $0x38] sm:$0xff] }
0x1785   : > { %7989 = vmatpush.msrb.mxu0 %v10140_v29 }
0x178a   : > { %v10524_v26 = vpop.eup %10523 }
0x178b   : > { %v7512_v58 = vsel %vm1113_vm5, %v10524_v26, 0.0 }
0x178c   : > { %7513 = vadd.xlane.f32.xlu2 %v7512_v58 }
0x179d   : > { %7663 = vrot.lane.b32.xlu1 %v14492_v49, %s16501_s29 }
0x179f   : > { %v7469_v33 = vpop.xlane.xlu0 %7468 }
0x17a0   : > { %v7479_v7 = vsub.f32 %v7443_v15, %v7469_v33 }
0x17a2   : > { %v7493_v23 = vmul.f32 1.442695, %v7479_v7 }
0x17a3   : > { %v7499_v61 = vpop.xlane.xlu1 %7498 }
0x17a4   : > { %10525 = vpow2.f32 %v7493_v23 }
0x17a5   : > { %10527 = vrcp.f32 %v7499_v61  ;;  %7761 = vrot.lane.b32.xlu1 %v14639_v50, %s10584_s26 }
0x17a7   : > { %v7472_v40 = vpop.xlane.xlu0 %7471 }
0x17a8   : > { %v7480_v4 = vsub.f32 %v7446_v25, %v7472_v40 }
0x17aa   : > { %v10526_v57 = vpop.eup %10525  ;;  %v7495_v8 = vmul.f32 1.442695, %v7480_v4 }
0x17ab   : > { %v10528_v5 = vpop.eup %10527  ;;  %v7515_v52 = vsel %vm1109_vm4, %v10526_v57, 0.0 }
0x17ac   : > { %v7529_v35 = vmul.f32 %v10528_v5, %v14776_v1  ;;  %10529 = vpow2.f32 %v7495_v8  ;;  %7516 = vadd.xlane.f32.xlu2 %v7515_v52 }
0x17ad   : > { %7793 = vrot.lane.b32.xlu1 %v14743_v13, %s10585_s23 }
0x17ae   : > { %10126 = vmatmul.msk.f32.vlgmr.msra.gmra.mxu0 %vm1109_vm4, %v7529_v35 }
0x17b2   : > { %v10530_v49 = vpop.eup %10529 }
0x17b3   : > { %v7518_v15 = vsel %vm1113_vm5, %v10530_v49, 0.0 }
0x17b4   : > { %7519 = vadd.xlane.f32.xlu0 %v7518_v15 }
0x17b5   : > { %7797 = vrot.lane.b32.xlu1 %v14756_v18, %s10585_s23 }
0x17bd   : > { %7769 = vrot.lane.b32.xlu1 %v14655_v42, %s10584_s26 }
0x17c4   : > { %7717 = vrot.lane.b32.xlu2 %v14513_v53, %s16501_s29 }
0x17cc   : > { %7765 = vrot.lane.b32.xlu2 %v14647_v43, %s10584_s26 }
0x17d4   : > { %7763 = vrot.lane.b32.xlu2 %v14645_v9, %s10584_s26 }
0x17dc   : > { %7795 = vrot.lane.b32.xlu2 %v14746_v12, %s10585_s23 }
0x17e3   : > { %v7502_v50 = vpop.xlane.xlu0 %7501 }
0x17e4   : > { %10531 = vrcp.f32 %v7502_v50  ;;  %7801 = vrot.lane.b32.xlu2 %v14760_v48, %s10585_s23 }
0x17e7   : > { %v7505_v13 = vpop.xlane.xlu2 %7504 }
0x17e8   : > { %10533 = vrcp.f32 %v7505_v13 }
0x17ea   : > { %v10532_v42 = vpop.eup %10531 }
0x17eb   : > { %v7530_v18 = vmul.f32 %v10532_v42, %v14782_v63 }
0x17ed   : > { %10127 = vmatmul.msk.f32.gmra.mxu0 %vm1109_vm4, %v7530_v18 }
0x17ee   : > { %v10534_v53 = vpop.eup %10533 }
0x17ef   : > { %v7531_v43 = vmul.f32 %v10534_v53, %v10518_v54  ;;  %v7508_v1 = vpop.xlane.xlu2 %7507 }
0x17f0   : > { %10535 = vrcp.f32 %v7508_v1 }
0x17f1   : > { %10129 = vmatmul.msk.f32.vlgmr.msrb.gmra.mxu2 %vm1109_vm4, %v7531_v43 }
0x17f6   : > { %v10536_v9 = vpop.eup %10535  ;;  %v7720_v12 = vpop.permute.xlu0 %7719 }
0x17f7   : > { %10134 = vmatpush.msk.msra.mxu1 %vm624_vm1, %v7720_v12  ;;  %v7532_v25 = vmul.f32 %v10536_v9, %v10520_v55  ;;  %v7511_v48 = vpop.xlane.xlu1 %7510 }
0x17f8   : > { %10537 = vrcp.f32 %v7511_v48 }
0x17f9   : > { %10130 = vmatmul.msk.f32.gmra.mxu2 %vm1109_vm4, %v7532_v25 }
0x17fe   : > { %v10538_v62 = vpop.eup %10537 }
0x17ff   : > { %v7514_v45 = vpop.xlane.xlu2 %7513  ;;  %v7533_v19 = vmul.f32 %v10538_v62, %v10522_v20 }
0x1800   : > { %10539 = vrcp.f32 %v7514_v45 }
0x1806   : > { %v10540_v63 = vpop.eup %10539 }
0x1807   : > { %v7534_v10 = vmul.f32 %v10540_v63, %v10524_v26 }
0x180f   : > { %v7664_v44 = vpop.permute.xlu1 %7663 }
0x1810   : > { %7691 = vmatpush.msrb.mxu3 %v7664_v44 }
0x1811   : > { %10132 = vmatmul.msk.f32.vlgmr.msrb.gmra.mxu3 %vm1109_vm4, %v7533_v19 }
0x1817   : > { %v7762_v11 = vpop.permute.xlu1 %7761 }
0x1818   : > { %v7849_v58 = vsel %vm864_vm3, %v14435_v31, %v7762_v11 }
0x1819   : > { %10133 = vmatmul.msk.f32.gmra.mxu3 %vm1109_vm4, %v7534_v10 }
0x181f   : > { %v7517_v41 = vpop.xlane.xlu2 %7516  ;;  %v7794_v20 = vpop.permute.xlu1 %7793 }
0x1820   : > { %10541 = vrcp.f32 %v7517_v41  ;;  %v7857_v33 = vsel %vm564_vm0, %v7849_v58, %v7794_v20 }
0x1826   : > { %v10542_v34 = vpop.eup %10541 }
0x1827   : > { %v7535_v54 = vmul.f32 %v10542_v34, %v10526_v57  ;;  %v7718_v56 = vpop.permute.xlu2 %7717  ;;  %v7520_v21 = vpop.xlane.xlu0 %7519 }
0x1828   : > { %7745 = vmatpush.msra.mxu1 %v7718_v56  ;;  %10543 = vrcp.f32 %v7520_v21  ;;  %v7798_v17 = vpop.permute.xlu1 %7797 }
0x1829   : > { %10135 = vmatmul.msk.f32.vlgmr.msra.gmra.mxu1 %vm1109_vm4, %v7535_v54 }
0x182b   : > { %v7585_v38 = vpop.f32.mrf.mxu0 }
0x182c   : > { %7825 = vrot.lane.b32.xlu1 %v7585_v38, %s10586_s25 }
0x182e   : > { %v10544_v37 = vpop.eup %10543 }
0x182f   : > { %v7536_v55 = vmul.f32 %v10544_v37, %v10530_v49  ;;  %v7766_v52 = vpop.permute.xlu2 %7765 }
0x1830   : > { %v7851_v18 = vsel %vm864_vm3, %v14430_v3, %v7766_v52 }
0x1831   : > { %10136 = vmatmul.msk.f32.gmra.mxu1 %vm1109_vm4, %v7536_v55  ;;  %v7859_v43 = vsel %vm564_vm0, %v7851_v18, %v7798_v17 }
0x1837   : > { %v7764_v35 = vpop.permute.xlu2 %7763 }
0x1838   : > { %v7850_v15 = vsel %vm864_vm3, %v14446_v39, %v7764_v35  ;;  %v14899_v35 = vld [vmem:[%s16120_s8 + $0x1] ss:$0 sm:$0xff] }
0x183f   : > { %v7796_v49 = vpop.permute.xlu2 %7795 }
0x1840   : > { %v7858_v50 = vsel %vm564_vm0, %v7850_v15, %v7796_v49 }
0x186a   : > { %v7588_v6 = vpop.f32.mrf.mxu0 }
0x186b   : > { %7827 = vrot.lane.b32.xlu0 %v7588_v6, %s10586_s25 }
0x1874   : > { %v7639_v60 = vpop.f32.mrf.mxu2 }
0x1875   : > { %7829 = vrot.lane.b32.xlu1 %v7639_v60, %s10586_s25 }
0x187c   : > { %v7642_v51 = vpop.f32.mrf.mxu2 }
0x187d   : > { %7767 = vrot.lane.b32.xlu1 %v14651_v28, %s10584_s26  ;;  %7831 = vrot.lane.b32.xlu0 %v7642_v51, %s10586_s25  ;;  %v10139_v28 = vld [vmem:[%s16119_s7 + $0x30] sm:$0xff] }
0x187e   : > { %7990 = vmatpush.msrb.mxu0 %v10139_v28 }
0x1885   : > { %7799 = vrot.lane.b32.xlu1 %v14758_v36, %s10585_s23  ;;  %7771 = vrot.lane.b32.xlu0 %v14658_v0, %s10584_s26  ;;  %v10138_v36 = vld [vmem:[%s16119_s7 + $0x28] sm:$0xff]  ;;  %v10137_v0 = vld [vmem:[%s16119_s7 + $0x20] sm:$0xff] }
0x1886   : > { %7991 = vmatpush.msrb.mxu0 %v10138_v36 }
0x1888   : > { %7992 = vmatpush.msrb.mxu0 %v10137_v0 }
0x188d   : > { %7805 = vrot.lane.b32.xlu1 %v14771_v14, %s10585_s23  ;;  %v7770_v14 = vpop.permute.xlu1 %7769 }
0x188e   : > { %v7853_v19 = vsel %vm864_vm3, %v14518_v16, %v7770_v14 }
0x1894   : > { %v7693_v47 = vpop.f32.mrf.mxu3 }
0x1895   : > { %7803 = vrot.lane.b32.xlu1 %v14764_v32, %s10585_s23  ;;  %7833 = vrot.lane.b32.xlu2 %v7693_v47, %s10586_s25 }
0x189c   : > { %v7696_v26 = vpop.f32.mrf.mxu3 }
0x189d   : > { %7807 = vrot.lane.b32.xlu1 %v14773_v24, %s10585_s23  ;;  %7773 = vrot.lane.b32.xlu2 %v14664_v22, %s10584_s26 }
0x189e   : > { %v7826_v7 = vpop.permute.xlu1 %7825  ;;  %7835 = vrot.lane.b32.xlu0 %v7696_v26, %s10586_s25 }
0x189f   : > { %v7865_v32 = vsel %vm3339_vm6, %v7857_v33, %v7826_v7 }
0x18a0   : > { %v7881_v23 = vrot.slane %v7865_v32, 1  ;;  %v7882_v61 = vrot.slane %v7865_v32, 2  ;;  %v7883_v40 = vrot.slane %v7865_v32, 3  ;;  %7919 = vst [vmem:[#allocation1] ss:$9 sm:$0xff] %v7865_v32  ;;  %v7884_v4 = vrot.slane %v7865_v32, 4 }
0x18a1   : > { %v7885_v57 = vrot.slane %v7865_v32, 5  ;;  %v7886_v31 = vrot.slane %v7865_v32, 6  ;;  %v7887_v24 = vrot.slane %v7865_v32, 7 }
0x18a2   : > { %7921 = vst [vmem:[#allocation1 + $0x1] ss:$9 sm:$0xff] %v7881_v23 }
0x18a3   : > { %7923 = vst [vmem:[#allocation1 + $0x2] ss:$9 sm:$0xff] %v7882_v61 }
0x18a4   : > { %7925 = vst [vmem:[#allocation1 + $0x3] ss:$9 sm:$0xff] %v7883_v40 }
0x18a5   : > { %7927 = vst [vmem:[#allocation1 + $0x4] ss:$9 sm:$0xff] %v7884_v4 }
0x18a6   : > { %7929 = vst [vmem:[#allocation1 + $0x5] ss:$9 sm:$0xff] %v7885_v57  ;;  %v7747_v22 = vpop.f32.mrf.mxu1 }
0x18a7   : > { %7931 = vst [vmem:[#allocation1 + $0x6] ss:$9 sm:$0xff] %v7886_v31  ;;  %7837 = vrot.lane.b32.xlu2 %v7747_v22, %s10586_s25 }
0x18a8   : > { %7933 = vst [vmem:[#allocation1 + $0x7] ss:$9 sm:$0xff] %v7887_v24 }
0x18ae   : > { %v7750_v5 = vpop.f32.mrf.mxu1 }
0x18af   : > { %v7934_v8 = vld [vmem:[#allocation1] sm:$0xff]  ;;  %7775 = vrot.lane.b32.xlu2 %v14666_v27, %s10584_s26  ;;  %7839 = vrot.lane.b32.xlu0 %v7750_v5, %s10586_s25  ;;  %v7802_v27 = vpop.permute.xlu2 %7801  ;;  %s10177_s26 = sshll.u32 %s16566_s30, 4 }
0x18b0   : > { %10142 = vmatmul.msk.f32.vlgmr.msrb.gmra.mxu0 %vm745_vm2, %v7934_v8  ;;  %v7861_v44 = vsel %vm564_vm0, %v7853_v19, %v7802_v27  ;;  %s16003_s0 = scalar_lea.vmem %s16129_s17, %s10177_s26 }
0x18dd   : > { %v7828_v13 = vpop.permute.xlu0 %7827 }
0x18de   : > { %v7866_v42 = vsel %vm3339_vm6, %v7858_v50, %v7828_v13 }
0x18df   : > { %7935 = vst [vmem:[#allocation1] ss:$9 sm:$0xff] %v7866_v42 }
0x18e7   : > { %v7830_v53 = vpop.permute.xlu1 %7829 }
0x18e8   : > { %v7867_v1 = vsel %vm3339_vm6, %v7859_v43, %v7830_v53  ;;  %v16502_v43 = vld [vmem:[#allocation30_spill] sm:$0xff] }
0x18e9   : > { %v7888_v9 = vrot.slane %v7867_v1, 1  ;;  %v7889_v12 = vrot.slane %v7867_v1, 2  ;;  %v7890_v25 = vrot.slane %v7867_v1, 3  ;;  %7936 = vst [vmem:[#allocation1 + $0x1] ss:$9 sm:$0xff] %v7867_v1  ;;  %v7891_v39 = vrot.slane %v7867_v1, 4 }
0x18ea   : > { %v7892_v48 = vrot.slane %v7867_v1, 5  ;;  %v7893_v45 = vrot.slane %v7867_v1, 6  ;;  %v7894_v10 = vrot.slane %v7867_v1, 7 }
0x18eb   : > { %7937 = vst [vmem:[#allocation1 + $0x2] ss:$9 sm:$0xff] %v7888_v9 }
0x18ec   : > { %7938 = vst [vmem:[#allocation1 + $0x3] ss:$9 sm:$0xff] %v7889_v12  ;;  %v16503_v12 = vld [vmem:[#allocation31_spill] sm:$0xff] }
0x18ed   : > { %7939 = vst [vmem:[#allocation1 + $0x4] ss:$9 sm:$0xff] %v7890_v25 }
0x18ee   : > { %7940 = vst [vmem:[#allocation1 + $0x5] ss:$9 sm:$0xff] %v7891_v39  ;;  %v16504_v39 = vld [vmem:[#allocation28_spill] sm:$0xff] }
0x18ef   : > { %7941 = vst [vmem:[#allocation1 + $0x6] ss:$9 sm:$0xff] %v7892_v48  ;;  %v7768_v62 = vpop.permute.xlu1 %7767  ;;  %v7834_v3 = vpop.permute.xlu2 %7833 }
0x18f0   : > { %7942 = vst [vmem:[#allocation1 + $0x7] ss:$9 sm:$0xff] %v7893_v45  ;;  %v7869_v63 = vsel %vm3339_vm6, %v7861_v44, %v7834_v3  ;;  %v7852_v21 = vsel %vm864_vm3, %v14443_v46, %v7768_v62  ;;  %v7832_v60 = vpop.permute.xlu0 %7831  ;;  %v16505_v45 = vld [vmem:[#allocation19_spill] sm:$0xff]  ;;  %v16506_v3 = vld [vmem:[#allocation21_spill] sm:$0xff] }
0x18f1   : > { %v7895_v41 = vrot.slane %v7869_v63, 1  ;;  %v7896_v54 = vrot.slane %v7869_v63, 2  ;;  %v7897_v38 = vrot.slane %v7869_v63, 3  ;;  %v7898_v37 = vrot.slane %v7869_v63, 4  ;;  %v16507_v44 = vld [vmem:[#allocation29_spill] sm:$0xff] }
0x18f2   : > { %v7899_v6 = vrot.slane %v7869_v63, 5  ;;  %v7900_v28 = vrot.slane %v7869_v63, 6  ;;  %v7901_v36 = vrot.slane %v7869_v63, 7 }
0x18f7   : > { %v7943_v34 = vld [vmem:[#allocation1] sm:$0xff]  ;;  %v7800_v56 = vpop.permute.xlu1 %7799  ;;  %v7774_v55 = vpop.permute.xlu2 %7773 }
0x18f8   : > { %7944 = vst [vmem:[#allocation1] ss:$9 sm:$0xff] %v7894_v10  ;;  %10143 = vmatmul.msk.f32.gmra.mxu0 %vm745_vm2, %v7943_v34  ;;  %v7860_v16 = vsel %vm564_vm0, %v7852_v21, %v7800_v56  ;;  %v7855_v46 = vsel %vm864_vm3, %v14503_v2, %v7774_v55  ;;  %v7772_v26 = vpop.permute.xlu0 %7771  ;;  %v16508_v10 = vld [vmem:[#allocation37_spill] sm:$0xff]  ;;  %v16509_v34 = vld [vmem:[#allocation18_spill] sm:$0xff] }
0x18f9   : > { %7946 = vst [vmem:[#allocation1 + $0x2] ss:$9 sm:$0xff] %v7869_v63  ;;  %v7868_v11 = vsel %vm3339_vm6, %v7860_v16, %v7832_v60  ;;  %v7854_v7 = vsel %vm864_vm3, %v14524_v59, %v7772_v26  ;;  %v16514_v26 = vld [vmem:[#allocation36_spill] sm:$0xff] }
0x18fa   : > { %7947 = vst [vmem:[#allocation1 + $0x3] ss:$9 sm:$0xff] %v7895_v41 }
0x18fb   : > { %7948 = vst [vmem:[#allocation1 + $0x4] ss:$9 sm:$0xff] %v7896_v54 }
0x18fc   : > { %7949 = vst [vmem:[#allocation1 + $0x5] ss:$9 sm:$0xff] %v7897_v38 }
0x18fd   : > { %7950 = vst [vmem:[#allocation1 + $0x6] ss:$9 sm:$0xff] %v7898_v37 }
0x18fe   : > { %7951 = vst [vmem:[#allocation1 + $0x7] ss:$9 sm:$0xff] %v7899_v6 }
0x18ff   : > { %7945 = vst [vmem:[#allocation1 + $0x1] ss:$9 sm:$0xff] %v7868_v11  ;;  %v7806_v51 = vpop.permute.xlu1 %7805 }
0x1900   : > { %v7863_v20 = vsel %vm564_vm0, %v7855_v46, %v7806_v51  ;;  %v16510_v51 = vld [vmem:[#allocation35_spill] sm:$0xff] }
0x1901   : > { %v7838_v17 = vpop.permute.xlu2 %7837 }
0x1902   : > { %v7871_v29 = vsel %vm3339_vm6, %v7863_v20, %v7838_v17 }
0x1903   : > { %v7902_v0 = vrot.slane %v7871_v29, 1  ;;  %v7903_v14 = vrot.slane %v7871_v29, 2  ;;  %v7904_v58 = vrot.slane %v7871_v29, 3  ;;  %v7905_v33 = vrot.slane %v7871_v29, 4 }
0x1904   : > { %v7906_v40 = vrot.slane %v7871_v29, 5  ;;  %v7907_v4 = vrot.slane %v7871_v29, 6  ;;  %v7908_v31 = vrot.slane %v7871_v29, 7 }
0x1906   : > { %v7952_v47 = vld [vmem:[#allocation1] sm:$0xff] }
0x1907   : > { %10144 = vmatmul.msk.f32.gmra.mxu0 %vm745_vm2, %v7952_v47  ;;  %7953 = vst [vmem:[#allocation1] ss:$9 sm:$0xff] %v7900_v28  ;;  %v7804_v2 = vpop.permute.xlu1 %7803  ;;  %v16513_v47 = vld [vmem:[#allocation38_spill] sm:$0xff] }
0x1908   : > { %7954 = vst [vmem:[#allocation1 + $0x1] ss:$9 sm:$0xff] %v7901_v36  ;;  %v7862_v32 = vsel %vm564_vm0, %v7854_v7, %v7804_v2  ;;  %v16512_v36 = vld [vmem:[#allocation33_spill] sm:$0xff]  ;;  %v16516_v7 = vld [vmem:[#allocation12_spill] sm:$0xff] }
0x1909   : > { %7956 = vst [vmem:[#allocation1 + $0x3] ss:$9 sm:$0xff] %v7871_v29  ;;  %v7776_v24 = vpop.permute.xlu2 %7775  ;;  %v16511_v29 = vld [vmem:[#allocation32_spill] sm:$0xff] }
0x190a   : > { %7957 = vst [vmem:[#allocation1 + $0x4] ss:$9 sm:$0xff] %v7902_v0  ;;  %v7856_v59 = vsel %vm864_vm3, %v14511_v30, %v7776_v24 }
0x190b   : > { %7958 = vst [vmem:[#allocation1 + $0x5] ss:$9 sm:$0xff] %v7903_v14 }
0x190c   : > { %7959 = vst [vmem:[#allocation1 + $0x6] ss:$9 sm:$0xff] %v7904_v58 }
0x190d   : > { %7960 = vst [vmem:[#allocation1 + $0x7] ss:$9 sm:$0xff] %v7905_v33  ;;  %v16515_v33 = vld [vmem:[#allocation34_spill] sm:$0xff] }
0x190f   : > { %v7808_v22 = vpop.permute.xlu1 %7807 }
0x1910   : > { %v7836_v23 = vpop.permute.xlu0 %7835  ;;  %v7864_v8 = vsel %vm564_vm0, %v7856_v59, %v7808_v22 }
0x1911   : > { %v7870_v61 = vsel %vm3339_vm6, %v7862_v32, %v7836_v23  ;;  %v16517_v23 = vld [vmem:[#allocation11_spill] sm:$0xff] }
0x1912   : > { %7955 = vst [vmem:[#allocation1 + $0x2] ss:$9 sm:$0xff] %v7870_v61 }
0x1919   : > { %v7961_v57 = vld [vmem:[#allocation1] sm:$0xff] }
0x191a   : > { %10145 = vmatmul.msk.f32.gmra.mxu0 %vm745_vm2, %v7961_v57  ;;  %7962 = vst [vmem:[#allocation1] ss:$9 sm:$0xff] %v7906_v40 }
0x191b   : > { %7963 = vst [vmem:[#allocation1 + $0x1] ss:$9 sm:$0xff] %v7907_v4 }
0x191c   : > { %7964 = vst [vmem:[#allocation1 + $0x2] ss:$9 sm:$0xff] %v7908_v31 }
0x1921   : > { %v7840_v5 = vpop.permute.xlu0 %7839 }
0x1922   : > { %v7872_v52 = vsel %vm3339_vm6, %v7864_v8, %v7840_v5  ;;  %v16518_v5 = vld [vmem:[#allocation39_spill] sm:$0xff] }
0x1923   : > { %7965 = vst [vmem:[#allocation1 + $0x3] ss:$9 sm:$0xff] %v7872_v52 }
0x192a   : > { %v7966_v49 = vld [vmem:[#allocation1] sm:$0xff] }
0x192b   : > { %10146 = vmatmul.msk.f32.gmra.mxu0 %vm745_vm2, %v7966_v49 }
0x192d   : > { %v7994_v15 = vpop.f32.mrf.mxu0 }
0x192e   : > { %v7995_v50 = vadd.f32 %v14899_v35, %v7994_v15  ;;  %v16519_v15 = vld [vmem:[#allocation3_spill] sm:$0xff] }
0x1930   : > { %v8014_v13 = vrot.slane %v7995_v50, 1  ;;  %v8015_v42 = vrot.slane %v7995_v50, 2  ;;  %v8016_v30 = vrot.slane %v7995_v50, 3  ;;  %v8017_v18 = vrot.slane %v7995_v50, 4 }
0x1931   : > { %v8018_v27 = vrot.slane %v7995_v50, 5  ;;  %v8019_v53 = vrot.slane %v7995_v50, 6  ;;  %v14904_v1 = vadd.f32 %v7995_v50, %v16502_v43  ;;  %v8020_v9 = vrot.slane %v7995_v50, 7 }
0x1932   : > { %v14907_v25 = vadd.f32 %v8014_v13, %v16503_v12  ;;  %v14910_v48 = vadd.f32 %v8015_v42, %v16504_v39  ;;  %v14913_v62 = vadd.f32 %v8016_v30, %v16505_v45  ;;  %v14916_v19 = vadd.f32 %v8017_v18, %v16506_v3  ;;  %v16520_v13 = vld [vmem:[#allocation2_spill] sm:$0xff]  ;;  %v16521_v30 = vld [vmem:[#allocation5_spill] sm:$0xff]  ;;  %v16523_v12 = vld [vmem:[#allocation7_spill] sm:$0xff] }
0x1933   : > { %8152 = vst [vmem:[#allocation1] ss:$9 sm:$0xff] %v14904_v1  ;;  %v14920_v63 = vadd.f32 %v8018_v27, %v16507_v44  ;;  %v14924_v41 = vadd.f32 %v8019_v53, %v16508_v10  ;;  %v14928_v54 = vadd.f32 %v8020_v9, %v16509_v34  ;;  %v16522_v53 = vld [vmem:[#allocation4_spill] sm:$0xff]  ;;  %v16524_v45 = vld [vmem:[#allocation6_spill] sm:$0xff]  ;;  %v16525_v44 = vld [vmem:[#allocation9_spill] sm:$0xff] }
0x1934   : > { %8154 = vst [vmem:[#allocation1 + $0x1] ss:$9 sm:$0xff] %v14907_v25 }
0x1935   : > { %8156 = vst [vmem:[#allocation1 + $0x2] ss:$9 sm:$0xff] %v14910_v48 }
0x1936   : > { %8158 = vst [vmem:[#allocation1 + $0x3] ss:$9 sm:$0xff] %v14913_v62 }
0x1937   : > { %8160 = vst [vmem:[#allocation1 + $0x4] ss:$9 sm:$0xff] %v14916_v19 }
0x1938   : > { %8162 = vst [vmem:[#allocation1 + $0x5] ss:$9 sm:$0xff] %v14920_v63 }
0x1939   : > { %8164 = vst [vmem:[#allocation1 + $0x6] ss:$9 sm:$0xff] %v14924_v41 }
0x193a   : > { %8166 = vst [vmem:[#allocation1 + $0x7] ss:$9 sm:$0xff] %v14928_v54 }
0x1941   : > { %v8167_v56 = vld [vmem:[#allocation1] sm:$0xff] }
0x1942   : > { %v8205_v21 = vsel %vm745_vm2, %v8167_v56, 0.0 }
0x1943   : > { %8206 = vadd.xlane.f32.xlu2 %v8205_v21 }
0x1975   : > { %v7997_v38 = vpop.f32.mrf.mxu0 }
0x1976   : > { %v7998_v37 = vadd.f32 %v14899_v35, %v7997_v38 }
0x1978   : > { %v8021_v16 = vrot.slane %v7998_v37, 1  ;;  %v8022_v55 = vrot.slane %v7998_v37, 2  ;;  %v8023_v6 = vrot.slane %v7998_v37, 3  ;;  %v8024_v60 = vrot.slane %v7998_v37, 4 }
0x1979   : > { %v8025_v11 = vrot.slane %v7998_v37, 5  ;;  %v8026_v46 = vrot.slane %v7998_v37, 6  ;;  %v14938_v20 = vadd.f32 %v7998_v37, %v16510_v51  ;;  %v8027_v17 = vrot.slane %v7998_v37, 7 }
0x197a   : > { %v14941_v28 = vadd.f32 %v8021_v16, %v16511_v29  ;;  %v14944_v0 = vadd.f32 %v8022_v55, %v16512_v36  ;;  %v14947_v14 = vadd.f32 %v8023_v6, %v16513_v47  ;;  %v14950_v58 = vadd.f32 %v8024_v60, %v16514_v26  ;;  %v16527_v29 = vld [vmem:[#allocation14_spill] sm:$0xff]  ;;  %v16528_v47 = vld [vmem:[#allocation13_spill] sm:$0xff] }
0x197b   : > { %8168 = vst [vmem:[#allocation1] ss:$9 sm:$0xff] %v14938_v20  ;;  %v14954_v2 = vadd.f32 %v8025_v11, %v16515_v33  ;;  %v14958_v32 = vadd.f32 %v8026_v46, %v16516_v7  ;;  %v14962_v61 = vadd.f32 %v8027_v17, %v16517_v23  ;;  %v16526_v46 = vld [vmem:[#allocation8_spill] sm:$0xff]  ;;  %v16529_v33 = vld [vmem:[#allocation15_spill] sm:$0xff]  ;;  %v16530_v23 = vld [vmem:[#allocation17_spill] sm:$0xff] }
0x197c   : > { %8169 = vst [vmem:[#allocation1 + $0x1] ss:$9 sm:$0xff] %v14941_v28 }
0x197d   : > { %8170 = vst [vmem:[#allocation1 + $0x2] ss:$9 sm:$0xff] %v14944_v0 }
0x197e   : > { %8171 = vst [vmem:[#allocation1 + $0x3] ss:$9 sm:$0xff] %v14947_v14 }
0x197f   : > { %8172 = vst [vmem:[#allocation1 + $0x4] ss:$9 sm:$0xff] %v14950_v58 }
0x1980   : > { %8173 = vst [vmem:[#allocation1 + $0x5] ss:$9 sm:$0xff] %v14954_v2 }
0x1981   : > { %8174 = vst [vmem:[#allocation1 + $0x6] ss:$9 sm:$0xff] %v14958_v32 }
0x1982   : > { %8175 = vst [vmem:[#allocation1 + $0x7] ss:$9 sm:$0xff] %v14962_v61 }
0x1984   : > { %v8000_v40 = vpop.f32.mrf.mxu0 }
0x1985   : > { %v8001_v4 = vadd.f32 %v14899_v35, %v8000_v40 }
0x1987   : > { %v8028_v57 = vrot.slane %v8001_v4, 1  ;;  %v8029_v31 = vrot.slane %v8001_v4, 2  ;;  %v8030_v24 = vrot.slane %v8001_v4, 3  ;;  %v8031_v22 = vrot.slane %v8001_v4, 4 }
0x1988   : > { %v8032_v59 = vrot.slane %v8001_v4, 5  ;;  %v8033_v8 = vrot.slane %v8001_v4, 6  ;;  %v14971_v52 = vadd.f32 %v8001_v4, %v16518_v5  ;;  %v8034_v49 = vrot.slane %v8001_v4, 7  ;;  %v16531_v4 = vld [vmem:[#allocation22_spill] sm:$0xff] }
0x1989   : > { %v14974_v50 = vadd.f32 %v8028_v57, %v16519_v15  ;;  %v14977_v42 = vadd.f32 %v8029_v31, %v16520_v13  ;;  %v14980_v18 = vadd.f32 %v8030_v24, %v16521_v30  ;;  %v8176_v27 = vld [vmem:[#allocation1] sm:$0xff]  ;;  %v14983_v43 = vadd.f32 %v8031_v22, %v16522_v53  ;;  %v16532_v31 = vld [vmem:[#allocation27_spill] sm:$0xff]  ;;  %v16533_v22 = vld [vmem:[#allocation16_spill] sm:$0xff] }
0x198a   : > { %v8208_v9 = vsel %vm745_vm2, %v8176_v27, 0.0  ;;  %8177 = vst [vmem:[#allocation1] ss:$9 sm:$0xff] %v14971_v52  ;;  %v14988_v39 = vadd.f32 %v8032_v59, %v16523_v12  ;;  %v14992_v3 = vadd.f32 %v8033_v8, %v16524_v45  ;;  %v14996_v10 = vadd.f32 %v8034_v49, %v16525_v44  ;;  %v16534_v53 = vld [vmem:[#allocation26_spill] sm:$0xff]  ;;  %v16535_v12 = vld [vmem:[#allocation20_spill] sm:$0xff] }
0x198b   : > { %8209 = vadd.xlane.f32.xlu1 %v8208_v9  ;;  %8178 = vst [vmem:[#allocation1 + $0x1] ss:$9 sm:$0xff] %v14974_v50  ;;  %v16536_v44 = vld [vmem:[#allocation24_spill] sm:$0xff] }
0x198c   : > { %8179 = vst [vmem:[#allocation1 + $0x2] ss:$9 sm:$0xff] %v14977_v42 }
0x198d   : > { %8180 = vst [vmem:[#allocation1 + $0x3] ss:$9 sm:$0xff] %v14980_v18 }
0x198e   : > { %8181 = vst [vmem:[#allocation1 + $0x4] ss:$9 sm:$0xff] %v14983_v43 }
0x198f   : > { %8182 = vst [vmem:[#allocation1 + $0x5] ss:$9 sm:$0xff] %v14988_v39 }
0x1990   : > { %8183 = vst [vmem:[#allocation1 + $0x6] ss:$9 sm:$0xff] %v14992_v3 }
0x1991   : > { %8184 = vst [vmem:[#allocation1 + $0x7] ss:$9 sm:$0xff] %v14996_v10 }
0x1997   : > { %v8003_v34 = vpop.f32.mrf.mxu0 }
0x1998   : > { %v8185_v56 = vld [vmem:[#allocation1] sm:$0xff]  ;;  %v8004_v21 = vadd.f32 %v14899_v35, %v8003_v34 }
0x1999   : > { %v8211_v38 = vsel %vm745_vm2, %v8185_v56, 0.0  ;;  %v16537_v56 = vld [vmem:[#allocation25_spill] sm:$0xff] }
0x199a   : > { %8212 = vadd.xlane.f32.xlu0 %v8211_v38  ;;  %v8035_v37 = vrot.slane %v8004_v21, 1  ;;  %v8036_v16 = vrot.slane %v8004_v21, 2  ;;  %v8037_v55 = vrot.slane %v8004_v21, 3  ;;  %v8038_v6 = vrot.slane %v8004_v21, 4  ;;  %v16538_v38 = vld [vmem:[#allocation10_spill] sm:$0xff] }
0x199b   : > { %v8039_v60 = vrot.slane %v8004_v21, 5  ;;  %v8040_v11 = vrot.slane %v8004_v21, 6  ;;  %v15006_v51 = vadd.f32 %v8004_v21, %v16526_v46  ;;  %v8041_v17 = vrot.slane %v8004_v21, 7 }
0x199c   : > { %v15009_v36 = vadd.f32 %v8035_v37, %v16527_v29  ;;  %v15012_v26 = vadd.f32 %v8036_v16, %v16528_v47  ;;  %v15015_v7 = vadd.f32 %v8037_v55, %v16529_v33  ;;  %v15018_v40 = vadd.f32 %v8038_v6, %v16530_v23 }
0x199d   : > { %8186 = vst [vmem:[#allocation1] ss:$9 sm:$0xff] %v15006_v51  ;;  %v15022_v57 = vadd.f32 %v8039_v60, %v16531_v4  ;;  %v15026_v24 = vadd.f32 %v8040_v11, %v16532_v31  ;;  %v15030_v59 = vadd.f32 %v8041_v17, %v16533_v22 }
0x199e   : > { %8187 = vst [vmem:[#allocation1 + $0x1] ss:$9 sm:$0xff] %v15009_v36 }
0x199f   : > { %8188 = vst [vmem:[#allocation1 + $0x2] ss:$9 sm:$0xff] %v15012_v26 }
0x19a0   : > { %8189 = vst [vmem:[#allocation1 + $0x3] ss:$9 sm:$0xff] %v15015_v7 }
0x19a1   : > { %8190 = vst [vmem:[#allocation1 + $0x4] ss:$9 sm:$0xff] %v15018_v40 }
0x19a2   : > { %8191 = vst [vmem:[#allocation1 + $0x5] ss:$9 sm:$0xff] %v15022_v57 }
0x19a3   : > { %8192 = vst [vmem:[#allocation1 + $0x6] ss:$9 sm:$0xff] %v15026_v24 }
0x19a4   : > { %8193 = vst [vmem:[#allocation1 + $0x7] ss:$9 sm:$0xff] %v15030_v59 }
0x19a8   : > { %v8006_v8 = vpop.f32.mrf.mxu0 }
0x19a9   : > { %v8007_v5 = vadd.f32 %v14899_v35, %v8006_v8 }
0x19ab   : > { %v8194_v49 = vld [vmem:[#allocation1] sm:$0xff]  ;;  %v8042_v13 = vrot.slane %v8007_v5, 1  ;;  %v8043_v30 = vrot.slane %v8007_v5, 2  ;;  %v8044_v27 = vrot.slane %v8007_v5, 3  ;;  %v15040_v9 = vadd.f32 %v8007_v5, %v16534_v53 }
0x19ac   : > { %v8214_v15 = vsel %vm745_vm2, %v8194_v49, 0.0 }
0x19ad   : > { %8215 = vadd.xlane.f32.xlu2 %v8214_v15  ;;  %v15043_v45 = vadd.f32 %v8042_v13, %v16535_v12  ;;  %v15046_v34 = vadd.f32 %v8043_v30, %v16536_v44  ;;  %v15049_v21 = vadd.f32 %v8044_v27, %v16537_v56  ;;  %8195 = vst [vmem:[#allocation1] ss:$9 sm:$0xff] %v15040_v9 }
0x19af   : > { %8196 = vst [vmem:[#allocation1 + $0x1] ss:$9 sm:$0xff] %v15043_v45 }
0x19b0   : > { %8197 = vst [vmem:[#allocation1 + $0x2] ss:$9 sm:$0xff] %v15046_v34 }
0x19b1   : > { %8198 = vst [vmem:[#allocation1 + $0x3] ss:$9 sm:$0xff] %v15049_v21 }
0x19b6   : > { %v8207_v35 = vpop.xlane.xlu2 %8206 }
0x19b7   : > { %v8220_v37 = vmul.f32 %v8207_v35, %v16538_v38 }
0x19b8   : > { %v8199_v31 = vld [vmem:[#allocation1] sm:$0xff] }
0x19b9   : > { %v8230_v16 = vperm.slane %v8220_v37, 0  ;;  %v8231_v55 = vperm.slane %v8220_v37, 1  ;;  %v8232_v6 = vperm.slane %v8220_v37, 2  ;;  %v8233_v60 = vperm.slane %v8220_v37, 3 }
0x19ba   : > { %v8234_v11 = vperm.slane %v8220_v37, 4  ;;  %v8235_v46 = vperm.slane %v8220_v37, 5  ;;  %v8236_v17 = vperm.slane %v8220_v37, 6  ;;  %v8237_v23 = vperm.slane %v8220_v37, 7 }
0x19bb   : > { %v15057_v29 = vsub.f32 %v14904_v1, %v8230_v16  ;;  %v15060_v47 = vsub.f32 %v14907_v25, %v8231_v55  ;;  %v15063_v33 = vsub.f32 %v14910_v48, %v8232_v6  ;;  %v15066_v4 = vsub.f32 %v14913_v62, %v8233_v60 }
0x19bc   : > { %v15069_v22 = vsub.f32 %v14916_v19, %v8234_v11  ;;  %v15074_v1 = vsub.f32 %v14920_v63, %v8235_v46  ;;  %v15079_v48 = vsub.f32 %v14924_v41, %v8236_v17  ;;  %v8217_v5 = vsel %vm3688_vm8, %v8199_v31, 0.0 }
0x19bd   : > { %v8338_v8 = vmul.f32 %v15057_v29, %v15057_v29  ;;  %v8339_v25 = vmul.f32 %v15060_v47, %v15060_v47  ;;  %v8340_v62 = vmul.f32 %v15063_v33, %v15063_v33  ;;  %v15085_v19 = vsub.f32 %v14928_v54, %v8237_v23  ;;  %8218 = vadd.xlane.f32.xlu1 %v8217_v5 }
0x19be   : > { %v8341_v49 = vmul.f32 %v15066_v4, %v15066_v4  ;;  %v8342_v63 = vmul.f32 %v15069_v22, %v15069_v22  ;;  %v8343_v41 = vmul.f32 %v15074_v1, %v15074_v1  ;;  %v8344_v15 = vmul.f32 %v15079_v48, %v15079_v48 }
0x19bf   : > { %8410 = vst [vmem:[#allocation1] ss:$9 sm:$0xff] %v8338_v8  ;;  %v8345_v54 = vmul.f32 %v15085_v19, %v15085_v19 }
0x19c0   : > { %8412 = vst [vmem:[#allocation1 + $0x1] ss:$9 sm:$0xff] %v8339_v25 }
0x19c1   : > { %8414 = vst [vmem:[#allocation1 + $0x2] ss:$9 sm:$0xff] %v8340_v62 }
0x19c2   : > { %8416 = vst [vmem:[#allocation1 + $0x3] ss:$9 sm:$0xff] %v8341_v49 }
0x19c3   : > { %8418 = vst [vmem:[#allocation1 + $0x4] ss:$9 sm:$0xff] %v8342_v63 }
0x19c4   : > { %8420 = vst [vmem:[#allocation1 + $0x5] ss:$9 sm:$0xff] %v8343_v41 }
0x19c5   : > { %8422 = vst [vmem:[#allocation1 + $0x6] ss:$9 sm:$0xff] %v8344_v15 }
0x19c6   : > { %8424 = vst [vmem:[#allocation1 + $0x7] ss:$9 sm:$0xff] %v8345_v54 }
0x19cd   : > { %v8425_v13 = vld [vmem:[#allocation1] sm:$0xff] }
0x19ce   : > { %v8463_v30 = vsel %vm745_vm2, %v8425_v13, 0.0 }
0x19cf   : > { %8464 = vadd.xlane.f32.xlu2 %v8463_v30 }
0x19fe   : > { %v8210_v27 = vpop.xlane.xlu1 %8209 }
0x19ff   : > { %v8221_v53 = vmul.f32 %v8210_v27, %v16538_v38 }
0x1a01   : > { %v8238_v12 = vperm.slane %v8221_v53, 0  ;;  %v8239_v44 = vperm.slane %v8221_v53, 1  ;;  %v8240_v56 = vperm.slane %v8221_v53, 2  ;;  %v8241_v35 = vperm.slane %v8221_v53, 3 }
0x1a02   : > { %v8242_v37 = vperm.slane %v8221_v53, 4  ;;  %v8243_v16 = vperm.slane %v8221_v53, 5  ;;  %v8244_v55 = vperm.slane %v8221_v53, 6  ;;  %v8245_v6 = vperm.slane %v8221_v53, 7 }
0x1a03   : > { %v15100_v60 = vsub.f32 %v14938_v20, %v8238_v12  ;;  %v15103_v11 = vsub.f32 %v14941_v28, %v8239_v44  ;;  %v15106_v46 = vsub.f32 %v14944_v0, %v8240_v56  ;;  %v15109_v17 = vsub.f32 %v14947_v14, %v8241_v35 }
0x1a04   : > { %v15112_v23 = vsub.f32 %v14950_v58, %v8242_v37  ;;  %v15115_v31 = vsub.f32 %v14954_v2, %v8243_v16  ;;  %v15118_v8 = vsub.f32 %v14958_v32, %v8244_v55  ;;  %v15127_v14 = vsub.f32 %v14962_v61, %v8245_v6 }
0x1a05   : > { %v8346_v20 = vmul.f32 %v15100_v60, %v15100_v60  ;;  %v8347_v28 = vmul.f32 %v15103_v11, %v15103_v11  ;;  %v8348_v0 = vmul.f32 %v15106_v46, %v15106_v46  ;;  %v8349_v58 = vmul.f32 %v15109_v17, %v15109_v17 }
0x1a06   : > { %v8350_v2 = vmul.f32 %v15112_v23, %v15112_v23  ;;  %v8351_v32 = vmul.f32 %v15115_v31, %v15115_v31  ;;  %v8352_v25 = vmul.f32 %v15118_v8, %v15118_v8  ;;  %v8353_v62 = vmul.f32 %v15127_v14, %v15127_v14 }
0x1a07   : > { %8426 = vst [vmem:[#allocation1] ss:$9 sm:$0xff] %v8346_v20 }
0x1a08   : > { %8427 = vst [vmem:[#allocation1 + $0x1] ss:$9 sm:$0xff] %v8347_v28 }
0x1a09   : > { %8428 = vst [vmem:[#allocation1 + $0x2] ss:$9 sm:$0xff] %v8348_v0 }
0x1a0a   : > { %8429 = vst [vmem:[#allocation1 + $0x3] ss:$9 sm:$0xff] %v8349_v58 }
0x1a0b   : > { %8430 = vst [vmem:[#allocation1 + $0x4] ss:$9 sm:$0xff] %v8350_v2 }
0x1a0c   : > { %8431 = vst [vmem:[#allocation1 + $0x5] ss:$9 sm:$0xff] %v8351_v32 }
0x1a0d   : > { %8432 = vst [vmem:[#allocation1 + $0x6] ss:$9 sm:$0xff] %v8352_v25  ;;  %v8213_v61 = vpop.xlane.xlu0 %8212 }
0x1a0e   : > { %8433 = vst [vmem:[#allocation1 + $0x7] ss:$9 sm:$0xff] %v8353_v62  ;;  %v8222_v5 = vmul.f32 %v8213_v61, %v16538_v38 }
0x1a10   : > { %v8246_v49 = vperm.slane %v8222_v5, 0  ;;  %v8247_v63 = vperm.slane %v8222_v5, 1  ;;  %v8248_v41 = vperm.slane %v8222_v5, 2  ;;  %v8249_v15 = vperm.slane %v8222_v5, 3 }
0x1a11   : > { %v8250_v54 = vperm.slane %v8222_v5, 4  ;;  %v8251_v13 = vperm.slane %v8222_v5, 5  ;;  %v8252_v30 = vperm.slane %v8222_v5, 6  ;;  %v8253_v27 = vperm.slane %v8222_v5, 7 }
0x1a12   : > { %v15141_v53 = vsub.f32 %v14971_v52, %v8246_v49  ;;  %v15144_v12 = vsub.f32 %v14974_v50, %v8247_v63  ;;  %v15147_v44 = vsub.f32 %v14977_v42, %v8248_v41  ;;  %v15150_v56 = vsub.f32 %v14980_v18, %v8249_v15 }
0x1a13   : > { %v15153_v35 = vsub.f32 %v14983_v43, %v8250_v54  ;;  %v15156_v37 = vsub.f32 %v14988_v39, %v8251_v13  ;;  %v15159_v16 = vsub.f32 %v14992_v3, %v8252_v30  ;;  %v15168_v18 = vsub.f32 %v14996_v10, %v8253_v27 }
0x1a14   : > { %v8354_v52 = vmul.f32 %v15141_v53, %v15141_v53  ;;  %v8355_v50 = vmul.f32 %v15144_v12, %v15144_v12  ;;  %v8356_v42 = vmul.f32 %v15147_v44, %v15147_v44  ;;  %v8357_v43 = vmul.f32 %v15150_v56, %v15150_v56 }
0x1a15   : > { %v8434_v39 = vld [vmem:[#allocation1] sm:$0xff]  ;;  %v8358_v3 = vmul.f32 %v15153_v35, %v15153_v35  ;;  %v8359_v6 = vmul.f32 %v15156_v37, %v15156_v37  ;;  %v8360_v20 = vmul.f32 %v15159_v16, %v15159_v16  ;;  %v8361_v10 = vmul.f32 %v15168_v18, %v15168_v18 }
0x1a16   : > { %v8466_v55 = vsel %vm745_vm2, %v8434_v39, 0.0  ;;  %8435 = vst [vmem:[#allocation1] ss:$9 sm:$0xff] %v8354_v52 }
0x1a17   : > { %8467 = vadd.xlane.f32.xlu0 %v8466_v55  ;;  %8436 = vst [vmem:[#allocation1 + $0x1] ss:$9 sm:$0xff] %v8355_v50 }
0x1a18   : > { %8437 = vst [vmem:[#allocation1 + $0x2] ss:$9 sm:$0xff] %v8356_v42 }
0x1a19   : > { %8438 = vst [vmem:[#allocation1 + $0x3] ss:$9 sm:$0xff] %v8357_v43 }
0x1a1a   : > { %8439 = vst [vmem:[#allocation1 + $0x4] ss:$9 sm:$0xff] %v8358_v3 }
0x1a1b   : > { %8440 = vst [vmem:[#allocation1 + $0x5] ss:$9 sm:$0xff] %v8359_v6 }
0x1a1c   : > { %8441 = vst [vmem:[#allocation1 + $0x6] ss:$9 sm:$0xff] %v8360_v20 }
0x1a1d   : > { %8442 = vst [vmem:[#allocation1 + $0x7] ss:$9 sm:$0xff] %v8361_v10 }
0x1a20   : > { %v8216_v28 = vpop.xlane.xlu2 %8215 }
0x1a21   : > { %v8223_v0 = vmul.f32 %v8216_v28, %v16538_v38 }
0x1a23   : > { %v8254_v58 = vperm.slane %v8223_v0, 0  ;;  %v8255_v2 = vperm.slane %v8223_v0, 1  ;;  %v8256_v32 = vperm.slane %v8223_v0, 2  ;;  %v8257_v25 = vperm.slane %v8223_v0, 3 }
0x1a24   : > { %v8443_v62 = vld [vmem:[#allocation1] sm:$0xff]  ;;  %v8258_v61 = vperm.slane %v8223_v0, 4  ;;  %v8259_v5 = vperm.slane %v8223_v0, 5  ;;  %v8260_v49 = vperm.slane %v8223_v0, 6  ;;  %v8261_v63 = vperm.slane %v8223_v0, 7 }
0x1a25   : > { %v8469_v41 = vsel %vm745_vm2, %v8443_v62, 0.0  ;;  %v15184_v15 = vsub.f32 %v15006_v51, %v8254_v58  ;;  %v15187_v54 = vsub.f32 %v15009_v36, %v8255_v2  ;;  %v15190_v13 = vsub.f32 %v15012_v26, %v8256_v32 }
0x1a26   : > { %8470 = vadd.xlane.f32.xlu1 %v8469_v41  ;;  %v15193_v30 = vsub.f32 %v15015_v7, %v8257_v25  ;;  %v15196_v27 = vsub.f32 %v15018_v40, %v8258_v61  ;;  %v15199_v52 = vsub.f32 %v15022_v57, %v8259_v5  ;;  %v15202_v50 = vsub.f32 %v15026_v24, %v8260_v49  ;;  %v10151_v41 = vld [vmem:[%s16123_s11 + $0x30] sm:$0xff] }
0x1a27   : > { %v8362_v51 = vmul.f32 %v15184_v15, %v15184_v15  ;;  %v8363_v36 = vmul.f32 %v15187_v54, %v15187_v54  ;;  %v8364_v26 = vmul.f32 %v15190_v13, %v15190_v13  ;;  %v15211_v7 = vsub.f32 %v15030_v59, %v8261_v63  ;;  %v10152_v63 = vld [vmem:[%s16123_s11 + $0x38] sm:$0xff] }
0x1a28   : > { %v8365_v40 = vmul.f32 %v15193_v30, %v15193_v30  ;;  %v8366_v57 = vmul.f32 %v15196_v27, %v15196_v27  ;;  %v8367_v24 = vmul.f32 %v15199_v52, %v15199_v52  ;;  %v8368_v42 = vmul.f32 %v15202_v50, %v15202_v50  ;;  %8873 = vmatpush.msra.mxu2 %v10152_v63 }
0x1a29   : > { %8444 = vst [vmem:[#allocation1] ss:$9 sm:$0xff] %v8362_v51  ;;  %v8369_v43 = vmul.f32 %v15211_v7, %v15211_v7  ;;  %v10150_v51 = vld [vmem:[%s16123_s11 + $0x28] sm:$0xff] }
0x1a2a   : > { %8445 = vst [vmem:[#allocation1 + $0x1] ss:$9 sm:$0xff] %v8363_v36  ;;  %8874 = vmatpush.msra.mxu2 %v10151_v41  ;;  %v10149_v36 = vld [vmem:[%s16123_s11 + $0x20] sm:$0xff] }
0x1a2b   : > { %8446 = vst [vmem:[#allocation1 + $0x2] ss:$9 sm:$0xff] %v8364_v26 }
0x1a2c   : > { %8447 = vst [vmem:[#allocation1 + $0x3] ss:$9 sm:$0xff] %v8365_v40  ;;  %8875 = vmatpush.msra.mxu2 %v10150_v51 }
0x1a2d   : > { %8448 = vst [vmem:[#allocation1 + $0x4] ss:$9 sm:$0xff] %v8366_v57 }
0x1a2e   : > { %8449 = vst [vmem:[#allocation1 + $0x5] ss:$9 sm:$0xff] %v8367_v24  ;;  %8876 = vmatpush.msra.mxu2 %v10149_v36  ;;  %v15262_v24 = vld [vmem:[%s16121_s9 + $0x1] ss:$0 sm:$0xff] }
0x1a2f   : > { %8450 = vst [vmem:[#allocation1 + $0x6] ss:$9 sm:$0xff] %v8368_v42 }
0x1a30   : > { %8451 = vst [vmem:[#allocation1 + $0x7] ss:$9 sm:$0xff] %v8369_v43  ;;  %v8219_v59 = vpop.xlane.xlu1 %8218  ;;  %v15267_v43 = vld [vmem:[%s16122_s10 + $0x1] ss:$0 sm:$0xff] }
0x1a31   : > { %v8224_v39 = vmul.f32 %v8219_v59, %v16538_v38 }
0x1a33   : > { %v8262_v3 = vperm.slane %v8224_v39, 0  ;;  %v8263_v55 = vperm.slane %v8224_v39, 1  ;;  %v8264_v6 = vperm.slane %v8224_v39, 2  ;;  %v8265_v20 = vperm.slane %v8224_v39, 3 }
0x1a34   : > { %v15270_v39 = vrot.slane %v15262_v24, 1 }
0x1a35   : > { %v15226_v0 = vsub.f32 %v15040_v9, %v8262_v3  ;;  %v15229_v58 = vsub.f32 %v15043_v45, %v8263_v55  ;;  %v15232_v2 = vsub.f32 %v15046_v34, %v8264_v6  ;;  %v15235_v32 = vsub.f32 %v15049_v21, %v8265_v20 }
0x1a36   : > { %v15273_v3 = vrot.slane %v15262_v24, 2  ;;  %v15276_v55 = vrot.slane %v15262_v24, 3  ;;  %v15279_v6 = vrot.slane %v15262_v24, 4 }
0x1a37   : > { %v8452_v10 = vld [vmem:[#allocation1] sm:$0xff]  ;;  %16539 = vst [vmem:[#allocation54_spill] sm:$0xff] %v15226_v0  ;;  %v8370_v25 = vmul.f32 %v15226_v0, %v15226_v0  ;;  %v8371_v62 = vmul.f32 %v15229_v58, %v15229_v58  ;;  %v8372_v9 = vmul.f32 %v15232_v2, %v15232_v2  ;;  %v8373_v45 = vmul.f32 %v15235_v32, %v15235_v32 }
0x1a38   : > { %v8472_v28 = vsel %vm745_vm2, %v8452_v10, 0.0  ;;  %16540 = vst [vmem:[#allocation52_spill] sm:$0xff] %v15229_v58  ;;  %v15282_v10 = vrot.slane %v15262_v24, 5 }
0x1a39   : > { %16541 = vst [vmem:[#allocation44_spill] sm:$0xff] %v15232_v2  ;;  %8473 = vadd.xlane.f32.xlu2 %v8472_v28  ;;  %v15285_v28 = vrot.slane %v15262_v24, 6 }
0x1a3a   : > { %16542 = vst [vmem:[#allocation45_spill] sm:$0xff] %v15235_v32 }
0x1a3b   : > { %8453 = vst [vmem:[#allocation1] ss:$9 sm:$0xff] %v8370_v25  ;;  %v15288_v25 = vrot.slane %v15262_v24, 7 }
0x1a3c   : > { %8454 = vst [vmem:[#allocation1 + $0x1] ss:$9 sm:$0xff] %v8371_v62  ;;  %v15291_v62 = vrot.slane %v15267_v43, 1 }
0x1a3d   : > { %8455 = vst [vmem:[#allocation1 + $0x2] ss:$9 sm:$0xff] %v8372_v9  ;;  %v15294_v9 = vrot.slane %v15267_v43, 2 }
0x1a3e   : > { %8456 = vst [vmem:[#allocation1 + $0x3] ss:$9 sm:$0xff] %v8373_v45  ;;  %v15297_v45 = vrot.slane %v15267_v43, 3 }
0x1a42   : > { %v8465_v34 = vpop.xlane.xlu2 %8464 }
0x1a43   : > { %v8478_v21 = vmul.f32 %v8465_v34, %v16538_v38  ;;  %v15300_v34 = vrot.slane %v15267_v43, 4 }
0x1a45   : > { %v8483_v61 = vadd.f32 1e-05, %v8478_v21  ;;  %v8457_v5 = vld [vmem:[#allocation1] sm:$0xff] }
0x1a46   : > { %v8475_v49 = vsel %vm3688_vm8, %v8457_v5, 0.0 }
0x1a47   : > { %10545 = vrsqrt.f32 %v8483_v61  ;;  %8476 = vadd.xlane.f32.xlu0 %v8475_v49  ;;  %vm8494_vm1 = vweird.f32 %v8483_v61 }
0x1a4d   : > { %v10546_v26 = vpop.eup %10545 }
0x1a4e   : > { %v8489_v40 = vmul.f32 %v10546_v26, %v8483_v61  ;;  %vm8495_vm0 = vweird.f32 %v10546_v26 }
0x1a4f   : > { %vm8496_vm3 = vmor %vm8494_vm1, %vm8495_vm0 }
0x1a50   : > { %v8490_v57 = vmul.f32 %v10546_v26, %v8489_v40 }
0x1a52   : > { %v8491_v42 = vmul.f32 0.5, %v8490_v57 }
0x1a54   : > { %v8492_v59 = vsub.f32 1.5, %v8491_v42 }
0x1a56   : > { %v8493_v20 = vmul.f32 %v10546_v26, %v8492_v59 }
0x1a58   : > { %v8497_v21 = vsel %vm8496_vm3, %v10546_v26, %v8493_v20 }
0x1a59   : > { %v8543_v61 = vperm.slane %v8497_v21, 0  ;;  %v8544_v5 = vperm.slane %v8497_v21, 1  ;;  %v8545_v49 = vperm.slane %v8497_v21, 2  ;;  %v8546_v63 = vperm.slane %v8497_v21, 3 }
0x1a5a   : > { %v8547_v41 = vperm.slane %v8497_v21, 4  ;;  %v8548_v51 = vperm.slane %v8497_v21, 5  ;;  %v8549_v36 = vperm.slane %v8497_v21, 6  ;;  %v8550_v40 = vperm.slane %v8497_v21, 7 }
0x1a5b   : > { %v8615_v57 = vmul.f32 %v8543_v61, %v15057_v29  ;;  %v8616_v42 = vmul.f32 %v8544_v5, %v15060_v47  ;;  %v8617_v59 = vmul.f32 %v8545_v49, %v15063_v33  ;;  %v8618_v32 = vmul.f32 %v8546_v63, %v15066_v4 }
0x1a5c   : > { %v8619_v2 = vmul.f32 %v8547_v41, %v15069_v22  ;;  %v8620_v26 = vmul.f32 %v8548_v51, %v15074_v1  ;;  %v8621_v20 = vmul.f32 %v8549_v36, %v15079_v48  ;;  %v8622_v58 = vmul.f32 %v8550_v40, %v15085_v19 }
0x1a5d   : > { %v8668_v0 = vmul.f32 %v15262_v24, %v8615_v57  ;;  %v8669_v21 = vmul.f32 %v15270_v39, %v8616_v42  ;;  %v8670_v29 = vmul.f32 %v15273_v3, %v8617_v59  ;;  %v8671_v47 = vmul.f32 %v15276_v55, %v8618_v32 }
0x1a5e   : > { %v15315_v33 = vrot.slane %v15267_v43, 5  ;;  %v15318_v4 = vrot.slane %v15267_v43, 6  ;;  %v8672_v22 = vmul.f32 %v15279_v6, %v8619_v2  ;;  %v8673_v1 = vmul.f32 %v15282_v10, %v8620_v26 }
0x1a5f   : > { %v8674_v48 = vmul.f32 %v15285_v28, %v8621_v20  ;;  %v15324_v19 = vadd.f32 %v15267_v43, %v8668_v0  ;;  %v15327_v61 = vadd.f32 %v15291_v62, %v8669_v21  ;;  %v15330_v32 = vadd.f32 %v15294_v9, %v8670_v29 }
0x1a60   : > { %v15333_v5 = vrot.slane %v15267_v43, 7  ;;  %v8675_v49 = vmul.f32 %v15288_v25, %v8622_v58  ;;  %v15337_v2 = vadd.f32 %v15297_v45, %v8671_v47  ;;  %v15340_v63 = vadd.f32 %v15300_v34, %v8672_v22 }
0x1a61   : > { %8803 = vst [vmem:[#allocation1] ss:$9 sm:$0xff] %v15324_v19  ;;  %v15344_v0 = vadd.f32 %v15315_v33, %v8673_v1  ;;  %v15348_v41 = vadd.f32 %v15318_v4, %v8674_v48 }
0x1a62   : > { %16543 = vst [vmem:[#allocation58_spill] sm:$0xff] %v15340_v63  ;;  %v15352_v58 = vadd.f32 %v15333_v5, %v8675_v49 }
0x1a63   : > { %16544 = vst [vmem:[#allocation57_spill] sm:$0xff] %v15344_v0 }
0x1a64   : > { %8805 = vst [vmem:[#allocation1 + $0x1] ss:$9 sm:$0xff] %v15327_v61 }
0x1a65   : > { %16545 = vst [vmem:[#allocation50_spill] sm:$0xff] %v15348_v41 }
0x1a66   : > { %8807 = vst [vmem:[#allocation1 + $0x2] ss:$9 sm:$0xff] %v15330_v32 }
0x1a67   : > { %16546 = vst [vmem:[#allocation51_spill] sm:$0xff] %v15352_v58 }
0x1a68   : > { %8809 = vst [vmem:[#allocation1 + $0x3] ss:$9 sm:$0xff] %v15337_v2 }
0x1a69   : > { %8811 = vst [vmem:[#allocation1 + $0x4] ss:$9 sm:$0xff] %v15340_v63 }
0x1a6a   : > { %8813 = vst [vmem:[#allocation1 + $0x5] ss:$9 sm:$0xff] %v15344_v0 }
0x1a6b   : > { %8815 = vst [vmem:[#allocation1 + $0x6] ss:$9 sm:$0xff] %v15348_v41 }
0x1a6c   : > { %8817 = vst [vmem:[#allocation1 + $0x7] ss:$9 sm:$0xff] %v15352_v58 }
0x1a73   : > { %v8818_v51 = vld [vmem:[#allocation1] sm:$0xff] }
0x1a74   : > { %10154 = vmatmul.msk.f32.vlgmr.msra.gmra.mxu2 %vm745_vm2, %v8818_v51 }
0x1a8a   : > { %v8468_v36 = vpop.xlane.xlu0 %8467 }
0x1a8b   : > { %v8479_v40 = vmul.f32 %v8468_v36, %v16538_v38 }
0x1a8d   : > { %v8484_v57 = vadd.f32 1e-05, %v8479_v40 }
0x1a8f   : > { %10547 = vrsqrt.f32 %v8484_v57  ;;  %vm8504_vm5 = vweird.f32 %v8484_v57 }
0x1a95   : > { %v10548_v42 = vpop.eup %10547 }
0x1a96   : > { %v8499_v59 = vmul.f32 %v10548_v42, %v8484_v57  ;;  %vm8505_vm4 = vweird.f32 %v10548_v42 }
0x1a97   : > { %vm8506_vm6 = vmor %vm8504_vm5, %vm8505_vm4 }
0x1a98   : > { %v8500_v26 = vmul.f32 %v10548_v42, %v8499_v59 }
0x1a99   : > { %v8471_v20 = vpop.xlane.xlu1 %8470 }
0x1a9a   : > { %v8501_v21 = vmul.f32 0.5, %v8500_v26  ;;  %v8480_v29 = vmul.f32 %v8471_v20, %v16538_v38 }
0x1a9c   : > { %v8502_v47 = vsub.f32 1.5, %v8501_v21  ;;  %v8485_v22 = vadd.f32 1e-05, %v8480_v29 }
0x1a9e   : > { %v8503_v1 = vmul.f32 %v10548_v42, %v8502_v47  ;;  %10549 = vrsqrt.f32 %v8485_v22  ;;  %vm8514_vm11 = vweird.f32 %v8485_v22 }
0x1aa0   : > { %v8507_v48 = vsel %vm8506_vm6, %v10548_v42, %v8503_v1 }
0x1aa1   : > { %v8551_v49 = vperm.slane %v8507_v48, 0  ;;  %v8552_v51 = vperm.slane %v8507_v48, 1  ;;  %v8553_v36 = vperm.slane %v8507_v48, 2  ;;  %v8554_v40 = vperm.slane %v8507_v48, 3 }
0x1aa2   : > { %v8555_v58 = vperm.slane %v8507_v48, 4  ;;  %v8556_v41 = vperm.slane %v8507_v48, 5  ;;  %v8557_v0 = vperm.slane %v8507_v48, 6  ;;  %v8558_v59 = vperm.slane %v8507_v48, 7 }
0x1aa3   : > { %v8623_v26 = vmul.f32 %v8551_v49, %v15100_v60  ;;  %v8624_v20 = vmul.f32 %v8552_v51, %v15103_v11  ;;  %v8625_v21 = vmul.f32 %v8553_v36, %v15106_v46  ;;  %v8626_v29 = vmul.f32 %v8554_v40, %v15109_v17 }
0x1aa4   : > { %v8627_v57 = vmul.f32 %v8555_v58, %v15112_v23  ;;  %v8628_v42 = vmul.f32 %v8556_v41, %v15115_v31  ;;  %v8629_v47 = vmul.f32 %v8557_v0, %v15118_v8  ;;  %v8630_v1 = vmul.f32 %v8558_v59, %v15127_v14  ;;  %v10550_v49 = vpop.eup %10549 }
0x1aa5   : > { %v8676_v63 = vmul.f32 %v15262_v24, %v8623_v26  ;;  %v8677_v48 = vmul.f32 %v15270_v39, %v8624_v20  ;;  %v8678_v60 = vmul.f32 %v15273_v3, %v8625_v21  ;;  %v8679_v11 = vmul.f32 %v15276_v55, %v8626_v29 }
0x1aa6   : > { %v8680_v46 = vmul.f32 %v15279_v6, %v8627_v57  ;;  %v8681_v17 = vmul.f32 %v15282_v10, %v8628_v42  ;;  %v8682_v23 = vmul.f32 %v15285_v28, %v8629_v47  ;;  %v8683_v0 = vmul.f32 %v15288_v25, %v8630_v1 }
0x1aa7   : > { %v15378_v31 = vadd.f32 %v15267_v43, %v8676_v63  ;;  %v15381_v8 = vadd.f32 %v15291_v62, %v8677_v48  ;;  %v15384_v14 = vadd.f32 %v15294_v9, %v8678_v60  ;;  %v15388_v41 = vadd.f32 %v15297_v45, %v8679_v11 }
0x1aa8   : > { %v15391_v58 = vadd.f32 %v15300_v34, %v8680_v46  ;;  %v8509_v51 = vmul.f32 %v10550_v49, %v8485_v22  ;;  %v15395_v63 = vadd.f32 %v15315_v33, %v8681_v17  ;;  %v15399_v36 = vadd.f32 %v15318_v4, %v8682_v23 }
0x1aa9   : > { %8819 = vst [vmem:[#allocation1] ss:$9 sm:$0xff] %v15378_v31  ;;  %v15403_v59 = vadd.f32 %v15333_v5, %v8683_v0  ;;  %vm8515_vm10 = vweird.f32 %v10550_v49 }
0x1aaa   : > { %8820 = vst [vmem:[#allocation1 + $0x1] ss:$9 sm:$0xff] %v15381_v8  ;;  %v8510_v40 = vmul.f32 %v10550_v49, %v8509_v51  ;;  %vm8516_vm12 = vmor %vm8514_vm11, %vm8515_vm10 }
0x1aab   : > { %8821 = vst [vmem:[#allocation1 + $0x2] ss:$9 sm:$0xff] %v15384_v14 }
0x1aac   : > { %16547 = vst [vmem:[#allocation53_spill] sm:$0xff] %v15403_v59  ;;  %v8474_v26 = vpop.xlane.xlu2 %8473  ;;  %v8511_v20 = vmul.f32 0.5, %v8510_v40 }
0x1aad   : > { %8822 = vst [vmem:[#allocation1 + $0x3] ss:$9 sm:$0xff] %v15388_v41  ;;  %v8481_v21 = vmul.f32 %v8474_v26, %v16538_v38 }
0x1aae   : > { %8823 = vst [vmem:[#allocation1 + $0x4] ss:$9 sm:$0xff] %v15391_v58  ;;  %v8512_v29 = vsub.f32 1.5, %v8511_v20 }
0x1aaf   : > { %8824 = vst [vmem:[#allocation1 + $0x5] ss:$9 sm:$0xff] %v15395_v63  ;;  %v8486_v57 = vadd.f32 1e-05, %v8481_v21 }
0x1ab0   : > { %8825 = vst [vmem:[#allocation1 + $0x6] ss:$9 sm:$0xff] %v15399_v36  ;;  %v8513_v42 = vmul.f32 %v10550_v49, %v8512_v29 }
0x1ab1   : > { %8826 = vst [vmem:[#allocation1 + $0x7] ss:$9 sm:$0xff] %v15403_v59  ;;  %10551 = vrsqrt.f32 %v8486_v57  ;;  %vm8524_vm14 = vweird.f32 %v8486_v57 }
0x1ab2   : > { %v8517_v47 = vsel %vm8516_vm12, %v10550_v49, %v8513_v42 }
0x1ab3   : > { %v8559_v1 = vperm.slane %v8517_v47, 0  ;;  %v8560_v48 = vperm.slane %v8517_v47, 1  ;;  %v8561_v60 = vperm.slane %v8517_v47, 2  ;;  %v8562_v11 = vperm.slane %v8517_v47, 3 }
0x1ab4   : > { %v8563_v46 = vperm.slane %v8517_v47, 4  ;;  %v8564_v17 = vperm.slane %v8517_v47, 5  ;;  %v8565_v23 = vperm.slane %v8517_v47, 6  ;;  %v8566_v0 = vperm.slane %v8517_v47, 7 }
0x1ab5   : > { %v8631_v51 = vmul.f32 %v8559_v1, %v15141_v53  ;;  %v8632_v40 = vmul.f32 %v8560_v48, %v15144_v12  ;;  %v8633_v26 = vmul.f32 %v8561_v60, %v15147_v44  ;;  %v8634_v20 = vmul.f32 %v8562_v11, %v15150_v56 }
0x1ab6   : > { %v8635_v22 = vmul.f32 %v8563_v46, %v15153_v35  ;;  %v8636_v49 = vmul.f32 %v8564_v17, %v15156_v37  ;;  %v8637_v21 = vmul.f32 %v8565_v23, %v15159_v16  ;;  %v8638_v29 = vmul.f32 %v8566_v0, %v15168_v18 }
0x1ab7   : > { %v8684_v59 = vmul.f32 %v15262_v24, %v8631_v51  ;;  %v8685_v47 = vmul.f32 %v15270_v39, %v8632_v40  ;;  %v8686_v53 = vmul.f32 %v15273_v3, %v8633_v26  ;;  %v8687_v12 = vmul.f32 %v15276_v55, %v8634_v20  ;;  %v10552_v44 = vpop.eup %10551 }
0x1ab8   : > { %v8827_v42 = vld [vmem:[#allocation1] sm:$0xff]  ;;  %v8688_v56 = vmul.f32 %v15279_v6, %v8635_v22  ;;  %v8689_v35 = vmul.f32 %v15282_v10, %v8636_v49  ;;  %v8690_v37 = vmul.f32 %v15285_v28, %v8637_v21  ;;  %v8691_v48 = vmul.f32 %v15288_v25, %v8638_v29  ;;  %v10166_v21 = vld [vmem:[%s16125_s13 + $0x78] sm:$0xff]  ;;  %v10165_v29 = vld [vmem:[%s16125_s13 + $0x70] sm:$0xff] }
0x1ab9   : > { %10155 = vmatmul.msk.f32.gmra.mxu2 %vm745_vm2, %v8827_v42  ;;  %v15428_v16 = vadd.f32 %v15267_v43, %v8684_v59  ;;  %v15431_v18 = vadd.f32 %v15291_v62, %v8685_v47  ;;  %v15434_v1 = vadd.f32 %v15294_v9, %v8686_v53  ;;  %v15438_v60 = vadd.f32 %v15297_v45, %v8687_v12 }
0x1aba   : > { %v8477_v11 = vpop.xlane.xlu0 %8476  ;;  %v15441_v46 = vadd.f32 %v15300_v34, %v8688_v56  ;;  %v8519_v17 = vmul.f32 %v10552_v44, %v8486_v57  ;;  %v15445_v59 = vadd.f32 %v15315_v33, %v8689_v35  ;;  %v15449_v23 = vadd.f32 %v15318_v4, %v8690_v37  ;;  %8935 = vmatpush.msra.mxu3 %v10166_v21 }
0x1abb   : > { %8828 = vst [vmem:[#allocation1] ss:$9 sm:$0xff] %v15428_v16  ;;  %v8482_v51 = vmul.f32 %v8477_v11, %v16538_v38  ;;  %v15454_v40 = vadd.f32 %v15333_v5, %v8691_v48  ;;  %vm8525_vm13 = vweird.f32 %v10552_v44 }
0x1abc   : > { %8829 = vst [vmem:[#allocation1 + $0x1] ss:$9 sm:$0xff] %v15431_v18  ;;  %v8520_v0 = vmul.f32 %v10552_v44, %v8519_v17  ;;  %vm8526_vm15 = vmor %vm8524_vm14, %vm8525_vm13  ;;  %8936 = vmatpush.msra.mxu3 %v10165_v29  ;;  %vm9803_vm13 = vcmask 253952  }
0x1abd   : > { %8830 = vst [vmem:[#allocation1 + $0x2] ss:$9 sm:$0xff] %v15434_v1  ;;  %v15460_v22 = vadd.f32 1e-05, %v8482_v51 }
0x1abe   : > { %8831 = vst [vmem:[#allocation1 + $0x3] ss:$9 sm:$0xff] %v15438_v60  ;;  %v8521_v26 = vmul.f32 0.5, %v8520_v0 }
0x1abf   : > { %8832 = vst [vmem:[#allocation1 + $0x4] ss:$9 sm:$0xff] %v15441_v46  ;;  %10553 = vrsqrt.f32 %v15460_v22  ;;  %vm8534_vm0 = vweird.f32 %v15460_v22 }
0x1ac0   : > { %8833 = vst [vmem:[#allocation1 + $0x5] ss:$9 sm:$0xff] %v15445_v59  ;;  %v8522_v20 = vsub.f32 1.5, %v8521_v26 }
0x1ac1   : > { %8834 = vst [vmem:[#allocation1 + $0x6] ss:$9 sm:$0xff] %v15449_v23 }
0x1ac2   : > { %8835 = vst [vmem:[#allocation1 + $0x7] ss:$9 sm:$0xff] %v15454_v40  ;;  %v8523_v49 = vmul.f32 %v10552_v44, %v8522_v20 }
0x1ac4   : > { %v8527_v42 = vsel %vm8526_vm15, %v10552_v44, %v8523_v49 }
0x1ac5   : > { %v8567_v47 = vperm.slane %v8527_v42, 0  ;;  %v8568_v53 = vperm.slane %v8527_v42, 1  ;;  %v8569_v12 = vperm.slane %v8527_v42, 2  ;;  %v8570_v56 = vperm.slane %v8527_v42, 3 }
0x1ac6   : > { %v8571_v35 = vperm.slane %v8527_v42, 4  ;;  %v8572_v37 = vperm.slane %v8527_v42, 5  ;;  %v8573_v57 = vperm.slane %v8527_v42, 6  ;;  %v8574_v48 = vperm.slane %v8527_v42, 7 }
0x1ac7   : > { %v8639_v11 = vmul.f32 %v8567_v47, %v15184_v15  ;;  %v8640_v17 = vmul.f32 %v8568_v53, %v15187_v54  ;;  %v8641_v0 = vmul.f32 %v8569_v12, %v15190_v13  ;;  %v8642_v44 = vmul.f32 %v8570_v56, %v15193_v30  ;;  %v10554_v13 = vpop.eup %10553  ;;  %v10164_v53 = vld [vmem:[%s16125_s13 + $0x68] sm:$0xff] }
0x1ac8   : > { %v8643_v51 = vmul.f32 %v8571_v35, %v15196_v27  ;;  %v8644_v26 = vmul.f32 %v8572_v37, %v15199_v52  ;;  %v8645_v20 = vmul.f32 %v8573_v57, %v15202_v50  ;;  %v8646_v49 = vmul.f32 %v8574_v48, %v15211_v7  ;;  %8937 = vmatpush.msra.mxu3 %v10164_v53  ;;  %v10162_v35 = vld [vmem:[%s16125_s13 + $0x58] sm:$0xff] }
0x1ac9   : > { %v8836_v21 = vld [vmem:[#allocation1] sm:$0xff]  ;;  %v8692_v42 = vmul.f32 %v15262_v24, %v8639_v11  ;;  %v8693_v29 = vmul.f32 %v15270_v39, %v8640_v17  ;;  %v8694_v15 = vmul.f32 %v15273_v3, %v8641_v0  ;;  %v8695_v54 = vmul.f32 %v15276_v55, %v8642_v44 }
0x1aca   : > { %10156 = vmatmul.msk.f32.gmra.mxu2 %vm745_vm2, %v8836_v21  ;;  %v8696_v30 = vmul.f32 %v15279_v6, %v8643_v51  ;;  %v8697_v27 = vmul.f32 %v15282_v10, %v8644_v26  ;;  %v8698_v52 = vmul.f32 %v15285_v28, %v8645_v20  ;;  %v10163_v6 = vld [vmem:[%s16125_s13 + $0x60] sm:$0xff]  ;;  %v8699_v10 = vmul.f32 %v15288_v25, %v8646_v49  ;;  %v16548_v49 = vld [vmem:[#allocation54_spill] sm:$0xff] }
0x1acb   : > { %v15487_v50 = vadd.f32 %v15267_v43, %v8692_v42  ;;  %v15490_v7 = vadd.f32 %v15291_v62, %v8693_v29  ;;  %v15493_v47 = vadd.f32 %v15294_v9, %v8694_v15  ;;  %v15503_v28 = vadd.f32 %v15297_v45, %v8695_v54  ;;  %8938 = vmatpush.msra.mxu3 %v10163_v6  ;;  %v10159_v17 = vld [vmem:[%s16125_s13 + $0x40] sm:$0xff]  ;;  %v16549_v42 = vld [vmem:[#allocation52_spill] sm:$0xff] }
0x1acc   : > { %v15506_v12 = vadd.f32 %v15300_v34, %v8696_v30  ;;  %v8529_v56 = vmul.f32 %v10554_v13, %v15460_v22  ;;  %v15514_v37 = vadd.f32 %v15315_v33, %v8697_v27  ;;  %v15518_v25 = vadd.f32 %v15318_v4, %v8698_v52  ;;  %v10161_v4 = vld [vmem:[%s16125_s13 + $0x50] sm:$0xff]  ;;  %v16550_v15 = vld [vmem:[#allocation44_spill] sm:$0xff]  ;;  %v16551_v22 = vld [vmem:[#allocation45_spill] sm:$0xff] }
0x1acd   : > { %8837 = vst [vmem:[#allocation1] ss:$9 sm:$0xff] %v15487_v50  ;;  %v15522_v57 = vadd.f32 %v15333_v5, %v8699_v10  ;;  %8939 = vmatpush.msra.mxu3 %v10162_v35  ;;  %vm8535_vm9 = vweird.f32 %v10554_v13  ;;  %v10160_v5 = vld [vmem:[%s16125_s13 + $0x48] sm:$0xff] }
0x1ace   : > { %8838 = vst [vmem:[#allocation1 + $0x1] ss:$9 sm:$0xff] %v15490_v7  ;;  %v8530_v34 = vmul.f32 %v10554_v13, %v8529_v56  ;;  %vm8536_vm1 = vmor %vm8534_vm0, %vm8535_vm9 }
0x1acf   : > { %8839 = vst [vmem:[#allocation1 + $0x2] ss:$9 sm:$0xff] %v15493_v47  ;;  %8940 = vmatpush.msra.mxu3 %v10161_v4 }
0x1ad0   : > { %8840 = vst [vmem:[#allocation1 + $0x3] ss:$9 sm:$0xff] %v15503_v28  ;;  %v8531_v48 = vmul.f32 0.5, %v8530_v34 }
0x1ad1   : > { %8841 = vst [vmem:[#allocation1 + $0x4] ss:$9 sm:$0xff] %v15506_v12  ;;  %8941 = vmatpush.msra.mxu3 %v10160_v5 }
0x1ad2   : > { %8842 = vst [vmem:[#allocation1 + $0x5] ss:$9 sm:$0xff] %v15514_v37  ;;  %v8532_v33 = vsub.f32 1.5, %v8531_v48 }
0x1ad3   : > { %8843 = vst [vmem:[#allocation1 + $0x6] ss:$9 sm:$0xff] %v15518_v25  ;;  %8942 = vmatpush.msra.mxu3 %v10159_v17 }
0x1ad4   : > { %8844 = vst [vmem:[#allocation1 + $0x7] ss:$9 sm:$0xff] %v15522_v57  ;;  %v8533_v11 = vmul.f32 %v10554_v13, %v8532_v33 }
0x1ad6   : > { %v8537_v0 = vsel %vm8536_vm1, %v10554_v13, %v8533_v11 }
0x1ad7   : > { %v8575_v44 = vperm.slane %v8537_v0, 0  ;;  %v8576_v51 = vperm.slane %v8537_v0, 1  ;;  %v8577_v26 = vperm.slane %v8537_v0, 2  ;;  %v8578_v20 = vperm.slane %v8537_v0, 3 }
0x1ad9   : > { %v8647_v21 = vmul.f32 %v8575_v44, %v16548_v49  ;;  %v8648_v29 = vmul.f32 %v8576_v51, %v16549_v42  ;;  %v8649_v54 = vmul.f32 %v8577_v26, %v16550_v15  ;;  %v8650_v30 = vmul.f32 %v8578_v20, %v16551_v22  ;;  %v15576_v26 = vld [vmem:[%s16126_s14 + $0x1] ss:$0 sm:$0xff] }
0x1adb   : > { %v8845_v27 = vld [vmem:[#allocation1] sm:$0xff]  ;;  %v8700_v52 = vmul.f32 %v15262_v24, %v8647_v21  ;;  %v8701_v53 = vmul.f32 %v15270_v39, %v8648_v29  ;;  %v8702_v13 = vmul.f32 %v15273_v3, %v8649_v54  ;;  %v8703_v6 = vmul.f32 %v15276_v55, %v8650_v30 }
0x1adc   : > { %10157 = vmatmul.msk.f32.gmra.mxu2 %vm745_vm2, %v8845_v27 }
0x1add   : > { %v15549_v10 = vadd.f32 %v15267_v43, %v8700_v52  ;;  %v15552_v56 = vadd.f32 %v15291_v62, %v8701_v53  ;;  %v15555_v35 = vadd.f32 %v15294_v9, %v8702_v13  ;;  %v15558_v34 = vadd.f32 %v15297_v45, %v8703_v6  ;;  %v10263_v43 = vld [vmem:[%s16124_s12 + $0x1] ss:$0 sm:$0xff]  ;;  %v16552_v6 = vld [vmem:[#allocation58_spill] sm:$0xff] }
0x1adf   : > { %8846 = vst [vmem:[#allocation1] ss:$9 sm:$0xff] %v15549_v10 }
0x1ae0   : > { %8847 = vst [vmem:[#allocation1 + $0x1] ss:$9 sm:$0xff] %v15552_v56 }
0x1ae1   : > { %8848 = vst [vmem:[#allocation1 + $0x2] ss:$9 sm:$0xff] %v15555_v35 }
0x1ae2   : > { %8849 = vst [vmem:[#allocation1 + $0x3] ss:$9 sm:$0xff] %v15558_v34 }
0x1ae9   : > { %v8850_v24 = vld [vmem:[#allocation1] sm:$0xff] }
0x1aea   : > { %10158 = vmatmul.msk.f32.gmra.mxu2 %vm745_vm2, %v8850_v24 }
0x1af7   : > { %v8878_v39 = vpop.f32.mrf.mxu2 }
0x1af8   : > { %v8879_v3 = vadd.f32 %v10263_v43, %v8878_v39 }
0x1afa   : > { %v8893_v55 = vmax.f32 %v8879_v3, 0.0 }
0x1afc   : > { %10168 = vmatmul.msk.f32.vlgmr.msra.gmra.mxu3 %vm4387_vm7, %v8893_v55 }
0x1b3c   : > { %v8881_v62 = vpop.f32.mrf.mxu2 }
0x1b3d   : > { %v8882_v9 = vadd.f32 %v10263_v43, %v8881_v62 }
0x1b3f   : > { %v8894_v45 = vmax.f32 %v8882_v9, 0.0 }
0x1b41   : > { %10169 = vmatmul.msk.f32.gmra.mxu3 %vm4387_vm7, %v8894_v45 }
0x1b4d   : > { %v8884_v48 = vpop.f32.mrf.mxu2 }
0x1b4e   : > { %v8885_v33 = vadd.f32 %v10263_v43, %v8884_v48 }
0x1b50   : > { %v8895_v4 = vmax.f32 %v8885_v33, 0.0 }
0x1b52   : > { %10170 = vmatmul.msk.f32.gmra.mxu3 %vm4387_vm7, %v8895_v4 }
0x1b5f   : > { %v8887_v5 = vpop.f32.mrf.mxu2 }
0x1b60   : > { %v8888_v11 = vadd.f32 %v10263_v43, %v8887_v5 }
0x1b62   : > { %v8896_v17 = vmax.f32 %v8888_v11, 0.0 }
0x1b64   : > { %10171 = vmatmul.msk.f32.gmra.mxu3 %vm4387_vm7, %v8896_v17 }
0x1b6d   : > { %v8890_v0 = vpop.f32.mrf.mxu2 }
0x1b6e   : > { %v8891_v44 = vadd.f32 %v10263_v43, %v8890_v0  ;;  %v16553_v43 = vld [vmem:[#allocation57_spill] sm:$0xff] }
0x1b70   : > { %v8897_v51 = vmax.f32 %v8891_v44, 0.0 }
0x1b72   : > { %10172 = vmatmul.msk.f32.gmra.mxu3 %vm4387_vm7, %v8897_v51 }
0x1b7f   : > { %v8944_v20 = vpop.f32.mrf.mxu3 }
0x1b80   : > { %v8945_v49 = vadd.f32 %v15576_v26, %v8944_v20 }
0x1b82   : > { %v8964_v21 = vrot.slane %v8945_v49, 1  ;;  %v8965_v42 = vrot.slane %v8945_v49, 2  ;;  %v8966_v29 = vrot.slane %v8945_v49, 3  ;;  %v8967_v15 = vrot.slane %v8945_v49, 4 }
0x1b83   : > { %v8968_v54 = vrot.slane %v8945_v49, 5  ;;  %v8969_v22 = vrot.slane %v8945_v49, 6  ;;  %v15580_v30 = vadd.f32 %v8945_v49, %v15324_v19  ;;  %v8970_v27 = vrot.slane %v8945_v49, 7  ;;  %v16554_v19 = vld [vmem:[#allocation50_spill] sm:$0xff] }
0x1b84   : > { %v15583_v52 = vadd.f32 %v8964_v21, %v15327_v61  ;;  %v15586_v53 = vadd.f32 %v8965_v42, %v15330_v32  ;;  %v15589_v13 = vadd.f32 %v8966_v29, %v15337_v2  ;;  %v15592_v24 = vadd.f32 %v8967_v15, %v16552_v6  ;;  %v16555_v61 = vld [vmem:[#allocation51_spill] sm:$0xff] }
0x1b85   : > { %9102 = vst [vmem:[#allocation1] ss:$9 sm:$0xff] %v15580_v30  ;;  %v15596_v39 = vadd.f32 %v8968_v54, %v16553_v43  ;;  %v15600_v3 = vadd.f32 %v8969_v22, %v16554_v19  ;;  %v15604_v32 = vadd.f32 %v8970_v27, %v16555_v61 }
0x1b86   : > { %9104 = vst [vmem:[#allocation1 + $0x1] ss:$9 sm:$0xff] %v15583_v52 }
0x1b87   : > { %9106 = vst [vmem:[#allocation1 + $0x2] ss:$9 sm:$0xff] %v15586_v53 }
0x1b88   : > { %9108 = vst [vmem:[#allocation1 + $0x3] ss:$9 sm:$0xff] %v15589_v13 }
0x1b89   : > { %9110 = vst [vmem:[#allocation1 + $0x4] ss:$9 sm:$0xff] %v15592_v24 }
0x1b8a   : > { %9112 = vst [vmem:[#allocation1 + $0x5] ss:$9 sm:$0xff] %v15596_v39 }
0x1b8b   : > { %9114 = vst [vmem:[#allocation1 + $0x6] ss:$9 sm:$0xff] %v15600_v3 }
0x1b8c   : > { %9116 = vst [vmem:[#allocation1 + $0x7] ss:$9 sm:$0xff] %v15604_v32 }
0x1b93   : > { %v9117_v2 = vld [vmem:[#allocation1] sm:$0xff] }
0x1b94   : > { %v9155_v55 = vsel %vm745_vm2, %v9117_v2, 0.0 }
0x1b95   : > { %9156 = vadd.xlane.f32.xlu1 %v9155_v55 }
0x1bc4   : > { %v8947_v62 = vpop.f32.mrf.mxu3 }
0x1bc5   : > { %v8948_v9 = vadd.f32 %v15576_v26, %v8947_v62 }
0x1bc7   : > { %v8971_v45 = vrot.slane %v8948_v9, 1  ;;  %v8972_v48 = vrot.slane %v8948_v9, 2  ;;  %v8973_v33 = vrot.slane %v8948_v9, 3  ;;  %v8974_v4 = vrot.slane %v8948_v9, 4 }
0x1bc8   : > { %v8975_v5 = vrot.slane %v8948_v9, 5  ;;  %v8976_v11 = vrot.slane %v8948_v9, 6  ;;  %v15614_v17 = vadd.f32 %v8948_v9, %v15378_v31  ;;  %v8977_v0 = vrot.slane %v8948_v9, 7 }
0x1bc9   : > { %v15617_v44 = vadd.f32 %v8971_v45, %v15381_v8  ;;  %v15620_v51 = vadd.f32 %v8972_v48, %v15384_v14  ;;  %v15623_v20 = vadd.f32 %v8973_v33, %v15388_v41  ;;  %v15626_v49 = vadd.f32 %v8974_v4, %v15391_v58  ;;  %v16556_v8 = vld [vmem:[#allocation53_spill] sm:$0xff] }
0x1bca   : > { %9118 = vst [vmem:[#allocation1] ss:$9 sm:$0xff] %v15614_v17  ;;  %v15630_v21 = vadd.f32 %v8975_v5, %v15395_v63  ;;  %v15634_v31 = vadd.f32 %v8976_v11, %v15399_v36  ;;  %v15638_v14 = vadd.f32 %v8977_v0, %v16556_v8 }
0x1bcb   : > { %9119 = vst [vmem:[#allocation1 + $0x1] ss:$9 sm:$0xff] %v15617_v44 }
0x1bcc   : > { %9120 = vst [vmem:[#allocation1 + $0x2] ss:$9 sm:$0xff] %v15620_v51 }
0x1bcd   : > { %9121 = vst [vmem:[#allocation1 + $0x3] ss:$9 sm:$0xff] %v15623_v20 }
0x1bce   : > { %9122 = vst [vmem:[#allocation1 + $0x4] ss:$9 sm:$0xff] %v15626_v49 }
0x1bcf   : > { %9123 = vst [vmem:[#allocation1 + $0x5] ss:$9 sm:$0xff] %v15630_v21 }
0x1bd0   : > { %9124 = vst [vmem:[#allocation1 + $0x6] ss:$9 sm:$0xff] %v15634_v31 }
0x1bd1   : > { %9125 = vst [vmem:[#allocation1 + $0x7] ss:$9 sm:$0xff] %v15638_v14 }
0x1bd5   : > { %v8950_v41 = vpop.f32.mrf.mxu3 }
0x1bd6   : > { %v8951_v58 = vadd.f32 %v15576_v26, %v8950_v41 }
0x1bd8   : > { %v9126_v63 = vld [vmem:[#allocation1] sm:$0xff]  ;;  %v8978_v42 = vrot.slane %v8951_v58, 1  ;;  %v8979_v29 = vrot.slane %v8951_v58, 2  ;;  %v8980_v15 = vrot.slane %v8951_v58, 3  ;;  %v8981_v54 = vrot.slane %v8951_v58, 4 }
0x1bd9   : > { %v9158_v36 = vsel %vm745_vm2, %v9126_v63, 0.0  ;;  %v8982_v22 = vrot.slane %v8951_v58, 5  ;;  %v8983_v27 = vrot.slane %v8951_v58, 6  ;;  %v15648_v6 = vadd.f32 %v8951_v58, %v15428_v16 }
0x1bda   : > { %9159 = vadd.xlane.f32.xlu2 %v9158_v36  ;;  %v8984_v43 = vrot.slane %v8951_v58, 7  ;;  %v15651_v19 = vadd.f32 %v8978_v42, %v15431_v18  ;;  %v15654_v61 = vadd.f32 %v8979_v29, %v15434_v1  ;;  %v15657_v2 = vadd.f32 %v8980_v15, %v15438_v60 }
0x1bdb   : > { %v15660_v55 = vadd.f32 %v8981_v54, %v15441_v46  ;;  %9127 = vst [vmem:[#allocation1] ss:$9 sm:$0xff] %v15648_v6  ;;  %v15664_v62 = vadd.f32 %v8982_v22, %v15445_v59  ;;  %v15668_v16 = vadd.f32 %v8983_v27, %v15449_v23 }
0x1bdc   : > { %9128 = vst [vmem:[#allocation1 + $0x1] ss:$9 sm:$0xff] %v15651_v19  ;;  %v15672_v18 = vadd.f32 %v8984_v43, %v15454_v40 }
0x1bdd   : > { %9129 = vst [vmem:[#allocation1 + $0x2] ss:$9 sm:$0xff] %v15654_v61 }
0x1bde   : > { %9130 = vst [vmem:[#allocation1 + $0x3] ss:$9 sm:$0xff] %v15657_v2 }
0x1bdf   : > { %9131 = vst [vmem:[#allocation1 + $0x4] ss:$9 sm:$0xff] %v15660_v55 }
0x1be0   : > { %9132 = vst [vmem:[#allocation1 + $0x5] ss:$9 sm:$0xff] %v15664_v62 }
0x1be1   : > { %9133 = vst [vmem:[#allocation1 + $0x6] ss:$9 sm:$0xff] %v15668_v16 }
0x1be2   : > { %9134 = vst [vmem:[#allocation1 + $0x7] ss:$9 sm:$0xff] %v15672_v18 }
0x1be7   : > { %v8953_v1 = vpop.f32.mrf.mxu3 }
0x1be8   : > { %v8954_v46 = vadd.f32 %v15576_v26, %v8953_v1 }
0x1be9   : > { %v9135_v60 = vld [vmem:[#allocation1] sm:$0xff] }
0x1bea   : > { %v9161_v59 = vsel %vm745_vm2, %v9135_v60, 0.0  ;;  %v8985_v23 = vrot.slane %v8954_v46, 1  ;;  %v8986_v40 = vrot.slane %v8954_v46, 2  ;;  %v8987_v9 = vrot.slane %v8954_v46, 3 }
0x1beb   : > { %9162 = vadd.xlane.f32.xlu0 %v9161_v59  ;;  %v8988_v45 = vrot.slane %v8954_v46, 4  ;;  %v8989_v48 = vrot.slane %v8954_v46, 5  ;;  %v8990_v33 = vrot.slane %v8954_v46, 6  ;;  %v15682_v4 = vadd.f32 %v8954_v46, %v15487_v50 }
0x1bec   : > { %v8991_v5 = vrot.slane %v8954_v46, 7  ;;  %v15685_v11 = vadd.f32 %v8985_v23, %v15490_v7  ;;  %v15688_v0 = vadd.f32 %v8986_v40, %v15493_v47  ;;  %v15691_v8 = vadd.f32 %v8987_v9, %v15503_v28 }
0x1bed   : > { %v15694_v41 = vadd.f32 %v8988_v45, %v15506_v12  ;;  %9136 = vst [vmem:[#allocation1] ss:$9 sm:$0xff] %v15682_v4  ;;  %v15698_v58 = vadd.f32 %v8989_v48, %v15514_v37  ;;  %v15702_v50 = vadd.f32 %v8990_v33, %v15518_v25 }
0x1bee   : > { %9137 = vst [vmem:[#allocation1 + $0x1] ss:$9 sm:$0xff] %v15685_v11  ;;  %v15706_v7 = vadd.f32 %v8991_v5, %v15522_v57 }
0x1bef   : > { %9138 = vst [vmem:[#allocation1 + $0x2] ss:$9 sm:$0xff] %v15688_v0 }
0x1bf0   : > { %9139 = vst [vmem:[#allocation1 + $0x3] ss:$9 sm:$0xff] %v15691_v8 }
0x1bf1   : > { %9140 = vst [vmem:[#allocation1 + $0x4] ss:$9 sm:$0xff] %v15694_v41 }
0x1bf2   : > { %9141 = vst [vmem:[#allocation1 + $0x5] ss:$9 sm:$0xff] %v15698_v58 }
0x1bf3   : > { %9142 = vst [vmem:[#allocation1 + $0x6] ss:$9 sm:$0xff] %v15702_v50 }
0x1bf4   : > { %9143 = vst [vmem:[#allocation1 + $0x7] ss:$9 sm:$0xff] %v15706_v7 }
0x1bf5   : > { %v8956_v47 = vpop.f32.mrf.mxu3 }
0x1bf6   : > { %v8957_v28 = vadd.f32 %v15576_v26, %v8956_v47 }
0x1bf8   : > { %v8992_v12 = vrot.slane %v8957_v28, 1  ;;  %v8993_v37 = vrot.slane %v8957_v28, 2  ;;  %v8994_v25 = vrot.slane %v8957_v28, 3  ;;  %v15715_v63 = vadd.f32 %v8957_v28, %v15549_v10 }
0x1bfa   : > { %v15718_v36 = vadd.f32 %v8992_v12, %v15552_v56  ;;  %v15721_v42 = vadd.f32 %v8993_v37, %v15555_v35  ;;  %v15724_v29 = vadd.f32 %v8994_v25, %v15558_v34 }
0x1bfb   : > { %v9144_v57 = vld [vmem:[#allocation1] sm:$0xff] }
0x1bfc   : > { %v9164_v15 = vsel %vm745_vm2, %v9144_v57, 0.0  ;;  %9145 = vst [vmem:[#allocation1] ss:$9 sm:$0xff] %v15715_v63 }
0x1bfd   : > { %9165 = vadd.xlane.f32.xlu1 %v9164_v15  ;;  %9146 = vst [vmem:[#allocation1 + $0x1] ss:$9 sm:$0xff] %v15718_v36 }
0x1bfe   : > { %9147 = vst [vmem:[#allocation1 + $0x2] ss:$9 sm:$0xff] %v15721_v42 }
0x1bff   : > { %9148 = vst [vmem:[#allocation1 + $0x3] ss:$9 sm:$0xff] %v15724_v29 }
0x1c06   : > { %v9149_v45 = vld [vmem:[#allocation1] sm:$0xff] }
0x1c08   : > { %v9157_v10 = vpop.xlane.xlu1 %9156 }
0x1c09   : > { %v9170_v56 = vmul.f32 %v9157_v10, %v16538_v38 }
0x1c0b   : > { %v9180_v26 = vperm.slane %v9170_v56, 0  ;;  %v9181_v35 = vperm.slane %v9170_v56, 1  ;;  %v9182_v54 = vperm.slane %v9170_v56, 2  ;;  %v9183_v22 = vperm.slane %v9170_v56, 3 }
0x1c0c   : > { %v9184_v34 = vperm.slane %v9170_v56, 4  ;;  %v9185_v27 = vperm.slane %v9170_v56, 5  ;;  %v9186_v43 = vperm.slane %v9170_v56, 6  ;;  %v9187_v1 = vperm.slane %v9170_v56, 7 }
0x1c0d   : > { %v15733_v60 = vsub.f32 %v15580_v30, %v9180_v26  ;;  %v15736_v46 = vsub.f32 %v15583_v52, %v9181_v35  ;;  %v15739_v59 = vsub.f32 %v15586_v53, %v9182_v54  ;;  %v15742_v23 = vsub.f32 %v15589_v13, %v9183_v22 }
0x1c0e   : > { %v15745_v40 = vsub.f32 %v15592_v24, %v9184_v34  ;;  %v15748_v9 = vsub.f32 %v15596_v39, %v9185_v27  ;;  %v15751_v48 = vsub.f32 %v15600_v3, %v9186_v43  ;;  %v15760_v13 = vsub.f32 %v15604_v32, %v9187_v1 }
0x1c0f   : > { %v9288_v30 = vmul.f32 %v15733_v60, %v15733_v60  ;;  %v9289_v52 = vmul.f32 %v15736_v46, %v15736_v46  ;;  %v9290_v53 = vmul.f32 %v15739_v59, %v15739_v59  ;;  %v9291_v24 = vmul.f32 %v15742_v23, %v15742_v23 }
0x1c10   : > { %v9292_v39 = vmul.f32 %v15745_v40, %v15745_v40  ;;  %v9167_v3 = vsel %vm3688_vm8, %v9149_v45, 0.0  ;;  %v9293_v33 = vmul.f32 %v15748_v9, %v15748_v9  ;;  %v9294_v5 = vmul.f32 %v15751_v48, %v15751_v48 }
0x1c11   : > { %9360 = vst [vmem:[#allocation1] ss:$9 sm:$0xff] %v9288_v30  ;;  %9168 = vadd.xlane.f32.xlu2 %v9167_v3  ;;  %v9295_v32 = vmul.f32 %v15760_v13, %v15760_v13 }
0x1c12   : > { %9362 = vst [vmem:[#allocation1 + $0x1] ss:$9 sm:$0xff] %v9289_v52 }
0x1c13   : > { %9364 = vst [vmem:[#allocation1 + $0x2] ss:$9 sm:$0xff] %v9290_v53 }
0x1c14   : > { %9366 = vst [vmem:[#allocation1 + $0x3] ss:$9 sm:$0xff] %v9291_v24 }
0x1c15   : > { %9368 = vst [vmem:[#allocation1 + $0x4] ss:$9 sm:$0xff] %v9292_v39 }
0x1c16   : > { %9370 = vst [vmem:[#allocation1 + $0x5] ss:$9 sm:$0xff] %v9293_v33 }
0x1c17   : > { %9372 = vst [vmem:[#allocation1 + $0x6] ss:$9 sm:$0xff] %v9294_v5 }
0x1c18   : > { %9374 = vst [vmem:[#allocation1 + $0x7] ss:$9 sm:$0xff] %v9295_v32 }
0x1c1f   : > { %v9375_v47 = vld [vmem:[#allocation1] sm:$0xff] }
0x1c20   : > { %v9413_v28 = vsel %vm745_vm2, %v9375_v47, 0.0 }
0x1c21   : > { %9414 = vadd.xlane.f32.xlu0 %v9413_v28 }
0x1c4d   : > { %v9160_v12 = vpop.xlane.xlu2 %9159 }
0x1c4e   : > { %v9171_v37 = vmul.f32 %v9160_v12, %v16538_v38 }
0x1c50   : > { %v9188_v25 = vperm.slane %v9171_v37, 0  ;;  %v9189_v57 = vperm.slane %v9171_v37, 1  ;;  %v9190_v15 = vperm.slane %v9171_v37, 2  ;;  %v9191_v10 = vperm.slane %v9171_v37, 3 }
0x1c51   : > { %v9192_v56 = vperm.slane %v9171_v37, 4  ;;  %v9193_v26 = vperm.slane %v9171_v37, 5  ;;  %v9194_v35 = vperm.slane %v9171_v37, 6  ;;  %v9195_v54 = vperm.slane %v9171_v37, 7 }
0x1c52   : > { %v15776_v22 = vsub.f32 %v15614_v17, %v9188_v25  ;;  %v15779_v34 = vsub.f32 %v15617_v44, %v9189_v57  ;;  %v15782_v27 = vsub.f32 %v15620_v51, %v9190_v15  ;;  %v15785_v43 = vsub.f32 %v15623_v20, %v9191_v10 }
0x1c53   : > { %v15788_v1 = vsub.f32 %v15626_v49, %v9192_v56  ;;  %v15791_v45 = vsub.f32 %v15630_v21, %v9193_v26  ;;  %v15794_v30 = vsub.f32 %v15634_v31, %v9194_v35  ;;  %v15803_v20 = vsub.f32 %v15638_v14, %v9195_v54 }
0x1c54   : > { %v9296_v17 = vmul.f32 %v15776_v22, %v15776_v22  ;;  %v9297_v44 = vmul.f32 %v15779_v34, %v15779_v34  ;;  %v9298_v51 = vmul.f32 %v15782_v27, %v15782_v27  ;;  %v9299_v49 = vmul.f32 %v15785_v43, %v15785_v43 }
0x1c55   : > { %v9300_v21 = vmul.f32 %v15788_v1, %v15788_v1  ;;  %v9301_v31 = vmul.f32 %v15791_v45, %v15791_v45  ;;  %v9302_v52 = vmul.f32 %v15794_v30, %v15794_v30  ;;  %v9303_v53 = vmul.f32 %v15803_v20, %v15803_v20 }
0x1c56   : > { %9376 = vst [vmem:[#allocation1] ss:$9 sm:$0xff] %v9296_v17 }
0x1c57   : > { %9377 = vst [vmem:[#allocation1 + $0x1] ss:$9 sm:$0xff] %v9297_v44 }
0x1c58   : > { %9378 = vst [vmem:[#allocation1 + $0x2] ss:$9 sm:$0xff] %v9298_v51 }
0x1c59   : > { %9379 = vst [vmem:[#allocation1 + $0x3] ss:$9 sm:$0xff] %v9299_v49 }
0x1c5a   : > { %9380 = vst [vmem:[#allocation1 + $0x4] ss:$9 sm:$0xff] %v9300_v21 }
0x1c5b   : > { %9381 = vst [vmem:[#allocation1 + $0x5] ss:$9 sm:$0xff] %v9301_v31 }
0x1c5c   : > { %9382 = vst [vmem:[#allocation1 + $0x6] ss:$9 sm:$0xff] %v9302_v52 }
0x1c5d   : > { %9383 = vst [vmem:[#allocation1 + $0x7] ss:$9 sm:$0xff] %v9303_v53 }
0x1c5e   : > { %v9163_v14 = vpop.xlane.xlu0 %9162 }
0x1c5f   : > { %v9172_v24 = vmul.f32 %v9163_v14, %v16538_v38 }
0x1c61   : > { %v9196_v39 = vperm.slane %v9172_v24, 0  ;;  %v9197_v3 = vperm.slane %v9172_v24, 1  ;;  %v9198_v33 = vperm.slane %v9172_v24, 2  ;;  %v9199_v5 = vperm.slane %v9172_v24, 3 }
0x1c62   : > { %v9200_v32 = vperm.slane %v9172_v24, 4  ;;  %v9201_v47 = vperm.slane %v9172_v24, 5  ;;  %v9202_v28 = vperm.slane %v9172_v24, 6  ;;  %v9203_v12 = vperm.slane %v9172_v24, 7 }
0x1c63   : > { %v15817_v37 = vsub.f32 %v15648_v6, %v9196_v39  ;;  %v15820_v25 = vsub.f32 %v15651_v19, %v9197_v3  ;;  %v15823_v57 = vsub.f32 %v15654_v61, %v9198_v33  ;;  %v15826_v15 = vsub.f32 %v15657_v2, %v9199_v5 }
0x1c64   : > { %v15829_v10 = vsub.f32 %v15660_v55, %v9200_v32  ;;  %v15832_v56 = vsub.f32 %v15664_v62, %v9201_v47  ;;  %v9384_v26 = vld [vmem:[#allocation1] sm:$0xff]  ;;  %v15835_v35 = vsub.f32 %v15668_v16, %v9202_v28  ;;  %v15844_v2 = vsub.f32 %v15672_v18, %v9203_v12 }
0x1c65   : > { %v9304_v6 = vmul.f32 %v15817_v37, %v15817_v37  ;;  %v9305_v19 = vmul.f32 %v15820_v25, %v15820_v25  ;;  %v9306_v61 = vmul.f32 %v15823_v57, %v15823_v57  ;;  %v9307_v55 = vmul.f32 %v15826_v15, %v15826_v15 }
0x1c66   : > { %v9308_v62 = vmul.f32 %v15829_v10, %v15829_v10  ;;  %v9416_v16 = vsel %vm745_vm2, %v9384_v26, 0.0  ;;  %v9309_v54 = vmul.f32 %v15832_v56, %v15832_v56  ;;  %v9310_v17 = vmul.f32 %v15835_v35, %v15835_v35 }
0x1c67   : > { %9385 = vst [vmem:[#allocation1] ss:$9 sm:$0xff] %v9304_v6  ;;  %9417 = vadd.xlane.f32.xlu1 %v9416_v16  ;;  %v9311_v18 = vmul.f32 %v15844_v2, %v15844_v2 }
0x1c68   : > { %9386 = vst [vmem:[#allocation1 + $0x1] ss:$9 sm:$0xff] %v9305_v19 }
0x1c69   : > { %9387 = vst [vmem:[#allocation1 + $0x2] ss:$9 sm:$0xff] %v9306_v61 }
0x1c6a   : > { %9388 = vst [vmem:[#allocation1 + $0x3] ss:$9 sm:$0xff] %v9307_v55 }
0x1c6b   : > { %9389 = vst [vmem:[#allocation1 + $0x4] ss:$9 sm:$0xff] %v9308_v62 }
0x1c6c   : > { %9390 = vst [vmem:[#allocation1 + $0x5] ss:$9 sm:$0xff] %v9309_v54 }
0x1c6d   : > { %9391 = vst [vmem:[#allocation1 + $0x6] ss:$9 sm:$0xff] %v9310_v17 }
0x1c6e   : > { %9392 = vst [vmem:[#allocation1 + $0x7] ss:$9 sm:$0xff] %v9311_v18 }
0x1c70   : > { %v9166_v44 = vpop.xlane.xlu1 %9165 }
0x1c71   : > { %v9173_v51 = vmul.f32 %v9166_v44, %v16538_v38 }
0x1c73   : > { %v9204_v49 = vperm.slane %v9173_v51, 0  ;;  %v9205_v21 = vperm.slane %v9173_v51, 1  ;;  %v9206_v31 = vperm.slane %v9173_v51, 2  ;;  %v9207_v52 = vperm.slane %v9173_v51, 3 }
0x1c74   : > { %v9208_v14 = vperm.slane %v9173_v51, 4  ;;  %v9209_v24 = vperm.slane %v9173_v51, 5  ;;  %v9210_v39 = vperm.slane %v9173_v51, 6  ;;  %v9211_v3 = vperm.slane %v9173_v51, 7 }
0x1c75   : > { %v9393_v53 = vld [vmem:[#allocation1] sm:$0xff]  ;;  %v15860_v5 = vsub.f32 %v15682_v4, %v9204_v49  ;;  %v15863_v32 = vsub.f32 %v15685_v11, %v9205_v21  ;;  %v15866_v47 = vsub.f32 %v15688_v0, %v9206_v31  ;;  %v15869_v28 = vsub.f32 %v15691_v8, %v9207_v52 }
0x1c76   : > { %v9419_v33 = vsel %vm745_vm2, %v9393_v53, 0.0  ;;  %v15872_v12 = vsub.f32 %v15694_v41, %v9208_v14  ;;  %v15875_v26 = vsub.f32 %v15698_v58, %v9209_v24  ;;  %v15878_v6 = vsub.f32 %v15702_v50, %v9210_v39 }
0x1c77   : > { %9420 = vadd.xlane.f32.xlu2 %v9419_v33  ;;  %v9312_v4 = vmul.f32 %v15860_v5, %v15860_v5  ;;  %v9313_v11 = vmul.f32 %v15863_v32, %v15863_v32  ;;  %v9314_v0 = vmul.f32 %v15866_v47, %v15866_v47  ;;  %v15887_v8 = vsub.f32 %v15706_v7, %v9211_v3 }
0x1c78   : > { %v9315_v41 = vmul.f32 %v15869_v28, %v15869_v28  ;;  %v9316_v58 = vmul.f32 %v15872_v12, %v15872_v12  ;;  %v9317_v50 = vmul.f32 %v15875_v26, %v15875_v26  ;;  %v9318_v19 = vmul.f32 %v15878_v6, %v15878_v6 }
0x1c79   : > { %9394 = vst [vmem:[#allocation1] ss:$9 sm:$0xff] %v9312_v4  ;;  %v9319_v61 = vmul.f32 %v15887_v8, %v15887_v8 }
0x1c7a   : > { %9395 = vst [vmem:[#allocation1 + $0x1] ss:$9 sm:$0xff] %v9313_v11  ;;  %v15926_v11 = vld [vmem:[%s16127_s15 + $0x1] ss:$0 sm:$0xff] }
0x1c7b   : > { %9396 = vst [vmem:[#allocation1 + $0x2] ss:$9 sm:$0xff] %v9314_v0 }
0x1c7c   : > { %9397 = vst [vmem:[#allocation1 + $0x3] ss:$9 sm:$0xff] %v9315_v41  ;;  %v15931_v41 = vld [vmem:[%s16128_s16 + $0x1] ss:$0 sm:$0xff] }
0x1c7d   : > { %9398 = vst [vmem:[#allocation1 + $0x4] ss:$9 sm:$0xff] %v9316_v58 }
0x1c7e   : > { %9399 = vst [vmem:[#allocation1 + $0x5] ss:$9 sm:$0xff] %v9317_v50  ;;  %v15934_v50 = vrot.slane %v15926_v11, 1 }
0x1c7f   : > { %9400 = vst [vmem:[#allocation1 + $0x6] ss:$9 sm:$0xff] %v9318_v19  ;;  %v15937_v19 = vrot.slane %v15926_v11, 2 }
0x1c80   : > { %9401 = vst [vmem:[#allocation1 + $0x7] ss:$9 sm:$0xff] %v9319_v61  ;;  %v15940_v61 = vrot.slane %v15926_v11, 3 }
0x1c84   : > { %v9169_v7 = vpop.xlane.xlu2 %9168 }
0x1c85   : > { %v9174_v55 = vmul.f32 %v9169_v7, %v16538_v38  ;;  %v15943_v7 = vrot.slane %v15926_v11, 4 }
0x1c87   : > { %v9212_v62 = vperm.slane %v9174_v55, 0  ;;  %v9213_v16 = vperm.slane %v9174_v55, 1  ;;  %v9214_v54 = vperm.slane %v9174_v55, 2  ;;  %v9215_v17 = vperm.slane %v9174_v55, 3 }
0x1c89   : > { %v15901_v18 = vsub.f32 %v15715_v63, %v9212_v62  ;;  %v15904_v44 = vsub.f32 %v15718_v36, %v9213_v16  ;;  %v15907_v51 = vsub.f32 %v15721_v42, %v9214_v54  ;;  %v15910_v49 = vsub.f32 %v15724_v29, %v9215_v17  ;;  %v9402_v63 = vld [vmem:[#allocation1] sm:$0xff] }
0x1c8a   : > { %v9422_v53 = vsel %vm745_vm2, %v9402_v63, 0.0  ;;  %v15946_v62 = vrot.slane %v15926_v11, 5  ;;  %v15949_v16 = vrot.slane %v15926_v11, 6  ;;  %v15952_v54 = vrot.slane %v15926_v11, 7 }
0x1c8b   : > { %16557 = vst [vmem:[#allocation48_spill] sm:$0xff] %v15901_v18  ;;  %v9320_v21 = vmul.f32 %v15901_v18, %v15901_v18  ;;  %v9321_v31 = vmul.f32 %v15904_v44, %v15904_v44  ;;  %v9322_v52 = vmul.f32 %v15907_v51, %v15907_v51  ;;  %v9323_v36 = vmul.f32 %v15910_v49, %v15910_v49 }
0x1c8c   : > { %16558 = vst [vmem:[#allocation56_spill] sm:$0xff] %v15904_v44  ;;  %9423 = vadd.xlane.f32.xlu0 %v9422_v53  ;;  %v15955_v17 = vrot.slane %v15931_v41, 1 }
0x1c8d   : > { %16559 = vst [vmem:[#allocation49_spill] sm:$0xff] %v15907_v51 }
0x1c8e   : > { %16560 = vst [vmem:[#allocation47_spill] sm:$0xff] %v15910_v49 }
0x1c8f   : > { %9403 = vst [vmem:[#allocation1] ss:$9 sm:$0xff] %v9320_v21  ;;  %v15958_v21 = vrot.slane %v15931_v41, 2 }
0x1c90   : > { %9404 = vst [vmem:[#allocation1 + $0x1] ss:$9 sm:$0xff] %v9321_v31  ;;  %v15961_v31 = vrot.slane %v15931_v41, 3 }
0x1c91   : > { %9405 = vst [vmem:[#allocation1 + $0x2] ss:$9 sm:$0xff] %v9322_v52  ;;  %v15964_v52 = vrot.slane %v15931_v41, 4 }
0x1c92   : > { %9406 = vst [vmem:[#allocation1 + $0x3] ss:$9 sm:$0xff] %v9323_v36 }
0x1c94   : > { %v9415_v42 = vpop.xlane.xlu0 %9414 }
0x1c95   : > { %v9428_v29 = vmul.f32 %v9415_v42, %v16538_v38 }
0x1c97   : > { %v9433_v14 = vadd.f32 1e-05, %v9428_v29 }
0x1c99   : > { %v9407_v24 = vld [vmem:[#allocation1] sm:$0xff]  ;;  %10555 = vrsqrt.f32 %v9433_v14 }
0x1c9a   : > { %v9425_v39 = vsel %vm3688_vm8, %v9407_v24, 0.0  ;;  %vm9444_vm8 = vweird.f32 %v9433_v14 }
0x1c9b   : > { %9426 = vadd.xlane.f32.xlu1 %v9425_v39 }
0x1c9f   : > { %v10556_v3 = vpop.eup %10555 }
0x1ca0   : > { %v9439_v33 = vmul.f32 %v10556_v3, %v9433_v14  ;;  %vm9445_vm7 = vweird.f32 %v10556_v3 }
0x1ca1   : > { %vm9446_vm3 = vmor %vm9444_vm8, %vm9445_vm7 }
0x1ca2   : > { %v9440_v4 = vmul.f32 %v10556_v3, %v9439_v33 }
0x1ca4   : > { %v9441_v0 = vmul.f32 0.5, %v9440_v4 }
0x1ca6   : > { %v9442_v58 = vsub.f32 1.5, %v9441_v0 }
0x1ca8   : > { %v9443_v55 = vmul.f32 %v10556_v3, %v9442_v58 }
0x1caa   : > { %v9447_v63 = vsel %vm9446_vm3, %v10556_v3, %v9443_v55 }
0x1cab   : > { %v9493_v36 = vperm.slane %v9447_v63, 0  ;;  %v9494_v53 = vperm.slane %v9447_v63, 1  ;;  %v9495_v42 = vperm.slane %v9447_v63, 2  ;;  %v9496_v29 = vperm.slane %v9447_v63, 3 }
0x1cac   : > { %v9497_v14 = vperm.slane %v9447_v63, 4  ;;  %v9498_v24 = vperm.slane %v9447_v63, 5  ;;  %v9499_v39 = vperm.slane %v9447_v63, 6  ;;  %v9500_v33 = vperm.slane %v9447_v63, 7 }
0x1cad   : > { %v9565_v4 = vmul.f32 %v9493_v36, %v15733_v60  ;;  %v9566_v0 = vmul.f32 %v9494_v53, %v15736_v46  ;;  %v9567_v58 = vmul.f32 %v9495_v42, %v15739_v59  ;;  %v9568_v49 = vmul.f32 %v9496_v29, %v15742_v23 }
0x1cae   : > { %v9569_v51 = vmul.f32 %v9497_v14, %v15745_v40  ;;  %v9570_v3 = vmul.f32 %v9498_v24, %v15748_v9  ;;  %v9571_v55 = vmul.f32 %v9499_v39, %v15751_v48  ;;  %v9572_v44 = vmul.f32 %v9500_v33, %v15760_v13 }
0x1caf   : > { %v9618_v18 = vmul.f32 %v15926_v11, %v9565_v4  ;;  %v9619_v63 = vmul.f32 %v15934_v50, %v9566_v0  ;;  %v9620_v60 = vmul.f32 %v15937_v19, %v9567_v58  ;;  %v9621_v46 = vmul.f32 %v15940_v61, %v9568_v49 }
0x1cb0   : > { %v15979_v59 = vrot.slane %v15931_v41, 5  ;;  %v15982_v23 = vrot.slane %v15931_v41, 6  ;;  %v9622_v40 = vmul.f32 %v15943_v7, %v9569_v51  ;;  %v9623_v9 = vmul.f32 %v15946_v62, %v9570_v3 }
0x1cb1   : > { %v9624_v48 = vmul.f32 %v15949_v16, %v9571_v55  ;;  %v9671_v13 = vadd.f32 %v15931_v41, %v9618_v18  ;;  %v9672_v36 = vadd.f32 %v15955_v17, %v9619_v63  ;;  %v9673_v53 = vadd.f32 %v15958_v21, %v9620_v60 }
0x1cb2   : > { %v15991_v49 = vrot.slane %v15931_v41, 7  ;;  %v9625_v42 = vmul.f32 %v15952_v54, %v9572_v44  ;;  %v9674_v29 = vadd.f32 %v15961_v31, %v9621_v46  ;;  %v9675_v51 = vadd.f32 %v15964_v52, %v9622_v40 }
0x1cb3   : > { %9743 = vst [vmem:[#allocation1] ss:$9 sm:$0xff] %v9671_v13  ;;  %v9676_v14 = vadd.f32 %v15979_v59, %v9623_v9  ;;  %v9677_v18 = vadd.f32 %v15982_v23, %v9624_v48 }
0x1cb4   : > { %9745 = vst [vmem:[#allocation1 + $0x1] ss:$9 sm:$0xff] %v9672_v36  ;;  %v9678_v24 = vadd.f32 %v15991_v49, %v9625_v42 }
0x1cb5   : > { %9747 = vst [vmem:[#allocation1 + $0x2] ss:$9 sm:$0xff] %v9673_v53 }
0x1cb6   : > { %9749 = vst [vmem:[#allocation1 + $0x3] ss:$9 sm:$0xff] %v9674_v29 }
0x1cb7   : > { %9751 = vst [vmem:[#allocation1 + $0x4] ss:$9 sm:$0xff] %v9675_v51 }
0x1cb8   : > { %9753 = vst [vmem:[#allocation1 + $0x5] ss:$9 sm:$0xff] %v9676_v14 }
0x1cb9   : > { %9755 = vst [vmem:[#allocation1 + $0x6] ss:$9 sm:$0xff] %v9677_v18 }
0x1cba   : > { %9757 = vst [vmem:[#allocation1 + $0x7] ss:$9 sm:$0xff] %v9678_v24 }
0x1cc1   : > { %v9758_v44 = vld [vmem:[#allocation1] sm:$0xff] }
0x1cc2   : > { %9802 = vst.msk [vmem:[%s16003_s0] sm:$0xff] %vm745_vm2, %v9758_v44 }
0x1cda   : > { %v9418_v39 = vpop.xlane.xlu1 %9417 }
0x1cdb   : > { %v9429_v33 = vmul.f32 %v9418_v39, %v16538_v38 }
0x1cdd   : > { %v9434_v4 = vadd.f32 1e-05, %v9429_v33 }
0x1cdf   : > { %10557 = vrsqrt.f32 %v9434_v4  ;;  %vm9454_vm5 = vweird.f32 %v9434_v4 }
0x1ce5   : > { %v10558_v0 = vpop.eup %10557 }
0x1ce6   : > { %v9449_v58 = vmul.f32 %v10558_v0, %v9434_v4  ;;  %vm9455_vm4 = vweird.f32 %v10558_v0 }
0x1ce7   : > { %vm9456_vm6 = vmor %vm9454_vm5, %vm9455_vm4 }
0x1ce8   : > { %v9450_v3 = vmul.f32 %v10558_v0, %v9449_v58 }
0x1cea   : > { %v9421_v55 = vpop.xlane.xlu2 %9420  ;;  %v9451_v63 = vmul.f32 0.5, %v9450_v3 }
0x1ceb   : > { %v9430_v60 = vmul.f32 %v9421_v55, %v16538_v38 }
0x1cec   : > { %v9452_v46 = vsub.f32 1.5, %v9451_v63 }
0x1ced   : > { %v9435_v40 = vadd.f32 1e-05, %v9430_v60 }
0x1cee   : > { %v9453_v9 = vmul.f32 %v10558_v0, %v9452_v46 }
0x1cef   : > { %10559 = vrsqrt.f32 %v9435_v40  ;;  %vm9464_vm11 = vweird.f32 %v9435_v40 }
0x1cf0   : > { %v9457_v48 = vsel %vm9456_vm6, %v10558_v0, %v9453_v9 }
0x1cf1   : > { %v9501_v13 = vperm.slane %v9457_v48, 0  ;;  %v9502_v36 = vperm.slane %v9457_v48, 1  ;;  %v9503_v42 = vperm.slane %v9457_v48, 2  ;;  %v9504_v29 = vperm.slane %v9457_v48, 3 }
0x1cf2   : > { %v9505_v18 = vperm.slane %v9457_v48, 4  ;;  %v9506_v24 = vperm.slane %v9457_v48, 5  ;;  %v9507_v33 = vperm.slane %v9457_v48, 6  ;;  %v9508_v0 = vperm.slane %v9457_v48, 7 }
0x1cf3   : > { %v9573_v53 = vmul.f32 %v9501_v13, %v15776_v22  ;;  %v9574_v44 = vmul.f32 %v9502_v36, %v15779_v34  ;;  %v9575_v4 = vmul.f32 %v9503_v42, %v15782_v27  ;;  %v9576_v58 = vmul.f32 %v9504_v29, %v15785_v43 }
0x1cf4   : > { %v9577_v22 = vmul.f32 %v9505_v18, %v15788_v1  ;;  %v9578_v55 = vmul.f32 %v9506_v24, %v15791_v45  ;;  %v9579_v46 = vmul.f32 %v9507_v33, %v15794_v30  ;;  %v9580_v9 = vmul.f32 %v9508_v0, %v15803_v20 }
0x1cf5   : > { %v9626_v51 = vmul.f32 %v15926_v11, %v9573_v53  ;;  %v10560_v14 = vpop.eup %10559  ;;  %v9627_v63 = vmul.f32 %v15934_v50, %v9574_v44  ;;  %v9628_v34 = vmul.f32 %v15937_v19, %v9575_v4  ;;  %v9629_v27 = vmul.f32 %v15940_v61, %v9576_v58 }
0x1cf6   : > { %v9459_v3 = vmul.f32 %v10560_v14, %v9435_v40  ;;  %v9630_v43 = vmul.f32 %v15943_v7, %v9577_v22  ;;  %v9631_v13 = vmul.f32 %v15946_v62, %v9578_v55  ;;  %vm9465_vm10 = vweird.f32 %v10560_v14 }
0x1cf7   : > { %v9679_v39 = vadd.f32 %v15931_v41, %v9626_v51  ;;  %v9680_v1 = vadd.f32 %v15955_v17, %v9627_v63  ;;  %v9632_v45 = vmul.f32 %v15949_v16, %v9579_v46  ;;  %v9681_v53 = vadd.f32 %v15958_v21, %v9628_v34  ;;  %vm9466_vm12 = vmor %vm9464_vm11, %vm9465_vm10 }
0x1cf8   : > { %v9460_v60 = vmul.f32 %v10560_v14, %v9459_v3  ;;  %v9633_v42 = vmul.f32 %v15952_v54, %v9580_v9  ;;  %v9682_v20 = vadd.f32 %v15961_v31, %v9629_v27  ;;  %v9683_v51 = vadd.f32 %v15964_v52, %v9630_v43 }
0x1cf9   : > { %9759 = vst [vmem:[#allocation1] ss:$9 sm:$0xff] %v9679_v39  ;;  %v9684_v18 = vadd.f32 %v15979_v59, %v9631_v13  ;;  %v9685_v44 = vadd.f32 %v15982_v23, %v9632_v45 }
0x1cfa   : > { %v9461_v48 = vmul.f32 0.5, %v9460_v60  ;;  %v9686_v33 = vadd.f32 %v15991_v49, %v9633_v42 }
0x1cfc   : > { %v9462_v36 = vsub.f32 1.5, %v9461_v48 }
0x1cfe   : > { %v9463_v29 = vmul.f32 %v10560_v14, %v9462_v36 }
0x1cff   : > { %v9424_v4 = vpop.xlane.xlu0 %9423 }
0x1d00   : > { %v9760_v30 = vld [vmem:[#allocation1] sm:$0xff]  ;;  %v9467_v24 = vsel %vm9466_vm12, %v10560_v14, %v9463_v29  ;;  %v9431_v14 = vmul.f32 %v9424_v4, %v16538_v38 }
0x1d01   : > { %9761 = vst [vmem:[#allocation1] ss:$9 sm:$0xff] %v9680_v1  ;;  %v9509_v39 = vperm.slane %v9467_v24, 0  ;;  %v9510_v40 = vperm.slane %v9467_v24, 1  ;;  %v9511_v63 = vperm.slane %v9467_v24, 2  ;;  %v9512_v46 = vperm.slane %v9467_v24, 3 }
0x1d02   : > { %9762 = vst [vmem:[#allocation1 + $0x1] ss:$9 sm:$0xff] %v9681_v53  ;;  %v9436_v55 = vadd.f32 1e-05, %v9431_v14  ;;  %v9514_v34 = vperm.slane %v9467_v24, 5  ;;  %v9515_v9 = vperm.slane %v9467_v24, 6 }
0x1d03   : > { %9763 = vst [vmem:[#allocation1 + $0x2] ss:$9 sm:$0xff] %v9682_v20  ;;  %v9581_v0 = vmul.f32 %v9509_v39, %v15817_v37  ;;  %v9582_v3 = vmul.f32 %v9510_v40, %v15820_v25  ;;  %v9513_v37 = vperm.slane %v9467_v24, 4  ;;  %v9583_v27 = vmul.f32 %v9511_v63, %v15823_v57 }
0x1d04   : > { %9764 = vst [vmem:[#allocation1 + $0x3] ss:$9 sm:$0xff] %v9683_v51  ;;  %10561 = vrsqrt.f32 %v9436_v55  ;;  %v9516_v43 = vperm.slane %v9467_v24, 7  ;;  %v9584_v25 = vmul.f32 %v9512_v46, %v15826_v15  ;;  %v9586_v45 = vmul.f32 %v9514_v34, %v15832_v56 }
0x1d05   : > { %9765 = vst [vmem:[#allocation1 + $0x4] ss:$9 sm:$0xff] %v9684_v18  ;;  %v9634_v58 = vmul.f32 %v15926_v11, %v9581_v0  ;;  %v9635_v60 = vmul.f32 %v15934_v50, %v9582_v3  ;;  %v9585_v36 = vmul.f32 %v9513_v37, %v15829_v10  ;;  %v9636_v42 = vmul.f32 %v15937_v19, %v9583_v27 }
0x1d06   : > { %9766 = vst [vmem:[#allocation1 + $0x5] ss:$9 sm:$0xff] %v9685_v44  ;;  %v9588_v57 = vmul.f32 %v9516_v43, %v15844_v2  ;;  %v9637_v20 = vmul.f32 %v15940_v61, %v9584_v25  ;;  %v9639_v51 = vmul.f32 %v15946_v62, %v9586_v45  ;;  %vm9474_vm15 = vweird.f32 %v9436_v55 }
0x1d07   : > { %9767 = vst [vmem:[#allocation1 + $0x6] ss:$9 sm:$0xff] %v9686_v33  ;;  %v9687_v22 = vadd.f32 %v15931_v41, %v9634_v58  ;;  %v9688_v48 = vadd.f32 %v15955_v17, %v9635_v60  ;;  %v9638_v15 = vmul.f32 %v15943_v7, %v9585_v36  ;;  %v9689_v56 = vadd.f32 %v15958_v21, %v9636_v42 }
0x1d08   : > { %9804 = vst.msk [vmem:[%s16003_s0 + $0x8] sm:$0x1] %vm9803_vm13, %v9760_v30  ;;  %v9587_v30 = vmul.f32 %v9515_v9, %v15835_v35  ;;  %v9641_v24 = vmul.f32 %v15952_v54, %v9588_v57  ;;  %v9690_v35 = vadd.f32 %v15961_v31, %v9637_v20  ;;  %v9692_v33 = vadd.f32 %v15979_v59, %v9639_v51 }
0x1d09   : > { %9768 = vst [vmem:[#allocation1 + $0x7] ss:$9 sm:$0xff] %v9687_v22  ;;  %v9691_v2 = vadd.f32 %v15964_v52, %v9638_v15 }
0x1d0a   : > { %v10562_v1 = vpop.eup %10561  ;;  %v9640_v18 = vmul.f32 %v15949_v16, %v9587_v30  ;;  %v9694_v0 = vadd.f32 %v15991_v49, %v9641_v24 }
0x1d0b   : > { %v9469_v53 = vmul.f32 %v10562_v1, %v9436_v55  ;;  %vm9475_vm14 = vweird.f32 %v10562_v1 }
0x1d0c   : > { %v9693_v40 = vadd.f32 %v15982_v23, %v9640_v18  ;;  %vm9476_vm9 = vmor %vm9474_vm15, %vm9475_vm14 }
0x1d0d   : > { %v9470_v29 = vmul.f32 %v10562_v1, %v9469_v53 }
0x1d0e   : > { %v9427_v22 = vpop.xlane.xlu1 %9426 }
0x1d0f   : > { %v9471_v10 = vmul.f32 0.5, %v9470_v29  ;;  %v9432_v34 = vmul.f32 %v9427_v22, %v16538_v38 }
0x1d10   : > { %v9769_v13 = vld [vmem:[#allocation1] sm:$0xff] }
0x1d11   : > { %9770 = vst [vmem:[#allocation1] ss:$9 sm:$0xff] %v9688_v48  ;;  %v9472_v39 = vsub.f32 1.5, %v9471_v10  ;;  %v9437_v43 = vadd.f32 1e-05, %v9432_v34 }
0x1d12   : > { %9805 = vst.msk [vmem:[%s16003_s0 + $0x10] sm:$0xff] %vm745_vm2, %v9769_v13 }
0x1d13   : > { %v9473_v4 = vmul.f32 %v10562_v1, %v9472_v39  ;;  %10563 = vrsqrt.f32 %v9437_v43  ;;  %vm9484_vm1 = vweird.f32 %v9437_v43 }
0x1d15   : > { %v9477_v58 = vsel %vm9476_vm9, %v10562_v1, %v9473_v4 }
0x1d16   : > { %v9517_v14 = vperm.slane %v9477_v58, 0  ;;  %v9518_v3 = vperm.slane %v9477_v58, 1  ;;  %v9519_v55 = vperm.slane %v9477_v58, 2  ;;  %v9521_v25 = vperm.slane %v9477_v58, 4 }
0x1d17   : > { %v9522_v13 = vperm.slane %v9477_v58, 5  ;;  %v9523_v1 = vperm.slane %v9477_v58, 6  ;;  %v9524_v36 = vperm.slane %v9477_v58, 7 }
0x1d18   : > { %v9771_v44 = vld [vmem:[#allocation1] sm:$0xff]  ;;  %v9589_v63 = vmul.f32 %v9517_v14, %v15860_v5  ;;  %v9590_v60 = vmul.f32 %v9518_v3, %v15863_v32  ;;  %v9591_v48 = vmul.f32 %v9519_v55, %v15866_v47  ;;  %v9520_v5 = vperm.slane %v9477_v58, 3 }
0x1d19   : > { %9772 = vst [vmem:[#allocation1] ss:$9 sm:$0xff] %v9689_v56  ;;  %v10564_v53 = vpop.eup %10563  ;;  %v9593_v30 = vmul.f32 %v9521_v25, %v15872_v12  ;;  %v9594_v42 = vmul.f32 %v9522_v13, %v15875_v26  ;;  %v9595_v20 = vmul.f32 %v9523_v1, %v15878_v6  ;;  %v9596_v29 = vmul.f32 %v9524_v36, %v15887_v8 }
0x1d1a   : > { %9773 = vst [vmem:[#allocation1 + $0x1] ss:$9 sm:$0xff] %v9690_v35  ;;  %v9642_v46 = vmul.f32 %v15926_v11, %v9589_v63  ;;  %v9643_v37 = vmul.f32 %v15934_v50, %v9590_v60  ;;  %v9644_v32 = vmul.f32 %v15937_v19, %v9591_v48  ;;  %v9592_v38 = vmul.f32 %v9520_v5, %v15869_v28  ;;  %v16564_v60 = vld [vmem:[#allocation47_spill] sm:$0xff] }
0x1d1b   : > { %9774 = vst [vmem:[#allocation1 + $0x2] ss:$9 sm:$0xff] %v9691_v2  ;;  %v9479_v57 = vmul.f32 %v10564_v53, %v9437_v43  ;;  %v9646_v28 = vmul.f32 %v15943_v7, %v9593_v30  ;;  %v9647_v10 = vmul.f32 %v15946_v62, %v9594_v42  ;;  %v9648_v12 = vmul.f32 %v15949_v16, %v9595_v20 }
0x1d1c   : > { %9775 = vst [vmem:[#allocation1 + $0x3] ss:$9 sm:$0xff] %v9692_v33  ;;  %v9695_v9 = vadd.f32 %v15931_v41, %v9642_v46  ;;  %v9696_v27 = vadd.f32 %v15955_v17, %v9643_v37  ;;  %v9697_v45 = vadd.f32 %v15958_v21, %v9644_v32  ;;  %v9645_v15 = vmul.f32 %v15940_v61, %v9592_v38  ;;  %v16562_v33 = vld [vmem:[#allocation56_spill] sm:$0xff] }
0x1d1d   : > { %9776 = vst [vmem:[#allocation1 + $0x4] ss:$9 sm:$0xff] %v9693_v40  ;;  %v9480_v51 = vmul.f32 %v10564_v53, %v9479_v57  ;;  %v9649_v26 = vmul.f32 %v15952_v54, %v9596_v29  ;;  %vm9485_vm0 = vweird.f32 %v10564_v53  ;;  %v9699_v6 = vadd.f32 %v15964_v52, %v9646_v28  ;;  %v16561_v52 = vld [vmem:[#allocation48_spill] sm:$0xff]  ;;  %v16563_v40 = vld [vmem:[#allocation49_spill] sm:$0xff] }
0x1d1e   : > { %9777 = vst [vmem:[#allocation1 + $0x5] ss:$9 sm:$0xff] %v9694_v0  ;;  %v9698_v56 = vadd.f32 %v15961_v31, %v9645_v15  ;;  %v9700_v8 = vadd.f32 %v15979_v59, %v9647_v10  ;;  %v9701_v7 = vadd.f32 %v15982_v23, %v9648_v12  ;;  %vm9486_vm7 = vmor %vm9484_vm1, %vm9485_vm0 }
0x1d1f   : > { %9806 = vst.msk [vmem:[%s16003_s0 + $0x18] sm:$0x1] %vm9803_vm13, %v9771_v44  ;;  %v9481_v18 = vmul.f32 0.5, %v9480_v51  ;;  %v9702_v62 = vadd.f32 %v15991_v49, %v9649_v26 }
0x1d20   : > { %9778 = vst [vmem:[#allocation1 + $0x6] ss:$9 sm:$0xff] %v9695_v9 }
0x1d21   : > { %9779 = vst [vmem:[#allocation1 + $0x7] ss:$9 sm:$0xff] %v9696_v27  ;;  %v9482_v24 = vsub.f32 1.5, %v9481_v18 }
0x1d23   : > { %v9483_v44 = vmul.f32 %v10564_v53, %v9482_v24 }
0x1d25   : > { %v9487_v16 = vsel %vm9486_vm7, %v10564_v53, %v9483_v44 }
0x1d26   : > { %v9525_v54 = vperm.slane %v9487_v16, 0  ;;  %v9526_v39 = vperm.slane %v9487_v16, 1  ;;  %v9527_v2 = vperm.slane %v9487_v16, 2  ;;  %v9528_v23 = vperm.slane %v9487_v16, 3 }
0x1d28   : > { %v9780_v47 = vld [vmem:[#allocation1] sm:$0xff]  ;;  %v9597_v59 = vmul.f32 %v9525_v54, %v16561_v52  ;;  %v9598_v4 = vmul.f32 %v9526_v39, %v16562_v33  ;;  %v9599_v0 = vmul.f32 %v9527_v2, %v16563_v40  ;;  %v9600_v55 = vmul.f32 %v9528_v23, %v16564_v60 }
0x1d29   : > { %9781 = vst [vmem:[#allocation1] ss:$9 sm:$0xff] %v9697_v45 }
0x1d2a   : > { %9807 = vst.msk [vmem:[%s16003_s0 + $0x20] sm:$0xff] %vm745_vm2, %v9780_v47  ;;  %v9650_v58 = vmul.f32 %v15926_v11, %v9597_v59  ;;  %v9651_v49 = vmul.f32 %v15934_v50, %v9598_v4  ;;  %v9652_v14 = vmul.f32 %v15937_v19, %v9599_v0  ;;  %v9653_v46 = vmul.f32 %v15940_v61, %v9600_v55 }
0x1d2c   : > { %v9703_v3 = vadd.f32 %v15931_v41, %v9650_v58  ;;  %v9704_v22 = vadd.f32 %v15955_v17, %v9651_v49  ;;  %v9705_v63 = vadd.f32 %v15958_v21, %v9652_v14  ;;  %v9706_v11 = vadd.f32 %v15961_v31, %v9653_v46 }
0x1d30   : > { %v9782_v35 = vld [vmem:[#allocation1] sm:$0xff] }
0x1d31   : > { %9783 = vst [vmem:[#allocation1] ss:$9 sm:$0xff] %v9698_v56 }
0x1d32   : > { %9784 = vst [vmem:[#allocation1 + $0x1] ss:$9 sm:$0xff] %v9699_v6 }
0x1d33   : > { %9785 = vst [vmem:[#allocation1 + $0x2] ss:$9 sm:$0xff] %v9700_v8 }
0x1d34   : > { %9786 = vst [vmem:[#allocation1 + $0x3] ss:$9 sm:$0xff] %v9701_v7 }
0x1d35   : > { %9787 = vst [vmem:[#allocation1 + $0x4] ss:$9 sm:$0xff] %v9702_v62 }
0x1d36   : > { %9808 = vst.msk [vmem:[%s16003_s0 + $0x28] sm:$0x1] %vm9803_vm13, %v9782_v35 }
0x1d37   : > { %9788 = vst [vmem:[#allocation1 + $0x5] ss:$9 sm:$0xff] %v9703_v3 }
0x1d38   : > { %9789 = vst [vmem:[#allocation1 + $0x6] ss:$9 sm:$0xff] %v9704_v22 }
0x1d39   : > { %9790 = vst [vmem:[#allocation1 + $0x7] ss:$9 sm:$0xff] %v9705_v63 }
0x1d40   : > { %v9791_v37 = vld [vmem:[#allocation1] sm:$0xff] }
0x1d41   : > { %9792 = vst [vmem:[#allocation1] ss:$9 sm:$0xff] %v9706_v11 }
0x1d42   : > { %9809 = vst.msk [vmem:[%s16003_s0 + $0x30] sm:$0xff] %vm745_vm2, %v9791_v37 }
0x1d48   : > { %v9793_v50 = vld [vmem:[#allocation1] sm:$0xff] }
0x1d49   : > { %9810 = vst.msk [vmem:[%s16003_s0 + $0x38] sm:$0x1] %vm9803_vm13, %v9793_v50 }
0x1d4a PF: > { %s27_s24 = sadd.s32 1, %s10571_s24  }
0x1d4b   : > { %p24_p4 = scmp.ge.s32.totalorder %s27_s24, 4  }
0x1d4d   :  { %26 = sbr.rel (!%p24_p4) target bundleno = 3 (0x3), region = 907 }

</bundles_post_ra>
